<compile_context>
chip_gen: v6e
topology: v6e:2x2x1
jax: 0.10.0
libtpu: 0.0.40
codegen_flags: <defaults>
</compile_context>

<pallas_src>
import functools

import jax
import jax.numpy as jnp
import numpy as np
from jax.experimental import pallas as pl
from jax.experimental.pallas import tpu as pltpu


def temporal_attention_kernel(
    x_ref,      # (Bb, N, C)  bf16 activation block (Bb batch elements)
    wq_ref,     # (C, C)      bf16, 1/sqrt(hd) pre-folded
    wk_ref,     # (C, C)      bf16
    wv_ref,     # (C, C)      bf16
    wp_ref,     # (C, C)      bf16
    bp_ref,     # (1, C)      f32
    o_ref,      # (Bb, N, C)  bf16
    *,
    num_heads: int,
):
    Bb, N, C = x_ref.shape
    hd = C // num_heads
    M = Bb * N                       # batch folded into the matmul M dimension

    xm = x_ref[...].reshape(M, C)    # leading-dim merge, layout preserving

    # ---- Q/K/V projections: three (M,C)x(C,C) MXU passes, f32 accumulate ----
    q = jnp.dot(xm, wq_ref[...], preferred_element_type=jnp.float32)
    k = jnp.dot(xm, wk_ref[...], preferred_element_type=jnp.float32)
    v = jnp.dot(xm, wv_ref[...], preferred_element_type=jnp.float32)

    # ---- head-major relayout; fuse (head, batch) into one batch axis g = h*Bb + b ----
    def to_heads(t):                          # (M, C) f32 -> (H*Bb, N, hd) bf16
        t = t.reshape(M, num_heads, hd)
        t = jnp.transpose(t, (1, 0, 2))       # (H, M, hd)
        return t.reshape(num_heads * Bb, N, hd).astype(jnp.bfloat16)

    qh, kh, vh = to_heads(q), to_heads(k), to_heads(v)

    # ---- attention: one batched contraction per phase, f32 softmax ----
    s = jnp.einsum('gqd,gkd->gqk', qh, kh,
                   preferred_element_type=jnp.float32)          # (G, N, N) f32
    s = s - jnp.max(s, axis=-1, keepdims=True)
    p = jnp.exp(s)
    p = p * pl.reciprocal(jnp.sum(p, axis=-1, keepdims=True), approx=True)

    ctx = jnp.einsum('gqk,gkd->gqd', p.astype(jnp.bfloat16), vh,
                     preferred_element_type=jnp.float32)        # (G, N, hd) f32

    # back to (M, C): inverse of to_heads
    ctx = ctx.reshape(num_heads, M, hd)
    ctx = jnp.transpose(ctx, (1, 0, 2)).reshape(M, C)

    # ---- output projection + bias ----
    out = jnp.dot(ctx.astype(jnp.bfloat16), wp_ref[...],
                  preferred_element_type=jnp.float32) + bp_ref[...]
    o_ref[...] = out.reshape(Bb, N, C).astype(o_ref.dtype)


def _vmem_bytes_estimate(Bb, N, C, num_heads):
    """Rough per-step VMEM footprint (blocks double-buffered + intermediates)."""
    M, G, hd = Bb * N, Bb * num_heads, C // num_heads
    act = 2 * (2 * Bb * N * C * 2)                  # x + out blocks, bf16, double-buffered
    wgt = 2 * (4 * C * C * 2 + C * 4)               # 4 bf16 weights + f32 bias, double-buffered
    inter = 3 * M * C * 4 + 3 * G * N * hd * 2      # q/k/v f32 + bf16 head-major copies
    inter += 2 * G * N * N * 4 + G * N * N * 2      # logits / probs f32 + probs bf16
    inter += G * N * hd * 4 + 2 * M * C * 4         # ctx f32 (head + merged) + out f32
    return act + wgt + inter


def temporal_attention(x, params, num_heads):
    B, N, C = x.shape
    scale = (C // num_heads) ** -0.5

    # Split Wqkv into three (C, C) weights; fold 1/sqrt(hd) into the q columns.
    wqkv = params["wqkv"]                               # (C, 3C), (in, out) layout
    wq = (wqkv[:, 0 * C:1 * C] * scale).astype(jnp.bfloat16)
    wk = wqkv[:, 1 * C:2 * C].astype(jnp.bfloat16)
    wv = wqkv[:, 2 * C:3 * C].astype(jnp.bfloat16)
    wp = params["wproj"].astype(jnp.bfloat16)
    bp = params["bproj"].astype(jnp.float32).reshape(1, C)

    # bf16 activations at the boundary: half the HBM<->VMEM DMA bytes.
    xb = x.astype(jnp.bfloat16)

    # Grid: keep 2 parallel steps when possible (one per v7x TensorCore), fold the
    # remaining batch into the per-step block so the projections see M = Bb*N rows;
    # grow the step count if the per-step block would get too large.
    grid_steps = 2 if B % 2 == 0 else B
    while (B // grid_steps) * N > 512 and B % (grid_steps * 2) == 0:
        grid_steps *= 2
    Bb = B // grid_steps

    kernel = functools.partial(temporal_attention_kernel, num_heads=num_heads)
    vmem_limit = int(min(64 * 2 ** 20,
                         max(16 * 2 ** 20,
                             2 * _vmem_bytes_estimate(Bb, N, C, num_heads))))

    return pl.pallas_call(
        kernel,
        out_shape=jax.ShapeDtypeStruct((B, N, C), jnp.bfloat16),
        grid_spec=pltpu.PrefetchScalarGridSpec(
            num_scalar_prefetch=0,
            grid=(grid_steps,),
            in_specs=[
                pl.BlockSpec((Bb, N, C), lambda g: (g, 0, 0)),
                pl.BlockSpec((C, C), lambda g: (0, 0)),
                pl.BlockSpec((C, C), lambda g: (0, 0)),
                pl.BlockSpec((C, C), lambda g: (0, 0)),
                pl.BlockSpec((C, C), lambda g: (0, 0)),
                pl.BlockSpec((1, C), lambda g: (0, 0)),
            ],
            out_specs=pl.BlockSpec((Bb, N, C), lambda g: (g, 0, 0)),
        ),
        compiler_params=pltpu.CompilerParams(
            dimension_semantics=("parallel",),
            vmem_limit_bytes=vmem_limit,
        ),
    )(xb, wq, wk, wv, wp, bp)


def temporal_attention_reference(x, p, num_heads):
    """Pure-JAX (f32) reference mirroring the PyTorch forward (comb=False)."""
    B, N, C = x.shape
    hd = C // num_heads
    scale = hd ** -0.5
    qkv = (x @ p["wqkv"]).reshape(B, N, 3, num_heads, hd).transpose(2, 0, 3, 1, 4)
    q, k, v = qkv[0], qkv[1], qkv[2]                    # (B, H, N, hd)
    attn = (q @ jnp.swapaxes(k, -2, -1)) * scale
    attn = jax.nn.softmax(attn, axis=-1)
    o = (attn @ v).transpose(0, 2, 1, 3).reshape(B, N, C)
    return o @ p["wproj"] + p["bproj"]


def init_params(key, dim):
    ks = jax.random.split(key, 3)
    s = 1.0 / np.sqrt(dim)
    return {
        # stored pre-transposed to (in, out) so x @ W matches nn.Linear's x @ W^T
        "wqkv": s * jax.random.normal(ks[0], (dim, 3 * dim), jnp.float32),
        "wproj": s * jax.random.normal(ks[1], (dim, dim), jnp.float32),
        "bproj": 0.1 * jax.random.normal(ks[2], (1, dim), jnp.float32),
    }


if __name__ == "__main__":
    B, N, dim, num_heads = 8, 16, 64, 8   # head_dim = 8; grid=(2,), Bb=4, M=64 per step

    key = jax.random.PRNGKey(0)
    kx, kp = jax.random.split(key)
    x = jax.random.normal(kx, (B, N, dim), jnp.float32)
    params = init_params(kp, dim)

    out = jax.block_until_ready(temporal_attention(x, params, num_heads))
    ref = jax.block_until_ready(temporal_attention_reference(x, params, num_heads))

    assert out.shape == (B, N, dim), out.shape
    # Tolerance relaxed for bf16 MXU operands, bf16 output, approx reciprocal (f32 accumulate).
    np.testing.assert_allclose(np.asarray(out.astype(jnp.float32)), np.asarray(ref),
                               rtol=4e-2, atol=4e-2)

    print("KERNEL_OK")
</pallas_src>

<mosaic_0001>
module attributes {stable_mosaic.version = 11 : i64} {
  func.func @temporal_attention_kernel(%arg0: i32, %arg1: memref<4x16x64xbf16, #tpu.memory_space<vmem>>, %arg2: memref<64x64xbf16, #tpu.memory_space<vmem>>, %arg3: memref<64x64xbf16, #tpu.memory_space<vmem>>, %arg4: memref<64x64xbf16, #tpu.memory_space<vmem>>, %arg5: memref<64x64xbf16, #tpu.memory_space<vmem>>, %arg6: memref<1x64xf32, #tpu.memory_space<vmem>>, %arg7: memref<4x16x64xbf16, #tpu.memory_space<vmem>>) attributes {dimension_semantics = [#tpu.dimension_semantics<parallel>], iteration_bounds = array<i64: 2>, scalar_prefetch = 0 : i64, scratch_operands = 0 : i64, tpu.core_type = #tpu.core_type<tc>, window_params = [{transform_indices = @transform_0, window_bounds = array<i64: 4, 16, 64>}, {pipeline_mode = #tpu.pipeline_mode<synchronous>, transform_indices = @transform_1, window_bounds = array<i64: 64, 64>}, {pipeline_mode = #tpu.pipeline_mode<synchronous>, transform_indices = @transform_2, window_bounds = array<i64: 64, 64>}, {pipeline_mode = #tpu.pipeline_mode<synchronous>, transform_indices = @transform_3, window_bounds = array<i64: 64, 64>}, {pipeline_mode = #tpu.pipeline_mode<synchronous>, transform_indices = @transform_4, window_bounds = array<i64: 64, 64>}, {pipeline_mode = #tpu.pipeline_mode<synchronous>, transform_indices = @transform_5, window_bounds = array<i64: 1, 64>}, {transform_indices = @transform_6, window_bounds = array<i64: 4, 16, 64>}]} {
    %c0 = arith.constant 0 : index
    %c0_0 = arith.constant 0 : index
    %c0_1 = arith.constant 0 : index
    %0 = vector.load %arg1[%c0, %c0_0, %c0_1] : memref<4x16x64xbf16, #tpu.memory_space<vmem>>, vector<4x16x64xbf16>
    %1 = vector.shape_cast %0 : vector<4x16x64xbf16> to vector<64x64xbf16>
    %c0_2 = arith.constant 0 : index
    %c0_3 = arith.constant 0 : index
    %2 = vector.load %arg2[%c0_2, %c0_3] : memref<64x64xbf16, #tpu.memory_space<vmem>>, vector<64x64xbf16>
    %cst = arith.constant dense<0.000000e+00> : vector<64x64xf32>
    %3 = tpu.matmul %1, %2, %cst {dimension_numbers = #tpu.dot_dimension_numbers<[1], [0], [0], [1], [0, 0, 1, 1], [], []>} : vector<64x64xbf16>, vector<64x64xbf16>, vector<64x64xf32> -> vector<64x64xf32>
    %c0_4 = arith.constant 0 : index
    %c0_5 = arith.constant 0 : index
    %4 = vector.load %arg3[%c0_4, %c0_5] : memref<64x64xbf16, #tpu.memory_space<vmem>>, vector<64x64xbf16>
    %cst_6 = arith.constant dense<0.000000e+00> : vector<64x64xf32>
    %5 = tpu.matmul %1, %4, %cst_6 {dimension_numbers = #tpu.dot_dimension_numbers<[1], [0], [0], [1], [0, 0, 1, 1], [], []>} : vector<64x64xbf16>, vector<64x64xbf16>, vector<64x64xf32> -> vector<64x64xf32>
    %c0_7 = arith.constant 0 : index
    %c0_8 = arith.constant 0 : index
    %6 = vector.load %arg4[%c0_7, %c0_8] : memref<64x64xbf16, #tpu.memory_space<vmem>>, vector<64x64xbf16>
    %cst_9 = arith.constant dense<0.000000e+00> : vector<64x64xf32>
    %7 = tpu.matmul %1, %6, %cst_9 {dimension_numbers = #tpu.dot_dimension_numbers<[1], [0], [0], [1], [0, 0, 1, 1], [], []>} : vector<64x64xbf16>, vector<64x64xbf16>, vector<64x64xf32> -> vector<64x64xf32>
    %8 = vector.shape_cast %3 : vector<64x64xf32> to vector<64x8x8xf32>
    %9 = tpu.transpose %8, [1, 0, 2] : vector<64x8x8xf32> -> vector<8x64x8xf32>
    %10 = vector.shape_cast %9 : vector<8x64x8xf32> to vector<32x16x8xf32>
    %11 = arith.truncf %10 : vector<32x16x8xf32> to vector<32x16x8xbf16>
    %12 = vector.shape_cast %5 : vector<64x64xf32> to vector<64x8x8xf32>
    %13 = tpu.transpose %12, [1, 0, 2] : vector<64x8x8xf32> -> vector<8x64x8xf32>
    %14 = vector.shape_cast %13 : vector<8x64x8xf32> to vector<32x16x8xf32>
    %15 = arith.truncf %14 : vector<32x16x8xf32> to vector<32x16x8xbf16>
    %16 = vector.shape_cast %7 : vector<64x64xf32> to vector<64x8x8xf32>
    %17 = tpu.transpose %16, [1, 0, 2] : vector<64x8x8xf32> -> vector<8x64x8xf32>
    %18 = vector.shape_cast %17 : vector<8x64x8xf32> to vector<32x16x8xf32>
    %19 = arith.truncf %18 : vector<32x16x8xf32> to vector<32x16x8xbf16>
    "tpu.trace_start"() <{level = 10 : i32, message = "gqd,gkd->gqk"}> : () -> ()
    %cst_10 = arith.constant dense<0.000000e+00> : vector<32x16x16xf32>
    %20 = tpu.matmul %11, %15, %cst_10 {dimension_numbers = #tpu.dot_dimension_numbers<[2], [2], [1], [1], [0, 0, 0, 1, 1, 1], [0], [0]>} : vector<32x16x8xbf16>, vector<32x16x8xbf16>, vector<32x16x16xf32> -> vector<32x16x16xf32>
    "tpu.trace_stop"() : () -> ()
    %cst_11 = arith.constant dense<0xFF800000> : vector<32x16xf32>
    %21 = vector.multi_reduction <maximumf>, %20, %cst_11 [2] : vector<32x16x16xf32> to vector<32x16xf32>
    %22 = vector.shape_cast %21 : vector<32x16xf32> to vector<32x16x1xf32>
    %23 = vector.broadcast %22 : vector<32x16x1xf32> to vector<32x16x16xf32>
    %24 = arith.subf %20, %23 : vector<32x16x16xf32>
    %25 = math.exp %24 : vector<32x16x16xf32>
    %cst_12 = arith.constant dense<0.000000e+00> : vector<32x16xf32>
    %26 = vector.multi_reduction <add>, %25, %cst_12 [2] : vector<32x16x16xf32> to vector<32x16xf32>
    %27 = vector.shape_cast %26 : vector<32x16xf32> to vector<32x16x1xf32>
    %28 = tpu.reciprocal %27 {approx = true} : vector<32x16x1xf32> -> vector<32x16x1xf32>
    %29 = vector.broadcast %28 : vector<32x16x1xf32> to vector<32x16x16xf32>
    %30 = arith.mulf %25, %29 : vector<32x16x16xf32>
    %31 = arith.truncf %30 : vector<32x16x16xf32> to vector<32x16x16xbf16>
    "tpu.trace_start"() <{level = 10 : i32, message = "gqk,gkd->gqd"}> : () -> ()
    %cst_13 = arith.constant dense<0.000000e+00> : vector<32x16x8xf32>
    %32 = tpu.matmul %31, %19, %cst_13 {dimension_numbers = #tpu.dot_dimension_numbers<[2], [1], [1], [2], [0, 0, 0, 1, 1, 2], [0], [0]>} : vector<32x16x16xbf16>, vector<32x16x8xbf16>, vector<32x16x8xf32> -> vector<32x16x8xf32>
    "tpu.trace_stop"() : () -> ()
    %33 = vector.shape_cast %32 : vector<32x16x8xf32> to vector<8x64x8xf32>
    %34 = tpu.transpose %33, [1, 0, 2] : vector<8x64x8xf32> -> vector<64x8x8xf32>
    %35 = vector.shape_cast %34 : vector<64x8x8xf32> to vector<64x64xf32>
    %36 = arith.truncf %35 : vector<64x64xf32> to vector<64x64xbf16>
    %c0_14 = arith.constant 0 : index
    %c0_15 = arith.constant 0 : index
    %37 = vector.load %arg5[%c0_14, %c0_15] : memref<64x64xbf16, #tpu.memory_space<vmem>>, vector<64x64xbf16>
    %cst_16 = arith.constant dense<0.000000e+00> : vector<64x64xf32>
    %38 = tpu.matmul %36, %37, %cst_16 {dimension_numbers = #tpu.dot_dimension_numbers<[1], [0], [0], [1], [0, 0, 1, 1], [], []>} : vector<64x64xbf16>, vector<64x64xbf16>, vector<64x64xf32> -> vector<64x64xf32>
    %c0_17 = arith.constant 0 : index
    %c0_18 = arith.constant 0 : index
    %39 = vector.load %arg6[%c0_17, %c0_18] : memref<1x64xf32, #tpu.memory_space<vmem>>, vector<1x64xf32>
    %40 = vector.broadcast %39 : vector<1x64xf32> to vector<64x64xf32>
    %41 = arith.addf %38, %40 : vector<64x64xf32>
    %42 = vector.shape_cast %41 : vector<64x64xf32> to vector<4x16x64xf32>
    %43 = arith.truncf %42 : vector<4x16x64xf32> to vector<4x16x64xbf16>
    %c0_19 = arith.constant 0 : index
    %c0_20 = arith.constant 0 : index
    %c0_21 = arith.constant 0 : index
    %44 = vector.load %arg7[%c0_19, %c0_20, %c0_21] : memref<4x16x64xbf16, #tpu.memory_space<vmem>>, vector<4x16x64xbf16>
    tpu.vector_store %arg7[%c0_19, %c0_20, %c0_21], %43 {strides = array<i32>} : memref<4x16x64xbf16, #tpu.memory_space<vmem>>, vector<4x16x64xbf16>,
    return
  }
  func.func @transform_0(%arg0: i32) -> (i32, i32, i32) {
    %c0_i32 = arith.constant 0 : i32
    %c0_i32_0 = arith.constant 0 : i32
    %c0_i32_1 = arith.constant 0 : i32
    return %arg0, %c0_i32, %c0_i32_0 : i32, i32, i32
  }
  func.func @transform_1(%arg0: i32) -> (i32, i32) {
    %c0_i32 = arith.constant 0 : i32
    %c0_i32_0 = arith.constant 0 : i32
    %c0_i32_1 = arith.constant 0 : i32
    return %c0_i32, %c0_i32_0 : i32, i32
  }
  func.func @transform_2(%arg0: i32) -> (i32, i32) {
    %c0_i32 = arith.constant 0 : i32
    %c0_i32_0 = arith.constant 0 : i32
    %c0_i32_1 = arith.constant 0 : i32
    return %c0_i32, %c0_i32_0 : i32, i32
  }
  func.func @transform_3(%arg0: i32) -> (i32, i32) {
    %c0_i32 = arith.constant 0 : i32
    %c0_i32_0 = arith.constant 0 : i32
    %c0_i32_1 = arith.constant 0 : i32
    return %c0_i32, %c0_i32_0 : i32, i32
  }
  func.func @transform_4(%arg0: i32) -> (i32, i32) {
    %c0_i32 = arith.constant 0 : i32
    %c0_i32_0 = arith.constant 0 : i32
    %c0_i32_1 = arith.constant 0 : i32
    return %c0_i32, %c0_i32_0 : i32, i32
  }
  func.func @transform_5(%arg0: i32) -> (i32, i32) {
    %c0_i32 = arith.constant 0 : i32
    %c0_i32_0 = arith.constant 0 : i32
    %c0_i32_1 = arith.constant 0 : i32
    return %c0_i32, %c0_i32_0 : i32, i32
  }
  func.func @transform_6(%arg0: i32) -> (i32, i32, i32) {
    %c0_i32 = arith.constant 0 : i32
    %c0_i32_0 = arith.constant 0 : i32
    %c0_i32_1 = arith.constant 0 : i32
    return %arg0, %c0_i32, %c0_i32_0 : i32, i32, i32
  }
}

</mosaic_0001>

<bundles_post_ra>
// kernel: tpu_custom_call.1
= control target key start
LH: loop header
LB: loop body
LE: loop exit
PB: predicated region body
PF: predicated region fallthrough
CT: control target
= control target key end

     0   :  { %11 = vsyncpa [#allocation3], 0  ;;  %s22185_s0 = inlined_call_operand.hbm [shape: bf16[8,16,64], index: 0, kind: input, shape index: {}]   ;;  %s22186_s1 = inlined_call_operand.hbm [shape: bf16[64,64], index: 1, kind: input, shape index: {}]   ;;  %s22187_s2 = inlined_call_operand.hbm [shape: bf16[64,64], index: 2, kind: input, shape index: {}]   ;;  %s22188_s3 = inlined_call_operand.hbm [shape: bf16[64,64], index: 3, kind: input, shape index: {}]   ;;  %s22189_s4 = inlined_call_operand.hbm [shape: bf16[64,64], index: 4, kind: input, shape index: {}]   ;;  %s22190_s5 = inlined_call_operand.vmem [shape: f32[1,64], index: 5, kind: input, shape index: {}]   ;;  %s22191_s6 = inlined_call_operand.hbm [shape: bf16[8,16,64], index: 6, kind: output, shape index: {}]  }
   0x1   :  { %13 = vsyncpa [#allocation3 + $0x1], 0 }
   0x2   :  { %14 = vsyncpa [#allocation6], 0 }
   0x3   :  { %15 = vsyncpa [#allocation9], 0 }
   0x4   :  { %16 = vsyncpa [#allocation4], 0 }
   0x5   :  { %18 = vsyncpa [#allocation4 + $0x1], 0  ;;  %s16017_s21 = smov 0   ;;  %s16019_s22 = smov 0  }
   0x6   :  { %s16021_s23 = smov 0   ;;  %s16023_s24 = smov 0  }
   0x7 LB: > { %s16038_s25 = sadd.s32 4294967295, %s15952_s24   ;;  %s14214_s26 = sadd.s32 4294967294, %s15952_s24   ;;  %s15952_s24 = sphi %s16023_s24, %s23469_s24   ;;  %s15948_s23 = sphi %s16021_s23, %s23468_s23   ;;  %s15944_s22 = sphi %s16019_s22, %s23467_s22   ;;  %s15940_s21 = sphi %s16017_s21, %s23466_s21  }
   0x8   : > { %p44_p0 = scmp.ne.s32.totalorder %s15944_s22, %s15940_s21  ;;  %p22192_p1 = scmp.eq.s32.totalorder %s16038_s25, 0 }
   0x9   : > { %p173_p2 = scmp.eq.s32.totalorder %s16038_s25, 1  ;;  %p179_p3 = scmp.eq.s32.totalorder %s14214_s26, 1 }
   0xa   : > { %p16047_p4 = por %p22192_p1, %p44_p0  ;;  %p14215_p5 = scmp.ge.s32.totalorder %s15952_s24, 1 }
   0xb   : > { %p16052_p6 = por %p179_p3, %p44_p0  ;;  %p186_p7 = scmp.lt.s32.totalorder %s15952_s24, 3 }
   0xc   : > { %s22610_s27 = scalar_select %p16047_p4, 1, 0 }
   0xd   : > { %s22611_s28 = scalar_select %p16052_p6, 1, 0 }
   0xe   : > { %p16057_p8 = pnand %p14215_p5, %p186_p7  ;;  %s15954_s30 = smov [#allocation5]  }
   0xf   : > { %s198_s7 = sshll.u32 %s15954_s30, 4  ;;  %s15955_s9 = smov [#allocation8]   ;;  %s199_s7 = int_to_ptr.vmem [resolvable:$true] %s198_s7 }
  0x10   : > { %s22612_s29 = scalar_select %p16057_p8, 1, 0 }
  0x11   : > { %p15243_p9 = pneg %p16057_p8  ;;  %s224_s10 = sshll.u32 %s15955_s9, 4  ;;  %s225_s10 = int_to_ptr.vmem [resolvable:$true] %s224_s10 }
  0x12   : > { %s15956_s11 = smov [#allocation7]   ;;  %s15759_s13 = scalar_lea.vmem %s199_s7, 512 }
  0x13   : > { %p16066_p11 = pnand %p15243_p9, %p22192_p1  ;;  %s211_s12 = sshll.u32 %s15956_s11, 4  ;;  %s212_s12 = int_to_ptr.vmem [resolvable:$true] %s211_s12 }
  0x14   : > { %p15760_p13 = scmp.ne.s32.totalorder %s199_s7, %s15759_s13  ;;  %p15767_p5 = scmp.lt.s32.totalorder %s199_s7, %s199_s7 }
  0x15   : > { %p15750_p12 = pneg %p16066_p11  ;;  %p15768_p7 = scmp.lt.s32.totalorder %s15759_s13, %s15759_s13 }
  0x17   : > { %p15762_p0 = pnand %p15760_p13, %p15750_p12  ;;  %p15769_p9 = por %p15768_p7, %p15767_p5 }
  0x19   : > { %p15763_p3 = pneg %p15762_p0 }
  0x1b   : > { %p15770_p10 = pnand %p15769_p9, %p15763_p3 }
  0x1d   : > { %15773 = shalt.err (!%p15770_p10)
}
  0x1e   : > { %s22193_s14 = smov 64   ;;  %s22194_s15 = smov 4  }
  0x1f   : > { %15246 = dma.hbm_to_vmem [thread:$0]  (!%p16066_p11), %s22186_s1, 512, %s199_s7, [#allocation6], %s22193_s14, %s22193_s14, %s22194_s15  }
  0x20   : > { %s15785_s18 = scalar_lea.vmem %s225_s10, 512  ;;  %p15793_p3 = scmp.lt.s32.totalorder %s225_s10, %s225_s10 }
  0x21   : > { %p15786_p13 = scmp.ne.s32.totalorder %s225_s10, %s15785_s18  ;;  %p15794_p10 = scmp.lt.s32.totalorder %s15785_s18, %s15785_s18 }
  0x23   : > { %p15788_p0 = pnand %p15786_p13, %p15750_p12  ;;  %p15795_p7 = por %p15794_p10, %p15793_p3 }
  0x25   : > { %p15789_p5 = pneg %p15788_p0 }
  0x27   : > { %p15796_p9 = pnand %p15795_p7, %p15789_p5 }
  0x29   : > { %15799 = shalt.err (!%p15796_p9)
}
  0x2a   : > { %15252 = dma.hbm_to_vmem [thread:$0]  (!%p16066_p11), %s22188_s3, 512, %s225_s10, [#allocation9], %s22193_s14, %s22193_s14, %s22194_s15  }
  0x2b   : > { %s15811_s26 = scalar_lea.vmem %s212_s12, 512  ;;  %p15819_p3 = scmp.lt.s32.totalorder %s212_s12, %s212_s12 }
  0x2c   : > { %p15812_p1 = scmp.ne.s32.totalorder %s212_s12, %s15811_s26  ;;  %p15820_p5 = scmp.lt.s32.totalorder %s15811_s26, %s15811_s26 }
  0x2e   : > { %p15814_p13 = pnand %p15812_p1, %p15750_p12  ;;  %p15821_p10 = por %p15820_p5, %p15819_p3 }
  0x30   : > { %p15815_p0 = pneg %p15814_p13 }
  0x32   : > { %p15822_p7 = pnand %p15821_p10, %p15815_p0 }
  0x34   : > { %15825 = shalt.err (!%p15822_p7)
}
  0x35   : > { %15249 = dma.hbm_to_vmem [thread:$0]  (!%p16066_p11), %s22187_s2, 512, %s212_s12, [#allocation6], %s22193_s14, %s22193_s14, %s22194_s15  }
  0x36   : > { %s15959_s9 = smov [#allocation10]  }
  0x37   : > { %s237_s10 = sshll.u32 %s15959_s9, 4  ;;  %s238_s10 = int_to_ptr.vmem [resolvable:$true] %s237_s10 }
  0x38   : > { %s15837_s11 = scalar_lea.vmem %s238_s10, 512  ;;  %p15845_p0 = scmp.lt.s32.totalorder %s238_s10, %s238_s10 }
  0x39   : > { %p15838_p1 = scmp.ne.s32.totalorder %s238_s10, %s15837_s11  ;;  %p15846_p3 = scmp.lt.s32.totalorder %s15837_s11, %s15837_s11 }
  0x3b   : > { %p15840_p9 = pnand %p15838_p1, %p15750_p12  ;;  %p15847_p5 = por %p15846_p3, %p15845_p0 }
  0x3d   : > { %p15841_p13 = pneg %p15840_p9 }
  0x3f   : > { %p15848_p10 = pnand %p15847_p5, %p15841_p13 }
  0x41   : > { %15851 = shalt.err (!%p15848_p10)
}
  0x42   : > { %15255 = dma.hbm_to_vmem [thread:$0]  (!%p16066_p11), %s22189_s4, 512, %s238_s10, [#allocation9], %s22193_s14, %s22193_s14, %s22194_s15  }
  0x43   : > { %s16117_s16 = sadd.s32 1, %s15952_s24   ;;  %s31_s8 = sadd.s32 1, %s15948_s23 }
  0x44   : > { %s28_s17 = ssub.s32 %s15952_s24, %s16117_s16  ;;  %p38_p12 = scmp.ne.s32.totalorder %s15948_s23, %s15944_s22 }
  0x45   : > { %p29_p7 = scmp.eq.s32.totalorder %s28_s17, 0  ;;  %p39_p1 = scmp.eq.s32.totalorder %s15952_s24, 0 }
  0x46   : > { %p16127_p9 = por %p173_p2, %p38_p12  ;;  %p15268_p13 = scmp.lt.s32.totalorder %s15952_s24, 2 }
  0x47   : > { %s16133_s19 = scalar_select %p29_p7, %s15948_s23, %s31_s8  }
  0x48   : > { %s22614_s18 = scalar_select %p16127_p9, 1, 0 }
  0x49   : > { %p40_p0 = por %p39_p1, %p38_p12  ;;  %s254_s20 = sand.u32 1, %s15948_s23  }
  0x4a   : > { %s14221_s26 = sshll.u32 %s254_s20, 5  ;;  %s14604_s30 = sshll.u32 %s15952_s24, 9 }
  0x4b   : > { %s16140_s10 = scalar_lea.hbm %s22185_s0, %s14604_s30  ;;  %s258_s11 = scalar_lea.vmem [#allocation2], %s14221_s26 }
  0x4c   : > { %s266_s12 = sshll.u32 %s258_s11, 4  ;;  %p16144_p2 = pnand %p15268_p13, %p40_p0  ;;  %s16142_s12 = int_to_ptr.vmem [resolvable:$true] %s266_s12 }
  0x4d   : > { %s16148_s8 = scalar_lea.sflag [#allocation3], %s254_s20  ;;  %s15852_s17 = scalar_lea.hbm %s16140_s10, 512 }
  0x4e   : > { %p15853_p11 = scmp.ne.s32.totalorder %s16140_s10, %s15852_s17  ;;  %p15854_p3 = pneg %p16144_p2 }
  0x4f   : > { %s15857_s26 = scalar_lea.hbm %s22185_s0, 1024  ;;  %p15858_p12 = scmp.lt.s32.totalorder %s16140_s10, %s22185_s0 }
  0x50   : > { %p15855_p5 = pnand %p15854_p3, %p15853_p11  ;;  %p15859_p7 = scmp.lt.s32.totalorder %s15857_s26, %s15852_s17 }
  0x52   : > { %p15856_p10 = pneg %p15855_p5  ;;  %p15860_p1 = por %p15859_p7, %p15858_p12 }
  0x54   : > { %p15861_p13 = pnand %p15860_p1, %p15856_p10 }
  0x56   : > { %15864 = shalt.err (!%p15861_p13)
}
  0x57   : > { %s15865_s20 = scalar_lea.vmem %s16142_s12, 512  ;;  %s15960_s14 = smov [#allocation2]  }
  0x58   : > { %p15866_p0 = scmp.ne.s32.totalorder %s16142_s12, %s15865_s20  ;;  %s15870_s15 = sshll.u32 %s15960_s14, 4  ;;  %s15871_s15 = int_to_ptr.vmem [resolvable:$false] %s15870_s15 }
  0x59   : > { %s15872_s30 = scalar_lea.vmem %s15871_s15, 1024  ;;  %p15873_p5 = scmp.lt.s32.totalorder %s16142_s12, %s15871_s15 }
  0x5a   : > { %p15868_p6 = pnand %p15866_p0, %p15854_p3  ;;  %p15874_p9 = scmp.lt.s32.totalorder %s15872_s30, %s15865_s20 }
  0x5c   : > { %p15869_p11 = pneg %p15868_p6  ;;  %p15875_p4 = por %p15874_p9, %p15873_p5 }
  0x5e   : > { %p15876_p8 = pnand %p15875_p4, %p15869_p11 }
  0x60   : > { %15879 = shalt.err (!%p15876_p8)
}
  0x61   : > { %s22616_s17 = smov 4   ;;  %s22617_s7 = smov 64  }
  0x62   : > { %15259 = dma.hbm_to_vmem [thread:$0]  (!%p16144_p2), %s16140_s10, 512, %s16142_s12, %s16148_s8, %s22617_s7, %s22617_s7, %s22616_s17  }
  0x63   : > { %p22618_p6 = scmp.ne.s32.totalorder %s22612_s29, 0 }
  0x65   : > { %278 = sbr.rel (%p22618_p6) target bundleno = 2053 (0x805), region = 44 }
  0x6a   : > { %s16175_s14 = sand.u32 1, %s15944_s22   ;;  %p22619_p4 = scmp.ne.s32.totalorder %s22610_s27, 0 }
  0x6b   : > { %s14226_s15 = sshll.u32 %s16175_s14, 5  ;;  %s281_s26 = scalar_lea.sflag [#allocation3], %s16175_s14 }
  0x6c   : > { %s16181_s13 = scalar_lea.vmem [#allocation2], %s14226_s15 }
  0x6d   : > { %15923 = dma.done.wait (%p22619_p4), %s281_s26, 512  }
  0x6e   : > { %15925 = vsyncadd (%p22619_p4), %s281_s26, 4294966784  ;;  %p22620_p8 = scmp.eq.s32.totalorder %s16038_s25, 0 }
  0x70   : > { %15927 = dma.done.wait (%p22620_p8), [#allocation6], 1024   ;;  %p22621_p9 = pmov %p22620_p8 }
  0x71   : > { %p22622_p2 = pmov %p22620_p8 }
  0x72   : > { %15929 = vsyncadd (%p22621_p9), [#allocation6], 4294966272 }
  0x73   : > { %15931 = dma.done.wait (%p22622_p2), [#allocation9], 1024   ;;  %p22623_p3 = pmov %p22622_p2 }
  0x74   : > { %v15472_v0 = vld [vmem:[#allocation5 + $0x18] sm:$0xff]   ;;  %v15473_v1 = vld [vmem:[#allocation5 + $0x10] sm:$0xff]   ;;  %v15474_v2 = vld [vmem:[#allocation5 + $0x8] sm:$0xff]   ;;  %vm392_vm0 = vcmask 523264   ;;  %s15961_s27 = smov 120   ;;  %s15962_s29 = smov 112   ;;  %v845_v29 = vlaneseq }
  0x75   : > { %15933 = vsyncadd (%p22623_p3), [#allocation9], 4294966272  ;;  %14775 = vmatprep.subr.bf16.mxu1 %v15472_v0  ;;  %v15476_v3 = vld [vmem:[%s16181_s13] sm:$0xff]   ;;  %v15480_v5 = vld [vmem:[#allocation7 + $0x18] sm:$0xff]   ;;  %s15963_s10 = smov 104   ;;  %s15964_s12 = smov 96  }
  0x76   : > { %14776 = vmatpush3.bf16.msra.mxu1 %v15472_v0  ;;  %14783 = vmatprep.mubr.msk.bf16.mxu1 %vm392_vm0, %v15476_v3  ;;  %v15475_v4 = vld [vmem:[#allocation5] sm:$0xff]   ;;  %v15477_v6 = vld [vmem:[%s16181_s13 + $0x8] sm:$0xff]   ;;  %v15478_v7 = vld [vmem:[%s16181_s13 + $0x10] sm:$0xff]   ;;  %s15965_s8 = smov 88   ;;  %s15966_s9 = smov 80   ;;  %v846_v35 = vshrl.u32 %v845_v29, 7 }
  0x77   : > { %14777 = vmatprep.subr.bf16.mxu1 %v15473_v1  ;;  %14815 = vmatprep.mubr.msk.bf16.mxu0 %vm392_vm0, %v15476_v3  ;;  %v15481_v8 = vld [vmem:[#allocation7 + $0x10] sm:$0xff]   ;;  %v15482_v9 = vld [vmem:[#allocation7 + $0x8] sm:$0xff]   ;;  %v15479_v10 = vld [vmem:[%s16181_s13 + $0x18] sm:$0xff]   ;;  %s15967_s11 = smov 72   ;;  %v15968_v27 = vmov 1983009808  }
  0x78   : > { %v15483_v11 = vld [vmem:[#allocation7] sm:$0xff]   ;;  %v15484_v12 = vld [vmem:[#allocation8 + $0x18] sm:$0xff]   ;;  %v15485_v13 = vld [vmem:[#allocation8 + $0x10] sm:$0xff]   ;;  %v843_v28 = vunpack.c.l.s4 %v15968_v27  ;;  %v15969_v32 = vmov 1934713408   ;;  %vm15971_vm1 = vmmov 0  }
  0x79   : > { %14807 = vmatprep.subr.bf16.mxu0 %v15484_v12  ;;  %v15486_v14 = vld [vmem:[#allocation8 + $0x8] sm:$0xff]   ;;  %v15487_v15 = vld [vmem:[#allocation8] sm:$0xff]   ;;  %v907_v33 = vunpack.c.l.s4 %v15969_v32  ;;  %vm7816_vm2 = vcmask 64512   ;;  %vm9321_vm3 = vcmask 130048   ;;  %s15972_s20 = smov 24   ;;  %s15973_s30 = smov 8  }
  0x7a   : > { %14778 = vmatpush3.bf16.msra.mxu1 %v15473_v1  ;;  %14808 = vmatpush3.bf16.msra.mxu0 %v15484_v12  ;;  %v844_v34 = vunpack.c.0.s8 %v843_v28  ;;  %s15974_s17 = smov 16   ;;  %s15975_s7 = smov 32   ;;  %vm13882_vm4 = vcmask 195584   ;;  %vm13891_vm5 = vcmask 261120   ;;  %vm13900_vm6 = vcmask 326656  }
  0x7b   : > { %14779 = vmatprep.subr.bf16.mxu1 %v15474_v2  ;;  %14809 = vmatprep.subr.bf16.mxu0 %v15485_v13  ;;  %v908_v38 = vunpack.c.0.s8 %v907_v33  ;;  %s15976_s26 = smov 40   ;;  %s15977_s13 = smov 48   ;;  %vm13909_vm7 = vcmask 392192   ;;  %vm13918_vm8 = vcmask 457728   ;;  %vm14079_vm9 = vcmask 519168  }
  0x7c   : > { %v16357_v39 = vsub.s32 %v844_v34, %v846_v35  ;;  %p23463_p12 = scmp.ne.s32.totalorder %s22614_s18, 0 }
  0x7d   : > { %v16361_v46 = vsub.s32 %v908_v38, %v846_v35 }
  0x7e   : > { %14780 = vmatpush3.bf16.msra.mxu1 %v15474_v2  ;;  %14810 = vmatpush3.bf16.msra.mxu0 %v15485_v13  ;;  %22627 = vst [vmem:[#allocation19_spill] sm:$0xff] %v16357_v39 }
  0x7f   : > { %14781 = vmatprep.subr.bf16.mxu1 %v15475_v4  ;;  %14811 = vmatprep.subr.bf16.mxu0 %v15486_v14  ;;  %22628 = vst [vmem:[#allocation20_spill] sm:$0xff] %v16361_v46 }
  0x82   : > { %14782 = vmatpush3.bf16.msra.mxu1 %v15475_v4  ;;  %14812 = vmatpush3.bf16.msra.mxu0 %v15486_v14 }
  0x83   : > { %14791 = vmatprep.subr.bf16.mxu1 %v15480_v5  ;;  %14813 = vmatprep.subr.bf16.mxu0 %v15487_v15 }
  0x85   : > { %14784 = vmatmul.mubr.msk.bf16.vlgmr.msra.gmra.mxu1 %vm392_vm0, %v15477_v6 }
  0x86   : > { %14787 = vmatprep.mubr.msk.bf16.mxu1 %vm392_vm0, %v15478_v7  ;;  %14792 = vmatpush3.bf16.msra.mxu1 %v15480_v5 }
  0x87   : > { %14793 = vmatprep.subr.bf16.mxu1 %v15481_v8  ;;  %14814 = vmatpush3.bf16.msra.mxu0 %v15487_v15 }
  0x8a   : > { %14794 = vmatpush3.bf16.msra.mxu1 %v15481_v8  ;;  %14816 = vmatmul.mubr.msk.bf16.vlgmr.msra.gmra.mxu0 %vm392_vm0, %v15477_v6 }
  0x8b   : > { %14795 = vmatprep.subr.bf16.mxu1 %v15482_v9  ;;  %14819 = vmatprep.mubr.msk.bf16.mxu0 %vm392_vm0, %v15478_v7 }
  0x8d   : > { %14788 = vmatmul.mubr.msk.bf16.gmra.mxu1 %vm392_vm0, %v15479_v10 }
  0x8e   : > { %14796 = vmatpush3.bf16.msra.mxu1 %v15482_v9  ;;  %14799 = vmatprep.mubr.msk.bf16.mxu1 %vm392_vm0, %v15476_v3 }
  0x8f   : > { %14797 = vmatprep.subr.bf16.mxu1 %v15483_v11 }
  0x92   : > { %14798 = vmatpush3.bf16.msra.mxu1 %v15483_v11  ;;  %14820 = vmatmul.mubr.msk.bf16.gmra.mxu0 %vm392_vm0, %v15479_v10 }
  0x95   : > { %14800 = vmatmul.mubr.msk.bf16.vlgmr.msra.gmra.mxu1 %vm392_vm0, %v15477_v6 }
  0x96   : > { %14803 = vmatprep.mubr.msk.bf16.mxu1 %vm392_vm0, %v15478_v7 }
  0x9d   : > { %14804 = vmatmul.mubr.msk.bf16.gmra.mxu1 %vm392_vm0, %v15479_v10 }
 0x145   : > { %v16211_v16 = vpop.f32.mrf.mxu1 }
 0x146   : > { %676 = vrot.lane.b32.xlu0 %v16211_v16, %s15961_s27 }
 0x147   : > { %v16215_v17 = vpop.f32.mrf.mxu1 }
 0x149   : > { %v16217_v18 = vpop.f32.mrf.mxu1 }
 0x14a   : > { %700 = vrot.lane.b32.xlu0 %v16211_v16, %s15962_s29  ;;  %678 = vrot.lane.b32.xlu1 %v16217_v18, %s15961_s27 }
 0x14b   : > { %v16247_v19 = vpop.f32.mrf.mxu1 }
 0x14d   : > { %v16269_v20 = vpop.f32.mrf.mxu1 }
 0x14e   : > { %724 = vrot.lane.b32.xlu0 %v16211_v16, %s15963_s10  ;;  %702 = vrot.lane.b32.xlu1 %v16217_v18, %s15962_s29 }
 0x14f   : > { %v16275_v21 = vpop.f32.mrf.mxu1 }
 0x150   : > { %22624 = vst [vmem:[#allocation16_spill] sm:$0xff] %v16275_v21 }
 0x151   : > { %v16281_v22 = vpop.f32.mrf.mxu1 }
 0x152   : > { %748 = vrot.lane.b32.xlu0 %v16211_v16, %s15964_s12  ;;  %726 = vrot.lane.b32.xlu1 %v16217_v18, %s15963_s10  ;;  %22625 = vst [vmem:[#allocation17_spill] sm:$0xff] %v16281_v22 }
 0x153   : > { %v16295_v23 = vpop.f32.mrf.mxu1 }
 0x154   : > { %22626 = vst [vmem:[#allocation18_spill] sm:$0xff] %v16295_v23 }
 0x155   : > { %v16305_v24 = vpop.f32.mrf.mxu1 }
 0x156   : > { %772 = vrot.lane.b32.xlu0 %v16211_v16, %s15965_s8  ;;  %750 = vrot.lane.b32.xlu1 %v16217_v18, %s15964_s12 }
 0x157   : > { %v16311_v25 = vpop.f32.mrf.mxu1 }
 0x159   : > { %v16317_v26 = vpop.f32.mrf.mxu1 }
 0x15a   : > { %796 = vrot.lane.b32.xlu0 %v16211_v16, %s15966_s9  ;;  %774 = vrot.lane.b32.xlu1 %v16217_v18, %s15965_s8 }
 0x15b   : > { %v16347_v31 = vpop.f32.mrf.mxu1 }
 0x15d   : > { %v16407_v28 = vpop.f32.mrf.mxu1 }
 0x15e   : > { %820 = vrot.lane.b32.xlu0 %v16211_v16, %s15967_s11  ;;  %798 = vrot.lane.b32.xlu1 %v16217_v18, %s15966_s9  ;;  %22633 = vst [vmem:[#allocation25_spill] sm:$0xff] %v16407_v28 }
 0x162   : > { %672 = vrot.lane.b32.xlu0 %v16215_v17, %s15961_s27  ;;  %822 = vrot.lane.b32.xlu1 %v16217_v18, %s15967_s11 }
 0x166   : > { %696 = vrot.lane.b32.xlu0 %v16215_v17, %s15962_s29  ;;  %674 = vrot.lane.b32.xlu1 %v16247_v19, %s15961_s27 }
 0x16a   : > { %720 = vrot.lane.b32.xlu0 %v16215_v17, %s15963_s10  ;;  %698 = vrot.lane.b32.xlu1 %v16247_v19, %s15962_s29 }
 0x16e   : > { %744 = vrot.lane.b32.xlu0 %v16215_v17, %s15964_s12  ;;  %722 = vrot.lane.b32.xlu1 %v16247_v19, %s15963_s10 }
 0x172   : > { %768 = vrot.lane.b32.xlu0 %v16215_v17, %s15965_s8  ;;  %746 = vrot.lane.b32.xlu1 %v16247_v19, %s15964_s12 }
 0x176   : > { %792 = vrot.lane.b32.xlu0 %v16215_v17, %s15966_s9  ;;  %770 = vrot.lane.b32.xlu1 %v16247_v19, %s15965_s8 }
 0x17a   : > { %816 = vrot.lane.b32.xlu0 %v16215_v17, %s15967_s11  ;;  %794 = vrot.lane.b32.xlu1 %v16247_v19, %s15966_s9 }
 0x17e   : > { %818 = vrot.lane.b32.xlu1 %v16247_v19, %s15967_s11  ;;  %684 = vrot.lane.b32.xlu0 %v16269_v20, %s15961_s27 }
 0x182   : > { %708 = vrot.lane.b32.xlu0 %v16269_v20, %s15962_s29  ;;  %686 = vrot.lane.b32.xlu1 %v16281_v22, %s15961_s27 }
 0x186   : > { %732 = vrot.lane.b32.xlu0 %v16269_v20, %s15963_s10  ;;  %710 = vrot.lane.b32.xlu1 %v16281_v22, %s15962_s29 }
 0x18a   : > { %680 = vrot.lane.b32.xlu0 %v16275_v21, %s15961_s27  ;;  %734 = vrot.lane.b32.xlu1 %v16281_v22, %s15963_s10 }
 0x18e   : > { %704 = vrot.lane.b32.xlu0 %v16275_v21, %s15962_s29  ;;  %682 = vrot.lane.b32.xlu1 %v16295_v23, %s15961_s27 }
 0x192   : > { %728 = vrot.lane.b32.xlu0 %v16275_v21, %s15963_s10  ;;  %706 = vrot.lane.b32.xlu1 %v16295_v23, %s15962_s29 }
 0x196   : > { %730 = vrot.lane.b32.xlu1 %v16295_v23, %s15963_s10  ;;  %3060 = vrot.lane.b32.xlu0 %v16305_v24, %s15961_s27 }
 0x19a   : > { %3084 = vrot.lane.b32.xlu0 %v16305_v24, %s15962_s29  ;;  %3080 = vrot.lane.b32.xlu1 %v16311_v25, %s15962_s29 }
 0x19e   : > { %3108 = vrot.lane.b32.xlu0 %v16305_v24, %s15963_s10  ;;  %3062 = vrot.lane.b32.xlu1 %v16317_v26, %s15961_s27 }
 0x1a2   : > { %3132 = vrot.lane.b32.xlu0 %v16305_v24, %s15964_s12  ;;  %3086 = vrot.lane.b32.xlu1 %v16317_v26, %s15962_s29 }
 0x1a6   : > { %3156 = vrot.lane.b32.xlu0 %v16305_v24, %s15965_s8  ;;  %3110 = vrot.lane.b32.xlu1 %v16317_v26, %s15963_s10 }
 0x1aa   : > { %3180 = vrot.lane.b32.xlu0 %v16305_v24, %s15966_s9  ;;  %3134 = vrot.lane.b32.xlu1 %v16317_v26, %s15964_s12 }
 0x1ae   : > { %3204 = vrot.lane.b32.xlu0 %v16305_v24, %s15967_s11  ;;  %3158 = vrot.lane.b32.xlu1 %v16317_v26, %s15965_s8 }
 0x1b2   : > { %3056 = vrot.lane.b32.xlu0 %v16311_v25, %s15961_s27  ;;  %3182 = vrot.lane.b32.xlu1 %v16317_v26, %s15966_s9 }
 0x1b6   : > { %3104 = vrot.lane.b32.xlu0 %v16311_v25, %s15963_s10  ;;  %3206 = vrot.lane.b32.xlu1 %v16317_v26, %s15967_s11 }
 0x1b8   : > { %v677_v30 = vpop.permute.xlu0 %676 }
 0x1ba   : > { %3128 = vrot.lane.b32.xlu0 %v16311_v25, %s15964_s12  ;;  %3082 = vrot.lane.b32.xlu1 %v16347_v31, %s15962_s29 }
 0x1bc   : > { %v701_v36 = vpop.permute.xlu0 %700  ;;  %v679_v37 = vpop.permute.xlu1 %678 }
 0x1bd   : > { %v1112_v40 = vcombine.low %v16211_v16, %v701_v36  ;;  %v1113_v41 = vcombine.high %v16211_v16, %v701_v36 }
 0x1be   : > { %3152 = vrot.lane.b32.xlu0 %v16311_v25, %s15965_s8  ;;  %3106 = vrot.lane.b32.xlu1 %v16347_v31, %s15963_s10 }
 0x1bf   : > { %v1120_v47 = vrot.slane %v1112_v40, %v16357_v39  ;;  %v1127_v48 = vrot.slane %v1113_v41, %v16357_v39 }
 0x1c0   : > { %v725_v42 = vpop.permute.xlu0 %724  ;;  %v703_v43 = vpop.permute.xlu1 %702 }
 0x1c1   : > { %v1128_v44 = vcombine.low %v677_v30, %v725_v42  ;;  %v1129_v45 = vcombine.high %v677_v30, %v725_v42  ;;  %v1248_v51 = vcombine.low %v16217_v18, %v703_v43  ;;  %v1249_v52 = vcombine.high %v16217_v18, %v703_v43 }
 0x1c2   : > { %3176 = vrot.lane.b32.xlu0 %v16311_v25, %s15966_s9  ;;  %3130 = vrot.lane.b32.xlu1 %v16347_v31, %s15964_s12 }
 0x1c3   : > { %v1136_v49 = vrot.slane %v1128_v44, %v16357_v39  ;;  %v1143_v50 = vrot.slane %v1129_v45, %v16357_v39  ;;  %v1256_v1 = vrot.slane %v1248_v51, %v16357_v39  ;;  %v1263_v2 = vrot.slane %v1249_v52, %v16357_v39 }
 0x1c4   : > { %v16373_v53 = vpop.permute.xlu0 %748  ;;  %v727_v54 = vpop.permute.xlu1 %726 }
 0x1c5   : > { %v1176_v55 = vcombine.low %v1120_v47, %v1136_v49  ;;  %v1177_v56 = vcombine.high %v1120_v47, %v1136_v49  ;;  %v1192_v57 = vcombine.low %v1127_v48, %v1143_v50  ;;  %v1193_v58 = vcombine.high %v1127_v48, %v1143_v50 }
 0x1c6   : > { %v1264_v59 = vcombine.low %v679_v37, %v727_v54  ;;  %v1265_v60 = vcombine.high %v679_v37, %v727_v54  ;;  %3200 = vrot.lane.b32.xlu0 %v16311_v25, %s15967_s11  ;;  %3154 = vrot.lane.b32.xlu1 %v16347_v31, %s15965_s8 }
 0x1c7   : > { %v1184_v61 = vrot.slane %v1176_v55, %v16361_v46  ;;  %v1191_v62 = vrot.slane %v1177_v56, %v16361_v46  ;;  %v1200_v63 = vrot.slane %v1192_v57, %v16361_v46  ;;  %v1207_v0 = vrot.slane %v1193_v58, %v16361_v46 }
 0x1c8   : > { %v1272_v3 = vrot.slane %v1264_v59, %v16357_v39  ;;  %v1279_v4 = vrot.slane %v1265_v60, %v16357_v39  ;;  %v16387_v5 = vpop.permute.xlu0 %772  ;;  %v16389_v6 = vpop.permute.xlu1 %750 }
 0x1c9   : > { %v14276_v7 = vcombine.low %v1184_v61, %v1191_v62  ;;  %v14278_v8 = vcombine.high %v1184_v61, %v1191_v62  ;;  %v14280_v9 = vcombine.low %v1200_v63, %v1207_v0  ;;  %v14282_v10 = vcombine.high %v1200_v63, %v1207_v0 }
 0x1ca   : > { %v1312_v11 = vcombine.low %v1256_v1, %v1272_v3  ;;  %v1313_v12 = vcombine.high %v1256_v1, %v1272_v3  ;;  %v1328_v13 = vcombine.low %v1263_v2, %v1279_v4  ;;  %v1329_v14 = vcombine.high %v1263_v2, %v1279_v4  ;;  %3178 = vrot.lane.b32.xlu1 %v16347_v31, %s15966_s9 }
 0x1cb   : > { %v16394_v15 = vrot.slane %v14276_v7, %v16357_v39  ;;  %v16397_v16 = vrot.slane %v14278_v8, %v16357_v39  ;;  %v16400_v18 = vrot.slane %v14280_v9, %v16357_v39  ;;  %v16403_v27 = vrot.slane %v14282_v10, %v16357_v39  ;;  %3058 = vrot.lane.b32.xlu0 %v16347_v31, %s15961_s27  ;;  %v16475_v10 = vpop.f32.mrf.mxu1 }
 0x1cc   : > { %v1320_v29 = vrot.slane %v1312_v11, %v16361_v46  ;;  %v1327_v30 = vrot.slane %v1313_v12, %v16361_v46  ;;  %v1336_v32 = vrot.slane %v1328_v13, %v16361_v46  ;;  %v1343_v33 = vrot.slane %v1329_v14, %v16361_v46  ;;  %v16413_v34 = vpop.permute.xlu0 %796  ;;  %v16415_v35 = vpop.permute.xlu1 %774  ;;  %22638 = vst [vmem:[#allocation30_spill] sm:$0xff] %v16475_v10 }
 0x1cd   : > { %22629 = vst [vmem:[#allocation21_spill] sm:$0xff] %v16394_v15  ;;  %22630 = vst [vmem:[#allocation22_spill] sm:$0xff] %v16397_v16 }
 0x1ce   : > { %22631 = vst [vmem:[#allocation23_spill] sm:$0xff] %v16400_v18  ;;  %22632 = vst [vmem:[#allocation24_spill] sm:$0xff] %v16403_v27  ;;  %v14284_v38 = vcombine.low %v1320_v29, %v1327_v30  ;;  %v14286_v40 = vcombine.high %v1320_v29, %v1327_v30  ;;  %v14288_v41 = vcombine.low %v1336_v32, %v1343_v33  ;;  %3202 = vrot.lane.b32.xlu1 %v16347_v31, %s15967_s11 }
 0x1cf   : > { %v14290_v42 = vcombine.high %v1336_v32, %v1343_v33  ;;  %3068 = vrot.lane.b32.xlu0 %v16407_v28, %s15961_s27 }
 0x1d0   : > { %v16426_v43 = vrot.slane %v14284_v38, %v16357_v39  ;;  %v16429_v44 = vrot.slane %v14286_v40, %v16357_v39  ;;  %v16432_v45 = vrot.slane %v14288_v41, %v16357_v39  ;;  %v16437_v48 = vpop.permute.xlu0 %820  ;;  %v16439_v49 = vpop.permute.xlu1 %798 }
 0x1d1   : > { %v16435_v47 = vrot.slane %v14290_v42, %v16357_v39  ;;  %v1160_v50 = vcombine.low %v16387_v5, %v16437_v48  ;;  %v1161_v37 = vcombine.high %v16387_v5, %v16437_v48 }
 0x1d2   : > { %22634 = vst [vmem:[#allocation26_spill] sm:$0xff] %v16426_v43  ;;  %22635 = vst [vmem:[#allocation27_spill] sm:$0xff] %v16429_v44  ;;  %754 = vrot.lane.b32.xlu1 %v16295_v23, %s15964_s12 }
 0x1d3   : > { %22636 = vst [vmem:[#allocation28_spill] sm:$0xff] %v16432_v45  ;;  %22637 = vst [vmem:[#allocation29_spill] sm:$0xff] %v16435_v47  ;;  %3092 = vrot.lane.b32.xlu0 %v16407_v28, %s15962_s29  ;;  %v1175_v5 = vrot.slane %v1161_v37, %v16357_v39  ;;  %v2432_v37 = vcombine.low %v16432_v45, %v16435_v47 }
 0x1d4   : > { %v673_v52 = vpop.permute.xlu0 %672  ;;  %v16449_v54 = vpop.permute.xlu1 %822 }
 0x1d6   : > { %778 = vrot.lane.b32.xlu1 %v16295_v23, %s15965_s8 }
 0x1d7   : > { %3116 = vrot.lane.b32.xlu0 %v16407_v28, %s15963_s10 }
 0x1d8   : > { %v697_v55 = vpop.permute.xlu0 %696  ;;  %v675_v56 = vpop.permute.xlu1 %674 }
 0x1d9   : > { %v840_v59 = vcombine.low %v16215_v17, %v697_v55  ;;  %v841_v60 = vcombine.high %v16215_v17, %v697_v55 }
 0x1da   : > { %802 = vrot.lane.b32.xlu1 %v16295_v23, %s15966_s9 }
 0x1db   : > { %3140 = vrot.lane.b32.xlu0 %v16407_v28, %s15964_s12  ;;  %v848_v1 = vrot.slane %v840_v59, %v16357_v39  ;;  %v855_v2 = vrot.slane %v841_v60, %v16357_v39 }
 0x1dc   : > { %v721_v57 = vpop.permute.xlu0 %720  ;;  %v699_v58 = vpop.permute.xlu1 %698 }
 0x1dd   : > { %v856_v61 = vcombine.low %v673_v52, %v721_v57  ;;  %v857_v62 = vcombine.high %v673_v52, %v721_v57  ;;  %v976_v11 = vcombine.low %v16247_v19, %v699_v58  ;;  %v977_v12 = vcombine.high %v16247_v19, %v699_v58 }
 0x1de   : > { %826 = vrot.lane.b32.xlu1 %v16295_v23, %s15967_s11  ;;  %v16632_v23 = vpop.f32.mrf.mxu0 }
 0x1df   : > { %3164 = vrot.lane.b32.xlu0 %v16407_v28, %s15965_s8  ;;  %v864_v3 = vrot.slane %v856_v61, %v16357_v39  ;;  %v871_v4 = vrot.slane %v857_v62, %v16357_v39  ;;  %v984_v41 = vrot.slane %v976_v11, %v16357_v39  ;;  %v991_v42 = vrot.slane %v977_v12, %v16357_v39 }
 0x1e0   : > { %v16465_v63 = vpop.permute.xlu0 %744  ;;  %v723_v0 = vpop.permute.xlu1 %722  ;;  %22655 = vst [vmem:[#allocation47_spill] sm:$0xff] %v16632_v23 }
 0x1e1   : > { %v904_v17 = vcombine.low %v848_v1, %v864_v3  ;;  %v905_v7 = vcombine.high %v848_v1, %v864_v3  ;;  %v920_v8 = vcombine.low %v855_v2, %v871_v4  ;;  %v921_v9 = vcombine.high %v855_v2, %v871_v4 }
 0x1e2   : > { %758 = vrot.lane.b32.xlu1 %v16281_v22, %s15964_s12  ;;  %v992_v13 = vcombine.low %v675_v56, %v723_v0  ;;  %v993_v14 = vcombine.high %v675_v56, %v723_v0 }
 0x1e3   : > { %3188 = vrot.lane.b32.xlu0 %v16407_v28, %s15966_s9  ;;  %v912_v32 = vrot.slane %v904_v17, %v16361_v46  ;;  %v919_v33 = vrot.slane %v905_v7, %v16361_v46  ;;  %v928_v38 = vrot.slane %v920_v8, %v16361_v46  ;;  %v935_v40 = vrot.slane %v921_v9, %v16361_v46 }
 0x1e4   : > { %v16479_v29 = vpop.permute.xlu0 %768  ;;  %v16481_v30 = vpop.permute.xlu1 %746  ;;  %v1000_v19 = vrot.slane %v992_v13, %v16357_v39  ;;  %v1007_v52 = vrot.slane %v993_v14, %v16357_v39 }
 0x1e5   : > { %v14260_v55 = vcombine.low %v912_v32, %v919_v33  ;;  %v14262_v56 = vcombine.high %v912_v32, %v919_v33  ;;  %v14264_v57 = vcombine.low %v928_v38, %v935_v40  ;;  %v14266_v58 = vcombine.high %v928_v38, %v935_v40 }
 0x1e6   : > { %782 = vrot.lane.b32.xlu1 %v16281_v22, %s15965_s8  ;;  %v1040_v59 = vcombine.low %v984_v41, %v1000_v19  ;;  %v1041_v60 = vcombine.high %v984_v41, %v1000_v19  ;;  %v1056_v61 = vcombine.low %v991_v42, %v1007_v52  ;;  %v1057_v62 = vcombine.high %v991_v42, %v1007_v52  ;;  %v16527_v42 = vpop.f32.mrf.mxu1 }
 0x1e7   : > { %3064 = vrot.lane.b32.xlu0 %v16475_v10, %s15961_s27  ;;  %v16500_v2 = vrot.slane %v14260_v55, %v16357_v39  ;;  %v16503_v3 = vrot.slane %v14262_v56, %v16357_v39  ;;  %v16506_v4 = vrot.slane %v14264_v57, %v16357_v39  ;;  %v16509_v17 = vrot.slane %v14266_v58, %v16357_v39 }
 0x1e8   : > { %v16495_v0 = vpop.permute.xlu0 %792  ;;  %v16497_v1 = vpop.permute.xlu1 %770  ;;  %v1048_v7 = vrot.slane %v1040_v59, %v16361_v46  ;;  %v1055_v8 = vrot.slane %v1041_v60, %v16361_v46  ;;  %v1064_v9 = vrot.slane %v1056_v61, %v16361_v46  ;;  %v1071_v11 = vrot.slane %v1057_v62, %v16361_v46  ;;  %22643 = vst [vmem:[#allocation35_spill] sm:$0xff] %v16527_v42 }
 0x1e9   : > { %22639 = vst [vmem:[#allocation31_spill] sm:$0xff] %v16500_v2  ;;  %22640 = vst [vmem:[#allocation32_spill] sm:$0xff] %v16503_v3  ;;  %v16601_v13 = vpop.f32.mrf.mxu1 }
 0x1ea   : > { %22641 = vst [vmem:[#allocation33_spill] sm:$0xff] %v16506_v4  ;;  %22642 = vst [vmem:[#allocation34_spill] sm:$0xff] %v16509_v17  ;;  %806 = vrot.lane.b32.xlu1 %v16281_v22, %s15966_s9  ;;  %v14268_v14 = vcombine.low %v1048_v7, %v1055_v8  ;;  %v14270_v32 = vcombine.high %v1048_v7, %v1055_v8  ;;  %v14272_v33 = vcombine.low %v1064_v9, %v1071_v11 }
 0x1eb   : > { %3088 = vrot.lane.b32.xlu0 %v16475_v10, %s15962_s29  ;;  %v14274_v38 = vcombine.high %v1064_v9, %v1071_v11 }
 0x1ec   : > { %v16523_v40 = vpop.permute.xlu0 %816  ;;  %v16525_v41 = vpop.permute.xlu1 %794  ;;  %v16530_v19 = vrot.slane %v14268_v14, %v16357_v39  ;;  %v16533_v52 = vrot.slane %v14270_v32, %v16357_v39  ;;  %v16536_v55 = vrot.slane %v14272_v33, %v16357_v39 }
 0x1ed   : > { %v16539_v56 = vrot.slane %v14274_v38, %v16357_v39 }
 0x1ee   : > { %22644 = vst [vmem:[#allocation36_spill] sm:$0xff] %v16530_v19  ;;  %22645 = vst [vmem:[#allocation37_spill] sm:$0xff] %v16533_v52  ;;  %3070 = vrot.lane.b32.xlu1 %v16527_v42, %s15961_s27 }
 0x1ef   : > { %22646 = vst [vmem:[#allocation38_spill] sm:$0xff] %v16536_v55  ;;  %22647 = vst [vmem:[#allocation39_spill] sm:$0xff] %v16539_v56  ;;  %3112 = vrot.lane.b32.xlu0 %v16475_v10, %s15963_s10 }
 0x1f0   : > { %v16549_v59 = vpop.permute.xlu1 %818  ;;  %v16551_v60 = vpop.permute.xlu0 %684 }
 0x1f2   : > { %3094 = vrot.lane.b32.xlu1 %v16527_v42, %s15962_s29 }
 0x1f3   : > { %3212 = vrot.lane.b32.xlu0 %v16407_v28, %s15967_s11  ;;  %v1168_v28 = vrot.slane %v1160_v50, %v16357_v39  ;;  %v1296_v50 = vcombine.low %v16415_v35, %v16449_v54 }
 0x1f4   : > { %v16557_v61 = vpop.permute.xlu0 %708  ;;  %v16559_v62 = vpop.permute.xlu1 %686 }
 0x1f6   : > { %3118 = vrot.lane.b32.xlu1 %v16527_v42, %s15963_s10 }
 0x1f7   : > { %752 = vrot.lane.b32.xlu0 %v16275_v21, %s15964_s12 }
 0x1f8   : > { %v16565_v7 = vpop.permute.xlu0 %732  ;;  %v16567_v8 = vpop.permute.xlu1 %710 }
 0x1f9   : > { %22648 = vst [vmem:[#allocation40_spill] sm:$0xff] %v16567_v8 }
 0x1fa   : > { %3142 = vrot.lane.b32.xlu1 %v16527_v42, %s15964_s12 }
 0x1fb   : > { %776 = vrot.lane.b32.xlu0 %v16275_v21, %s15965_s8 }
 0x1fc   : > { %v16573_v9 = vpop.permute.xlu0 %680  ;;  %v16575_v11 = vpop.permute.xlu1 %734 }
 0x1fd   : > { %22649 = vst [vmem:[#allocation41_spill] sm:$0xff] %v16573_v9  ;;  %v2264_v9 = vcombine.low %v16394_v15, %v16397_v16  ;;  %v1281_v16 = vcombine.high %v16389_v6, %v16439_v49  ;;  %v1304_v15 = vrot.slane %v1296_v50, %v16357_v39 }
 0x1fe   : > { %3166 = vrot.lane.b32.xlu1 %v16527_v42, %s15965_s8 }
 0x1ff   : > { %800 = vrot.lane.b32.xlu0 %v16275_v21, %s15966_s9 }
 0x200   : > { %v16581_v14 = vpop.permute.xlu0 %704  ;;  %v16583_v32 = vpop.permute.xlu1 %682 }
 0x201   : > { %22650 = vst [vmem:[#allocation42_spill] sm:$0xff] %v16581_v14  ;;  %22651 = vst [vmem:[#allocation43_spill] sm:$0xff] %v16583_v32  ;;  %v1144_v32 = vcombine.low %v16373_v53, %v16413_v34 }
 0x202   : > { %3190 = vrot.lane.b32.xlu1 %v16527_v42, %s15966_s9 }
 0x203   : > { %824 = vrot.lane.b32.xlu0 %v16275_v21, %s15967_s11  ;;  %v1280_v21 = vcombine.low %v16389_v6, %v16439_v49  ;;  %v16683_v6 = vrot.slane %v2432_v37, %v16361_v46  ;;  %v872_v37 = vcombine.low %v16465_v63, %v16495_v0 }
 0x204   : > { %v16589_v33 = vpop.permute.xlu0 %728  ;;  %v16591_v38 = vpop.permute.xlu1 %706 }
 0x205   : > { %22652 = vst [vmem:[#allocation44_spill] sm:$0xff] %v16589_v33  ;;  %22653 = vst [vmem:[#allocation45_spill] sm:$0xff] %v16591_v38  ;;  %v2400_v33 = vcombine.low %v16426_v43, %v16429_v44  ;;  %v16659_v44 = vpop.f32.mrf.mxu0 }
 0x206   : > { %3214 = vrot.lane.b32.xlu1 %v16527_v42, %s15967_s11  ;;  %22657 = vst [vmem:[#allocation49_spill] sm:$0xff] %v16659_v44  ;;  %22661 = vst [vmem:[#allocation53_spill] sm:$0xff] %v16683_v6 }
 0x207   : > { %756 = vrot.lane.b32.xlu0 %v16269_v20, %s15964_s12 }
 0x208   : > { %v16597_v58 = vpop.permute.xlu1 %730  ;;  %v16599_v57 = vpop.permute.xlu0 %3060 }
 0x209   : > { %22654 = vst [vmem:[#allocation46_spill] sm:$0xff] %v16597_v58  ;;  %v1145_v58 = vcombine.high %v16373_v53, %v16413_v34  ;;  %v2296_v53 = vcombine.low %v16400_v18, %v16403_v27  ;;  %v1152_v34 = vrot.slane %v1144_v32, %v16357_v39  ;;  %v1297_v32 = vcombine.high %v16415_v35, %v16449_v54 }
 0x20a   : > { %3066 = vrot.lane.b32.xlu1 %v16601_v13, %s15961_s27  ;;  %v1288_v54 = vrot.slane %v1280_v21, %v16357_v39  ;;  %v889_v21 = vcombine.high %v16479_v29, %v16523_v40 }
 0x20b   : > { %780 = vrot.lane.b32.xlu0 %v16269_v20, %s15965_s8  ;;  %v1208_v27 = vcombine.low %v1152_v34, %v1168_v28  ;;  %v1209_v18 = vcombine.high %v1152_v34, %v1168_v28  ;;  %v16669_v28 = vrot.slane %v2264_v9, %v16361_v46  ;;  %v16672_v35 = vrot.slane %v2296_v53, %v16361_v46  ;;  %v16692_v34 = vpop.f32.mrf.mxu0 }
 0x20c   : > { %v16607_v12 = vpop.permute.xlu0 %3084  ;;  %v16609_v51 = vpop.permute.xlu1 %3080  ;;  %v1311_v53 = vrot.slane %v1297_v32, %v16357_v39  ;;  %22662 = vst [vmem:[#allocation54_spill] sm:$0xff] %v16692_v34  ;;  %v1295_v32 = vrot.slane %v1281_v16, %v16357_v39 }
 0x20d   : > { %22659 = vst [vmem:[#allocation51_spill] sm:$0xff] %v16669_v28  ;;  %22660 = vst [vmem:[#allocation52_spill] sm:$0xff] %v16672_v35  ;;  %v1216_v49 = vrot.slane %v1208_v27, %v16361_v46  ;;  %v1223_v9 = vrot.slane %v1209_v18, %v16361_v46 }
 0x20e   : > { %3090 = vrot.lane.b32.xlu1 %v16601_v13, %s15962_s29 }
 0x20f   : > { %804 = vrot.lane.b32.xlu0 %v16269_v20, %s15966_s9  ;;  %v14277_v16 = vcombine.low %v1216_v49, %v1223_v9 }
 0x210   : > { %v16619_v36 = vpop.permute.xlu0 %3108  ;;  %v16621_v42 = vpop.permute.xlu1 %3062 }
 0x212   : > { %3114 = vrot.lane.b32.xlu1 %v16601_v13, %s15963_s10 }
 0x213   : > { %828 = vrot.lane.b32.xlu0 %v16269_v20, %s15967_s11 }
 0x214   : > { %v16635_v48 = vpop.permute.xlu0 %3132  ;;  %v16637_v38 = vpop.permute.xlu1 %3086 }
 0x215   : > { %22656 = vst [vmem:[#allocation48_spill] sm:$0xff] %v16635_v48  ;;  %v1159_v48 = vrot.slane %v1145_v58, %v16357_v39 }
 0x216   : > { %830 = vrot.lane.b32.xlu1 %v16281_v22, %s15967_s11 }
 0x217   : > { %3136 = vrot.lane.b32.xlu0 %v16475_v10, %s15964_s12  ;;  %v1224_v43 = vcombine.low %v1159_v48, %v1175_v5  ;;  %v1225_v47 = vcombine.high %v1159_v48, %v1175_v5  ;;  %v888_v5 = vcombine.low %v16479_v29, %v16523_v40  ;;  %v16680_v48 = vrot.slane %v2400_v33, %v16361_v46 }
 0x218   : > { %v16661_v45 = vpop.permute.xlu0 %3156  ;;  %v16663_v58 = vpop.permute.xlu1 %3110  ;;  %v1345_v29 = vcombine.high %v1288_v54, %v1304_v15  ;;  %v873_v40 = vcombine.high %v16465_v63, %v16495_v0  ;;  %v14279_v0 = vcombine.high %v1216_v49, %v1223_v9  ;;  %v1008_v49 = vcombine.low %v16481_v30, %v16525_v41 }
 0x219   : > { %22658 = vst [vmem:[#allocation50_spill] sm:$0xff] %v16661_v45  ;;  %v1232_v33 = vrot.slane %v1224_v43, %v16361_v46  ;;  %v1239_v50 = vrot.slane %v1225_v47, %v16361_v46  ;;  %v1344_v45 = vcombine.low %v1288_v54, %v1304_v15  ;;  %v896_v14 = vrot.slane %v888_v5, %v16357_v39  ;;  %v16717_v63 = vpop.f32.mrf.mxu0 }
 0x21a   : > { %5440 = vrot.lane.b32.xlu1 %v16659_v44, %s15961_s27  ;;  %v1361_v15 = vcombine.high %v1295_v32, %v1311_v53  ;;  %v903_v54 = vrot.slane %v889_v21, %v16357_v39  ;;  %22665 = vst [vmem:[#allocation57_spill] sm:$0xff] %v16717_v63  ;;  %v880_v43 = vrot.slane %v872_v37, %v16357_v39 }
 0x21b   : > { %3160 = vrot.lane.b32.xlu0 %v16475_v10, %s15965_s8  ;;  %v14281_v5 = vcombine.low %v1232_v33, %v1239_v50  ;;  %v1024_v47 = vcombine.low %v16497_v1, %v16549_v59  ;;  %v14283_v35 = vcombine.high %v1232_v33, %v1239_v50  ;;  %v1359_v21 = vrot.slane %v1345_v29, %v16361_v46 }
 0x21c   : > { %v16698_v27 = vpop.permute.xlu0 %3180  ;;  %v16700_v18 = vpop.permute.xlu1 %3134  ;;  %v936_v28 = vcombine.low %v880_v43, %v896_v14  ;;  %v937_v8 = vcombine.high %v880_v43, %v896_v14  ;;  %v1025_v9 = vcombine.high %v16497_v1, %v16549_v59  ;;  %v1375_v33 = vrot.slane %v1361_v15, %v16361_v46 }
 0x21d   : > { %22663 = vst [vmem:[#allocation55_spill] sm:$0xff] %v16698_v27  ;;  %22664 = vst [vmem:[#allocation56_spill] sm:$0xff] %v16700_v18  ;;  %v1360_v27 = vcombine.low %v1295_v32, %v1311_v53  ;;  %v1352_v53 = vrot.slane %v1344_v45, %v16361_v46  ;;  %v887_v32 = vrot.slane %v873_v40, %v16357_v39 }
 0x21e   : > { %5464 = vrot.lane.b32.xlu1 %v16659_v44, %s15962_s29  ;;  %v16740_v14 = vrot.slane %v14277_v16, %v16357_v39  ;;  %v1009_v29 = vcombine.high %v16481_v30, %v16525_v41  ;;  %v1032_v1 = vrot.slane %v1024_v47, %v16357_v39  ;;  %v16752_v43 = vrot.slane %v14279_v0, %v16357_v39 }
 0x21f   : > { %3184 = vrot.lane.b32.xlu0 %v16475_v10, %s15966_s9  ;;  %v1368_v37 = vrot.slane %v1360_v27, %v16361_v46  ;;  %v952_v45 = vcombine.low %v887_v32, %v903_v54  ;;  %v953_v50 = vcombine.high %v887_v32, %v903_v54  ;;  %v16755_v15 = vrot.slane %v14281_v5, %v16357_v39 }
 0x220   : > { %v16722_v22 = vpop.permute.xlu0 %3204  ;;  %v16724_v18 = vpop.permute.xlu1 %3158  ;;  %22667 = vst [vmem:[#allocation59_spill] sm:$0xff] %v16740_v14  ;;  %22668 = vst [vmem:[#allocation60_spill] sm:$0xff] %v16752_v43  ;;  %v16758_v16 = vrot.slane %v14283_v35, %v16357_v39  ;;  %v14285_v54 = vcombine.low %v1352_v53, %v1359_v21  ;;  %v944_v30 = vrot.slane %v936_v28, %v16361_v46 }
 0x221   : > { %22666 = vst [vmem:[#allocation58_spill] sm:$0xff] %v16724_v18  ;;  %22669 = vst [vmem:[#allocation61_spill] sm:$0xff] %v16755_v15  ;;  %v951_v41 = vrot.slane %v937_v8, %v16361_v46  ;;  %v1016_v47 = vrot.slane %v1008_v49, %v16357_v39  ;;  %v1039_v32 = vrot.slane %v1025_v9, %v16357_v39 }
 0x222   : > { %5466 = vrot.lane.b32.xlu1 %v16717_v63, %s15962_s29  ;;  %22670 = vst [vmem:[#allocation62_spill] sm:$0xff] %v16758_v16  ;;  %v14287_v0 = vcombine.high %v1352_v53, %v1359_v21  ;;  %v14289_v27 = vcombine.low %v1368_v37, %v1375_v33  ;;  %v960_v5 = vrot.slane %v952_v45, %v16361_v46 }
 0x223   : > { %3208 = vrot.lane.b32.xlu0 %v16475_v10, %s15967_s11  ;;  %v967_v10 = vrot.slane %v953_v50, %v16361_v46  ;;  %v14291_v35 = vcombine.high %v1368_v37, %v1375_v33  ;;  %v1023_v28 = vrot.slane %v1009_v29, %v16357_v39  ;;  %v1072_v8 = vcombine.low %v1016_v47, %v1032_v1 }
 0x224   : > { %v16745_v59 = vpop.permute.xlu0 %3056  ;;  %v16747_v40 = vpop.permute.xlu1 %3182  ;;  %v1073_v18 = vcombine.high %v1016_v47, %v1032_v1  ;;  %v16782_v50 = vrot.slane %v14285_v54, %v16357_v39  ;;  %v14261_v37 = vcombine.low %v944_v30, %v951_v41  ;;  %v14263_v33 = vcombine.high %v944_v30, %v951_v41 }
 0x225   : > { %v1088_v29 = vcombine.low %v1023_v28, %v1039_v32  ;;  %v1089_v1 = vcombine.high %v1023_v28, %v1039_v32  ;;  %v16787_v47 = vrot.slane %v14287_v0, %v16357_v39  ;;  %v16790_v53 = vrot.slane %v14289_v27, %v16357_v39  ;;  %v16794_v54 = vpop.f32.mrf.mxu0 }
 0x226   : > { %5490 = vrot.lane.b32.xlu1 %v16717_v63, %s15963_s10  ;;  %22671 = vst [vmem:[#allocation63_spill] sm:$0xff] %v16782_v50  ;;  %v14265_v21 = vcombine.low %v960_v5, %v967_v10  ;;  %v14267_v43 = vcombine.high %v960_v5, %v967_v10  ;;  %22674 = vst [vmem:[#allocation66_spill] sm:$0xff] %v16794_v54  ;;  %v16797_v30 = vrot.slane %v14291_v35, %v16357_v39 }
 0x227   : > { %5442 = vrot.lane.b32.xlu0 %v16717_v63, %s15961_s27  ;;  %22672 = vst [vmem:[#allocation64_spill] sm:$0xff] %v16787_v47  ;;  %22673 = vst [vmem:[#allocation65_spill] sm:$0xff] %v16790_v53  ;;  %v1992_v41 = vcombine.low %v16500_v2, %v16503_v3  ;;  %v16802_v32 = vrot.slane %v1072_v8, %v16361_v46  ;;  %v16805_v0 = vrot.slane %v1073_v18, %v16361_v46 }
 0x228   : > { %v16771_v49 = vpop.permute.xlu0 %3104  ;;  %v16773_v9 = vpop.permute.xlu1 %3206  ;;  %22675 = vst [vmem:[#allocation67_spill] sm:$0xff] %v16797_v30  ;;  %v2024_v35 = vcombine.low %v16506_v4, %v16509_v17  ;;  %v2128_v28 = vcombine.low %v16530_v19, %v16533_v52  ;;  %v2160_v8 = vcombine.low %v16536_v55, %v16539_v56  ;;  %v16820_v45 = vrot.slane %v14261_v37, %v16357_v39 }
 0x229   : > { %v16823_v18 = vrot.slane %v14263_v33, %v16357_v39  ;;  %v16826_v14 = vrot.slane %v1088_v29, %v16361_v46  ;;  %v16829_v5 = vrot.slane %v1089_v1, %v16361_v46  ;;  %v16838_v37 = vrot.slane %v14265_v21, %v16357_v39  ;;  %v16845_v29 = vpop.f32.mrf.mxu0 }
 0x22a   : > { %3138 = vrot.lane.b32.xlu1 %v16601_v13, %s15964_s12  ;;  %22677 = vst [vmem:[#allocation69_spill] sm:$0xff] %v16820_v45  ;;  %v16841_v33 = vrot.slane %v14267_v43, %v16357_v39  ;;  %22681 = vst [vmem:[#allocation73_spill] sm:$0xff] %v16845_v29  ;;  %v16852_v56 = vrot.slane %v1992_v41, %v16361_v46  ;;  %v14269_v21 = vcombine.low %v16802_v32, %v16805_v0 }
 0x22b   : > { %5488 = vrot.lane.b32.xlu0 %v16659_v44, %s15963_s10  ;;  %22678 = vst [vmem:[#allocation70_spill] sm:$0xff] %v16823_v18  ;;  %22679 = vst [vmem:[#allocation71_spill] sm:$0xff] %v16838_v37  ;;  %v16861_v47 = vrot.slane %v2024_v35, %v16361_v46  ;;  %v16864_v50 = vrot.slane %v2128_v28, %v16361_v46  ;;  %v16867_v1 = vrot.slane %v2160_v8, %v16361_v46  ;;  %v16889_v30 = vpop.f32.mrf.mxu0 }
 0x22c   : > { %v16807_v27 = vpop.permute.xlu0 %3128  ;;  %v16809_v10 = vpop.permute.xlu1 %3082  ;;  %22680 = vst [vmem:[#allocation72_spill] sm:$0xff] %v16841_v33  ;;  %22682 = vst [vmem:[#allocation74_spill] sm:$0xff] %v16852_v56  ;;  %v3240_v8 = vcombine.low %v16745_v59, %v16771_v49  ;;  %v3241_v16 = vcombine.high %v16745_v59, %v16771_v49  ;;  %v16894_v53 = vrot.slane %v14269_v21, %v16357_v39  ;;  %v22264_v49 = vmov 0.0  }
 0x22d   : > { %22676 = vst [vmem:[#allocation68_spill] sm:$0xff] %v16807_v27  ;;  %22684 = vst [vmem:[#allocation76_spill] sm:$0xff] %v16861_v47  ;;  %v3512_v41 = vcombine.low %v16599_v57, %v16619_v36  ;;  %14823 = vmatprep.subr.bf16.mxu1 %v22264_v49  ;;  %v3496_v45 = vcombine.low %v16305_v24, %v16607_v12  ;;  %v3224_v21 = vcombine.low %v16311_v25, %v16609_v51 }
 0x22e   : > { %3162 = vrot.lane.b32.xlu1 %v16601_v13, %s15965_s8  ;;  %22685 = vst [vmem:[#allocation77_spill] sm:$0xff] %v16864_v50  ;;  %22686 = vst [vmem:[#allocation78_spill] sm:$0xff] %v16867_v1  ;;  %v3225_v35 = vcombine.high %v16311_v25, %v16609_v51  ;;  %v3648_v28 = vcombine.low %v16621_v42, %v16663_v58  ;;  %14835 = vmatprep.subr.bf16.mxu0 %v22264_v49 }
 0x22f   : > { %5444 = vrot.lane.b32.xlu0 %v16632_v23, %s15961_s27  ;;  %22687 = vst [vmem:[#allocation79_spill] sm:$0xff] %v16889_v30  ;;  %22688 = vst [vmem:[#allocation80_spill] sm:$0xff] %v16894_v53  ;;  %v3497_v33 = vcombine.high %v16305_v24, %v16607_v12  ;;  %v3513_v37 = vcombine.high %v16599_v57, %v16619_v36  ;;  %v3632_v55 = vcombine.low %v16317_v26, %v16637_v38  ;;  %v16928_v24 = vpop.f32.mrf.mxu0 }
 0x230   : > { %v16856_v15 = vpop.permute.xlu0 %3152  ;;  %v16858_v43 = vpop.permute.xlu1 %3106  ;;  %v3248_v51 = vrot.slane %v3240_v8, %v16357_v39  ;;  %v3255_v52 = vrot.slane %v3241_v16, %v16357_v39  ;;  %22691 = vst [vmem:[#allocation83_spill] sm:$0xff] %v16928_v24  ;;  %14825 = vmatprep.mubr.msk.bf16.mxu1 %vm15971_vm1, %v22264_v49  ;;  %v16937_v57 = vrot.slane %v3512_v41, %v16357_v39 }
 0x231   : > { %22683 = vst [vmem:[#allocation75_spill] sm:$0xff] %v16856_v15  ;;  %v3633_v16 = vcombine.high %v16317_v26, %v16637_v38  ;;  %14837 = vmatprep.mubr.msk.bf16.mxu0 %vm15971_vm1, %v22264_v49  ;;  %v3232_v19 = vrot.slane %v3224_v21, %v16357_v39  ;;  %v3239_v36 = vrot.slane %v3225_v35, %v16357_v39 }
 0x232   : > { %3186 = vrot.lane.b32.xlu1 %v16601_v13, %s15966_s9  ;;  %v3649_v12 = vcombine.high %v16621_v42, %v16663_v58  ;;  %v3656_v41 = vrot.slane %v3648_v28, %v16357_v39  ;;  %v3504_v17 = vrot.slane %v3496_v45, %v16357_v39  ;;  %v3511_v26 = vrot.slane %v3497_v33, %v16357_v39 }
 0x233   : > { %5468 = vrot.lane.b32.xlu0 %v16632_v23, %s15962_s29  ;;  %v3527_v38 = vrot.slane %v3513_v37, %v16357_v39  ;;  %v3640_v4 = vrot.slane %v3632_v55, %v16357_v39  ;;  %v3288_v49 = vcombine.low %v3232_v19, %v3248_v51  ;;  %v3289_v21 = vcombine.high %v3232_v19, %v3248_v51 }
 0x234   : > { %v16900_v18 = vpop.permute.xlu0 %3176  ;;  %v16902_v59 = vpop.permute.xlu1 %3130  ;;  %v3304_v3 = vcombine.low %v3239_v36, %v3255_v52  ;;  %v3305_v35 = vcombine.high %v3239_v36, %v3255_v52  ;;  %v3560_v42 = vcombine.low %v3504_v17, %v16937_v57  ;;  %v3647_v58 = vrot.slane %v3633_v16, %v16357_v39 }
 0x235   : > { %22689 = vst [vmem:[#allocation81_spill] sm:$0xff] %v16900_v18  ;;  %22690 = vst [vmem:[#allocation82_spill] sm:$0xff] %v16902_v59  ;;  %v3360_v45 = vcombine.low %v16347_v31, %v16809_v10  ;;  %v3361_v55 = vcombine.high %v16347_v31, %v16809_v10  ;;  %v3561_v33 = vcombine.high %v3504_v17, %v16937_v57  ;;  %v22740_v18 = vld [vmem:[#allocation51_spill] sm:$0xff] }
 0x236   : > { %3210 = vrot.lane.b32.xlu1 %v16601_v13, %s15967_s11  ;;  %v3663_v19 = vrot.slane %v3649_v12, %v16357_v39  ;;  %v3696_v52 = vcombine.low %v3640_v4, %v3656_v41  ;;  %v3697_v28 = vcombine.high %v3640_v4, %v3656_v41  ;;  %v3576_v36 = vcombine.low %v3511_v26, %v3527_v38 }
 0x237   : > { %5492 = vrot.lane.b32.xlu0 %v16632_v23, %s15963_s10  ;;  %v3577_v2 = vcombine.high %v3511_v26, %v3527_v38  ;;  %v3296_v31 = vrot.slane %v3288_v49, %v16361_v46  ;;  %v3303_v10 = vrot.slane %v3289_v21, %v16361_v46  ;;  %v3312_v17 = vrot.slane %v3304_v3, %v16361_v46 }
 0x238   : > { %v16941_v8 = vpop.permute.xlu0 %3200  ;;  %v16943_v25 = vpop.permute.xlu1 %3154  ;;  %v3319_v12 = vrot.slane %v3305_v35, %v16361_v46  ;;  %v3368_v4 = vrot.slane %v3360_v45, %v16357_v39  ;;  %v3375_v57 = vrot.slane %v3361_v55, %v16357_v39  ;;  %v3704_v49 = vrot.slane %v3696_v52, %v16361_v46 }
 0x239   : > { %22692 = vst [vmem:[#allocation84_spill] sm:$0xff] %v16941_v8  ;;  %22693 = vst [vmem:[#allocation85_spill] sm:$0xff] %v16943_v25  ;;  %v3711_v38 = vrot.slane %v3697_v28, %v16361_v46  ;;  %v3712_v3 = vcombine.low %v3647_v58, %v3663_v19  ;;  %v3713_v21 = vcombine.high %v3647_v58, %v3663_v19 }
 0x23a   : > { %5446 = vrot.lane.b32.xlu1 %v16692_v34, %s15961_s27  ;;  %v14324_v45 = vcombine.low %v3296_v31, %v3303_v10  ;;  %v14326_v55 = vcombine.high %v3296_v31, %v3303_v10  ;;  %v14330_v27 = vcombine.high %v3312_v17, %v3319_v12  ;;  %v3584_v31 = vrot.slane %v3576_v36, %v16361_v46 }
 0x23b   : > { %5450 = vrot.lane.b32.xlu0 %v16928_v24, %s15961_s27  ;;  %v3591_v10 = vrot.slane %v3577_v2, %v16361_v46  ;;  %v14350_v36 = vcombine.high %v3704_v49, %v3711_v38  ;;  %v2056_v53 = vcombine.low %v16852_v56, %v16861_v47  ;;  %v22741_v56 = vld [vmem:[#allocation52_spill] sm:$0xff] }
 0x23c   : > { %v16966_v37 = vpop.permute.xlu1 %3178  ;;  %v22742_v15 = vcombine.low %v22740_v18, %v22741_v56 }
 0x23d   : > { %22694 = vst [vmem:[#allocation86_spill] sm:$0xff] %v16966_v37  ;;  %v3059_v51 = vpop.permute.xlu0 %3058 }
 0x23e   : > { %v3376_v25 = vcombine.low %v3059_v51, %v16858_v43  ;;  %v3377_v16 = vcombine.high %v3059_v51, %v16858_v43  ;;  %5470 = vrot.lane.b32.xlu1 %v16692_v34, %s15962_s29 }
 0x23f   : > { %5496 = vrot.lane.b32.xlu0 %v16845_v29, %s15963_s10 }
 0x240   : > { %v3384_v43 = vrot.slane %v3376_v25, %v16357_v39  ;;  %v3391_v41 = vrot.slane %v3377_v16, %v16357_v39  ;;  %v16984_v26 = vpop.permute.xlu1 %3202  ;;  %v14328_v25 = vcombine.low %v3312_v17, %v3319_v12  ;;  %v3720_v17 = vrot.slane %v3712_v3, %v16361_v46 }
 0x241   : > { %22695 = vst [vmem:[#allocation87_spill] sm:$0xff] %v16984_v26  ;;  %v3727_v12 = vrot.slane %v3713_v21, %v16361_v46 }
 0x242   : > { %v3424_v35 = vcombine.low %v3368_v4, %v3384_v43  ;;  %v3425_v51 = vcombine.high %v3368_v4, %v3384_v43  ;;  %v3440_v59 = vcombine.low %v3375_v57, %v3391_v41  ;;  %v3441_v37 = vcombine.high %v3375_v57, %v3391_v41  ;;  %5494 = vrot.lane.b32.xlu1 %v16692_v34, %s15963_s10 }
 0x243   : > { %5452 = vrot.lane.b32.xlu0 %v16794_v54, %s15961_s27  ;;  %v3568_v4 = vrot.slane %v3560_v42, %v16361_v46  ;;  %v3575_v57 = vrot.slane %v3561_v33, %v16361_v46  ;;  %v17012_v42 = vrot.slane %v14326_v55, %v16357_v39  ;;  %v17015_v2 = vrot.slane %v14328_v25, %v16357_v39 }
 0x244   : > { %v3432_v52 = vrot.slane %v3424_v35, %v16361_v46  ;;  %v3439_v28 = vrot.slane %v3425_v51, %v16361_v46  ;;  %v3448_v58 = vrot.slane %v3440_v59, %v16361_v46  ;;  %v3455_v19 = vrot.slane %v3441_v37, %v16361_v46  ;;  %v16996_v16 = vpop.permute.xlu1 %754 }
 0x245   : > { %22696 = vst [vmem:[#allocation88_spill] sm:$0xff] %v16996_v16  ;;  %v17009_v59 = vrot.slane %v14324_v45, %v16357_v39  ;;  %22698 = vst [vmem:[#allocation90_spill] sm:$0xff] %v17012_v42  ;;  %v17018_v37 = vrot.slane %v14330_v27, %v16357_v39  ;;  %v14348_v33 = vcombine.low %v3704_v49, %v3711_v38 }
 0x246   : > { %v14332_v43 = vcombine.low %v3432_v52, %v3439_v28  ;;  %v14334_v41 = vcombine.high %v3432_v52, %v3439_v28  ;;  %5448 = vrot.lane.b32.xlu1 %v16845_v29, %s15961_s27  ;;  %22699 = vst [vmem:[#allocation91_spill] sm:$0xff] %v17015_v2  ;;  %v14336_v3 = vcombine.low %v3448_v58, %v3455_v19 }
 0x247   : > { %5476 = vrot.lane.b32.xlu0 %v16794_v54, %s15962_s29  ;;  %22697 = vst [vmem:[#allocation89_spill] sm:$0xff] %v17009_v59  ;;  %22700 = vst [vmem:[#allocation92_spill] sm:$0xff] %v17018_v37  ;;  %v14338_v21 = vcombine.high %v3448_v58, %v3455_v19  ;;  %v22702_v51 = vcombine.low %v16269_v20, %v16557_v61  ;;  %v22703_v55 = vcombine.high %v16269_v20, %v16557_v61 }
 0x248   : > { %v17020_v35 = vpop.permute.xlu1 %778  ;;  %v17033_v27 = vrot.slane %v14332_v43, %v16357_v39  ;;  %v17036_v49 = vrot.slane %v14334_v41, %v16357_v39  ;;  %v14340_v38 = vcombine.low %v3568_v4, %v3575_v57  ;;  %v14342_v52 = vcombine.high %v3568_v4, %v3575_v57 }
 0x249   : > { %22701 = vst [vmem:[#allocation93_spill] sm:$0xff] %v17020_v35  ;;  %v1664_v45 = vrot.slane %v22702_v51, %v16357_v39  ;;  %v17030_v25 = vrot.slane %v22703_v55, %v16357_v39  ;;  %v14344_v28 = vcombine.low %v3584_v31, %v3591_v10  ;;  %v14346_v58 = vcombine.high %v3584_v31, %v3591_v10 }
 0x24a   : > { %22704 = vst [vmem:[#allocation94_spill] sm:$0xff] %v17033_v27  ;;  %22705 = vst [vmem:[#allocation95_spill] sm:$0xff] %v17036_v49  ;;  %5472 = vrot.lane.b32.xlu1 %v16845_v29, %s15962_s29  ;;  %v14352_v19 = vcombine.low %v3720_v17, %v3727_v12  ;;  %v14354_v51 = vcombine.high %v3720_v17, %v3727_v12  ;;  %v4376_v20 = vcombine.low %v17009_v59, %v17012_v42 }
 0x24b   : > { %5500 = vrot.lane.b32.xlu0 %v16794_v54, %s15963_s10  ;;  %v4408_v61 = vcombine.low %v17015_v2, %v17018_v37  ;;  %v17049_v4 = vrot.slane %v14336_v3, %v16357_v39  ;;  %v17052_v57 = vrot.slane %v14338_v21, %v16357_v39  ;;  %v17055_v31 = vrot.slane %v14348_v33, %v16357_v39  ;;  %v17113_v37 = vpop.permute.xlu0 %3068 }
 0x24c   : > { %v17046_v43 = vpop.permute.xlu1 %802  ;;  %v17058_v10 = vrot.slane %v14350_v36, %v16357_v39  ;;  %v22709_v17 = vcombine.low %v16551_v60, %v16565_v7  ;;  %v22710_v41 = vcombine.high %v16551_v60, %v16565_v7  ;;  %v1808_v21 = vcombine.low %v16559_v62, %v16575_v11 }
 0x24d   : > { %22706 = vst [vmem:[#allocation96_spill] sm:$0xff] %v17046_v43  ;;  %22707 = vst [vmem:[#allocation97_spill] sm:$0xff] %v17049_v4  ;;  %v4512_v33 = vcombine.low %v17033_v27, %v17036_v49  ;;  %v17075_v36 = vrot.slane %v14340_v38, %v16357_v39  ;;  %v17078_v55 = vrot.slane %v14342_v52, %v16357_v39  ;;  %v22713_v27 = vld [vmem:[#allocation17_spill] sm:$0xff] }
 0x24e   : > { %22708 = vst [vmem:[#allocation98_spill] sm:$0xff] %v17052_v57  ;;  %v1680_v12 = vrot.slane %v22709_v17, %v16357_v39  ;;  %v1687_v3 = vrot.slane %v22710_v41, %v16357_v39  ;;  %5474 = vrot.lane.b32.xlu1 %v16928_v24, %s15962_s29  ;;  %v17081_v17 = vrot.slane %v14344_v28, %v16357_v39  ;;  %v22712_v28 = vld [vmem:[#allocation40_spill] sm:$0xff] }
 0x24f   : > { %v17084_v60 = vrot.slane %v14346_v58, %v16357_v39  ;;  %5514 = vrot.lane.b32.xlu0 %v16717_v63, %s15964_s12  ;;  %v17089_v7 = vrot.slane %v4512_v33, %v16361_v46  ;;  %v4544_v41 = vcombine.low %v17049_v4, %v17052_v57  ;;  %v17094_v38 = vrot.slane %v14352_v19, %v16357_v39 }
 0x250   : > { %v17097_v52 = vrot.slane %v14354_v51, %v16357_v39  ;;  %v1792_v58 = vcombine.low %v22713_v27, %v22712_v28  ;;  %v17101_v49 = vpop.permute.xlu1 %826  ;;  %v17104_v2 = vrot.slane %v4376_v20, %v16361_v46  ;;  %v17107_v33 = vrot.slane %v4408_v61, %v16361_v46 }
 0x251   : > { %22711 = vst [vmem:[#allocation99_spill] sm:$0xff] %v17089_v7  ;;  %22714 = vst [vmem:[#allocation40_spill] sm:$0xff] %v17101_v49  ;;  %v4784_v4 = vcombine.low %v17055_v31, %v17058_v10  ;;  %v1720_v57 = vcombine.low %v1664_v45, %v1680_v12  ;;  %v1721_v19 = vcombine.high %v1664_v45, %v1680_v12 }
 0x252   : > { %22715 = vst [vmem:[#allocation17_spill] sm:$0xff] %v17104_v2  ;;  %22716 = vst [vmem:[#allocation100_spill] sm:$0xff] %v17107_v33  ;;  %v1809_v51 = vcombine.high %v16559_v62, %v16575_v11  ;;  %v17116_v59 = vrot.slane %v4544_v41, %v16361_v46  ;;  %v1736_v42 = vcombine.low %v17030_v25, %v1687_v3  ;;  %5498 = vrot.lane.b32.xlu1 %v16928_v24, %s15963_s10 }
 0x253   : > { %v1793_v20 = vcombine.high %v22713_v27, %v22712_v28  ;;  %v4648_v61 = vcombine.low %v17075_v36, %v17078_v55  ;;  %v4680_v45 = vcombine.low %v17081_v17, %v17084_v60  ;;  %v1737_v62 = vcombine.high %v17030_v25, %v1687_v3  ;;  %5560 = vrot.lane.b32.xlu0 %v16659_v44, %s15966_s9 }
 0x254   : > { %22717 = vst [vmem:[#allocation101_spill] sm:$0xff] %v17116_v59  ;;  %v1816_v11 = vrot.slane %v1808_v21, %v16357_v39  ;;  %v4576_v12 = vcombine.low %v17089_v7, %v17116_v59  ;;  %v4816_v27 = vcombine.low %v17094_v38, %v17097_v52  ;;  %v22718_v41 = vcombine.high %v16802_v32, %v16805_v0  ;;  %v17149_v7 = vpop.permute.xlu1 %758 }
 0x255   : > { %v22720_v25 = vcombine.low %v16826_v14, %v16829_v5  ;;  %v4440_v21 = vcombine.low %v17104_v2, %v17107_v33  ;;  %22722 = vst [vmem:[#allocation104_spill] sm:$0xff] %v17149_v7  ;;  %v17152_v59 = vrot.slane %v4784_v4, %v16361_v46  ;;  %v1728_v16 = vrot.slane %v1720_v57, %v16361_v46 }
 0x256   : > { %v17139_v28 = vrot.slane %v22718_v41, %v16357_v39  ;;  %v1735_v32 = vrot.slane %v1721_v19, %v16361_v46  ;;  %v1800_v0 = vrot.slane %v1792_v58, %v16357_v39  ;;  %v1823_v41 = vrot.slane %v1809_v51, %v16357_v39  ;;  %5454 = vrot.lane.b32.xlu1 %v16889_v30, %s15961_s27  ;;  %s15978_s27 = smov 56  }
 0x257   : > { %v17145_v3 = vrot.slane %v22720_v25, %v16357_v39  ;;  %v5400_v43 = vpack.c.bf16 %v4576_v12, %v4440_v21  ;;  %v17161_v25 = vrot.slane %v4648_v61, %v16361_v46  ;;  %v17164_v7 = vrot.slane %v4680_v45, %v16361_v46  ;;  %v17172_v12 = vpop.permute.xlu0 %3092  ;;  %5584 = vrot.lane.b32.xlu0 %v16659_v44, %s15967_s11 }
 0x258   : > { %22719 = vst [vmem:[#allocation102_spill] sm:$0xff] %v17139_v28  ;;  %v17167_v4 = vrot.slane %v4816_v27, %v16361_v46  ;;  %v1744_v57 = vrot.slane %v1736_v42, %v16361_v46  ;;  %v1751_v19 = vrot.slane %v1737_v62, %v16361_v46  ;;  %v1807_v58 = vrot.slane %v1793_v20, %v16357_v39  ;;  %v17183_v42 = vpop.permute.xlu1 %782 }
 0x259   : > { %22721 = vst [vmem:[#allocation103_spill] sm:$0xff] %v17145_v3  ;;  %v1856_v51 = vcombine.low %v1800_v0, %v1816_v11  ;;  %v22723_v61 = vcombine.high %v16826_v14, %v16829_v5  ;;  %v1857_v27 = vcombine.high %v1800_v0, %v1816_v11  ;;  %v7821_v21 = vsel %vm7816_vm2, %v5400_v43, 0  ;;  %22725 = vst [vmem:[#allocation106_spill] sm:$0xff] %v17183_v42 }
 0x25a   : > { %v4848_v20 = vcombine.low %v17152_v59, %v17167_v4  ;;  %v1872_v33 = vcombine.low %v1807_v58, %v1823_v41  ;;  %v1873_v35 = vcombine.high %v1807_v58, %v1823_v41  ;;  %14824 = vmatpush3.bf16.xpose.msra.mxu1 %v7821_v21  ;;  %v14308_v14 = vcombine.low %v1728_v16, %v1735_v32  ;;  %v22727_v58 = vld [vmem:[#allocation42_spill] sm:$0xff]  ;;  %v22728_v21 = vld [vmem:[#allocation16_spill] sm:$0xff] }
 0x25b   : > { %v17180_v45 = vrot.slane %v22723_v61, %v16357_v39  ;;  %v2192_v5 = vcombine.low %v16864_v50, %v16867_v1  ;;  %v22726_v11 = vmov 0.0   ;;  %v4712_v43 = vcombine.low %v17161_v25, %v17164_v7  ;;  %5478 = vrot.lane.b32.xlu1 %v16889_v30, %s15962_s29  ;;  %5516 = vrot.lane.b32.xlu0 %v16632_v23, %s15964_s12  ;;  %v3117_v1 = vpop.permute.xlu0 %3116 }
 0x25c   : > { %14829 = vmatprep.subr.bf16.mxu1 %v22726_v11  ;;  %v14310_v0 = vcombine.high %v1728_v16, %v1735_v32  ;;  %v14312_v61 = vcombine.low %v1744_v57, %v1751_v19  ;;  %v14314_v62 = vcombine.high %v1744_v57, %v1751_v19  ;;  %v17199_v2 = vrot.slane %v1856_v51, %v16361_v46  ;;  %v17210_v50 = vpop.permute.xlu1 %806  ;;  %v22730_v57 = vld [vmem:[#allocation44_spill] sm:$0xff]  ;;  %v22731_v19 = vld [vmem:[#allocation41_spill] sm:$0xff] }
 0x25d   : > { %22724 = vst [vmem:[#allocation105_spill] sm:$0xff] %v17180_v45  ;;  %v17204_v41 = vrot.slane %v1857_v27, %v16361_v46  ;;  %v1384_v28 = vcombine.low %v22728_v21, %v22727_v58  ;;  %v5401_v42 = vpack.c.bf16 %v4848_v20, %v4712_v43  ;;  %22729 = vst [vmem:[#allocation42_spill] sm:$0xff] %v17210_v50 }
 0x25e   : > { %v1400_v51 = vcombine.low %v22731_v19, %v22730_v57  ;;  %v1401_v27 = vcombine.high %v22731_v19, %v22730_v57  ;;  %v17221_v49 = vrot.slane %v1872_v33, %v16361_v46  ;;  %v17224_v20 = vrot.slane %v1873_v35, %v16361_v46  ;;  %v22735_v19 = vld [vmem:[#allocation18_spill] sm:$0xff] }
 0x25f   : > { %v1385_v43 = vcombine.high %v22728_v21, %v22727_v58  ;;  %v3016_v16 = vpack.c.bf16 %v2192_v5, %v2056_v53  ;;  %5502 = vrot.lane.b32.xlu1 %v16889_v30, %s15963_s10  ;;  %v17231_v32 = vrot.slane %v14308_v14, %v16357_v39  ;;  %v17234_v45 = vrot.slane %v14310_v0, %v16357_v39 }
 0x260   : > { %v17237_v57 = vrot.slane %v14312_v61, %v16357_v39  ;;  %v17240_v33 = vrot.slane %v14314_v62, %v16357_v39  ;;  %5540 = vrot.lane.b32.xlu0 %v16632_v23, %s15965_s8  ;;  %v1392_v35 = vrot.slane %v1384_v28, %v16357_v39  ;;  %v4056_v14 = vcombine.low %v17113_v37, %v3117_v1  ;;  %v3071_v0 = vpop.permute.xlu1 %3070  ;;  %v22734_v28 = vld [vmem:[#allocation45_spill] sm:$0xff] }
 0x261   : > { %14826 = vmatmul.mubr.msk.bf16.vlgmr.msra.gmra.mxu1 %vm7816_vm2, %v3016_v16  ;;  %v7868_v5 = vsel %vm7816_vm2, %v5401_v42, 0  ;;  %v1408_v61 = vrot.slane %v1400_v51, %v16357_v39  ;;  %v1415_v62 = vrot.slane %v1401_v27, %v16357_v39  ;;  %v4057_v58 = vcombine.high %v17113_v37, %v3117_v1  ;;  %v22736_v16 = vld [vmem:[#allocation25_spill] sm:$0xff]  ;;  %v22737_v37 = vld [vmem:[#allocation46_spill] sm:$0xff]  ;;  %v22738_v42 = vld [vmem:[#allocation43_spill] sm:$0xff] }
 0x262   : > { %22732 = vst [vmem:[#allocation16_spill] sm:$0xff] %v17237_v57  ;;  %22733 = vst [vmem:[#allocation44_spill] sm:$0xff] %v17240_v33  ;;  %14830 = vmatpush3.bf16.xpose.msra.mxu1 %v7868_v5  ;;  %14831 = vmatprep.mubr.msk.bf16.mxu1 %vm15971_vm1, %v22726_v11  ;;  %v1399_v21 = vrot.slane %v1385_v43, %v16357_v39  ;;  %v1520_v53 = vcombine.low %v22735_v19, %v22734_v28 }
 0x263   : > { %v4040_v3 = vcombine.low %v22736_v16, %v17172_v12  ;;  %5512 = vrot.lane.b32.xlu1 %v16659_v44, %s15964_s12  ;;  %14841 = vmatprep.subr.bf16.mxu1 %v22726_v11  ;;  %v1521_v1 = vcombine.high %v22735_v19, %v22734_v28  ;;  %v1536_v51 = vcombine.low %v22738_v42, %v22737_v37 }
 0x264   : > { %v1537_v27 = vcombine.high %v22738_v42, %v22737_v37  ;;  %v4041_v43 = vcombine.high %v22736_v16, %v17172_v12  ;;  %5564 = vrot.lane.b32.xlu0 %v16632_v23, %s15966_s9  ;;  %v4064_v19 = vrot.slane %v4056_v14, %v16357_v39  ;;  %v3095_v47 = vpop.permute.xlu1 %3094  ;;  %v1448_v50 = vcombine.low %v1392_v35, %v1408_v61  ;;  %v17281_v16 = vpop.permute.xlu0 %3140 }
 0x265   : > { %v1449_v37 = vcombine.high %v1392_v35, %v1408_v61  ;;  %v1464_v42 = vcombine.low %v1399_v21, %v1415_v62  ;;  %v4071_v12 = vrot.slane %v4057_v58, %v16357_v39  ;;  %22739 = vst [vmem:[#allocation41_spill] sm:$0xff] %v17281_v16  ;;  %v1465_v30 = vcombine.high %v1399_v21, %v1415_v62 }
 0x266   : > { %v1528_v26 = vrot.slane %v1520_v53, %v16357_v39  ;;  %v4048_v5 = vrot.slane %v4040_v3, %v16357_v39  ;;  %v22743_v28 = vcombine.low %v16680_v48, %v16683_v6  ;;  %v17294_v35 = vrot.slane %v1521_v1, %v16357_v39 }
 0x267   : > { %5536 = vrot.lane.b32.xlu1 %v16659_v44, %s15965_s8  ;;  %v1544_v61 = vrot.slane %v1536_v51, %v16357_v39  ;;  %v17298_v62 = vrot.slane %v1537_v27, %v16357_v39  ;;  %v4055_v3 = vrot.slane %v4041_v43, %v16357_v39  ;;  %v17309_v27 = vrot.slane %v1448_v50, %v16361_v46 }
 0x268   : > { %v3017_v14 = vpack.c.bf16 %v22743_v28, %v22742_v15  ;;  %5588 = vrot.lane.b32.xlu0 %v16632_v23, %s15967_s11  ;;  %v4104_v53 = vcombine.low %v4048_v5, %v4064_v19  ;;  %v4105_v58 = vcombine.high %v4048_v5, %v4064_v19  ;;  %v22744_v15 = vld [vmem:[#allocation35_spill] sm:$0xff]  ;;  %v3119_v1 = vpop.permute.xlu1 %3118  ;;  %v17312_v43 = vrot.slane %v1449_v37, %v16361_v46 }
 0x269   : > { %v4176_v21 = vcombine.low %v22744_v15, %v3095_v47  ;;  %v4177_v28 = vcombine.high %v22744_v15, %v3095_v47  ;;  %v4120_v44 = vcombine.low %v4055_v3, %v4071_v12  ;;  %v4121_v16 = vcombine.high %v4055_v3, %v4071_v12 }
 0x26a   : > { %14832 = vmatmul.mubr.msk.bf16.vlgmr.msra.gmra.mxu1 %vm7816_vm2, %v3017_v14  ;;  %v4192_v51 = vcombine.low %v3071_v0, %v3119_v1  ;;  %v4193_v8 = vcombine.high %v3071_v0, %v3119_v1  ;;  %v17315_v5 = vrot.slane %v1464_v42, %v16361_v46  ;;  %v17318_v19 = vrot.slane %v1465_v30, %v16361_v46  ;;  %v17326_v14 = vpop.permute.xlu0 %3164 }
 0x26b   : > { %14843 = vmatprep.mubr.msk.bf16.mxu1 %vm15971_vm1, %v22726_v11  ;;  %5538 = vrot.lane.b32.xlu1 %v16717_v63, %s15965_s8  ;;  %v1584_v47 = vcombine.low %v1528_v26, %v1544_v61  ;;  %v1585_v0 = vcombine.high %v1528_v26, %v1544_v61  ;;  %v1600_v12 = vcombine.low %v17294_v35, %v17298_v62 }
 0x26c   : > { %v1601_v50 = vcombine.high %v17294_v35, %v17298_v62  ;;  %22745 = vst [vmem:[#allocation45_spill] sm:$0xff] %v17326_v14  ;;  %5522 = vrot.lane.b32.xlu0 %v16928_v24, %s15964_s12  ;;  %v4184_v37 = vrot.slane %v4176_v21, %v16357_v39  ;;  %v4191_v30 = vrot.slane %v4177_v28, %v16357_v39  ;;  %v17334_v26 = vpop.permute.xlu1 %3142 }
 0x26d   : > { %v4200_v42 = vrot.slane %v4192_v51, %v16357_v39  ;;  %v4207_v3 = vrot.slane %v4193_v8, %v16357_v39  ;;  %22746 = vst [vmem:[#allocation18_spill] sm:$0xff] %v17334_v26  ;;  %v4112_v61 = vrot.slane %v4104_v53, %v16361_v46  ;;  %v4119_v15 = vrot.slane %v4105_v58, %v16361_v46 }
 0x26e   : > { %v4128_v35 = vrot.slane %v4120_v44, %v16361_v46  ;;  %v4135_v62 = vrot.slane %v4121_v16, %v16361_v46  ;;  %v14292_v8 = vcombine.low %v17309_v27, %v17312_v43  ;;  %v14294_v28 = vcombine.high %v17309_v27, %v17312_v43 }
 0x26f   : > { %v4240_v1 = vcombine.low %v4184_v37, %v4200_v42  ;;  %v4241_v23 = vcombine.high %v4184_v37, %v4200_v42  ;;  %v4256_v14 = vcombine.low %v4191_v30, %v4207_v3  ;;  %v4257_v21 = vcombine.high %v4191_v30, %v4207_v3  ;;  %5562 = vrot.lane.b32.xlu1 %v16717_v63, %s15966_s9 }
 0x270   : > { %v1592_v53 = vrot.slane %v1584_v47, %v16361_v46  ;;  %v1599_v58 = vrot.slane %v1585_v0, %v16361_v46  ;;  %5568 = vrot.lane.b32.xlu0 %v16845_v29, %s15966_s9  ;;  %v17354_v30 = vpop.permute.xlu1 %3166  ;;  %v14372_v42 = vcombine.low %v4112_v61, %v4119_v15  ;;  %v14374_v3 = vcombine.high %v4112_v61, %v4119_v15  ;;  %v17356_v47 = vpop.permute.xlu0 %3188 }
 0x271   : > { %v4248_v44 = vrot.slane %v4240_v1, %v16361_v46  ;;  %v4255_v16 = vrot.slane %v4241_v23, %v16361_v46  ;;  %v4264_v51 = vrot.slane %v4256_v14, %v16361_v46  ;;  %v4271_v37 = vrot.slane %v4257_v21, %v16361_v46  ;;  %22747 = vst [vmem:[#allocation25_spill] sm:$0xff] %v17354_v30 }
 0x272   : > { %v14376_v27 = vcombine.low %v4128_v35, %v4135_v62  ;;  %v14378_v43 = vcombine.high %v4128_v35, %v4135_v62  ;;  %22748 = vst [vmem:[#allocation46_spill] sm:$0xff] %v17356_v47  ;;  %v14296_v23 = vcombine.low %v17315_v5, %v17318_v19  ;;  %v14298_v14 = vcombine.high %v17315_v5, %v17318_v19  ;;  %v22771_v47 = vld [vmem:[#allocation50_spill] sm:$0xff] }
 0x273   : > { %v14380_v0 = vcombine.low %v4248_v44, %v4255_v16  ;;  %v14382_v26 = vcombine.high %v4248_v44, %v4255_v16  ;;  %v14384_v24 = vcombine.low %v4264_v51, %v4271_v37  ;;  %v14386_v6 = vcombine.high %v4264_v51, %v4271_v37  ;;  %5586 = vrot.lane.b32.xlu1 %v16717_v63, %s15967_s11 }
 0x274   : > { %v1608_v1 = vrot.slane %v1600_v12, %v16361_v46  ;;  %v1615_v61 = vrot.slane %v1601_v50, %v16361_v46  ;;  %5592 = vrot.lane.b32.xlu0 %v16845_v29, %s15967_s11  ;;  %v17368_v15 = vpop.permute.xlu1 %3190  ;;  %v17383_v19 = vrot.slane %v14372_v42, %v16357_v39  ;;  %v17386_v12 = vrot.slane %v14374_v3, %v16357_v39 }
 0x275   : > { %22749 = vst [vmem:[#allocation43_spill] sm:$0xff] %v17368_v15  ;;  %v17371_v35 = vrot.slane %v14380_v0, %v16357_v39  ;;  %v17374_v62 = vrot.slane %v14382_v26, %v16357_v39  ;;  %v17377_v21 = vrot.slane %v14384_v24, %v16357_v39  ;;  %v17380_v5 = vrot.slane %v14386_v6, %v16357_v39 }
 0x276   : > { %v17389_v50 = vrot.slane %v14376_v27, %v16357_v39  ;;  %v17392_v44 = vrot.slane %v14378_v43, %v16357_v39  ;;  %v14300_v6 = vcombine.low %v1592_v53, %v1599_v58  ;;  %v14302_v16 = vcombine.high %v1592_v53, %v1599_v58  ;;  %v17412_v27 = vpop.permute.xlu0 %3064 }
 0x277   : > { %22750 = vst [vmem:[#allocation51_spill] sm:$0xff] %v17371_v35  ;;  %22751 = vst [vmem:[#allocation52_spill] sm:$0xff] %v17374_v62  ;;  %5518 = vrot.lane.b32.xlu1 %v16692_v34, %s15964_s12  ;;  %v22754_v51 = vcombine.low %v17199_v2, %v17204_v41  ;;  %v22756_v42 = vcombine.high %v17199_v2, %v17204_v41  ;;  %v5328_v53 = vcombine.low %v17371_v35, %v17374_v62 }
 0x278   : > { %22752 = vst [vmem:[#allocation35_spill] sm:$0xff] %v17377_v21  ;;  %22753 = vst [vmem:[#allocation107_spill] sm:$0xff] %v17380_v5  ;;  %v5360_v58 = vcombine.low %v17377_v21, %v17380_v5  ;;  %5524 = vrot.lane.b32.xlu0 %v16794_v54, %s15964_s12  ;;  %v17421_v43 = vrot.slane %v14292_v8, %v16357_v39  ;;  %v17424_v0 = vrot.slane %v14294_v28, %v16357_v39 }
 0x279   : > { %v17404_v37 = vrot.slane %v22754_v51, %v16357_v39  ;;  %v17410_v3 = vrot.slane %v22756_v42, %v16357_v39  ;;  %v17427_v2 = vrot.slane %v14296_v23, %v16357_v39  ;;  %v17430_v41 = vrot.slane %v14298_v14, %v16357_v39  ;;  %v17432_v51 = vpop.permute.xlu1 %3214 }
 0x27a   : > { %22758 = vst [vmem:[#allocation110_spill] sm:$0xff] %v17421_v43  ;;  %22759 = vst [vmem:[#allocation111_spill] sm:$0xff] %v17424_v0  ;;  %v14304_v42 = vcombine.low %v1608_v1, %v1615_v61  ;;  %v14306_v24 = vcombine.high %v1608_v1, %v1615_v61  ;;  %v5192_v26 = vcombine.low %v17383_v19, %v17386_v12 }
 0x27b   : > { %22755 = vst [vmem:[#allocation108_spill] sm:$0xff] %v17404_v37  ;;  %22757 = vst [vmem:[#allocation109_spill] sm:$0xff] %v17410_v3  ;;  %v5224_v8 = vcombine.low %v17389_v50, %v17392_v44  ;;  %v2840_v28 = vcombine.low %v17237_v57, %v17240_v33  ;;  %v17443_v63 = vrot.slane %v14300_v6, %v16357_v39  ;;  %5542 = vrot.lane.b32.xlu1 %v16692_v34, %s15965_s8 }
 0x27c   : > { %22760 = vst [vmem:[#allocation112_spill] sm:$0xff] %v17427_v2  ;;  %22761 = vst [vmem:[#allocation113_spill] sm:$0xff] %v17430_v41  ;;  %v17446_v14 = vrot.slane %v14302_v16, %v16357_v39  ;;  %v22765_v1 = vcombine.low %v17221_v49, %v17224_v20  ;;  %v22766_v30 = vcombine.high %v17221_v49, %v17224_v20  ;;  %5548 = vrot.lane.b32.xlu0 %v16794_v54, %s15965_s8 }
 0x27d   : > { %22762 = vst [vmem:[#allocation114_spill] sm:$0xff] %v17432_v51  ;;  %22763 = vst [vmem:[#allocation115_spill] sm:$0xff] %v17443_v63  ;;  %v17463_v6 = vrot.slane %v5328_v53, %v16361_v46  ;;  %v17466_v16 = vrot.slane %v5360_v58, %v16361_v46  ;;  %v2944_v51 = vcombine.low %v17404_v37, %v17410_v3  ;;  %v17484_v58 = vpop.permute.xlu0 %3088  ;;  %v17486_v15 = vpop.permute.xlu1 %3066  ;;  %v22769_v3 = vld [vmem:[#allocation55_spill] sm:$0xff]  ;;  %v22770_v37 = vld [vmem:[#allocation48_spill] sm:$0xff] }
 0x27e   : > { %22764 = vst [vmem:[#allocation116_spill] sm:$0xff] %v17446_v14  ;;  %v17454_v61 = vrot.slane %v22765_v1, %v16357_v39  ;;  %v17460_v23 = vrot.slane %v22766_v30, %v16357_v39  ;;  %v2536_v49 = vcombine.low %v17421_v43, %v17424_v0  ;;  %v2568_v20 = vcombine.low %v17427_v2, %v17430_v41  ;;  %v22775_v2 = vld [vmem:[#allocation30_spill] sm:$0xff] }
 0x27f   : > { %v17479_v30 = vrot.slane %v14304_v42, %v16357_v39  ;;  %v17482_v53 = vrot.slane %v14306_v24, %v16357_v39  ;;  %v17489_v33 = vrot.slane %v5192_v26, %v16361_v46  ;;  %v17492_v1 = vrot.slane %v5224_v8, %v16361_v46  ;;  %5566 = vrot.lane.b32.xlu1 %v16692_v34, %s15966_s9 }
 0x280   : > { %v2672_v57 = vcombine.low %v17443_v63, %v17446_v14  ;;  %v3528_v42 = vcombine.low %v22770_v37, %v22769_v3  ;;  %v3529_v24 = vcombine.high %v22770_v37, %v22769_v3  ;;  %v3544_v21 = vcombine.low %v22771_v47, %v16722_v22  ;;  %5572 = vrot.lane.b32.xlu0 %v16794_v54, %s15966_s9 }
 0x281   : > { %22767 = vst [vmem:[#allocation117_spill] sm:$0xff] %v17479_v30  ;;  %22768 = vst [vmem:[#allocation118_spill] sm:$0xff] %v17482_v53  ;;  %v2976_v26 = vcombine.low %v17454_v61, %v17460_v23  ;;  %v5392_v35 = vcombine.low %v17463_v6, %v17466_v16  ;;  %v17515_v37 = vrot.slane %v2536_v49, %v16361_v46  ;;  %v3113_v54 = vpop.permute.xlu0 %3112 }
 0x282   : > { %v17520_v62 = vrot.slane %v2568_v20, %v16361_v46  ;;  %v3545_v8 = vcombine.high %v22771_v47, %v16722_v22  ;;  %v2704_v0 = vcombine.low %v17479_v30, %v17482_v53  ;;  %v5256_v49 = vcombine.low %v17489_v33, %v17492_v1  ;;  %v22772_v47 = vld [vmem:[#allocation56_spill] sm:$0xff]  ;;  %v17544_v30 = vpop.permute.xlu1 %3090 }
 0x283   : > { %v17533_v3 = vrot.slane %v2672_v57, %v16361_v46  ;;  %v3536_v20 = vrot.slane %v3528_v42, %v16357_v39  ;;  %v17537_v41 = vrot.slane %v3529_v24, %v16357_v39  ;;  %v3552_v22 = vrot.slane %v3544_v21, %v16357_v39  ;;  %5590 = vrot.lane.b32.xlu1 %v16692_v34, %s15967_s11  ;;  %v22773_v34 = vld [vmem:[#allocation58_spill] sm:$0xff] }
 0x284   : > { %v3664_v5 = vcombine.low %v22772_v47, %v16747_v40  ;;  %v5403_v53 = vpack.c.bf16 %v5392_v35, %v5256_v49  ;;  %v17547_v57 = vrot.slane %v2944_v51, %v16361_v46  ;;  %v17550_v42 = vrot.slane %v2976_v26, %v16361_v46 }
 0x285   : > { %v3559_v24 = vrot.slane %v3545_v8, %v16357_v39  ;;  %v3665_v21 = vcombine.high %v22772_v47, %v16747_v40  ;;  %v3680_v14 = vcombine.low %v22773_v34, %v16773_v9  ;;  %v3681_v63 = vcombine.high %v22773_v34, %v16773_v9 }
 0x286   : > { %v7962_v35 = vsel %vm7816_vm2, %v5403_v53, 0  ;;  %v22774_v51 = vcombine.low %v17231_v32, %v17234_v45  ;;  %v17567_v26 = vrot.slane %v2840_v28, %v16361_v46  ;;  %v4849_v40 = vcombine.high %v17152_v59, %v17167_v4 }
 0x287   : > { %v3592_v8 = vcombine.low %v3536_v20, %v3552_v22  ;;  %v3593_v47 = vcombine.high %v3536_v20, %v3552_v22  ;;  %v3768_v43 = vcombine.low %v22775_v2, %v17484_v58  ;;  %v3784_v34 = vcombine.low %v17412_v27, %v3113_v54  ;;  %14842 = vmatpush3.bf16.xpose.msra.mxu1 %v7962_v35 }
 0x288   : > { %v17564_v49 = vrot.slane %v22774_v51, %v16361_v46  ;;  %v3785_v9 = vcombine.high %v17412_v27, %v3113_v54  ;;  %v3008_v53 = vcombine.low %v17547_v57, %v17550_v42  ;;  %14853 = vmatprep.subr.bf16.mxu1 %v22726_v11  ;;  %v4713_v28 = vcombine.high %v17161_v25, %v17164_v7  ;;  %v3115_v7 = vpop.permute.xlu1 %3114 }
 0x289   : > { %5520 = vrot.lane.b32.xlu1 %v16845_v29, %s15964_s12  ;;  %v17583_v59 = vrot.slane %v2704_v0, %v16361_v46  ;;  %v17586_v4 = vrot.slane %v3664_v5, %v16357_v39  ;;  %v17589_v20 = vrot.slane %v3665_v21, %v16357_v39  ;;  %v3769_v54 = vcombine.high %v22775_v2, %v17484_v58 }
 0x28a   : > { %v3608_v27 = vcombine.low %v17537_v41, %v3559_v24  ;;  %v3609_v22 = vcombine.high %v17537_v41, %v3559_v24  ;;  %v2872_v25 = vcombine.low %v17564_v49, %v17567_v26  ;;  %v5405_v35 = vpack.c.bf16 %v4849_v40, %v4713_v28 }
 0x28b   : > { %v17598_v0 = vrot.slane %v3592_v8, %v16361_v46  ;;  %v17601_v5 = vrot.slane %v3680_v14, %v16357_v39  ;;  %v17604_v21 = vrot.slane %v3681_v63, %v16357_v39  ;;  %v3792_v2 = vrot.slane %v3784_v34, %v16357_v39 }
 0x28c   : > { %v17608_v58 = vrot.slane %v3593_v47, %v16361_v46  ;;  %v3776_v41 = vrot.slane %v3768_v43, %v16357_v39  ;;  %v3799_v24 = vrot.slane %v3785_v9, %v16357_v39  ;;  %v3019_v51 = vpack.c.bf16 %v3008_v53, %v2872_v25 }
 0x28d   : > { %5544 = vrot.lane.b32.xlu1 %v16845_v29, %s15965_s8  ;;  %v3783_v40 = vrot.slane %v3769_v54, %v16357_v39  ;;  %v3920_v14 = vcombine.low %v17486_v15, %v3115_v7  ;;  %v3921_v63 = vcombine.high %v17486_v15, %v3115_v7  ;;  %v5257_v8 = vcombine.high %v17489_v33, %v17492_v1  ;;  %v22809_v29 = vld [vmem:[#allocation24_spill] sm:$0xff] }
 0x28e   : > { %14844 = vmatmul.mubr.msk.bf16.vlgmr.msra.gmra.mxu1 %vm7816_vm2, %v3019_v51  ;;  %v8056_v47 = vsel %vm7816_vm2, %v5405_v35, 0  ;;  %v5393_v43 = vcombine.high %v17463_v6, %v17466_v16  ;;  %v4785_v34 = vcombine.high %v17055_v31, %v17058_v10  ;;  %v4817_v9 = vcombine.high %v17094_v38, %v17097_v52 }
 0x28f   : > { %v3832_v53 = vcombine.low %v3776_v41, %v3792_v2  ;;  %v3833_v28 = vcombine.high %v3776_v41, %v3792_v2  ;;  %v3904_v15 = vcombine.low %v16601_v13, %v17544_v30  ;;  %v3905_v33 = vcombine.high %v16601_v13, %v17544_v30  ;;  %14854 = vmatpush3.bf16.xpose.msra.mxu1 %v8056_v47 }
 0x290   : > { %v3848_v1 = vcombine.low %v3783_v40, %v3799_v24  ;;  %v3849_v54 = vcombine.high %v3783_v40, %v3799_v24  ;;  %14855 = vmatprep.mubr.msk.bf16.mxu1 %vm15971_vm1, %v22726_v11  ;;  %v4649_v31 = vcombine.high %v17075_v36, %v17078_v55  ;;  %v4681_v10 = vcombine.high %v17081_v17, %v17084_v60  ;;  %v22777_v36 = vld [vmem:[#allocation53_spill] sm:$0xff] }
 0x291   : > { %v17638_v38 = vrot.slane %v3608_v27, %v16361_v46  ;;  %v17641_v52 = vrot.slane %v3609_v22, %v16361_v46  ;;  %v3928_v13 = vrot.slane %v3920_v14, %v16357_v39  ;;  %v3935_v6 = vrot.slane %v3921_v63, %v16357_v39  ;;  %14865 = vmatprep.subr.bf16.mxu1 %v22726_v11  ;;  %v22779_v22 = vld [vmem:[#allocation83_spill] sm:$0xff] }
 0x292   : > { %v22776_v16 = vcombine.high %v22740_v18, %v22741_v56  ;;  %v22778_v55 = vcombine.high %v16680_v48, %v22777_v36  ;;  %v5407_v17 = vpack.c.bf16 %v5393_v43, %v5257_v8  ;;  %v17653_v60 = vrot.slane %v4785_v34, %v16361_v46  ;;  %5546 = vrot.lane.b32.xlu1 %v22779_v22, %s15965_s8 }
 0x293   : > { %v17656_v27 = vrot.slane %v4817_v9, %v16361_v46  ;;  %v3840_v7 = vrot.slane %v3832_v53, %v16361_v46  ;;  %v3847_v25 = vrot.slane %v3833_v28, %v16361_v46  ;;  %v3912_v56 = vrot.slane %v3904_v15, %v16357_v39  ;;  %v22780_v9 = vld [vmem:[#allocation84_spill] sm:$0xff]  ;;  %v22781_v53 = vld [vmem:[#allocation75_spill] sm:$0xff] }
 0x294   : > { %v3021_v30 = vpack.c.bf16 %v22778_v55, %v22776_v16  ;;  %v3919_v18 = vrot.slane %v3905_v33, %v16357_v39  ;;  %v3856_v48 = vrot.slane %v3848_v1, %v16361_v46  ;;  %v3863_v35 = vrot.slane %v3849_v54, %v16361_v46  ;;  %v22782_v55 = vld [vmem:[#allocation81_spill] sm:$0xff] }
 0x295   : > { %v17667_v2 = vrot.slane %v4649_v31, %v16361_v46  ;;  %v17670_v41 = vrot.slane %v4681_v10, %v16361_v46  ;;  %v3968_v24 = vcombine.low %v3912_v56, %v3928_v13  ;;  %v3969_v51 = vcombine.high %v3912_v56, %v3928_v13 }
 0x296   : > { %v3984_v40 = vcombine.low %v3919_v18, %v3935_v6  ;;  %v3985_v14 = vcombine.high %v3919_v18, %v3935_v6  ;;  %14856 = vmatmul.mubr.msk.bf16.vlgmr.msra.gmra.mxu1 %vm7816_vm2, %v3021_v30  ;;  %v8150_v47 = vsel %vm7816_vm2, %v5407_v17, 0  ;;  %v4850_v43 = vcombine.low %v17653_v60, %v17656_v27  ;;  %v22783_v30 = vld [vmem:[#allocation68_spill] sm:$0xff]  ;;  %5570 = vrot.lane.b32.xlu1 %v22779_v22, %s15966_s9 }
 0x297   : > { %v3728_v34 = vcombine.low %v17586_v4, %v17601_v5  ;;  %v3272_v28 = vcombine.low %v22781_v53, %v22780_v9  ;;  %v14356_v15 = vcombine.low %v3840_v7, %v3847_v25  ;;  %v14358_v33 = vcombine.high %v3840_v7, %v3847_v25  ;;  %14866 = vmatpush3.bf16.xpose.msra.mxu1 %v8150_v47 }
 0x298   : > { %v14360_v1 = vcombine.low %v3856_v48, %v3863_v35  ;;  %v14362_v54 = vcombine.high %v3856_v48, %v3863_v35  ;;  %14867 = vmatprep.mubr.msk.bf16.mxu1 %vm15971_vm1, %v22726_v11  ;;  %v3009_v31 = vcombine.high %v17547_v57, %v17550_v42  ;;  %v4714_v10 = vcombine.low %v17667_v2, %v17670_v41  ;;  %v17699_v57 = vpop.permute.xlu0 %3212 }
 0x299   : > { %v3976_v13 = vrot.slane %v3968_v24, %v16361_v46  ;;  %v3983_v6 = vrot.slane %v3969_v51, %v16361_v46  ;;  %v3992_v16 = vrot.slane %v3984_v40, %v16361_v46  ;;  %v3999_v36 = vrot.slane %v3985_v14, %v16361_v46  ;;  %14877 = vmatprep.subr.bf16.mxu1 %v22726_v11 }
 0x29a   : > { %v3256_v17 = vcombine.low %v22783_v30, %v22782_v55  ;;  %v3273_v7 = vcombine.high %v22781_v53, %v22780_v9  ;;  %v2873_v42 = vcombine.high %v17564_v49, %v17567_v26  ;;  %v5409_v25 = vpack.c.bf16 %v4850_v43, %v4714_v10  ;;  %5594 = vrot.lane.b32.xlu1 %v22779_v22, %s15967_s11 }
 0x29b   : > { %v3729_v56 = vcombine.high %v17586_v4, %v17601_v5  ;;  %v3257_v18 = vcombine.high %v22783_v30, %v22782_v55  ;;  %v17710_v48 = vrot.slane %v14356_v15, %v16357_v39  ;;  %v17713_v35 = vrot.slane %v14358_v33, %v16357_v39 }
 0x29c   : > { %v3280_v24 = vrot.slane %v3272_v28, %v16357_v39  ;;  %v3023_v51 = vpack.c.bf16 %v3009_v31, %v2873_v42  ;;  %v17717_v49 = vrot.slane %v14360_v1, %v16357_v39  ;;  %v17720_v26 = vrot.slane %v14362_v54, %v16357_v39 }
 0x29d   : > { %22784 = vst [vmem:[#allocation55_spill] sm:$0xff] %v17710_v48  ;;  %22785 = vst [vmem:[#allocation48_spill] sm:$0xff] %v17713_v35  ;;  %v14364_v40 = vcombine.low %v3976_v13, %v3983_v6  ;;  %v14366_v4 = vcombine.high %v3976_v13, %v3983_v6  ;;  %v14368_v5 = vcombine.low %v3992_v16, %v3999_v36  ;;  %v8244_v53 = vsel %vm7816_vm2, %v5409_v25, 0  ;;  %v17738_v13 = vpop.permute.xlu0 %752 }
 0x29e   : > { %22786 = vst [vmem:[#allocation50_spill] sm:$0xff] %v17717_v49  ;;  %22787 = vst [vmem:[#allocation56_spill] sm:$0xff] %v17720_v26  ;;  %v14370_v14 = vcombine.high %v3992_v16, %v3999_v36  ;;  %v3744_v47 = vcombine.low %v17589_v20, %v17604_v21  ;;  %v3264_v43 = vrot.slane %v3256_v17, %v16357_v39  ;;  %14868 = vmatmul.mubr.msk.bf16.vlgmr.msra.gmra.mxu1 %vm7816_vm2, %v3023_v51  ;;  %v22797_v51 = vld [vmem:[#allocation86_spill] sm:$0xff] }
 0x29f   : > { %v3287_v9 = vrot.slane %v3273_v7, %v16357_v39  ;;  %v17731_v15 = vrot.slane %v3728_v34, %v16361_v46  ;;  %v3745_v33 = vcombine.high %v17589_v20, %v17604_v21  ;;  %14878 = vmatpush3.bf16.xpose.msra.mxu1 %v8244_v53  ;;  %v4920_v1 = vcombine.low %v17710_v48, %v17713_v35 }
 0x2a0   : > { %v3271_v54 = vrot.slane %v3257_v18, %v16357_v39  ;;  %v3320_v31 = vcombine.low %v3264_v43, %v3280_v24  ;;  %v3321_v10 = vcombine.high %v3264_v43, %v3280_v24  ;;  %v4952_v6 = vcombine.low %v17717_v49, %v17720_v26  ;;  %14879 = vmatprep.mubr.msk.bf16.mxu1 %vm15971_vm1, %v22726_v11  ;;  %v22801_v43 = vld [vmem:[#allocation85_spill] sm:$0xff]  ;;  %v22830_v26 = vld [vmem:[#allocation46_spill] sm:$0xff] }
 0x2a1   : > { %22788 = vst [vmem:[#allocation58_spill] sm:$0xff] %v17731_v15  ;;  %v17745_v34 = vrot.slane %v14364_v40, %v16357_v39  ;;  %v17748_v20 = vrot.slane %v14366_v4, %v16357_v39  ;;  %v17751_v21 = vrot.slane %v14368_v5, %v16357_v39  ;;  %v17754_v16 = vrot.slane %v14370_v14, %v16357_v39  ;;  %v22798_v40 = vld [vmem:[#allocation82_spill] sm:$0xff] }
 0x2a2   : > { %14889 = vmatprep.subr.bf16.mxu1 %v22726_v11  ;;  %v17758_v36 = vrot.slane %v3729_v56, %v16361_v46  ;;  %v17761_v55 = vrot.slane %v3744_v47, %v16361_v46  ;;  %v3336_v30 = vcombine.low %v3271_v54, %v3287_v9  ;;  %v3337_v17 = vcombine.high %v3271_v54, %v3287_v9  ;;  %v22800_v47 = vld [vmem:[#allocation87_spill] sm:$0xff] }
 0x2a3   : > { %22789 = vst [vmem:[#allocation30_spill] sm:$0xff] %v17745_v34  ;;  %22790 = vst [vmem:[#allocation53_spill] sm:$0xff] %v17748_v20  ;;  %v17766_v7 = vrot.slane %v4920_v1, %v16361_v46  ;;  %v17769_v42 = vrot.slane %v4952_v6, %v16361_v46  ;;  %v5056_v25 = vcombine.low %v17745_v34, %v17748_v20  ;;  %v17804_v6 = vpop.permute.xlu0 %776  ;;  %v22806_v1 = vld [vmem:[#allocation22_spill] sm:$0xff] }
 0x2a4   : > { %22791 = vst [vmem:[#allocation84_spill] sm:$0xff] %v17751_v21  ;;  %22792 = vst [vmem:[#allocation75_spill] sm:$0xff] %v17754_v16  ;;  %v5088_v56 = vcombine.low %v17751_v21, %v17754_v16  ;;  %v17776_v18 = vrot.slane %v3745_v33, %v16361_v46  ;;  %v17779_v24 = vrot.slane %v3320_v31, %v16361_v46 }
 0x2a5   : > { %22793 = vst [vmem:[#allocation81_spill] sm:$0xff] %v17758_v36  ;;  %22794 = vst [vmem:[#allocation68_spill] sm:$0xff] %v17761_v55  ;;  %v3392_v4 = vcombine.low %v22798_v40, %v22797_v51  ;;  %v3393_v5 = vcombine.high %v22798_v40, %v22797_v51  ;;  %v17786_v14 = vrot.slane %v3321_v10, %v16361_v46 }
 0x2a6   : > { %22795 = vst [vmem:[#allocation119_spill] sm:$0xff] %v17776_v18  ;;  %22796 = vst [vmem:[#allocation120_spill] sm:$0xff] %v17779_v24  ;;  %v3408_v9 = vcombine.low %v22801_v43, %v22800_v47  ;;  %v17791_v53 = vrot.slane %v5056_v25, %v16361_v46  ;;  %v17794_v33 = vrot.slane %v5088_v56, %v16361_v46  ;;  %v22802_v25 = vld [vmem:[#allocation79_spill] sm:$0xff] }
 0x2a7   : > { %22799 = vst [vmem:[#allocation86_spill] sm:$0xff] %v17786_v14  ;;  %v3409_v10 = vcombine.high %v22801_v43, %v22800_v47  ;;  %5526 = vrot.lane.b32.xlu1 %v22802_v25, %s15964_s12  ;;  %v17809_v56 = vrot.slane %v3336_v30, %v16361_v46  ;;  %v17812_v51 = vrot.slane %v3337_v17, %v16361_v46  ;;  %v22805_v30 = vld [vmem:[#allocation21_spill] sm:$0xff]  ;;  %v22822_v14 = vld [vmem:[#allocation88_spill] sm:$0xff]  ;;  %s328_s12 = scalar_lea.vmem [#allocation11], %s14226_s15  ;;  %s14614_s15 = sshll.u32 %s16038_s25, 9 }
 0x2a8   : > { %v4984_v40 = vcombine.low %v17766_v7, %v17769_v42  ;;  %v5120_v31 = vcombine.low %v17791_v53, %v17794_v33  ;;  %v17823_v54 = vrot.slane %v3392_v4, %v16357_v39  ;;  %v22807_v17 = vcombine.high %v22805_v30, %v22806_v1  ;;  %v22808_v4 = vld [vmem:[#allocation23_spill] sm:$0xff]  ;;  %v22811_v30 = vld [vmem:[#allocation26_spill] sm:$0xff]  ;;  %s14089_s25 = scalar_lea.sflag [#allocation4], %s16175_s14 }
 0x2a9   : > { %22803 = vst [vmem:[#allocation82_spill] sm:$0xff] %v17809_v56  ;;  %22804 = vst [vmem:[#allocation87_spill] sm:$0xff] %v17812_v51  ;;  %v17834_v63 = vrot.slane %v3393_v5, %v16357_v39  ;;  %v17837_v47 = vrot.slane %v3408_v9, %v16357_v39  ;;  %v17840_v43 = vrot.slane %v3409_v10, %v16357_v39  ;;  %v22814_v5 = vld [vmem:[#allocation28_spill] sm:$0xff]  ;;  %v22815_v9 = vld [vmem:[#allocation29_spill] sm:$0xff] }
 0x2aa   : > { %v17829_v28 = vrot.slane %v22807_v17, %v16361_v46  ;;  %v5402_v22 = vpack.c.bf16 %v5120_v31, %v4984_v40  ;;  %v22810_v21 = vcombine.high %v22808_v4, %v22809_v29  ;;  %v22812_v17 = vld [vmem:[#allocation27_spill] sm:$0xff]  ;;  %v22816_v34 = vcombine.high %v22814_v5, %v22815_v9  ;;  %v22817_v10 = vld [vmem:[#allocation40_spill] sm:$0xff]  ;;  %v22818_v40 = vld [vmem:[#allocation93_spill] sm:$0xff] }
 0x2ab   : > { %v22813_v8 = vcombine.high %v22811_v30, %v22812_v17  ;;  %5550 = vrot.lane.b32.xlu1 %v22802_v25, %s15965_s8  ;;  %v1568_v4 = vcombine.low %v22818_v40, %v22817_v10  ;;  %v17871_v17 = vpop.permute.xlu0 %800  ;;  %v5193_v9 = vcombine.high %v17383_v19, %v17386_v12  ;;  %v5225_v30 = vcombine.high %v17389_v50, %v17392_v44  ;;  %v22819_v29 = vld [vmem:[#allocation52_spill] sm:$0xff]  ;;  %v22823_v44 = vld [vmem:[#allocation45_spill] sm:$0xff]  ;;  %s14103_s8 = sshll.u32 %s328_s12, 4  ;;  %s22140_s8 = int_to_ptr.vmem [resolvable:$true] %s14103_s8 }
 0x2ac   : > { %v17846_v1 = vrot.slane %v22810_v21, %v16361_v46  ;;  %v17858_v31 = vrot.slane %v22816_v34, %v16361_v46  ;;  %v3456_v21 = vcombine.low %v17823_v54, %v17837_v47  ;;  %v22821_v56 = vld [vmem:[#allocation96_spill] sm:$0xff]  ;;  %v1569_v12 = vcombine.high %v22818_v40, %v22817_v10 }
 0x2ad   : > { %v17852_v16 = vrot.slane %v22813_v8, %v16361_v46  ;;  %v7915_v8 = vsel %vm7816_vm2, %v5402_v22, 0  ;;  %v3457_v22 = vcombine.high %v17823_v54, %v17837_v47  ;;  %v1552_v19 = vcombine.low %v22822_v14, %v22821_v56 }
 0x2ae   : > { %14836 = vmatpush3.bf16.xpose.msra.mxu0 %v7915_v8  ;;  %v2330_v34 = vcombine.low %v17829_v28, %v17846_v1  ;;  %v22820_v8 = vld [vmem:[#allocation51_spill] sm:$0xff]  ;;  %v1553_v54 = vcombine.high %v22822_v14, %v22821_v56  ;;  %v1576_v50 = vrot.slane %v1568_v4, %v16357_v39  ;;  %v4088_v47 = vcombine.low %v22823_v44, %v17699_v57 }
 0x2af   : > { %v2466_v5 = vcombine.low %v17852_v16, %v17858_v31  ;;  %v5329_v25 = vcombine.high %v22820_v8, %v22819_v29  ;;  %14847 = vmatprep.subr.bf16.mxu0 %v22726_v11  ;;  %v4089_v29 = vcombine.high %v22823_v44, %v17699_v57  ;;  %v17903_v8 = vrot.slane %v5193_v9, %v16361_v46  ;;  %v22824_v14 = vld [vmem:[#allocation107_spill] sm:$0xff]  ;;  %v22828_v9 = vld [vmem:[#allocation101_spill] sm:$0xff] }
 0x2b0   : > { %v17906_v51 = vrot.slane %v5225_v30, %v16361_v46  ;;  %v22825_v56 = vld [vmem:[#allocation35_spill] sm:$0xff]  ;;  %v2600_v4 = vcombine.low %v17515_v37, %v17520_v62  ;;  %v2736_v57 = vcombine.low %v17533_v3, %v17583_v59  ;;  %v1560_v30 = vrot.slane %v1552_v19, %v16357_v39 }
 0x2b1   : > { %v3025_v24 = vpack.c.bf16 %v2466_v5, %v2330_v34  ;;  %v17909_v10 = vrot.slane %v5329_v25, %v16361_v46  ;;  %v5361_v40 = vcombine.high %v22825_v56, %v22824_v14  ;;  %v22826_v34 = vld [vmem:[#allocation100_spill] sm:$0xff]  ;;  %v22829_v44 = vld [vmem:[#allocation99_spill] sm:$0xff]  ;;  %v3473_v25 = vcombine.high %v17834_v63, %v17840_v43  ;;  %v17927_v56 = vpop.permute.xlu0 %824 }
 0x2b2   : > { %v4577_v20 = vcombine.high %v22829_v44, %v22828_v9  ;;  %v1583_v14 = vrot.slane %v1569_v12, %v16357_v39  ;;  %v3018_v44 = vpack.c.bf16 %v2736_v57, %v2600_v4  ;;  %v17937_v35 = vrot.slane %v3456_v21, %v16361_v46  ;;  %v22833_v4 = vld [vmem:[#allocation109_spill] sm:$0xff] }
 0x2b3   : > { %14880 = vmatmul.mubr.msk.bf16.vlgmr.msra.gmra.mxu1 %vm7816_vm2, %v3025_v24  ;;  %v22827_v24 = vld [vmem:[#allocation17_spill] sm:$0xff]  ;;  %v17930_v49 = vrot.slane %v5361_v40, %v16361_v46  ;;  %v1567_v19 = vrot.slane %v1553_v54, %v16357_v39  ;;  %v5258_v12 = vcombine.low %v17903_v8, %v17906_v51  ;;  %v1616_v18 = vcombine.low %v1560_v30, %v1576_v50  ;;  %v22832_v54 = vld [vmem:[#allocation108_spill] sm:$0xff] }
 0x2b4   : > { %v4441_v5 = vcombine.high %v22827_v24, %v22826_v34  ;;  %14891 = vmatprep.mubr.msk.bf16.mxu1 %vm15971_vm1, %v22726_v11  ;;  %v22831_v34 = vld [vmem:[#allocation41_spill] sm:$0xff]  ;;  %v4096_v55 = vrot.slane %v4088_v47, %v16357_v39  ;;  %v4103_v36 = vrot.slane %v4089_v29, %v16357_v39  ;;  %v22834_v57 = vcombine.high %v22832_v54, %v22833_v4 }
 0x2b5   : > { %v4072_v24 = vcombine.low %v22831_v34, %v22830_v26  ;;  %v4073_v9 = vcombine.high %v22831_v34, %v22830_v26  ;;  %v5394_v40 = vcombine.low %v17909_v10, %v17930_v49  ;;  %14838 = vmatmul.mubr.msk.bf16.vlgmr.msra.gmra.mxu0 %vm7816_vm2, %v3018_v44  ;;  %v22835_v34 = vcombine.high %v17454_v61, %v17460_v23  ;;  %v22837_v61 = vld [vmem:[#allocation16_spill] sm:$0xff] }
 0x2b6   : > { %v5404_v48 = vpack.c.bf16 %v4577_v20, %v4441_v5  ;;  %v1617_v20 = vcombine.high %v1560_v30, %v1576_v50  ;;  %v17952_v5 = vrot.slane %v22834_v57, %v16361_v46  ;;  %v1632_v29 = vcombine.low %v1567_v19, %v1583_v14  ;;  %14849 = vmatprep.mubr.msk.bf16.mxu0 %vm15971_vm1, %v22726_v11  ;;  %v17964_v50 = vpop.permute.xlu0 %756 }
 0x2b7   : > { %v5411_v21 = vpack.c.bf16 %v5394_v40, %v5258_v12  ;;  %v17958_v47 = vrot.slane %v22835_v34, %v16361_v46  ;;  %v1633_v15 = vcombine.high %v1567_v19, %v1583_v14  ;;  %v4080_v44 = vrot.slane %v4072_v24, %v16357_v39  ;;  %v22838_v14 = vld [vmem:[#allocation44_spill] sm:$0xff] }
 0x2b8   : > { %v8009_v26 = vsel %vm7816_vm2, %v5404_v48, 0  ;;  %v4087_v48 = vrot.slane %v4073_v9, %v16357_v39  ;;  %v22836_v12 = vcombine.high %v17231_v32, %v17234_v45  ;;  %v22839_v19 = vcombine.high %v22837_v61, %v22838_v14  ;;  %v22844_v14 = vld [vmem:[#allocation78_spill] sm:$0xff] }
 0x2b9   : > { %14848 = vmatpush3.bf16.xpose.msra.mxu0 %v8009_v26  ;;  %v8338_v30 = vsel %vm7816_vm2, %v5411_v21, 0  ;;  %v4851_v9 = vcombine.high %v17653_v60, %v17656_v27  ;;  %v4136_v40 = vcombine.low %v4080_v44, %v4096_v55  ;;  %v4137_v26 = vcombine.high %v4080_v44, %v4096_v55 }
 0x2ba   : > { %v17971_v23 = vrot.slane %v22836_v12, %v16361_v46  ;;  %v17977_v24 = vrot.slane %v22839_v19, %v16361_v46  ;;  %14859 = vmatprep.subr.bf16.mxu0 %v22726_v11  ;;  %v4152_v21 = vcombine.low %v4087_v48, %v4103_v36  ;;  %v4153_v54 = vcombine.high %v4087_v48, %v4103_v36  ;;  %v18031_v12 = vpop.permute.xlu0 %780  ;;  %v22845_v19 = vld [vmem:[#allocation77_spill] sm:$0xff] }
 0x2bb   : > { %14890 = vmatpush3.bf16.xpose.msra.mxu1 %v8338_v30  ;;  %v17983_v45 = vrot.slane %v3457_v22, %v16361_v46  ;;  %v17986_v32 = vrot.slane %v1616_v18, %v16361_v46  ;;  %v3010_v4 = vcombine.low %v17952_v5, %v17958_v47  ;;  %v4715_v60 = vcombine.high %v17667_v2, %v17670_v41  ;;  %v22840_v22 = vld [vmem:[#allocation42_spill] sm:$0xff]  ;;  %v22841_v18 = vld [vmem:[#allocation104_spill] sm:$0xff] }
 0x2bc   : > { %14901 = vmatprep.subr.bf16.mxu1 %v22726_v11  ;;  %v17994_v27 = vrot.slane %v1617_v20, %v16361_v46  ;;  %v17997_v36 = vrot.slane %v1632_v29, %v16361_v46  ;;  %v18000_v55 = vrot.slane %v1633_v15, %v16361_v46  ;;  %v1824_v57 = vcombine.low %v22841_v18, %v22840_v22 }
 0x2bd   : > { %v22842_v34 = vcombine.low %v17834_v63, %v17840_v43  ;;  %v1825_v2 = vcombine.high %v22841_v18, %v22840_v22  ;;  %v2874_v41 = vcombine.low %v17971_v23, %v17977_v24  ;;  %v5413_v20 = vpack.c.bf16 %v4851_v9, %v4715_v60  ;;  %v22846_v22 = vld [vmem:[#allocation76_spill] sm:$0xff]  ;;  %v22847_v18 = vld [vmem:[#allocation74_spill] sm:$0xff] }
 0x2be   : > { %v18015_v29 = vrot.slane %v4136_v40, %v16361_v46  ;;  %v18018_v15 = vrot.slane %v4137_v26, %v16361_v46  ;;  %v18021_v48 = vrot.slane %v4152_v21, %v16361_v46  ;;  %v18024_v63 = vrot.slane %v4153_v54, %v16361_v46  ;;  %v22884_v26 = vld [vmem:[#allocation33_spill] sm:$0xff] }
 0x2bf   : > { %v18008_v44 = vrot.slane %v22842_v34, %v16361_v46  ;;  %v18027_v43 = vrot.slane %v3473_v25, %v16361_v46  ;;  %v3027_v61 = vpack.c.bf16 %v3010_v4, %v2874_v41  ;;  %v2193_v9 = vcombine.high %v22845_v19, %v22844_v14 }
 0x2c0   : > { %v18042_v25 = vrot.slane %v1824_v57, %v16357_v39  ;;  %v1416_v54 = vcombine.low %v17738_v13, %v17871_v17  ;;  %v1417_v4 = vcombine.high %v17738_v13, %v17871_v17  ;;  %v8432_v60 = vsel %vm7816_vm2, %v5413_v20, 0  ;;  %v22894_v57 = vld [vmem:[#allocation55_spill] sm:$0xff] }
 0x2c1   : > { %22843 = vst [vmem:[#allocation85_spill] sm:$0xff] %v18008_v44  ;;  %v2057_v34 = vcombine.high %v22847_v18, %v22846_v22  ;;  %v18053_v41 = vrot.slane %v1825_v2, %v16357_v39  ;;  %v4985_v17 = vcombine.high %v17766_v7, %v17769_v42  ;;  %v5121_v20 = vcombine.high %v17791_v53, %v17794_v33  ;;  %v22849_v22 = vld [vmem:[#allocation18_spill] sm:$0xff] }
 0x2c2   : > { %14892 = vmatmul.mubr.msk.bf16.vlgmr.msra.gmra.mxu1 %vm7816_vm2, %v3027_v61  ;;  %v2331_v2 = vcombine.high %v17829_v28, %v17846_v1  ;;  %v22848_v61 = vld [vmem:[#allocation43_spill] sm:$0xff]  ;;  %v2467_v30 = vcombine.high %v17852_v16, %v17858_v31  ;;  %v5259_v7 = vcombine.high %v17903_v8, %v17906_v51  ;;  %v5395_v42 = vcombine.high %v17909_v10, %v17930_v49  ;;  %v18086_v1 = vpop.permute.xlu0 %804  ;;  %v22850_v49 = vld [vmem:[#allocation90_spill] sm:$0xff]  ;;  %v22851_v10 = vld [vmem:[#allocation89_spill] sm:$0xff] }
 0x2c3   : > { %14902 = vmatpush3.bf16.xpose.msra.mxu1 %v8432_v60  ;;  %v3020_v13 = vpack.c.bf16 %v2193_v9, %v2057_v34  ;;  %14903 = vmatprep.mubr.msk.bf16.mxu1 %vm15971_vm1, %v22726_v11  ;;  %v4208_v18 = vcombine.low %v22849_v22, %v22848_v61  ;;  %v18081_v33 = vrot.slane %v1416_v54, %v16357_v39  ;;  %v22852_v34 = vld [vmem:[#allocation92_spill] sm:$0xff] }
 0x2c4   : > { %14913 = vmatprep.subr.bf16.mxu1 %v22726_v11  ;;  %v18084_v28 = vrot.slane %v1417_v4, %v16357_v39  ;;  %v5406_v16 = vpack.c.bf16 %v5121_v20, %v4985_v17  ;;  %v4209_v51 = vcombine.high %v22849_v22, %v22848_v61  ;;  %v3029_v31 = vpack.c.bf16 %v2467_v30, %v2331_v2  ;;  %v22854_v2 = vld [vmem:[#allocation95_spill] sm:$0xff]  ;;  %v22855_v61 = vld [vmem:[#allocation94_spill] sm:$0xff] }
 0x2c5   : > { %14850 = vmatmul.mubr.msk.bf16.vlgmr.msra.gmra.mxu0 %vm7816_vm2, %v3020_v13  ;;  %v5415_v8 = vpack.c.bf16 %v5395_v42, %v5259_v7  ;;  %v4377_v9 = vcombine.high %v22851_v10, %v22850_v49  ;;  %v1432_v54 = vcombine.low %v17804_v6, %v17927_v56  ;;  %v1433_v4 = vcombine.high %v17804_v6, %v17927_v56  ;;  %v22853_v13 = vld [vmem:[#allocation91_spill] sm:$0xff]  ;;  %v22856_v7 = vld [vmem:[#allocation98_spill] sm:$0xff]  ;;  %v22857_v42 = vld [vmem:[#allocation97_spill] sm:$0xff] }
 0x2c6   : > { %14861 = vmatprep.mubr.msk.bf16.mxu0 %vm15971_vm1, %v22726_v11  ;;  %v8103_v60 = vsel %vm7816_vm2, %v5406_v16, 0  ;;  %v4409_v17 = vcombine.high %v22853_v13, %v22852_v34  ;;  %v18103_v30 = vrot.slane %v4208_v18, %v16357_v39  ;;  %v4513_v22 = vcombine.high %v22855_v61, %v22854_v2  ;;  %v22858_v10 = vld [vmem:[#allocation114_spill] sm:$0xff]  ;;  %v22859_v6 = vld [vmem:[#allocation25_spill] sm:$0xff] }
 0x2c7   : > { %14860 = vmatpush3.bf16.xpose.msra.mxu0 %v8103_v60  ;;  %v18106_v20 = vrot.slane %v4377_v9, %v16361_v46  ;;  %v4545_v49 = vcombine.high %v22857_v42, %v22856_v7  ;;  %v4224_v56 = vcombine.low %v22859_v6, %v22858_v10  ;;  %v8526_v16 = vsel %vm7816_vm2, %v5415_v8, 0 }
 0x2c8   : > { %v2737_v18 = vcombine.high %v17533_v3, %v17583_v59  ;;  %14871 = vmatprep.subr.bf16.mxu0 %v22726_v11  ;;  %v18120_v9 = vrot.slane %v4409_v17, %v16361_v46  ;;  %v18123_v60 = vrot.slane %v4209_v51, %v16357_v39  ;;  %v18126_v34 = vrot.slane %v4513_v22, %v16361_v46  ;;  %v829_v59 = vpop.permute.xlu0 %828 }
 0x2c9   : > { %v18129_v13 = vrot.slane %v4545_v49, %v16361_v46  ;;  %v4225_v3 = vcombine.high %v22859_v6, %v22858_v10  ;;  %v3011_v8 = vcombine.high %v17952_v5, %v17958_v47  ;;  %v22860_v2 = vcombine.low %v17598_v0, %v17608_v58 }
 0x2ca   : > { %14904 = vmatmul.mubr.msk.bf16.vlgmr.msra.gmra.mxu1 %vm7816_vm2, %v3029_v31  ;;  %v2601_v31 = vcombine.high %v17515_v37, %v17520_v62  ;;  %v4442_v51 = vcombine.low %v18106_v20, %v18120_v9  ;;  %v22862_v62 = vcombine.high %v17598_v0, %v17608_v58  ;;  %v22864_v5 = vcombine.low %v17638_v38, %v17641_v52 }
 0x2cb   : > { %14914 = vmatpush3.bf16.xpose.msra.mxu1 %v8526_v16  ;;  %14915 = vmatprep.mubr.msk.bf16.mxu1 %vm15971_vm1, %v22726_v11  ;;  %v4578_v17 = vcombine.low %v18126_v34, %v18129_v13  ;;  %v18148_v61 = vrot.slane %v22860_v2, %v16357_v39  ;;  %v18163_v22 = vrot.slane %v1432_v54, %v16357_v39 }
 0x2cc   : > { %14925 = vmatprep.subr.bf16.mxu1 %v22726_v11  ;;  %v18154_v37 = vrot.slane %v22862_v62, %v16357_v39  ;;  %v18160_v47 = vrot.slane %v22864_v5, %v16357_v39  ;;  %v18166_v7 = vrot.slane %v1433_v4, %v16357_v39  ;;  %v18169_v42 = vrot.slane %v4224_v56, %v16357_v39  ;;  %v831_v62 = vpop.permute.xlu1 %830 }
 0x2cd   : > { %22861 = vst [vmem:[#allocation21_spill] sm:$0xff] %v18148_v61  ;;  %v3022_v49 = vpack.c.bf16 %v2737_v18, %v2601_v31  ;;  %v1704_v0 = vcombine.low %v18031_v12, %v829_v59  ;;  %v5408_v58 = vpack.c.bf16 %v4578_v17, %v4442_v51  ;;  %v2875_v10 = vcombine.high %v17971_v23, %v17977_v24 }
 0x2ce   : > { %22863 = vst [vmem:[#allocation22_spill] sm:$0xff] %v18154_v37  ;;  %22865 = vst [vmem:[#allocation23_spill] sm:$0xff] %v18160_v47  ;;  %v22866_v6 = vcombine.high %v17638_v38, %v17641_v52  ;;  %v18181_v54 = vrot.slane %v4225_v3, %v16357_v39  ;;  %v1688_v4 = vcombine.low %v17964_v50, %v18086_v1  ;;  %v22868_v52 = vld [vmem:[#allocation58_spill] sm:$0xff]  ;;  %v22869_v3 = vld [vmem:[#allocation81_spill] sm:$0xff] }
 0x2cf   : > { %v1705_v56 = vcombine.high %v18031_v12, %v829_v59  ;;  %14862 = vmatmul.mubr.msk.bf16.vlgmr.msra.gmra.mxu0 %vm7816_vm2, %v3022_v49  ;;  %v4664_v18 = vcombine.low %v18148_v61, %v18154_v37  ;;  %v8197_v23 = vsel %vm7816_vm2, %v5408_v58, 0  ;;  %v3031_v24 = vpack.c.bf16 %v3011_v8, %v2875_v10  ;;  %v22874_v58 = vld [vmem:[#allocation68_spill] sm:$0xff]  ;;  %v22875_v10 = vld [vmem:[#allocation119_spill] sm:$0xff] }
 0x2d0   : > { %v18178_v16 = vrot.slane %v22866_v6, %v16357_v39  ;;  %v22870_v31 = vcombine.low %v22868_v52, %v22869_v3  ;;  %14873 = vmatprep.mubr.msk.bf16.mxu0 %vm15971_vm1, %v22726_v11  ;;  %v4272_v59 = vcombine.low %v18103_v30, %v18169_v42  ;;  %v4273_v8 = vcombine.high %v18103_v30, %v18169_v42  ;;  %v22901_v61 = vld [vmem:[#allocation84_spill] sm:$0xff] }
 0x2d1   : > { %v1689_v17 = vcombine.high %v17964_v50, %v18086_v1  ;;  %14872 = vmatpush3.bf16.xpose.msra.mxu0 %v8197_v23  ;;  %v1712_v2 = vrot.slane %v1704_v0, %v16357_v39  ;;  %v22872_v5 = vcombine.high %v22868_v52, %v22869_v3  ;;  %v22876_v6 = vcombine.low %v22874_v58, %v22875_v10 }
 0x2d2   : > { %22867 = vst [vmem:[#allocation24_spill] sm:$0xff] %v18178_v16  ;;  %v4696_v38 = vcombine.low %v18160_v47, %v18178_v16  ;;  %v18196_v51 = vrot.slane %v22870_v31, %v16357_v39  ;;  %14916 = vmatmul.mubr.msk.bf16.vlgmr.msra.gmra.mxu1 %vm7816_vm2, %v3031_v24  ;;  %v22878_v50 = vcombine.high %v22874_v58, %v22875_v10  ;;  %v22881_v10 = vld [vmem:[#allocation31_spill] sm:$0xff] }
 0x2d3   : > { %v18214_v49 = vrot.slane %v22872_v5, %v16357_v39  ;;  %v18220_v30 = vrot.slane %v22876_v6, %v16357_v39  ;;  %v4288_v42 = vcombine.low %v18123_v60, %v18181_v54  ;;  %v1719_v0 = vrot.slane %v1705_v56, %v16357_v39  ;;  %14883 = vmatprep.subr.bf16.mxu0 %v22726_v11  ;;  %v22900_v16 = vld [vmem:[#allocation75_spill] sm:$0xff] }
 0x2d4   : > { %22871 = vst [vmem:[#allocation26_spill] sm:$0xff] %v18196_v51  ;;  %v18226_v1 = vrot.slane %v22878_v50, %v16357_v39  ;;  %v18232_v23 = vrot.slane %v4664_v18, %v16361_v46  ;;  %v18235_v24 = vrot.slane %v4696_v38, %v16361_v46  ;;  %v4289_v52 = vcombine.high %v18123_v60, %v18181_v54  ;;  %v22880_v18 = vld [vmem:[#allocation106_spill] sm:$0xff]  ;;  %v22882_v60 = vld [vmem:[#allocation32_spill] sm:$0xff] }
 0x2d5   : > { %22873 = vst [vmem:[#allocation27_spill] sm:$0xff] %v18214_v49  ;;  %22877 = vst [vmem:[#allocation28_spill] sm:$0xff] %v18220_v30  ;;  %v1696_v3 = vrot.slane %v1688_v4, %v16357_v39  ;;  %v4800_v31 = vcombine.low %v18196_v51, %v18214_v49  ;;  %14927 = vmatprep.mubr.msk.bf16.mxu1 %vm15971_vm1, %v22726_v11  ;;  %v1703_v56 = vrot.slane %v1689_v17, %v16357_v39  ;;  %v22885_v17 = vld [vmem:[#allocation34_spill] sm:$0xff]  ;;  %v22898_v51 = vld [vmem:[#allocation53_spill] sm:$0xff] }
 0x2d6   : > { %22879 = vst [vmem:[#allocation29_spill] sm:$0xff] %v18226_v1  ;;  %v4832_v5 = vcombine.low %v18220_v30, %v18226_v1  ;;  %v1840_v38 = vcombine.low %v22880_v18, %v831_v62  ;;  %v1841_v58 = vcombine.high %v22880_v18, %v831_v62  ;;  %v22883_v54 = vcombine.high %v22881_v10, %v22882_v60  ;;  %v22887_v60 = vld [vmem:[#allocation36_spill] sm:$0xff]  ;;  %v22899_v49 = vld [vmem:[#allocation30_spill] sm:$0xff] }
 0x2d7   : > { %v1752_v6 = vcombine.low %v1696_v3, %v1712_v2  ;;  %v18257_v50 = vrot.slane %v4800_v31, %v16361_v46  ;;  %v22886_v40 = vcombine.high %v22884_v26, %v22885_v17  ;;  %v1753_v62 = vcombine.high %v1696_v3, %v1712_v2  ;;  %v22891_v26 = vld [vmem:[#allocation39_spill] sm:$0xff]  ;;  %v22893_v17 = vld [vmem:[#allocation48_spill] sm:$0xff] }
 0x2d8   : > { %v18254_v4 = vrot.slane %v22883_v54, %v16361_v46  ;;  %v18260_v21 = vrot.slane %v4832_v5, %v16361_v46  ;;  %v1768_v18 = vcombine.low %v1703_v56, %v1719_v0  ;;  %v4716_v10 = vcombine.low %v18232_v23, %v18235_v24  ;;  %v22888_v54 = vld [vmem:[#allocation37_spill] sm:$0xff] }
 0x2d9   : > { %v18266_v53 = vrot.slane %v22886_v40, %v16361_v46  ;;  %v22889_v19 = vcombine.high %v22887_v60, %v22888_v54  ;;  %v22890_v40 = vld [vmem:[#allocation38_spill] sm:$0xff]  ;;  %v4921_v12 = vcombine.high %v22894_v57, %v22893_v17  ;;  %v1848_v30 = vrot.slane %v1840_v38, %v16357_v39  ;;  %v18289_v60 = vpop.permute.xlu1 %5440  ;;  %v18302_v38 = vpop.permute.xlu0 %3136 }
 0x2da   : > { %v4852_v5 = vcombine.low %v18257_v50, %v18260_v21  ;;  %v22892_v2 = vcombine.high %v22890_v40, %v22891_v26  ;;  %22895 = vst [vmem:[#allocation40_spill] sm:$0xff] %v18289_v60  ;;  %v22897_v54 = vld [vmem:[#allocation50_spill] sm:$0xff]  ;;  %v5057_v47 = vcombine.high %v22899_v49, %v22898_v51  ;;  %v5089_v37 = vcombine.high %v22901_v61, %v22900_v16 }
 0x2db   : > { %v18274_v31 = vrot.slane %v22889_v19, %v16361_v46  ;;  %v2058_v14 = vcombine.low %v18254_v4, %v18266_v53  ;;  %v22896_v19 = vld [vmem:[#allocation56_spill] sm:$0xff]  ;;  %v1769_v44 = vcombine.high %v1703_v56, %v1719_v0  ;;  %v18300_v57 = vrot.slane %v4921_v12, %v16361_v46 }
 0x2dc   : > { %v18284_v3 = vrot.slane %v22892_v2, %v16361_v46  ;;  %v4953_v1 = vcombine.high %v22897_v54, %v22896_v19  ;;  %v5417_v40 = vpack.c.bf16 %v4852_v5, %v4716_v10  ;;  %v1855_v2 = vrot.slane %v1841_v58, %v16357_v39 }
 0x2dd   : > { %v18309_v51 = vrot.slane %v5057_v47, %v16361_v46  ;;  %v18312_v61 = vrot.slane %v5089_v37, %v16361_v46  ;;  %v1760_v16 = vrot.slane %v1752_v6, %v16361_v46  ;;  %v1767_v49 = vrot.slane %v1753_v62, %v16361_v46  ;;  %v18334_v5 = vpop.permute.xlu1 %5464 }
 0x2de   : > { %v2194_v26 = vcombine.low %v18274_v31, %v18284_v3  ;;  %v18306_v17 = vrot.slane %v4953_v1, %v16361_v46  ;;  %v8620_v12 = vsel %vm7816_vm2, %v5417_v40, 0  ;;  %v1888_v56 = vcombine.low %v18042_v25, %v1848_v30 }
 0x2df   : > { %v1889_v58 = vcombine.high %v18042_v25, %v1848_v30  ;;  %14926 = vmatpush3.bf16.xpose.msra.mxu1 %v8620_v12  ;;  %v5122_v47 = vcombine.low %v18309_v51, %v18312_v61  ;;  %v1481_v37 = vcombine.high %v18081_v33, %v18163_v22  ;;  %v4280_v6 = vrot.slane %v4272_v59, %v16361_v46 }
 0x2e0   : > { %v3024_v0 = vpack.c.bf16 %v2194_v26, %v2058_v14  ;;  %v4986_v1 = vcombine.low %v18300_v57, %v18306_v17  ;;  %v4287_v62 = vrot.slane %v4273_v8, %v16361_v46  ;;  %v18328_v14 = vrot.slane %v1768_v18, %v16361_v46  ;;  %14937 = vmatprep.subr.bf16.mxu1 %v22726_v11  ;;  %v18347_v26 = vpop.permute.xlu0 %3160 }
 0x2e1   : > { %v1783_v25 = vrot.slane %v1769_v44, %v16361_v46  ;;  %v1904_v30 = vcombine.low %v18053_v41, %v1855_v2  ;;  %v1905_v10 = vcombine.high %v18053_v41, %v1855_v2  ;;  %v4296_v18 = vrot.slane %v4288_v42, %v16361_v46  ;;  %22902 = vst [vmem:[#allocation93_spill] sm:$0xff] %v18347_v26  ;;  %v18379_v60 = vpop.permute.xlu1 %5466  ;;  %v22914_v26 = vld [vmem:[#allocation65_spill] sm:$0xff] }
 0x2e2   : > { %14874 = vmatmul.mubr.msk.bf16.vlgmr.msra.gmra.mxu0 %vm7816_vm2, %v3024_v0  ;;  %v5410_v19 = vpack.c.bf16 %v5122_v47, %v4986_v1  ;;  %v4303_v54 = vrot.slane %v4289_v52, %v16361_v46  ;;  %v14309_v44 = vcombine.low %v1760_v16, %v1767_v49  ;;  %v1896_v41 = vrot.slane %v1888_v56, %v16361_v46 }
 0x2e3   : > { %14885 = vmatprep.mubr.msk.bf16.mxu0 %vm15971_vm1, %v22726_v11  ;;  %v1903_v40 = vrot.slane %v1889_v58, %v16361_v46  ;;  %v22903_v12 = vcombine.low %v18081_v33, %v18163_v22  ;;  %v18357_v42 = vrot.slane %v1481_v37, %v16361_v46  ;;  %v14381_v52 = vcombine.low %v4280_v6, %v4287_v62  ;;  %v22904_v33 = vld [vmem:[#allocation59_spill] sm:$0xff]  ;;  %v22905_v22 = vld [vmem:[#allocation60_spill] sm:$0xff] }
 0x2e4   : > { %v8291_v2 = vsel %vm7816_vm2, %v5410_v19, 0  ;;  %v14383_v1 = vcombine.high %v4280_v6, %v4287_v62  ;;  %v14311_v47 = vcombine.high %v1760_v16, %v1767_v49  ;;  %v14313_v56 = vcombine.low %v18328_v14, %v1783_v25  ;;  %v22907_v6 = vld [vmem:[#allocation61_spill] sm:$0xff]  ;;  %v22908_v62 = vld [vmem:[#allocation62_spill] sm:$0xff]  ;;  %22910 = vst [vmem:[#allocation52_spill] sm:$0xff] %v18379_v60 }
 0x2e5   : > { %v18354_v0 = vrot.slane %v22903_v12, %v16361_v46  ;;  %14884 = vmatpush3.bf16.xpose.msra.mxu0 %v8291_v2  ;;  %v1912_v58 = vrot.slane %v1904_v30, %v16361_v46  ;;  %v1919_v8 = vrot.slane %v1905_v10, %v16361_v46  ;;  %v14385_v19 = vcombine.low %v4296_v18, %v4303_v54 }
 0x2e6   : > { %14895 = vmatprep.subr.bf16.mxu0 %v22726_v11  ;;  %v14387_v59 = vcombine.high %v4296_v18, %v4303_v54  ;;  %v22906_v12 = vcombine.low %v22904_v33, %v22905_v22  ;;  %v22909_v16 = vcombine.low %v22907_v6, %v22908_v62  ;;  %v18376_v30 = vrot.slane %v14309_v44, %v16357_v39  ;;  %v22911_v18 = vld [vmem:[#allocation63_spill] sm:$0xff]  ;;  %v22912_v54 = vld [vmem:[#allocation64_spill] sm:$0xff] }
 0x2e7   : > { %v14315_v10 = vcombine.high %v18328_v14, %v1783_v25  ;;  %v14317_v2 = vcombine.low %v1896_v41, %v1903_v40  ;;  %v22913_v22 = vcombine.low %v22911_v18, %v22912_v54  ;;  %v14319_v33 = vcombine.high %v1896_v41, %v1903_v40  ;;  %v22915_v62 = vld [vmem:[#allocation67_spill] sm:$0xff] }
 0x2e8   : > { %v18367_v37 = vrot.slane %v22906_v12, %v16361_v46  ;;  %v18373_v49 = vrot.slane %v22909_v16, %v16361_v46  ;;  %v22916_v16 = vcombine.low %v22914_v26, %v22915_v62  ;;  %v22917_v14 = vcombine.low %v18015_v29, %v18018_v15  ;;  %v18411_v62 = vpop.permute.xlu0 %3184 }
 0x2e9   : > { %v18385_v12 = vrot.slane %v22913_v22, %v16361_v46  ;;  %v22919_v44 = vcombine.high %v18015_v29, %v18018_v15  ;;  %v18406_v41 = vrot.slane %v14311_v47, %v16357_v39  ;;  %v18409_v40 = vrot.slane %v14313_v56, %v16357_v39 }
 0x2ea   : > { %v18391_v6 = vrot.slane %v22916_v16, %v16361_v46  ;;  %v18397_v25 = vrot.slane %v22917_v14, %v16357_v39  ;;  %v14321_v22 = vcombine.low %v1912_v58, %v1919_v8  ;;  %v14323_v16 = vcombine.high %v1912_v58, %v1919_v8 }
 0x2eb   : > { %v18403_v54 = vrot.slane %v22919_v44, %v16357_v39  ;;  %22921 = vst [vmem:[#allocation88_spill] sm:$0xff] %v18409_v40  ;;  %v2332_v14 = vcombine.low %v18367_v37, %v18373_v49  ;;  %v22922_v29 = vcombine.low %v18021_v48, %v18024_v63  ;;  %v22924_v47 = vcombine.high %v18021_v48, %v18024_v63 }
 0x2ec   : > { %22918 = vst [vmem:[#allocation51_spill] sm:$0xff] %v18397_v25  ;;  %v2468_v26 = vcombine.low %v18385_v12, %v18391_v6  ;;  %v18430_v8 = vrot.slane %v14317_v2, %v16357_v39  ;;  %v18435_v44 = vrot.slane %v14381_v52, %v16357_v39  ;;  %v18438_v18 = vrot.slane %v14383_v1, %v16357_v39  ;;  %v18454_v52 = vpop.permute.xlu1 %5490 }
 0x2ed   : > { %22920 = vst [vmem:[#allocation96_spill] sm:$0xff] %v18403_v54  ;;  %v18421_v15 = vrot.slane %v22922_v29, %v16357_v39  ;;  %v18427_v56 = vrot.slane %v22924_v47, %v16357_v39  ;;  %v5208_v58 = vcombine.low %v18397_v25, %v18403_v54  ;;  %v18441_v29 = vrot.slane %v14319_v33, %v16357_v39  ;;  %v22944_v54 = vld [vmem:[#allocation115_spill] sm:$0xff] }
 0x2ee   : > { %22926 = vst [vmem:[#allocation35_spill] sm:$0xff] %v18430_v8  ;;  %22927 = vst [vmem:[#allocation100_spill] sm:$0xff] %v18435_v44  ;;  %v3033_v60 = vpack.c.bf16 %v2468_v26, %v2332_v14  ;;  %v18446_v63 = vrot.slane %v14385_v19, %v16357_v39  ;;  %v18449_v2 = vrot.slane %v14321_v22, %v16357_v39  ;;  %v22936_v19 = vld [vmem:[#allocation110_spill] sm:$0xff]  ;;  %v22937_v22 = vld [vmem:[#allocation111_spill] sm:$0xff] }
 0x2ef   : > { %22923 = vst [vmem:[#allocation45_spill] sm:$0xff] %v18421_v15  ;;  %22925 = vst [vmem:[#allocation107_spill] sm:$0xff] %v18427_v56  ;;  %v5240_v48 = vcombine.low %v18421_v15, %v18427_v56  ;;  %v18452_v47 = vrot.slane %v14323_v16, %v16357_v39  ;;  %v18457_v1 = vrot.slane %v14387_v59, %v16357_v39  ;;  %v22940_v16 = vld [vmem:[#allocation112_spill] sm:$0xff]  ;;  %v22941_v56 = vld [vmem:[#allocation113_spill] sm:$0xff] }
 0x2f0   : > { %22928 = vst [vmem:[#allocation17_spill] sm:$0xff] %v18438_v18  ;;  %22929 = vst [vmem:[#allocation101_spill] sm:$0xff] %v18441_v29  ;;  %v5344_v26 = vcombine.low %v18435_v44, %v18438_v18  ;;  %v18462_v33 = vrot.slane %v14315_v10, %v16357_v39  ;;  %14928 = vmatmul.mubr.msk.bf16.vlgmr.msra.gmra.mxu1 %vm7816_vm2, %v3033_v60  ;;  %v22938_v14 = vcombine.high %v22936_v19, %v22937_v22  ;;  %v22945_v44 = vld [vmem:[#allocation116_spill] sm:$0xff] }
 0x2f1   : > { %22930 = vst [vmem:[#allocation99_spill] sm:$0xff] %v18446_v63  ;;  %22931 = vst [vmem:[#allocation46_spill] sm:$0xff] %v18449_v2  ;;  %v22942_v25 = vcombine.high %v22940_v16, %v22941_v56  ;;  %v22946_v18 = vcombine.high %v22944_v54, %v22945_v44  ;;  %v18486_v60 = vrot.slane %v5208_v58, %v16361_v46  ;;  %14939 = vmatprep.mubr.msk.bf16.mxu1 %vm15971_vm1, %v22726_v11 }
 0x2f2   : > { %22932 = vst [vmem:[#allocation41_spill] sm:$0xff] %v18452_v47  ;;  %22933 = vst [vmem:[#allocation108_spill] sm:$0xff] %v18454_v52  ;;  %v18469_v15 = vrot.slane %v22938_v14, %v16361_v46  ;;  %v18483_v52 = vpop.permute.xlu0 %3208  ;;  %v18489_v19 = vrot.slane %v5240_v48, %v16361_v46  ;;  %v18492_v22 = vrot.slane %v5344_v26, %v16361_v46  ;;  %v22949_v48 = vld [vmem:[#allocation117_spill] sm:$0xff]  ;;  %v22950_v26 = vld [vmem:[#allocation118_spill] sm:$0xff] }
 0x2f3   : > { %22934 = vst [vmem:[#allocation109_spill] sm:$0xff] %v18457_v1  ;;  %22935 = vst [vmem:[#allocation16_spill] sm:$0xff] %v18462_v33  ;;  %v18475_v59 = vrot.slane %v22942_v25, %v16361_v46  ;;  %v18481_v10 = vrot.slane %v22946_v18, %v16361_v46  ;;  %v5376_v25 = vcombine.low %v18446_v63, %v18457_v1 }
 0x2f4   : > { %22939 = vst [vmem:[#allocation44_spill] sm:$0xff] %v18469_v15  ;;  %v22947_v18 = vcombine.low %v18084_v28, %v18166_v7  ;;  %v22948_v56 = vcombine.high %v18084_v28, %v18166_v7  ;;  %v2960_v44 = vcombine.low %v18430_v8, %v18441_v29  ;;  %v22951_v14 = vcombine.high %v22949_v48, %v22950_v26 }
 0x2f5   : > { %22943 = vst [vmem:[#allocation42_spill] sm:$0xff] %v18475_v59  ;;  %v2992_v63 = vcombine.low %v18449_v2, %v18452_v47  ;;  %v18517_v1 = vrot.slane %v5376_v25, %v16361_v46  ;;  %v4579_v28 = vcombine.high %v18126_v34, %v18129_v13  ;;  %v2824_v7 = vcombine.low %v18376_v30, %v18406_v41 }
 0x2f6   : > { %v1504_v54 = vrot.slane %v22947_v18, %v16361_v46  ;;  %v1511_v58 = vrot.slane %v22948_v56, %v16361_v46  ;;  %v18512_v16 = vrot.slane %v22951_v14, %v16361_v46  ;;  %v4443_v18 = vcombine.high %v18106_v20, %v18120_v9  ;;  %v18533_v14 = vpop.permute.xlu1 %3138 }
 0x2f7   : > { %v2856_v56 = vcombine.low %v18409_v40, %v18462_v33  ;;  %v2602_v48 = vcombine.low %v18469_v15, %v18475_v59  ;;  %v14307_v25 = vcombine.high %v17997_v36, %v18000_v55  ;;  %22952 = vst [vmem:[#allocation104_spill] sm:$0xff] %v18533_v14  ;;  %v5260_v20 = vcombine.low %v18486_v60, %v18489_v19  ;;  %v18549_v40 = vpop.permute.xlu0 %5442 }
 0x2f8   : > { %v2738_v26 = vcombine.low %v18481_v10, %v18512_v16  ;;  %v5396_v9 = vcombine.low %v18492_v22, %v18517_v1  ;;  %v5412_v34 = vpack.c.bf16 %v4579_v28, %v4443_v18  ;;  %v22953_v13 = vcombine.low %v17986_v32, %v17994_v27  ;;  %22954 = vst [vmem:[#allocation78_spill] sm:$0xff] %v18549_v40 }
 0x2f9   : > { %v14293_v47 = vcombine.low %v18354_v0, %v18357_v42  ;;  %v14295_v8 = vcombine.high %v18354_v0, %v18357_v42  ;;  %v14297_v14 = vcombine.low %v1504_v54, %v1511_v58  ;;  %v18552_v15 = vrot.slane %v2960_v44, %v16361_v46 }
 0x2fa   : > { %v18543_v2 = vrot.slane %v22953_v13, %v16357_v39  ;;  %v3026_v29 = vpack.c.bf16 %v2738_v26, %v2602_v48  ;;  %v5419_v33 = vpack.c.bf16 %v5396_v9, %v5260_v20  ;;  %v18555_v18 = vrot.slane %v2992_v63, %v16361_v46  ;;  %v22959_v48 = vld [vmem:[#allocation85_spill] sm:$0xff]  ;;  %v23000_v9 = vld [vmem:[#allocation46_spill] sm:$0xff] }
 0x2fb   : > { %v14299_v28 = vcombine.high %v1504_v54, %v1511_v58  ;;  %v8385_v13 = vsel %vm7816_vm2, %v5412_v34, 0  ;;  %v18560_v59 = vrot.slane %v2824_v7, %v16361_v46  ;;  %v18563_v0 = vrot.slane %v2856_v56, %v16361_v46  ;;  %v18613_v56 = vpop.permute.xlu0 %5488  ;;  %v22960_v34 = vld [vmem:[#allocation49_spill] sm:$0xff] }
 0x2fc   : > { %14886 = vmatmul.mubr.msk.bf16.vlgmr.msra.gmra.mxu0 %vm7816_vm2, %v3026_v29  ;;  %v22955_v42 = vcombine.high %v17986_v32, %v17994_v27  ;;  %v8714_v63 = vsel %vm7816_vm2, %v5419_v33, 0  ;;  %v4853_v29 = vcombine.high %v18257_v50, %v18260_v21  ;;  %v2059_v54 = vcombine.high %v18254_v4, %v18266_v53  ;;  %v18593_v50 = vpop.permute.xlu1 %3162  ;;  %22958 = vst [vmem:[#allocation76_spill] sm:$0xff] %v18613_v56  ;;  %v23009_v56 = vld [vmem:[#allocation102_spill] sm:$0xff] }
 0x2fd   : > { %14896 = vmatpush3.bf16.xpose.msra.mxu0 %v8385_v13  ;;  %14897 = vmatprep.mubr.msk.bf16.mxu0 %vm15971_vm1, %v22726_v11  ;;  %v22956_v58 = vcombine.low %v17997_v36, %v18000_v55  ;;  %v18585_v32 = vrot.slane %v14307_v25, %v16357_v39  ;;  %v18588_v27 = vrot.slane %v14293_v47, %v16357_v39 }
 0x2fe   : > { %v18569_v44 = vrot.slane %v22955_v42, %v16357_v39  ;;  %v18591_v21 = vrot.slane %v14295_v8, %v16357_v39  ;;  %14938 = vmatpush3.bf16.xpose.msra.mxu1 %v8714_v63  ;;  %v3012_v53 = vcombine.low %v18552_v15, %v18555_v18  ;;  %v4717_v36 = vcombine.high %v18232_v23, %v18235_v24  ;;  %v22993_v42 = vld [vmem:[#allocation26_spill] sm:$0xff] }
 0x2ff   : > { %v18582_v7 = vrot.slane %v22956_v58, %v16357_v39  ;;  %14949 = vmatprep.subr.bf16.mxu1 %v22726_v11  ;;  %v2195_v55 = vcombine.high %v18274_v31, %v18284_v3  ;;  %14907 = vmatprep.subr.bf16.mxu0 %v22726_v11  ;;  %v14335_v4 = vcombine.high %v17937_v35, %v17983_v45 }
 0x300   : > { %v18606_v8 = vrot.slane %v14297_v14, %v16357_v39  ;;  %v18609_v47 = vrot.slane %v14299_v28, %v16357_v39  ;;  %v2876_v33 = vcombine.low %v18560_v59, %v18563_v0  ;;  %v5421_v23 = vpack.c.bf16 %v4853_v29, %v4717_v36  ;;  %v18642_v63 = vpop.permute.xlu1 %3186 }
 0x301   : > { %v3028_v24 = vpack.c.bf16 %v2195_v55, %v2059_v54  ;;  %v4987_v31 = vcombine.high %v18300_v57, %v18306_v17  ;;  %v5123_v3 = vcombine.high %v18309_v51, %v18312_v61  ;;  %v14337_v26 = vcombine.low %v22959_v48, %v18027_v43  ;;  %v22988_v57 = vld [vmem:[#allocation22_spill] sm:$0xff] }
 0x302   : > { %22957 = vst [vmem:[#allocation77_spill] sm:$0xff] %v18609_v47  ;;  %v14339_v25 = vcombine.high %v22959_v48, %v18027_v43  ;;  %v3035_v17 = vpack.c.bf16 %v3012_v53, %v2876_v33  ;;  %v5608_v28 = vcombine.low %v22960_v34, %v18334_v5  ;;  %v5609_v13 = vcombine.high %v22960_v34, %v18334_v5  ;;  %v22961_v53 = vld [vmem:[#allocation93_spill] sm:$0xff]  ;;  %v18657_v33 = vpop.permute.xlu0 %5444 }
 0x303   : > { %v5414_v51 = vpack.c.bf16 %v5123_v3, %v4987_v31  ;;  %v8808_v29 = vsel %vm7816_vm2, %v5421_v23, 0  ;;  %v5397_v58 = vcombine.high %v18492_v22, %v18517_v1  ;;  %v3800_v5 = vcombine.low %v18302_v38, %v18411_v62  ;;  %v22962_v31 = vld [vmem:[#allocation120_spill] sm:$0xff]  ;;  %v22963_v3 = vld [vmem:[#allocation86_spill] sm:$0xff] }
 0x304   : > { %14898 = vmatmul.mubr.msk.bf16.vlgmr.msra.gmra.mxu0 %vm7816_vm2, %v3028_v24  ;;  %v3816_v36 = vcombine.low %v22961_v53, %v18483_v52  ;;  %v3817_v55 = vcombine.high %v22961_v53, %v18483_v52  ;;  %v2469_v1 = vcombine.high %v18385_v12, %v18391_v6  ;;  %v5261_v22 = vcombine.high %v18486_v60, %v18489_v19  ;;  %v22992_v53 = vld [vmem:[#allocation27_spill] sm:$0xff] }
 0x305   : > { %14940 = vmatmul.mubr.msk.bf16.vlgmr.msra.gmra.mxu1 %vm7816_vm2, %v3035_v17  ;;  %v8479_v54 = vsel %vm7816_vm2, %v5414_v51, 0  ;;  %14909 = vmatprep.mubr.msk.bf16.mxu0 %vm15971_vm1, %v22726_v11  ;;  %v2739_v23 = vcombine.high %v18481_v10, %v18512_v16  ;;  %v3801_v52 = vcombine.high %v18302_v38, %v18411_v62  ;;  %v2333_v24 = vcombine.high %v18367_v37, %v18373_v49  ;;  %v22968_v16 = vld [vmem:[#allocation42_spill] sm:$0xff]  ;;  %v22969_v38 = vld [vmem:[#allocation44_spill] sm:$0xff]  ;;  %v22971_v49 = vld [vmem:[#allocation87_spill] sm:$0xff] }
 0x306   : > { %14950 = vmatpush3.bf16.xpose.msra.mxu1 %v8808_v29  ;;  %14908 = vmatpush3.bf16.xpose.msra.mxu0 %v8479_v54  ;;  %v22964_v6 = vcombine.low %v22962_v31, %v22963_v3  ;;  %v22966_v60 = vcombine.high %v22962_v31, %v22963_v3  ;;  %v5423_v10 = vpack.c.bf16 %v5397_v58, %v5261_v22  ;;  %v22970_v37 = vld [vmem:[#allocation82_spill] sm:$0xff]  ;;  %v22976_v29 = vld [vmem:[#allocation16_spill] sm:$0xff] }
 0x307   : > { %14951 = vmatprep.mubr.msk.bf16.mxu1 %vm15971_vm1, %v22726_v11  ;;  %14961 = vmatprep.subr.bf16.mxu1 %v22726_v11  ;;  %v2603_v62 = vcombine.high %v22969_v38, %v22968_v16  ;;  %v22972_v48 = vcombine.low %v22970_v37, %v22971_v49  ;;  %v22974_v51 = vcombine.high %v22970_v37, %v22971_v49  ;;  %v22977_v54 = vld [vmem:[#allocation88_spill] sm:$0xff] }
 0x308   : > { %14919 = vmatprep.subr.bf16.mxu0 %v22726_v11  ;;  %v18677_v12 = vrot.slane %v22964_v6, %v16357_v39  ;;  %v18683_v19 = vrot.slane %v22966_v60, %v16357_v39  ;;  %v18702_v58 = vrot.slane %v5608_v28, %v16357_v39  ;;  %v18705_v22 = vrot.slane %v3816_v36, %v16357_v39  ;;  %v3211_v60 = vpop.permute.xlu1 %3210 }
 0x309   : > { %v18691_v17 = vrot.slane %v22972_v48, %v16357_v39  ;;  %v18697_v34 = vrot.slane %v22974_v51, %v16357_v39  ;;  %v22979_v31 = vcombine.low %v17937_v35, %v17983_v45  ;;  %v18714_v6 = vrot.slane %v3817_v55, %v16357_v39 }
 0x30a   : > { %22965 = vst [vmem:[#allocation74_spill] sm:$0xff] %v18677_v12  ;;  %22967 = vst [vmem:[#allocation43_spill] sm:$0xff] %v18683_v19  ;;  %v3037_v16 = vpack.c.bf16 %v2469_v1, %v2333_v24  ;;  %v3030_v38 = vpack.c.bf16 %v2739_v23, %v2603_v62  ;;  %v18717_v37 = vrot.slane %v14335_v4, %v16357_v39  ;;  %v18735_v62 = vpop.permute.xlu0 %5468  ;;  %v22990_v24 = vld [vmem:[#allocation24_spill] sm:$0xff] }
 0x30b   : > { %22973 = vst [vmem:[#allocation18_spill] sm:$0xff] %v18691_v17  ;;  %22975 = vst [vmem:[#allocation90_spill] sm:$0xff] %v18697_v34  ;;  %v18711_v3 = vrot.slane %v22979_v31, %v16357_v39  ;;  %v18720_v28 = vrot.slane %v5609_v13, %v16357_v39  ;;  %v4392_v36 = vcombine.low %v18677_v12, %v18683_v19  ;;  %v8902_v13 = vsel %vm7816_vm2, %v5423_v10, 0  ;;  %v23045_v12 = vld [vmem:[#allocation99_spill] sm:$0xff] }
 0x30c   : > { %22978 = vst [vmem:[#allocation89_spill] sm:$0xff] %v18702_v58  ;;  %22981 = vst [vmem:[#allocation91_spill] sm:$0xff] %v18717_v37  ;;  %v4424_v35 = vcombine.low %v18691_v17, %v18697_v34  ;;  %v18727_v45 = vrot.slane %v14337_v26, %v16357_v39  ;;  %v3808_v55 = vrot.slane %v3800_v5, %v16357_v39  ;;  %v22989_v26 = vld [vmem:[#allocation21_spill] sm:$0xff]  ;;  %v23005_v58 = vld [vmem:[#allocation71_spill] sm:$0xff] }
 0x30d   : > { %22980 = vst [vmem:[#allocation92_spill] sm:$0xff] %v18711_v3  ;;  %22982 = vst [vmem:[#allocation95_spill] sm:$0xff] %v18720_v28  ;;  %v18731_v1 = vrot.slane %v3801_v52, %v16357_v39  ;;  %14952 = vmatmul.mubr.msk.bf16.vlgmr.msra.gmra.mxu1 %vm7816_vm2, %v3037_v16  ;;  %14910 = vmatmul.mubr.msk.bf16.vlgmr.msra.gmra.mxu0 %vm7816_vm2, %v3030_v38  ;;  %v3952_v49 = vcombine.low %v18593_v50, %v3211_v60  ;;  %v23039_v17 = vld [vmem:[#allocation51_spill] sm:$0xff] }
 0x30e   : > { %22983 = vst [vmem:[#allocation94_spill] sm:$0xff] %v18727_v45  ;;  %14962 = vmatpush3.bf16.xpose.msra.mxu1 %v8902_v13  ;;  %v18744_v5 = vrot.slane %v14339_v25, %v16357_v39  ;;  %v4528_v52 = vcombine.low %v18711_v3, %v18717_v37  ;;  %v3864_v48 = vcombine.low %v3808_v55, %v18705_v22 }
 0x30f   : > { %v3865_v51 = vcombine.high %v3808_v55, %v18705_v22  ;;  %v3880_v10 = vcombine.low %v18731_v1, %v18714_v6  ;;  %v3953_v31 = vcombine.high %v18593_v50, %v3211_v60  ;;  %14963 = vmatprep.mubr.msk.bf16.mxu1 %vm15971_vm1, %v22726_v11  ;;  %v18756_v16 = vrot.slane %v4392_v36, %v16361_v46  ;;  %v22987_v55 = vld [vmem:[#allocation104_spill] sm:$0xff] }
 0x310   : > { %22986 = vst [vmem:[#allocation98_spill] sm:$0xff] %v18744_v5  ;;  %v18759_v25 = vrot.slane %v4424_v35, %v16361_v46  ;;  %v18762_v38 = vrot.slane %v4528_v52, %v16361_v46  ;;  %v4560_v22 = vcombine.low %v18727_v45, %v18744_v5  ;;  %14973 = vmatprep.subr.bf16.mxu1 %v22726_v11  ;;  %v23023_v5 = vld [vmem:[#allocation59_spill] sm:$0xff] }
 0x311   : > { %v3936_v50 = vcombine.low %v22987_v55, %v18642_v63  ;;  %v3937_v60 = vcombine.high %v22987_v55, %v18642_v63  ;;  %v2877_v36 = vcombine.high %v18560_v59, %v18563_v0  ;;  %v3013_v35 = vcombine.high %v18552_v15, %v18555_v18  ;;  %14921 = vmatprep.mubr.msk.bf16.mxu0 %vm15971_vm1, %v22726_v11  ;;  %v5493_v55 = vpop.permute.xlu0 %5492  ;;  %v22991_v15 = vld [vmem:[#allocation23_spill] sm:$0xff] }
 0x312   : > { %v3881_v13 = vcombine.high %v18731_v1, %v18714_v6  ;;  %v3960_v52 = vrot.slane %v3952_v49, %v16357_v39  ;;  %v18781_v43 = vrot.slane %v4560_v22, %v16361_v46  ;;  %v4665_v63 = vcombine.high %v22989_v26, %v22988_v57  ;;  %v22994_v57 = vld [vmem:[#allocation29_spill] sm:$0xff]  ;;  %v22995_v26 = vld [vmem:[#allocation28_spill] sm:$0xff] }
 0x313   : > { %v3967_v59 = vrot.slane %v3953_v31, %v16357_v39  ;;  %v3039_v0 = vpack.c.bf16 %v3013_v35, %v2877_v36  ;;  %v4697_v18 = vcombine.high %v22991_v15, %v22990_v24  ;;  %v4801_v20 = vcombine.high %v22993_v42, %v22992_v53  ;;  %v22996_v24 = vld [vmem:[#allocation47_spill] sm:$0xff] }
 0x314   : > { %v4444_v6 = vcombine.low %v18756_v16, %v18759_v25  ;;  %v4580_v1 = vcombine.low %v18762_v38, %v18781_v43  ;;  %v18795_v49 = vrot.slane %v4665_v63, %v16361_v46  ;;  %v4833_v22 = vcombine.high %v22995_v26, %v22994_v57  ;;  %v18817_v26 = vpop.permute.xlu1 %5446 }
 0x315   : > { %v3944_v31 = vrot.slane %v3936_v50, %v16357_v39  ;;  %v3951_v36 = vrot.slane %v3937_v60, %v16357_v39  ;;  %14964 = vmatmul.mubr.msk.bf16.vlgmr.msra.gmra.mxu1 %vm7816_vm2, %v3039_v0  ;;  %v18803_v42 = vrot.slane %v4697_v18, %v16361_v46  ;;  %v18806_v53 = vrot.slane %v4801_v20, %v16361_v46 }
 0x316   : > { %v5880_v35 = vcombine.low %v22996_v24, %v18735_v62  ;;  %v5896_v63 = vcombine.low %v18657_v33, %v5493_v55  ;;  %v5416_v15 = vpack.c.bf16 %v4580_v1, %v4444_v6  ;;  %v18812_v57 = vrot.slane %v4833_v22, %v16361_v46  ;;  %14975 = vmatprep.mubr.msk.bf16.mxu1 %vm15971_vm1, %v22726_v11  ;;  %v22997_v1 = vld [vmem:[#allocation101_spill] sm:$0xff]  ;;  %v22998_v22 = vld [vmem:[#allocation35_spill] sm:$0xff] }
 0x317   : > { %v5897_v50 = vcombine.high %v18657_v33, %v5493_v55  ;;  %v4000_v60 = vcombine.low %v3944_v31, %v3960_v52  ;;  %v4001_v0 = vcombine.high %v3944_v31, %v3960_v52  ;;  %v4016_v18 = vcombine.low %v3951_v36, %v3967_v59 }
 0x318   : > { %v4017_v20 = vcombine.high %v3951_v36, %v3967_v59  ;;  %v8573_v14 = vsel %vm7816_vm2, %v5416_v15, 0  ;;  %v4718_v61 = vcombine.low %v18795_v49, %v18803_v42  ;;  %v4854_v6 = vcombine.low %v18806_v53, %v18812_v57  ;;  %v22999_v15 = vld [vmem:[#allocation41_spill] sm:$0xff] }
 0x319   : > { %v3872_v28 = vrot.slane %v3864_v48, %v16361_v46  ;;  %v3879_v33 = vrot.slane %v3865_v51, %v16361_v46  ;;  %v3888_v52 = vrot.slane %v3880_v10, %v16361_v46  ;;  %14920 = vmatpush3.bf16.xpose.msra.mxu0 %v8573_v14  ;;  %v3895_v55 = vrot.slane %v3881_v13, %v16361_v46 }
 0x31a   : > { %v5881_v59 = vcombine.high %v22996_v24, %v18735_v62  ;;  %v18833_v31 = vrot.slane %v5896_v63, %v16357_v39  ;;  %v5425_v36 = vpack.c.bf16 %v4854_v6, %v4718_v61  ;;  %14931 = vmatprep.subr.bf16.mxu0 %v22726_v11  ;;  %v18839_v48 = vrot.slane %v5880_v35, %v16357_v39  ;;  %v18851_v35 = vpop.permute.xlu1 %5470 }
 0x31b   : > { %v4008_v51 = vrot.slane %v4000_v60, %v16361_v46  ;;  %v4015_v14 = vrot.slane %v4001_v0, %v16361_v46  ;;  %v18844_v10 = vrot.slane %v5897_v50, %v16357_v39  ;;  %v4024_v62 = vrot.slane %v4016_v18, %v16361_v46  ;;  %v23002_v60 = vld [vmem:[#allocation69_spill] sm:$0xff]  ;;  %v23003_v0 = vld [vmem:[#allocation70_spill] sm:$0xff] }
 0x31c   : > { %v4031_v13 = vrot.slane %v4017_v20, %v16361_v46  ;;  %v8996_v61 = vsel %vm7816_vm2, %v5425_v36, 0  ;;  %v14357_v24 = vcombine.low %v3872_v28, %v3879_v33  ;;  %v14359_v63 = vcombine.high %v3872_v28, %v3879_v33 }
 0x31d   : > { %14974 = vmatpush3.bf16.xpose.msra.mxu1 %v8996_v61  ;;  %v23004_v23 = vcombine.low %v23002_v60, %v23003_v0  ;;  %v14361_v4 = vcombine.low %v3888_v52, %v3895_v55  ;;  %v14363_v18 = vcombine.high %v3888_v52, %v3895_v55  ;;  %v18860_v20 = vrot.slane %v5881_v59, %v16357_v39  ;;  %v23006_v0 = vld [vmem:[#allocation72_spill] sm:$0xff] }
 0x31e   : > { %v5944_v28 = vcombine.low %v18839_v48, %v18833_v31  ;;  %14985 = vmatprep.subr.bf16.mxu1 %v22726_v11  ;;  %v5945_v33 = vcombine.high %v18839_v48, %v18833_v31  ;;  %v14365_v36 = vcombine.low %v4008_v51, %v4015_v14  ;;  %v14367_v61 = vcombine.high %v4008_v51, %v4015_v14  ;;  %v23008_v59 = vld [vmem:[#allocation80_spill] sm:$0xff]  ;;  %v23011_v31 = vld [vmem:[#allocation103_spill] sm:$0xff]  ;;  %v23012_v48 = vld [vmem:[#allocation105_spill] sm:$0xff] }
 0x31f   : > { %v18857_v50 = vrot.slane %v23004_v23, %v16361_v46  ;;  %v23007_v23 = vcombine.low %v23005_v58, %v23006_v0  ;;  %v5960_v52 = vcombine.low %v18860_v20, %v18844_v10  ;;  %v14369_v55 = vcombine.low %v4024_v62, %v4031_v13 }
 0x320   : > { %v23010_v40 = vcombine.low %v23008_v59, %v23009_v56  ;;  %v23013_v51 = vcombine.low %v23011_v31, %v23012_v48  ;;  %v14371_v0 = vcombine.high %v4024_v62, %v4031_v13  ;;  %v18892_v45 = vrot.slane %v14357_v24, %v16357_v39  ;;  %v23018_v62 = vld [vmem:[#allocation54_spill] sm:$0xff]  ;;  %v5495_v24 = vpop.permute.xlu1 %5494 }
 0x321   : > { %v18871_v60 = vrot.slane %v23007_v23, %v16361_v46  ;;  %v5961_v23 = vcombine.high %v18860_v20, %v18844_v10  ;;  %v18897_v56 = vrot.slane %v14359_v63, %v16357_v39  ;;  %v18900_v48 = vrot.slane %v14361_v4, %v16357_v39 }
 0x322   : > { %v18879_v6 = vrot.slane %v23010_v40, %v16361_v46  ;;  %v18885_v14 = vrot.slane %v23013_v51, %v16361_v46  ;;  %23014 = vst [vmem:[#allocation97_spill] sm:$0xff] %v18892_v45  ;;  %v18903_v51 = vrot.slane %v14363_v18, %v16357_v39  ;;  %v18906_v10 = vrot.slane %v5944_v28, %v16361_v46 }
 0x323   : > { %v2060_v58 = vcombine.low %v18857_v50, %v18871_v60  ;;  %23015 = vst [vmem:[#allocation114_spill] sm:$0xff] %v18897_v56  ;;  %23016 = vst [vmem:[#allocation25_spill] sm:$0xff] %v18900_v48  ;;  %v6016_v13 = vcombine.low %v23018_v62, %v18851_v35  ;;  %v18911_v20 = vrot.slane %v14365_v36, %v16357_v39 }
 0x324   : > { %v2196_v40 = vcombine.low %v18879_v6, %v18885_v14  ;;  %23017 = vst [vmem:[#allocation58_spill] sm:$0xff] %v18903_v51  ;;  %v18914_v31 = vrot.slane %v14367_v61, %v16357_v39  ;;  %v4936_v4 = vcombine.low %v18892_v45, %v18897_v56  ;;  %v4968_v18 = vcombine.low %v18900_v48, %v18903_v51  ;;  %v23024_v61 = vld [vmem:[#allocation60_spill] sm:$0xff]  ;;  %v23028_v45 = vld [vmem:[#allocation62_spill] sm:$0xff] }
 0x325   : > { %23019 = vst [vmem:[#allocation81_spill] sm:$0xff] %v18911_v20  ;;  %v18921_v28 = vrot.slane %v14369_v55, %v16357_v39  ;;  %v18924_v59 = vrot.slane %v14371_v0, %v16357_v39  ;;  %v23025_v3 = vcombine.high %v23023_v5, %v23024_v61  ;;  %v6032_v55 = vcombine.low %v18817_v26, %v5495_v24  ;;  %v23036_v61 = vld [vmem:[#allocation67_spill] sm:$0xff] }
 0x326   : > { %23020 = vst [vmem:[#allocation68_spill] sm:$0xff] %v18914_v31  ;;  %v3032_v63 = vpack.c.bf16 %v2196_v40, %v2060_v58  ;;  %v5072_v36 = vcombine.low %v18911_v20, %v18914_v31  ;;  %v23027_v40 = vld [vmem:[#allocation61_spill] sm:$0xff]  ;;  %v18943_v0 = vrot.slane %v4936_v4, %v16361_v46  ;;  %v23031_v20 = vld [vmem:[#allocation63_spill] sm:$0xff]  ;;  %v23032_v31 = vld [vmem:[#allocation64_spill] sm:$0xff] }
 0x327   : > { %23021 = vst [vmem:[#allocation119_spill] sm:$0xff] %v18921_v28  ;;  %23022 = vst [vmem:[#allocation106_spill] sm:$0xff] %v18924_v59  ;;  %v18932_v58 = vrot.slane %v23025_v3, %v16361_v46  ;;  %v23029_v56 = vcombine.high %v23027_v40, %v23028_v45  ;;  %v23033_v51 = vcombine.high %v23031_v20, %v23032_v31  ;;  %v23035_v3 = vld [vmem:[#allocation65_spill] sm:$0xff]  ;;  %v23038_v40 = vld [vmem:[#allocation96_spill] sm:$0xff] }
 0x328   : > { %14922 = vmatmul.mubr.msk.bf16.vlgmr.msra.gmra.mxu0 %vm7816_vm2, %v3032_v63  ;;  %v23037_v37 = vcombine.high %v23035_v3, %v23036_v61  ;;  %v18961_v63 = vrot.slane %v5072_v36, %v16361_v46  ;;  %v5104_v4 = vcombine.low %v18921_v28, %v18924_v59  ;;  %v5209_v31 = vcombine.high %v23039_v17, %v23038_v40  ;;  %v23040_v20 = vld [vmem:[#allocation107_spill] sm:$0xff]  ;;  %v23042_v36 = vld [vmem:[#allocation17_spill] sm:$0xff]  ;;  %v23043_v61 = vld [vmem:[#allocation100_spill] sm:$0xff] }
 0x329   : > { %23026 = vst [vmem:[#allocation31_spill] sm:$0xff] %v18932_v58  ;;  %v18938_v48 = vrot.slane %v23029_v56, %v16361_v46  ;;  %v18949_v5 = vrot.slane %v23033_v51, %v16361_v46  ;;  %v18958_v56 = vrot.slane %v4968_v18, %v16361_v46  ;;  %14933 = vmatprep.mubr.msk.bf16.mxu0 %vm15971_vm1, %v22726_v11  ;;  %v23041_v18 = vld [vmem:[#allocation45_spill] sm:$0xff] }
 0x32a   : > { %v18955_v45 = vrot.slane %v23037_v37, %v16361_v46  ;;  %v5241_v3 = vcombine.high %v23041_v18, %v23040_v20  ;;  %v5345_v34 = vcombine.high %v23043_v61, %v23042_v36  ;;  %v6033_v28 = vcombine.high %v18817_v26, %v5495_v24  ;;  %v23044_v40 = vld [vmem:[#allocation109_spill] sm:$0xff]  ;;  %v18993_v18 = vpop.f32.mrf.mxu1 }
 0x32b   : > { %23030 = vst [vmem:[#allocation32_spill] sm:$0xff] %v18938_v48  ;;  %23034 = vst [vmem:[#allocation33_spill] sm:$0xff] %v18949_v5  ;;  %v2334_v51 = vcombine.low %v18932_v58, %v18938_v48  ;;  %v18979_v59 = vrot.slane %v5104_v4, %v16361_v46  ;;  %v18982_v17 = vrot.slane %v5209_v31, %v16361_v46 }
 0x32c   : > { %v2470_v37 = vcombine.low %v18949_v5, %v18955_v45  ;;  %v5377_v58 = vcombine.high %v23045_v12, %v23044_v40  ;;  %v6040_v48 = vrot.slane %v6032_v55, %v16357_v39  ;;  %v18988_v5 = vrot.slane %v5241_v3, %v16361_v46 }
 0x32d   : > { %v18991_v20 = vrot.slane %v5345_v34, %v16361_v46  ;;  %v5959_v26 = vrot.slane %v5945_v33, %v16361_v46  ;;  %v4988_v24 = vcombine.low %v18943_v0, %v18958_v56  ;;  %v5124_v4 = vcombine.low %v18961_v63, %v18979_v59 }
 0x32e   : > { %v3041_v19 = vpack.c.bf16 %v2470_v37, %v2334_v51  ;;  %v19001_v12 = vrot.slane %v5377_v58, %v16361_v46  ;;  %v19004_v55 = vrot.slane %v5960_v52, %v16361_v46  ;;  %v6024_v31 = vrot.slane %v6016_v13, %v16357_v39  ;;  %v14827_v58 = vpop.f32.mrf.mxu1 }
 0x32f   : > { %v23046_v34 = vcombine.low %v18588_v27, %v18591_v21  ;;  %v23047_v51 = vcombine.low %v18606_v8, %v18609_v47  ;;  %v19021_v52 = vrot.slane %v5961_v23, %v16361_v46  ;;  %v5418_v3 = vpack.c.bf16 %v5124_v4, %v4988_v24 }
 0x330   : > { %14976 = vmatmul.mubr.msk.bf16.vlgmr.msra.gmra.mxu1 %vm7816_vm2, %v3041_v19  ;;  %v5262_v19 = vcombine.low %v18982_v17, %v18988_v5  ;;  %v5398_v13 = vcombine.low %v18991_v20, %v19001_v12  ;;  %v6017_v36 = vcombine.high %v23018_v62, %v18851_v35  ;;  %v6047_v61 = vrot.slane %v6033_v28, %v16357_v39  ;;  %v19038_v4 = vpop.f32.mrf.mxu1 }
 0x331   : > { %v19012_v33 = vrot.slane %v23046_v34, %v16361_v46  ;;  %v19018_v37 = vrot.slane %v23047_v51, %v16361_v46  ;;  %14987 = vmatprep.mubr.msk.bf16.mxu1 %vm15971_vm1, %v22726_v11  ;;  %v6080_v40 = vcombine.low %v6024_v31, %v6040_v48  ;;  %v23048_v23 = vcombine.low %v18543_v2, %v18569_v44 }
 0x332   : > { %v8667_v34 = vsel %vm7816_vm2, %v5418_v3, 0  ;;  %v5427_v51 = vpack.c.bf16 %v5398_v13, %v5262_v19  ;;  %v23049_v58 = vcombine.low %v18582_v7, %v18585_v32  ;;  %v4581_v35 = vcombine.high %v18762_v38, %v18781_v43  ;;  %v14828_v13 = vpop.f32.mrf.mxu1 }
 0x333   : > { %v19036_v24 = vrot.slane %v23048_v23, %v16361_v46  ;;  %v6081_v62 = vcombine.high %v6024_v31, %v6040_v48  ;;  %14932 = vmatpush3.bf16.xpose.msra.mxu0 %v8667_v34  ;;  %v2604_v28 = vcombine.low %v19012_v33, %v19018_v37  ;;  %v4445_v23 = vcombine.high %v18756_v16, %v18759_v25 }
 0x334   : > { %v19045_v47 = vrot.slane %v23049_v58, %v16361_v46  ;;  %v23050_v3 = vcombine.high %v18376_v30, %v18406_v41  ;;  %v9090_v58 = vsel %vm7816_vm2, %v5427_v51, 0  ;;  %14943 = vmatprep.subr.bf16.mxu0 %v22726_v11  ;;  %v23051_v43 = vcombine.high %v22977_v54, %v22976_v29  ;;  %v19084_v34 = vpop.f32.mrf.mxu1 }
 0x335   : > { %v23052_v16 = vcombine.high %v22998_v22, %v22997_v1  ;;  %v23053_v30 = vcombine.high %v23000_v9, %v22999_v15  ;;  %v14404_v48 = vcombine.low %v18906_v10, %v5959_v26  ;;  %v14406_v31 = vcombine.high %v18906_v10, %v5959_v26  ;;  %14986 = vmatpush3.bf16.xpose.msra.mxu1 %v9090_v58 }
 0x336   : > { %v19057_v19 = vrot.slane %v23050_v3, %v16361_v46  ;;  %v19065_v38 = vrot.slane %v23051_v43, %v16361_v46  ;;  %v14408_v29 = vcombine.low %v19004_v55, %v19021_v52  ;;  %v6031_v54 = vrot.slane %v6017_v36, %v16357_v39  ;;  %14997 = vmatprep.subr.bf16.mxu1 %v22726_v11  ;;  %v14833_v3 = vpop.f32.mrf.mxu1 }
 0x337   : > { %v19071_v25 = vrot.slane %v23052_v16, %v16361_v46  ;;  %v19077_v41 = vrot.slane %v23053_v30, %v16361_v46  ;;  %v14410_v1 = vcombine.high %v19004_v55, %v19021_v52  ;;  %v2740_v9 = vcombine.low %v19036_v24, %v19045_v47  ;;  %v23062_v3 = vld [vmem:[#allocation90_spill] sm:$0xff] }
 0x338   : > { %v5420_v22 = vpack.c.bf16 %v4581_v35, %v4445_v23  ;;  %v6096_v10 = vcombine.low %v6031_v54, %v6047_v61  ;;  %v6097_v26 = vcombine.high %v6031_v54, %v6047_v61  ;;  %v4719_v36 = vcombine.high %v18795_v49, %v18803_v42  ;;  %v19107_v49 = vpop.f32.mrf.mxu1 }
 0x339   : > { %v3014_v15 = vcombine.low %v19071_v25, %v19077_v41  ;;  %v4855_v51 = vcombine.high %v18806_v53, %v18812_v57  ;;  %v6088_v55 = vrot.slane %v6080_v40, %v16361_v46  ;;  %v6095_v52 = vrot.slane %v6081_v62, %v16361_v46 }
 0x33a   : > { %v3034_v13 = vpack.c.bf16 %v2740_v9, %v2604_v28  ;;  %v2878_v35 = vcombine.low %v19057_v19, %v19065_v38  ;;  %v19102_v23 = vrot.slane %v14404_v48, %v16357_v39  ;;  %v19105_v61 = vrot.slane %v14406_v31, %v16357_v39  ;;  %v14834_v16 = vpop.f32.mrf.mxu1 }
 0x33b   : > { %v5429_v58 = vpack.c.bf16 %v4855_v51, %v4719_v36  ;;  %v19110_v42 = vrot.slane %v14408_v29, %v16357_v39  ;;  %v8761_v53 = vsel %vm7816_vm2, %v5420_v22, 0  ;;  %v5125_v40 = vcombine.high %v18961_v63, %v18979_v59 }
 0x33c   : > { %23054 = vst [vmem:[#allocation34_spill] sm:$0xff] %v19102_v23  ;;  %23055 = vst [vmem:[#allocation36_spill] sm:$0xff] %v19105_v61  ;;  %14934 = vmatmul.mubr.msk.bf16.vlgmr.msra.gmra.mxu0 %vm7816_vm2, %v3034_v13  ;;  %v3043_v57 = vpack.c.bf16 %v3014_v15, %v2878_v35  ;;  %v6104_v62 = vrot.slane %v6096_v10, %v16361_v46  ;;  %v6111_v28 = vrot.slane %v6097_v26, %v16361_v46  ;;  %v23058_v15 = vld [vmem:[#allocation43_spill] sm:$0xff]  ;;  %v23059_v10 = vld [vmem:[#allocation74_spill] sm:$0xff] }
 0x33d   : > { %23056 = vst [vmem:[#allocation37_spill] sm:$0xff] %v19110_v42  ;;  %14944 = vmatpush3.bf16.xpose.msra.mxu0 %v8761_v53  ;;  %14945 = vmatprep.mubr.msk.bf16.mxu0 %vm15971_vm1, %v22726_v11  ;;  %v2197_v43 = vcombine.high %v18879_v6, %v18885_v14  ;;  %v14412_v30 = vcombine.low %v6088_v55, %v6095_v52  ;;  %v9184_v48 = vsel %vm7816_vm2, %v5429_v58, 0  ;;  %v9322_v63 = vsel %vm9321_vm3, %v18993_v18, -inf  ;;  %v23065_v13 = vld [vmem:[#allocation92_spill] sm:$0xff]  ;;  %v23068_v53 = vld [vmem:[#allocation98_spill] sm:$0xff] }
 0x33e   : > { %14988 = vmatmul.mubr.msk.bf16.vlgmr.msra.gmra.mxu1 %vm7816_vm2, %v3043_v57  ;;  %14955 = vmatprep.subr.bf16.mxu0 %v22726_v11  ;;  %v4989_v59 = vcombine.high %v18943_v0, %v18958_v56  ;;  %v14414_v31 = vcombine.high %v6088_v55, %v6095_v52  ;;  %v2061_v29 = vcombine.high %v18857_v50, %v18871_v60  ;;  %v9325_v14 = vsel %vm9321_vm3, %v19038_v4, -inf  ;;  %v23057_v0 = vld [vmem:[#allocation33_spill] sm:$0xff]  ;;  %v23063_v55 = vld [vmem:[#allocation18_spill] sm:$0xff]  ;;  %v23064_v52 = vld [vmem:[#allocation91_spill] sm:$0xff] }
 0x33f   : > { %14998 = vmatpush3.bf16.xpose.msra.mxu1 %v9184_v48  ;;  %14999 = vmatprep.mubr.msk.bf16.mxu1 %vm15971_vm1, %v22726_v11  ;;  %v5399_v6 = vcombine.high %v18991_v20, %v19001_v12  ;;  %v2471_v56 = vcombine.high %v23057_v0, %v18955_v45  ;;  %v5263_v9 = vcombine.high %v18982_v17, %v18988_v5  ;;  %v23060_v20 = vld [vmem:[#allocation32_spill] sm:$0xff]  ;;  %v23061_v12 = vld [vmem:[#allocation31_spill] sm:$0xff]  ;;  %v23069_v57 = vld [vmem:[#allocation94_spill] sm:$0xff] }
 0x340   : > { %v5422_v54 = vpack.c.bf16 %v5125_v40, %v4989_v59  ;;  %15009 = vmatprep.subr.bf16.mxu1 %v22726_v11  ;;  %9323 = vmax.xlane.f32.xlu0 %v9322_v63  ;;  %v14416_v60 = vcombine.low %v6104_v62, %v6111_v28  ;;  %v14418_v50 = vcombine.high %v6104_v62, %v6111_v28  ;;  %v23073_v0 = vld [vmem:[#allocation108_spill] sm:$0xff] }
 0x341   : > { %v3036_v22 = vpack.c.bf16 %v2197_v43, %v2061_v29  ;;  %v4393_v26 = vcombine.high %v23059_v10, %v23058_v15  ;;  %9326 = vmax.xlane.f32.xlu1 %v9325_v14  ;;  %v2335_v36 = vcombine.high %v23061_v12, %v23060_v20  ;;  %v5431_v51 = vpack.c.bf16 %v5399_v6, %v5263_v9  ;;  %v23077_v15 = vld [vmem:[#allocation40_spill] sm:$0xff] }
 0x342   : > { %v4425_v45 = vcombine.high %v23063_v55, %v23062_v3  ;;  %v4529_v35 = vcombine.high %v23065_v13, %v23064_v52  ;;  %v19151_v5 = vrot.slane %v14410_v1, %v16357_v39  ;;  %v19154_v17 = vrot.slane %v14412_v30, %v16357_v39 }
 0x343   : > { %v19157_v58 = vrot.slane %v4393_v26, %v16361_v46  ;;  %v4561_v40 = vcombine.high %v23069_v57, %v23068_v53  ;;  %v8855_v62 = vsel %vm7816_vm2, %v5422_v54, 0  ;;  %v3045_v28 = vpack.c.bf16 %v2471_v56, %v2335_v36 }
 0x344   : > { %23066 = vst [vmem:[#allocation38_spill] sm:$0xff] %v19151_v5  ;;  %23067 = vst [vmem:[#allocation39_spill] sm:$0xff] %v19154_v17  ;;  %14946 = vmatmul.mubr.msk.bf16.vlgmr.msra.gmra.mxu0 %vm7816_vm2, %v3036_v22  ;;  %v19164_v43 = vrot.slane %v4425_v45, %v16361_v46  ;;  %v19167_v1 = vrot.slane %v4529_v35, %v16361_v46  ;;  %v19170_v16 = vrot.slane %v14414_v31, %v16357_v39  ;;  %v23076_v22 = vld [vmem:[#allocation76_spill] sm:$0xff] }
 0x345   : > { %v19173_v30 = vrot.slane %v14416_v60, %v16357_v39  ;;  %14956 = vmatpush3.bf16.xpose.msra.mxu0 %v8855_v62  ;;  %14957 = vmatprep.mubr.msk.bf16.mxu0 %vm15971_vm1, %v22726_v11  ;;  %v19178_v48 = vrot.slane %v4561_v40, %v16361_v46  ;;  %v19181_v59 = vrot.slane %v14418_v50, %v16357_v39  ;;  %v9278_v63 = vsel %vm7816_vm2, %v5431_v51, 0  ;;  %v23080_v51 = vld [vmem:[#allocation52_spill] sm:$0xff] }
 0x346   : > { %23070 = vst [vmem:[#allocation48_spill] sm:$0xff] %v19170_v16  ;;  %15000 = vmatmul.mubr.msk.bf16.vlgmr.msra.gmra.mxu1 %vm7816_vm2, %v3045_v28  ;;  %v2605_v31 = vcombine.high %v19012_v33, %v19018_v37  ;;  %14967 = vmatprep.subr.bf16.mxu0 %v22726_v11  ;;  %v9328_v29 = vsel %vm9321_vm3, %v19084_v34, -inf  ;;  %v4446_v6 = vcombine.low %v19157_v58, %v19164_v43  ;;  %v23074_v33 = vld [vmem:[#allocation78_spill] sm:$0xff]  ;;  %v23086_v28 = vld [vmem:[#allocation69_spill] sm:$0xff] }
 0x347   : > { %23071 = vst [vmem:[#allocation55_spill] sm:$0xff] %v19173_v30  ;;  %23072 = vst [vmem:[#allocation56_spill] sm:$0xff] %v19181_v59  ;;  %15010 = vmatpush3.bf16.xpose.msra.mxu1 %v9278_v63  ;;  %v4582_v14 = vcombine.low %v19167_v1, %v19178_v48  ;;  %15011 = vmatprep.mubr.msk.bf16.mxu1 %vm15971_vm1, %v22726_v11  ;;  %v7032_v54 = vcombine.low %v19102_v23, %v19105_v61  ;;  %v23087_v63 = vld [vmem:[#allocation70_spill] sm:$0xff] }
 0x348   : > { %v5761_v37 = vcombine.high %v23074_v33, %v23073_v0  ;;  %v23075_v56 = vcombine.low %v23074_v33, %v23073_v0  ;;  %v2741_v60 = vcombine.high %v19036_v24, %v19045_v47  ;;  %v3015_v50 = vcombine.high %v19071_v25, %v19077_v41  ;;  %15021 = vmatprep.subr.bf16.mxu1 %v22726_v11  ;;  %v23079_v41 = vld [vmem:[#allocation57_spill] sm:$0xff] }
 0x349   : > { %v5624_v10 = vcombine.low %v23077_v15, %v23076_v22  ;;  %v5424_v26 = vpack.c.bf16 %v4582_v14, %v4446_v6  ;;  %v7064_v20 = vcombine.low %v19110_v42, %v19151_v5  ;;  %v7168_v12 = vcombine.low %v19154_v17, %v19170_v16  ;;  %9329 = vmax.xlane.f32.xlu0 %v9328_v29 }
 0x34a   : > { %v19204_v9 = vrot.slane %v23075_v56, %v16357_v39  ;;  %v5625_v36 = vcombine.high %v23077_v15, %v23076_v22  ;;  %v3038_v47 = vpack.c.bf16 %v2741_v60, %v2605_v31  ;;  %v2879_v24 = vcombine.high %v19057_v19, %v19065_v38  ;;  %v23089_v56 = vld [vmem:[#allocation71_spill] sm:$0xff]  ;;  %v23090_v60 = vld [vmem:[#allocation72_spill] sm:$0xff] }
 0x34b   : > { %v19222_v25 = vrot.slane %v7032_v54, %v16361_v46  ;;  %v23081_v3 = vcombine.low %v23079_v41, %v23080_v51  ;;  %v19229_v45 = vrot.slane %v7064_v20, %v16361_v46  ;;  %v19232_v52 = vrot.slane %v7168_v12, %v16361_v46  ;;  %v23092_v15 = vld [vmem:[#allocation80_spill] sm:$0xff]  ;;  %v23095_v20 = vld [vmem:[#allocation103_spill] sm:$0xff]  ;;  %v23096_v12 = vld [vmem:[#allocation105_spill] sm:$0xff] }
 0x34c   : > { %v7200_v13 = vcombine.low %v19173_v30, %v19181_v59  ;;  %v23084_v19 = vcombine.high %v23079_v41, %v23080_v51  ;;  %v19243_v35 = vrot.slane %v5761_v37, %v16357_v39  ;;  %14958 = vmatmul.mubr.msk.bf16.vlgmr.msra.gmra.mxu0 %vm7816_vm2, %v3038_v47  ;;  %v8949_v53 = vsel %vm7816_vm2, %v5424_v26, 0  ;;  %v23099_v41 = vld [vmem:[#allocation97_spill] sm:$0xff] }
 0x34d   : > { %23078 = vst [vmem:[#allocation50_spill] sm:$0xff] %v19222_v25  ;;  %v5752_v55 = vrot.slane %v23081_v3, %v16357_v39  ;;  %23082 = vst [vmem:[#allocation53_spill] sm:$0xff] %v19229_v45  ;;  %v3047_v57 = vpack.c.bf16 %v3015_v50, %v2879_v24  ;;  %v5632_v40 = vrot.slane %v5624_v10, %v16357_v39  ;;  %14968 = vmatpush3.bf16.xpose.msra.mxu0 %v8949_v53  ;;  %v23093_v10 = vld [vmem:[#allocation102_spill] sm:$0xff]  ;;  %v23103_v53 = vld [vmem:[#allocation81_spill] sm:$0xff] }
 0x34e   : > { %23083 = vst [vmem:[#allocation30_spill] sm:$0xff] %v19232_v52  ;;  %v19240_v38 = vrot.slane %v23084_v19, %v16357_v39  ;;  %v19249_v62 = vrot.slane %v7200_v13, %v16361_v46  ;;  %14969 = vmatprep.mubr.msk.bf16.mxu0 %vm15971_vm1, %v22726_v11  ;;  %v23088_v31 = vcombine.high %v23086_v28, %v23087_v63  ;;  %v9331_v6 = vsel %vm9321_vm3, %v19107_v49, -inf  ;;  %v23098_v24 = vld [vmem:[#allocation114_spill] sm:$0xff]  ;;  %v23102_v19 = vld [vmem:[#allocation68_spill] sm:$0xff]  ;;  %v23105_v63 = vld [vmem:[#allocation119_spill] sm:$0xff] }
 0x34f   : > { %v5808_v14 = vcombine.low %v5752_v55, %v19204_v9  ;;  %v5809_v54 = vcombine.high %v5752_v55, %v19204_v9  ;;  %v5639_v0 = vrot.slane %v5625_v36, %v16357_v39  ;;  %15012 = vmatmul.mubr.msk.bf16.vlgmr.msra.gmra.mxu1 %vm7816_vm2, %v3047_v57  ;;  %v7096_v33 = vcombine.low %v19222_v25, %v19229_v45  ;;  %v23100_v3 = vld [vmem:[#allocation58_spill] sm:$0xff]  ;;  %v23101_v55 = vld [vmem:[#allocation25_spill] sm:$0xff] }
 0x350   : > { %23085 = vst [vmem:[#allocation75_spill] sm:$0xff] %v19249_v62  ;;  %v19257_v29 = vrot.slane %v23088_v31, %v16361_v46  ;;  %v7232_v37 = vcombine.low %v19232_v52, %v19249_v62  ;;  %v23091_v50 = vcombine.high %v23089_v56, %v23090_v60  ;;  %v23094_v9 = vcombine.high %v23092_v15, %v23093_v10  ;;  %v23104_v28 = vld [vmem:[#allocation106_spill] sm:$0xff]  ;;  %v23106_v56 = vld [vmem:[#allocation89_spill] sm:$0xff] }
 0x351   : > { %v23097_v36 = vcombine.high %v23095_v20, %v23096_v12  ;;  %14979 = vmatprep.subr.bf16.mxu0 %v22726_v11  ;;  %v4937_v51 = vcombine.high %v23099_v41, %v23098_v24  ;;  %v4969_v13 = vcombine.high %v23101_v55, %v23100_v3  ;;  %v5073_v57 = vcombine.high %v23103_v53, %v23102_v19  ;;  %v23107_v12 = vld [vmem:[#allocation95_spill] sm:$0xff] }
 0x352   : > { %v19273_v22 = vrot.slane %v23091_v50, %v16361_v46  ;;  %v19279_v26 = vrot.slane %v23094_v9, %v16361_v46  ;;  %v5105_v31 = vcombine.high %v23105_v63, %v23104_v28  ;;  %9332 = vmax.xlane.f32.xlu0 %v9331_v6  ;;  %v5672_v60 = vcombine.low %v23106_v56, %v5632_v40 }
 0x353   : > { %v19285_v47 = vrot.slane %v23097_v36, %v16361_v46  ;;  %v7785_v50 = vpack.c.bf16 %v7232_v37, %v7096_v33  ;;  %15023 = vmatprep.mubr.msk.bf16.mxu1 %vm15971_vm1, %v22726_v11  ;;  %v19304_v9 = vrot.slane %v4937_v51, %v16361_v46  ;;  %v19307_v20 = vrot.slane %v4969_v13, %v16361_v46 }
 0x354   : > { %v2062_v15 = vcombine.low %v19257_v29, %v19273_v22  ;;  %v19310_v6 = vrot.slane %v5073_v57, %v16361_v46  ;;  %v19313_v33 = vrot.slane %v5105_v31, %v16361_v46  ;;  %v5673_v37 = vcombine.high %v23106_v56, %v5632_v40 }
 0x355   : > { %v2198_v10 = vcombine.low %v19279_v26, %v19285_v47  ;;  %v5688_v36 = vcombine.low %v23107_v12, %v5639_v0  ;;  %v5689_v24 = vcombine.high %v23107_v12, %v5639_v0  ;;  %15022 = vmatpush3.bf16.msra.mxu1 %v7785_v50  ;;  %v2689_v51 = vcombine.high %v18543_v2, %v18569_v44 }
 0x356   : > { %v2721_v3 = vcombine.high %v18582_v7, %v18585_v32  ;;  %v4990_v55 = vcombine.low %v19304_v9, %v19307_v20  ;;  %v5126_v13 = vcombine.low %v19310_v6, %v19313_v33  ;;  %15033 = vmatprep.subr.bf16.mxu1 %v22726_v11  ;;  %v5816_v40 = vrot.slane %v5808_v14, %v16361_v46  ;;  %v23109_v14 = vld [vmem:[#allocation77_spill] sm:$0xff] }
 0x357   : > { %v3040_v41 = vpack.c.bf16 %v2198_v10, %v2062_v15  ;;  %v5824_v0 = vcombine.low %v19240_v38, %v19243_v35  ;;  %v5825_v19 = vcombine.high %v19240_v38, %v19243_v35  ;;  %v5823_v2 = vrot.slane %v5809_v54, %v16361_v46 }
 0x358   : > { %v5426_v44 = vpack.c.bf16 %v5126_v13, %v4990_v55  ;;  %v23108_v7 = vcombine.high %v18588_v27, %v18591_v21  ;;  %v23110_v53 = vcombine.high %v18606_v8, %v23109_v14  ;;  %v5680_v38 = vrot.slane %v5672_v60, %v16361_v46 }
 0x359   : > { %14970 = vmatmul.mubr.msk.bf16.vlgmr.msra.gmra.mxu0 %vm7816_vm2, %v3040_v41  ;;  %v5687_v35 = vrot.slane %v5673_v37, %v16361_v46  ;;  %v5696_v54 = vrot.slane %v5688_v36, %v16361_v46  ;;  %v5703_v28 = vrot.slane %v5689_v24, %v16361_v46  ;;  %v19354_v27 = vrot.slane %v2689_v51, %v16361_v46  ;;  %v19370_v24 = vpop.f32.mrf.mxu1 }
 0x35a   : > { %14981 = vmatprep.mubr.msk.bf16.mxu0 %vm15971_vm1, %v22726_v11  ;;  %v19340_v32 = vrot.slane %v23108_v7, %v16361_v46  ;;  %v19346_v57 = vrot.slane %v23110_v53, %v16361_v46  ;;  %v9043_v63 = vsel %vm7816_vm2, %v5426_v44, 0  ;;  %v19357_v21 = vrot.slane %v2721_v3, %v16361_v46 }
 0x35b   : > { %v4583_v8 = vcombine.high %v19167_v1, %v19178_v48  ;;  %v5832_v31 = vrot.slane %v5824_v0, %v16361_v46  ;;  %v5839_v56 = vrot.slane %v5825_v19, %v16361_v46  ;;  %14980 = vmatpush3.bf16.xpose.msra.mxu0 %v9043_v63  ;;  %v4447_v50 = vcombine.high %v19157_v58, %v19164_v43  ;;  %v14845_v13 = vpop.f32.mrf.mxu1 }
 0x35c   : > { %v2606_v60 = vcombine.low %v19340_v32, %v19346_v57  ;;  %14991 = vmatprep.subr.bf16.mxu0 %v22726_v11  ;;  %v14388_v15 = vcombine.low %v5680_v38, %v5687_v35  ;;  %v14390_v10 = vcombine.high %v5680_v38, %v5687_v35  ;;  %v14392_v37 = vcombine.low %v5696_v54, %v5703_v28 }
 0x35d   : > { %v14394_v12 = vcombine.high %v5696_v54, %v5703_v28  ;;  %v14396_v36 = vcombine.low %v5816_v40, %v5823_v2  ;;  %v2742_v1 = vcombine.low %v19354_v27, %v19357_v21  ;;  %v5428_v48 = vpack.c.bf16 %v4583_v8, %v4447_v50  ;;  %v19389_v7 = vpop.f32.mrf.mxu1 }
 0x35e   : > { %v14398_v41 = vcombine.high %v5816_v40, %v5823_v2  ;;  %v14400_v51 = vcombine.low %v5832_v31, %v5839_v56  ;;  %v14402_v3 = vcombine.high %v5832_v31, %v5839_v56  ;;  %v19373_v0 = vrot.slane %v14388_v15, %v16357_v39 }
 0x35f   : > { %v3042_v55 = vpack.c.bf16 %v2742_v1, %v2606_v60  ;;  %v19376_v58 = vrot.slane %v14390_v10, %v16357_v39  ;;  %v19379_v43 = vrot.slane %v14392_v37, %v16357_v39  ;;  %v19382_v19 = vrot.slane %v14394_v12, %v16357_v39 }
 0x360   : > { %v6840_v44 = vrot.slane %v14396_v36, %v16357_v39  ;;  %v9137_v40 = vsel %vm7816_vm2, %v5428_v48, 0  ;;  %v5127_v2 = vcombine.high %v19310_v6, %v19313_v33  ;;  %v6856_v14 = vrot.slane %v14398_v41, %v16357_v39  ;;  %v14846_v33 = vpop.f32.mrf.mxu1 }
 0x361   : > { %v6872_v53 = vrot.slane %v14400_v51, %v16357_v39  ;;  %v6888_v38 = vrot.slane %v14402_v3, %v16357_v39  ;;  %v2199_v35 = vcombine.high %v19279_v26, %v19285_v47  ;;  %v4991_v6 = vcombine.high %v19304_v9, %v19307_v20 }
 0x362   : > { %14982 = vmatmul.mubr.msk.bf16.vlgmr.msra.gmra.mxu0 %vm7816_vm2, %v3042_v55  ;;  %v6760_v54 = vcombine.low %v19373_v0, %v19376_v58  ;;  %v6792_v28 = vcombine.low %v19379_v43, %v19382_v19  ;;  %v2063_v63 = vcombine.high %v19257_v29, %v19273_v22  ;;  %v19407_v31 = vpop.f32.mrf.mxu1  ;;  %v6896_v56 = vcombine.low %v6840_v44, %v6856_v14 }
 0x363   : > { %14992 = vmatpush3.bf16.xpose.msra.mxu0 %v9137_v40  ;;  %14993 = vmatprep.mubr.msk.bf16.mxu0 %vm15971_vm1, %v22726_v11  ;;  %v5430_v8 = vpack.c.bf16 %v5127_v2, %v4991_v6  ;;  %v6928_v26 = vcombine.low %v6872_v53, %v6888_v38  ;;  %v2607_v10 = vcombine.high %v19340_v32, %v19346_v57 }
 0x364   : > { %15003 = vmatprep.subr.bf16.mxu0 %v22726_v11  ;;  %v3044_v47 = vpack.c.bf16 %v2199_v35, %v2063_v63  ;;  %v14857_v60 = vpop.f32.mrf.mxu1  ;;  %v6768_v50 = vrot.slane %v6760_v54, %v16361_v46  ;;  %v6800_v9 = vrot.slane %v6792_v28, %v16361_v46  ;;  %v6904_v29 = vrot.slane %v6896_v56, %v16361_v46 }
 0x365   : > { %v9231_v20 = vsel %vm7816_vm2, %v5430_v8, 0  ;;  %v6936_v22 = vrot.slane %v6928_v26, %v16361_v46  ;;  %v2743_v36 = vcombine.high %v19354_v27, %v19357_v21  ;;  %v6897_v21 = vcombine.high %v6840_v44, %v6856_v14 }
 0x366   : > { %v19413_v15 = vpop.f32.mrf.mxu1  ;;  %v6824_v12 = vcombine.low %v6768_v50, %v6800_v9  ;;  %v6929_v13 = vcombine.high %v6872_v53, %v6888_v38  ;;  %v6761_v8 = vcombine.high %v19373_v0, %v19376_v58  ;;  %v6793_v44 = vcombine.high %v19379_v43, %v19382_v19 }
 0x367   : > { %v6960_v48 = vcombine.low %v6904_v29, %v6936_v22  ;;  %v3046_v41 = vpack.c.bf16 %v2743_v36, %v2607_v10  ;;  %v6911_v35 = vrot.slane %v6897_v21, %v16361_v46  ;;  %v6961_v63 = vcombine.high %v6904_v29, %v6936_v22 }
 0x368   : > { %v14858_v37 = vpop.f32.mrf.mxu1  ;;  %v6943_v6 = vrot.slane %v6929_v13, %v16361_v46  ;;  %v6775_v56 = vrot.slane %v6761_v8, %v16361_v46  ;;  %v6807_v26 = vrot.slane %v6793_v44, %v16361_v46  ;;  %v9340_v60 = vsel %vm9321_vm3, %v19370_v24, -inf }
 0x369   : > { %v7784_v3 = vpack.c.bf16 %v6960_v48, %v6824_v12  ;;  %v6825_v0 = vcombine.high %v6768_v50, %v6800_v9  ;;  %v9343_v10 = vsel %vm9321_vm3, %v19389_v7, -inf }
 0x36a   : > { %14994 = vmatmul.mubr.msk.bf16.vlgmr.msra.gmra.mxu0 %vm7816_vm2, %v3044_v47  ;;  %v19424_v1 = vpop.f32.mrf.mxu1  ;;  %v6962_v14 = vcombine.low %v6911_v35, %v6943_v6  ;;  %v6963_v53 = vcombine.high %v6911_v35, %v6943_v6  ;;  %v6826_v58 = vcombine.low %v6775_v56, %v6807_v26  ;;  %v6827_v43 = vcombine.high %v6775_v56, %v6807_v26 }
 0x36b   : > { %15004 = vmatpush3.bf16.xpose.msra.mxu0 %v9231_v20  ;;  %15005 = vmatprep.mubr.msk.bf16.mxu0 %vm15971_vm1, %v22726_v11  ;;  %v19454_v19 = vpack.c.bf16 %v6961_v63, %v6825_v0  ;;  %v9355_v6 = vsel %vm9321_vm3, %v19413_v15, -inf  ;;  %v19498_v0 = vpop.permute.xlu1 %5448 }
 0x36c   : > { %15015 = vmatprep.subr.bf16.mxu0 %v22726_v11  ;;  %v14869_v51 = vpop.f32.mrf.mxu1  ;;  %v19456_v29 = vpack.c.bf16 %v6962_v14, %v6826_v58  ;;  %v19458_v22 = vpack.c.bf16 %v6963_v53, %v6827_v43  ;;  %v9364_v53 = vsel %vm9321_vm3, %v19424_v1, -inf  ;;  %23115 = vst [vmem:[#allocation113_spill] sm:$0xff] %v19498_v0 }
 0x36d   : > { %23111 = vst [vmem:[#allocation84_spill] sm:$0xff] %v19454_v19 }
 0x36e   : > { %v19427_v55 = vpop.f32.mrf.mxu1  ;;  %23112 = vst [vmem:[#allocation110_spill] sm:$0xff] %v19456_v29  ;;  %23113 = vst [vmem:[#allocation111_spill] sm:$0xff] %v19458_v22 }
 0x370   : > { %v14870_v32 = vpop.f32.mrf.mxu1 }
 0x372   : > { %15006 = vmatmul.mubr.msk.bf16.vlgmr.msra.gmra.mxu0 %vm7816_vm2, %v3046_v41 }
 0x373   : > { %15016 = vmatpush3.bf16.msra.mxu0 %v7784_v3  ;;  %15017 = vmatprep.mubr.msk.bf16.mxu0 %vm15971_vm1, %v22726_v11  ;;  %v19432_v57 = vpop.f32.mrf.mxu1 }
 0x374   : > { %15027 = vmatprep.subr.bf16.mxu0 %v22726_v11 }
 0x375   : > { %v14881_v27 = vpop.f32.mrf.mxu1  ;;  %v19436_v2 = vpop.f32.mrf.mxu0 }
 0x376   : > { %v9334_v33 = vsel %vm9321_vm3, %v19436_v2, -inf  ;;  %v9352_v27 = vsel %vm9321_vm3, %v19407_v31, -inf }
 0x377   : > { %v19434_v40 = vpop.f32.mrf.mxu1  ;;  %v14839_v28 = vpop.f32.mrf.mxu0  ;;  %9335 = vmax.xlane.f32.xlu1 %v9334_v33 }
 0x379   : > { %v14882_v54 = vpop.f32.mrf.mxu1  ;;  %v19446_v38 = vpop.f32.mrf.mxu0 }
 0x37a   : > { %v9337_v47 = vsel %vm9321_vm3, %v19446_v38, -inf }
 0x37b   : > { %v14840_v20 = vpop.f32.mrf.mxu0  ;;  %9338 = vmax.xlane.f32.xlu0 %v9337_v47  ;;  %9341 = vmax.xlane.f32.xlu1 %v9340_v60  ;;  %v9367_v60 = vsel %vm9321_vm3, %v19427_v55, -inf }
 0x37f   : > { %9344 = vmax.xlane.f32.xlu0 %v9343_v10 }
 0x382   : > { %v19462_v37 = vpop.f32.mrf.mxu1 }
 0x384   : > { %v14893_v12 = vpop.f32.mrf.mxu1 }
 0x385   : > { %v19464_v36 = vpop.f32.mrf.mxu0 }
 0x386   : > { %v19466_v48 = vpop.f32.mrf.mxu1  ;;  %v9346_v50 = vsel %vm9321_vm3, %v19464_v36, -inf }
 0x387   : > { %v14851_v9 = vpop.f32.mrf.mxu0  ;;  %9347 = vmax.xlane.f32.xlu1 %v9346_v50 }
 0x388   : > { %v14894_v41 = vpop.f32.mrf.mxu1  ;;  %v9376_v9 = vsel %vm9321_vm3, %v19432_v57, -inf }
 0x389   : > { %v19470_v51 = vpop.f32.mrf.mxu0  ;;  %v19510_v41 = vpop.permute.xlu1 %5472 }
 0x38a   : > { %v19472_v3 = vpop.f32.mrf.mxu1  ;;  %v9349_v32 = vsel %vm9321_vm3, %v19470_v51, -inf  ;;  %23116 = vst [vmem:[#allocation115_spill] sm:$0xff] %v19510_v41 }
 0x38b   : > { %v14852_v21 = vpop.f32.mrf.mxu0  ;;  %9350 = vmax.xlane.f32.xlu0 %v9349_v32  ;;  %9353 = vmax.xlane.f32.xlu1 %v9352_v27  ;;  %v9379_v27 = vsel %vm9321_vm3, %v19434_v40, -inf  ;;  %v9400_v45 = vsel %vm9321_vm3, %v19472_v3, -inf }
 0x38c   : > { %v14905_v13 = vpop.f32.mrf.mxu1 }
 0x38d   : > { %v19514_v21 = vpop.permute.xlu1 %5474  ;;  %v19516_v13 = vpop.permute.xlu0 %5450 }
 0x38e   : > { %v19478_v35 = vpop.f32.mrf.mxu1  ;;  %23117 = vst [vmem:[#allocation116_spill] sm:$0xff] %v19514_v21  ;;  %23118 = vst [vmem:[#allocation117_spill] sm:$0xff] %v19516_v13 }
 0x38f   : > { %v19482_v33 = vpop.f32.mrf.mxu0  ;;  %9356 = vmax.xlane.f32.xlu0 %v9355_v6 }
 0x390   : > { %v14906_v54 = vpop.f32.mrf.mxu1  ;;  %v9358_v28 = vsel %vm9321_vm3, %v19482_v33, -inf }
 0x391   : > { %v14863_v63 = vpop.f32.mrf.mxu0  ;;  %9359 = vmax.xlane.f32.xlu1 %v9358_v28  ;;  %v19520_v28 = vpop.permute.xlu1 %5498 }
 0x392   : > { %v19486_v8 = vpop.f32.mrf.mxu1  ;;  %23119 = vst [vmem:[#allocation118_spill] sm:$0xff] %v19520_v28 }
 0x393   : > { %v19488_v44 = vpop.f32.mrf.mxu0  ;;  %v9412_v5 = vsel %vm9321_vm3, %v19486_v8, -inf }
 0x394   : > { %v9361_v14 = vsel %vm9321_vm3, %v19488_v44, -inf  ;;  %v14917_v56 = vpop.f32.mrf.mxu1 }
 0x395   : > { %v14864_v26 = vpop.f32.mrf.mxu0  ;;  %9362 = vmax.xlane.f32.xlu0 %v9361_v14  ;;  %9365 = vmax.xlane.f32.xlu1 %v9364_v53  ;;  %v19524_v14 = vpop.permute.xlu0 %5496 }
 0x396   : > { %v19494_v47 = vpop.f32.mrf.mxu1  ;;  %23121 = vst [vmem:[#allocation49_spill] sm:$0xff] %v19524_v14 }
 0x397   : > { %23114 = vst [vmem:[#allocation112_spill] sm:$0xff] %v19494_v47 }
 0x398   : > { %v14918_v20 = vpop.f32.mrf.mxu1 }
 0x399   : > { %9368 = vmax.xlane.f32.xlu0 %v9367_v60  ;;  %v19530_v60 = vpop.permute.xlu1 %5454 }
 0x39a   : > { %23122 = vst [vmem:[#allocation93_spill] sm:$0xff] %v19530_v60 }
 0x3a2   : > { %v19500_v58 = vpop.f32.mrf.mxu0 }
 0x3a3   : > { %v9370_v43 = vsel %vm9321_vm3, %v19500_v58, -inf }
 0x3a4   : > { %v14875_v10 = vpop.f32.mrf.mxu0  ;;  %9371 = vmax.xlane.f32.xlu1 %v9370_v43  ;;  %v19532_v43 = vpop.permute.xlu0 %5452 }
 0x3a5   : > { %23123 = vst [vmem:[#allocation120_spill] sm:$0xff] %v19532_v43  ;;  %v23182_v43 = vld [vmem:[#allocation66_spill] sm:$0xff] }
 0x3a6   : > { %v19504_v12 = vpop.f32.mrf.mxu0 }
 0x3a7   : > { %v9373_v50 = vsel %vm9321_vm3, %v19504_v12, -inf }
 0x3a8   : > { %v14876_v32 = vpop.f32.mrf.mxu0  ;;  %9374 = vmax.xlane.f32.xlu0 %v9373_v50  ;;  %9377 = vmax.xlane.f32.xlu1 %v9376_v9  ;;  %v9388_v9 = vsel %vm9321_vm3, %v19462_v37, -inf  ;;  %v19550_v22 = vpop.permute.xlu0 %5476 }
 0x3a9   : > { %23126 = vst [vmem:[#allocation44_spill] sm:$0xff] %v19550_v22 }
 0x3ac   : > { %9380 = vmax.xlane.f32.xlu0 %v9379_v27  ;;  %v19540_v27 = vpop.permute.xlu1 %5478 }
 0x3ad   : > { %23124 = vst [vmem:[#allocation86_spill] sm:$0xff] %v19540_v27 }
 0x3b0   : > { %v19518_v6 = vpop.f32.mrf.mxu1  ;;  %v19560_v52 = vpop.permute.xlu1 %5502 }
 0x3b1   : > { %23128 = vst [vmem:[#allocation87_spill] sm:$0xff] %v19560_v52 }
 0x3b2   : > { %v14929_v54 = vpop.f32.mrf.mxu1 }
 0x3b4   : > { %v19522_v63 = vpop.f32.mrf.mxu1 }
 0x3b5   : > { %23120 = vst [vmem:[#allocation85_spill] sm:$0xff] %v19522_v63 }
 0x3b6   : > { %v14930_v53 = vpop.f32.mrf.mxu1 }
 0x3bc   : > { %v19526_v56 = vpop.f32.mrf.mxu0 }
 0x3bd   : > { %v9382_v26 = vsel %vm9321_vm3, %v19526_v56, -inf }
 0x3be   : > { %v14887_v20 = vpop.f32.mrf.mxu0  ;;  %9383 = vmax.xlane.f32.xlu1 %v9382_v26 }
 0x3bf   : > { %v9391_v20 = vsel %vm9321_vm3, %v19466_v48, -inf }
 0x3c0   : > { %v19534_v10 = vpop.f32.mrf.mxu0 }
 0x3c1   : > { %v9385_v50 = vsel %vm9321_vm3, %v19534_v10, -inf }
 0x3c2   : > { %v14888_v32 = vpop.f32.mrf.mxu0  ;;  %9386 = vmax.xlane.f32.xlu0 %v9385_v50  ;;  %9389 = vmax.xlane.f32.xlu1 %v9388_v9 }
 0x3c4   : > { %v19542_v54 = vpop.f32.mrf.mxu0 }
 0x3c5   : > { %v19544_v53 = vpop.f32.mrf.mxu1  ;;  %v9394_v26 = vsel %vm9321_vm3, %v19542_v54, -inf }
 0x3c6   : > { %23125 = vst [vmem:[#allocation42_spill] sm:$0xff] %v19544_v53  ;;  %v14899_v29 = vpop.f32.mrf.mxu0  ;;  %9395 = vmax.xlane.f32.xlu1 %v9394_v26  ;;  %9392 = vmax.xlane.f32.xlu0 %v9391_v20 }
 0x3c7   : > { %v14941_v32 = vpop.f32.mrf.mxu1  ;;  %v19562_v29 = vpop.permute.xlu0 %5500 }
 0x3c8   : > { %v19552_v50 = vpop.f32.mrf.mxu0  ;;  %23129 = vst [vmem:[#allocation16_spill] sm:$0xff] %v19562_v29  ;;  %v9403_v32 = vsel %vm9321_vm3, %v19478_v35, -inf }
 0x3c9   : > { %v19554_v9 = vpop.f32.mrf.mxu1  ;;  %v9397_v25 = vsel %vm9321_vm3, %v19552_v50, -inf }
 0x3ca   : > { %23127 = vst [vmem:[#allocation82_spill] sm:$0xff] %v19554_v9  ;;  %v14900_v62 = vpop.f32.mrf.mxu0  ;;  %9398 = vmax.xlane.f32.xlu0 %v9397_v25  ;;  %9401 = vmax.xlane.f32.xlu1 %v9400_v45 }
 0x3cb   : > { %v14942_v30 = vpop.f32.mrf.mxu1  ;;  %v19572_v62 = vpop.permute.xlu1 %5512 }
 0x3cc   : > { %23131 = vst [vmem:[#allocation104_spill] sm:$0xff] %v19572_v62  ;;  %v19578_v45 = vpop.permute.xlu0 %5514 }
 0x3cd   : > { %v19564_v26 = vpop.f32.mrf.mxu1  ;;  %v19566_v20 = vpop.f32.mrf.mxu0  ;;  %23133 = vst [vmem:[#allocation21_spill] sm:$0xff] %v19578_v45 }
 0x3ce   : > { %23130 = vst [vmem:[#allocation88_spill] sm:$0xff] %v19564_v26  ;;  %v9406_v59 = vsel %vm9321_vm3, %v19566_v20, -inf  ;;  %9404 = vmax.xlane.f32.xlu0 %v9403_v32 }
 0x3cf   : > { %v14953_v17 = vpop.f32.mrf.mxu1  ;;  %v14911_v16 = vpop.f32.mrf.mxu0  ;;  %9407 = vmax.xlane.f32.xlu1 %v9406_v59  ;;  %v9415_v59 = vsel %vm9321_vm3, %v19494_v47, -inf }
 0x3d0   : > { %v19586_v16 = vpop.permute.xlu1 %5536  ;;  %v19590_v19 = vpop.permute.xlu0 %5560 }
 0x3d1   : > { %v19574_v25 = vpop.f32.mrf.mxu1  ;;  %v19576_v30 = vpop.f32.mrf.mxu0  ;;  %23135 = vst [vmem:[#allocation23_spill] sm:$0xff] %v19586_v16  ;;  %23136 = vst [vmem:[#allocation27_spill] sm:$0xff] %v19590_v19 }
 0x3d2   : > { %23132 = vst [vmem:[#allocation22_spill] sm:$0xff] %v19574_v25  ;;  %v9409_v42 = vsel %vm9321_vm3, %v19576_v30, -inf }
 0x3d3   : > { %v14954_v23 = vpop.f32.mrf.mxu1  ;;  %v14912_v61 = vpop.f32.mrf.mxu0  ;;  %9410 = vmax.xlane.f32.xlu0 %v9409_v42  ;;  %9413 = vmax.xlane.f32.xlu1 %v9412_v5 }
 0x3d4   : > { %v19594_v62 = vpop.permute.xlu1 %5538  ;;  %v19596_v23 = vpop.permute.xlu0 %5584 }
 0x3d5   : > { %v19584_v17 = vpop.f32.mrf.mxu1  ;;  %23138 = vst [vmem:[#allocation29_spill] sm:$0xff] %v19594_v62  ;;  %23139 = vst [vmem:[#allocation28_spill] sm:$0xff] %v19596_v23 }
 0x3d6   : > { %23134 = vst [vmem:[#allocation24_spill] sm:$0xff] %v19584_v17 }
 0x3d7   : > { %v14965_v32 = vpop.f32.mrf.mxu1  ;;  %9416 = vmax.xlane.f32.xlu0 %v9415_v59 }
 0x3d8   : > { %v19598_v61 = vpop.permute.xlu1 %5562  ;;  %v19600_v42 = vpop.permute.xlu0 %5516 }
 0x3d9   : > { %v19592_v11 = vpop.f32.mrf.mxu1  ;;  %23140 = vst [vmem:[#allocation47_spill] sm:$0xff] %v19598_v61  ;;  %23141 = vst [vmem:[#allocation101_spill] sm:$0xff] %v19600_v42  ;;  %v9424_v61 = vsel %vm9321_vm3, %v19518_v6, -inf }
 0x3da   : > { %23137 = vst [vmem:[#allocation26_spill] sm:$0xff] %v19592_v11 }
 0x3db   : > { %v14966_v45 = vpop.f32.mrf.mxu1 }
 0x3dc   : > { %v19606_v32 = vpop.permute.xlu1 %5586  ;;  %v19610_v45 = vpop.permute.xlu0 %5540 }
 0x3dd   : > { %23142 = vst [vmem:[#allocation35_spill] sm:$0xff] %v19606_v32  ;;  %23144 = vst [vmem:[#allocation46_spill] sm:$0xff] %v19610_v45 }
 0x3e0   : > { %v19618_v60 = vpop.permute.xlu1 %5518  ;;  %v19624_v45 = vpop.permute.xlu0 %5564 }
 0x3e1   : > { %23146 = vst [vmem:[#allocation59_spill] sm:$0xff] %v19618_v60  ;;  %23148 = vst [vmem:[#allocation61_spill] sm:$0xff] %v19624_v45 }
 0x3e4   : > { %v19626_v27 = vpop.permute.xlu1 %5542  ;;  %v19630_v28 = vpop.permute.xlu0 %5588 }
 0x3e5   : > { %23149 = vst [vmem:[#allocation62_spill] sm:$0xff] %v19626_v27  ;;  %23151 = vst [vmem:[#allocation64_spill] sm:$0xff] %v19630_v28  ;;  %v9436_v27 = vsel %vm9321_vm3, %v19544_v53, -inf }
 0x3e8   : > { %v19602_v5 = vpop.f32.mrf.mxu0  ;;  %v19640_v45 = vpop.permute.xlu0 %5522 }
 0x3e9   : > { %v9418_v16 = vsel %vm9321_vm3, %v19602_v5, -inf  ;;  %23155 = vst [vmem:[#allocation51_spill] sm:$0xff] %v19640_v45  ;;  %v9439_v45 = vsel %vm9321_vm3, %v19554_v9, -inf }
 0x3ea   : > { %v14923_v59 = vpop.f32.mrf.mxu0  ;;  %9419 = vmax.xlane.f32.xlu1 %v9418_v16  ;;  %v9427_v16 = vsel %vm9321_vm3, %v19522_v63, -inf }
 0x3ec   : > { %v19608_v19 = vpop.f32.mrf.mxu0 }
 0x3ed   : > { %23143 = vst [vmem:[#allocation41_spill] sm:$0xff] %v19608_v19  ;;  %v9421_v62 = vsel %vm9321_vm3, %v19608_v19, -inf }
 0x3ee   : > { %v14924_v42 = vpop.f32.mrf.mxu0  ;;  %9422 = vmax.xlane.f32.xlu0 %v9421_v62  ;;  %9425 = vmax.xlane.f32.xlu1 %v9424_v61 }
 0x3f0   : > { %v19616_v23 = vpop.f32.mrf.mxu1 }
 0x3f1   : > { %23145 = vst [vmem:[#allocation54_spill] sm:$0xff] %v19616_v23 }
 0x3f2   : > { %v14977_v32 = vpop.f32.mrf.mxu1  ;;  %9428 = vmax.xlane.f32.xlu0 %v9427_v16 }
 0x3f3   : > { %v19636_v32 = vpop.permute.xlu1 %5566 }
 0x3f4   : > { %v19622_v59 = vpop.f32.mrf.mxu1  ;;  %23153 = vst [vmem:[#allocation67_spill] sm:$0xff] %v19636_v32 }
 0x3f5   : > { %23147 = vst [vmem:[#allocation60_spill] sm:$0xff] %v19622_v59 }
 0x3f6   : > { %v14978_v52 = vpop.f32.mrf.mxu1 }
 0x3f7   : > { %v19650_v32 = vpop.permute.xlu1 %5590 }
 0x3f8   : > { %23158 = vst [vmem:[#allocation17_spill] sm:$0xff] %v19650_v32  ;;  %v9448_v32 = vsel %vm9321_vm3, %v19564_v26, -inf }
 0x3fb   : > { %v19662_v0 = vpop.permute.xlu1 %5520 }
 0x3fc   : > { %v19628_v13 = vpop.f32.mrf.mxu0  ;;  %23162 = vst [vmem:[#allocation33_spill] sm:$0xff] %v19662_v0  ;;  %v9451_v0 = vsel %vm9321_vm3, %v19574_v25, -inf }
 0x3fd   : > { %23150 = vst [vmem:[#allocation63_spill] sm:$0xff] %v19628_v13  ;;  %v9430_v62 = vsel %vm9321_vm3, %v19628_v13, -inf }
 0x3fe   : > { %v14935_v61 = vpop.f32.mrf.mxu0  ;;  %9431 = vmax.xlane.f32.xlu1 %v9430_v62  ;;  %v19634_v42 = vpop.f32.mrf.mxu1 }
 0x3ff   : > { %23152 = vst [vmem:[#allocation65_spill] sm:$0xff] %v19634_v42 }
 0x400   : > { %v19638_v60 = vpop.f32.mrf.mxu0  ;;  %v14989_v16 = vpop.f32.mrf.mxu1 }
 0x401   : > { %23154 = vst [vmem:[#allocation96_spill] sm:$0xff] %v19638_v60  ;;  %v9433_v52 = vsel %vm9321_vm3, %v19638_v60, -inf }
 0x402   : > { %v14936_v28 = vpop.f32.mrf.mxu0  ;;  %9434 = vmax.xlane.f32.xlu0 %v9433_v52  ;;  %9437 = vmax.xlane.f32.xlu1 %v9436_v27  ;;  %v19646_v61 = vpop.f32.mrf.mxu1 }
 0x403   : > { %23156 = vst [vmem:[#allocation107_spill] sm:$0xff] %v19646_v61  ;;  %v19658_v28 = vpop.permute.xlu0 %5568 }
 0x404   : > { %v19648_v62 = vpop.f32.mrf.mxu0  ;;  %v14990_v21 = vpop.f32.mrf.mxu1  ;;  %23160 = vst [vmem:[#allocation109_spill] sm:$0xff] %v19658_v28 }
 0x405   : > { %23157 = vst [vmem:[#allocation45_spill] sm:$0xff] %v19648_v62  ;;  %v9442_v16 = vsel %vm9321_vm3, %v19648_v62, -inf }
 0x406   : > { %v14947_v46 = vpop.f32.mrf.mxu0  ;;  %9443 = vmax.xlane.f32.xlu1 %v9442_v16  ;;  %9440 = vmax.xlane.f32.xlu0 %v9439_v45  ;;  %v19656_v41 = vpop.f32.mrf.mxu1 }
 0x407   : > { %23159 = vst [vmem:[#allocation100_spill] sm:$0xff] %v19656_v41  ;;  %v19672_v28 = vpop.permute.xlu0 %5592 }
 0x408   : > { %v19660_v27 = vpop.f32.mrf.mxu0  ;;  %v15001_v52 = vpop.f32.mrf.mxu1  ;;  %23164 = vst [vmem:[#allocation74_spill] sm:$0xff] %v19672_v28  ;;  %v9460_v28 = vsel %vm9321_vm3, %v19584_v17, -inf }
 0x409   : > { %23161 = vst [vmem:[#allocation99_spill] sm:$0xff] %v19660_v27  ;;  %v9445_v21 = vsel %vm9321_vm3, %v19660_v27, -inf }
 0x40a   : > { %v14948_v14 = vpop.f32.mrf.mxu0  ;;  %9446 = vmax.xlane.f32.xlu0 %v9445_v21  ;;  %9449 = vmax.xlane.f32.xlu1 %v9448_v32  ;;  %v19668_v46 = vpop.f32.mrf.mxu1 }
 0x40b   : > { %v19680_v14 = vpop.permute.xlu1 %5544 }
 0x40c   : > { %v19670_v45 = vpop.f32.mrf.mxu0  ;;  %v15002_v16 = vpop.f32.mrf.mxu1  ;;  %23165 = vst [vmem:[#allocation32_spill] sm:$0xff] %v19680_v14 }
 0x40d   : > { %23163 = vst [vmem:[#allocation43_spill] sm:$0xff] %v19670_v45  ;;  %v9454_v52 = vsel %vm9321_vm3, %v19670_v45, -inf }
 0x40e   : > { %v14959_v27 = vpop.f32.mrf.mxu0  ;;  %9455 = vmax.xlane.f32.xlu1 %v9454_v52  ;;  %9452 = vmax.xlane.f32.xlu0 %v9451_v0 }
 0x40f   : > { %v19678_v39 = vpop.f32.mrf.mxu1  ;;  %v19690_v27 = vpop.permute.xlu0 %5524 }
 0x410   : > { %v19682_v32 = vpop.f32.mrf.mxu0  ;;  %23167 = vst [vmem:[#allocation90_spill] sm:$0xff] %v19690_v27  ;;  %v19692_v52 = vpop.permute.xlu1 %5546  ;;  %v9472_v27 = vsel %vm9321_vm3, %v19616_v23, -inf }
 0x411   : > { %23166 = vst [vmem:[#allocation31_spill] sm:$0xff] %v19682_v32  ;;  %v15013_v21 = vpop.f32.mrf.mxu1  ;;  %v9457_v16 = vsel %vm9321_vm3, %v19682_v32, -inf  ;;  %23168 = vst [vmem:[#allocation18_spill] sm:$0xff] %v19692_v52 }
 0x412   : > { %v14960_v45 = vpop.f32.mrf.mxu0  ;;  %9458 = vmax.xlane.f32.xlu0 %v9457_v16  ;;  %9461 = vmax.xlane.f32.xlu1 %v9460_v28 }
 0x413   : > { %v19688_v25 = vpop.f32.mrf.mxu1  ;;  %v19700_v17 = vpop.permute.xlu0 %5548  ;;  %v9463_v45 = vsel %vm9321_vm3, %v19592_v11, -inf }
 0x414   : > { %23171 = vst [vmem:[#allocation98_spill] sm:$0xff] %v19700_v17  ;;  %v19706_v16 = vpop.permute.xlu1 %5570 }
 0x415   : > { %v15014_v0 = vpop.f32.mrf.mxu1  ;;  %23172 = vst [vmem:[#allocation94_spill] sm:$0xff] %v19706_v16 }
 0x417   : > { %v19716_v52 = vpop.permute.xlu0 %5572 }
 0x418   : > { %v19714_v17 = vpop.permute.xlu1 %5594  ;;  %23175 = vst [vmem:[#allocation76_spill] sm:$0xff] %v19716_v52 }
 0x419   : > { %v19694_v14 = vpop.f32.mrf.mxu0  ;;  %23174 = vst [vmem:[#allocation78_spill] sm:$0xff] %v19714_v17 }
 0x41a   : > { %23169 = vst [vmem:[#allocation91_spill] sm:$0xff] %v19694_v14  ;;  %v9466_v21 = vsel %vm9321_vm3, %v19694_v14, -inf }
 0x41b   : > { %v14971_v26 = vpop.f32.mrf.mxu0  ;;  %9467 = vmax.xlane.f32.xlu0 %v9466_v21 }
 0x41c   : > { %v9475_v26 = vsel %vm9321_vm3, %v19622_v59, -inf }
 0x41d   : > { %v19698_v32 = vpop.f32.mrf.mxu0 }
 0x41e   : > { %23170 = vst [vmem:[#allocation92_spill] sm:$0xff] %v19698_v32  ;;  %v9469_v28 = vsel %vm9321_vm3, %v19698_v32, -inf }
 0x41f   : > { %v14972_v0 = vpop.f32.mrf.mxu0  ;;  %9470 = vmax.xlane.f32.xlu1 %v9469_v28  ;;  %9464 = vmax.xlane.f32.xlu0 %v9463_v45  ;;  %v9324_v45 = vpop.xlane.xlu0 %9323 }
 0x422   : > { %v19712_v21 = vpop.f32.mrf.mxu0 }
 0x423   : > { %9473 = vmax.xlane.f32.xlu0 %v9472_v27  ;;  %9476 = vmax.xlane.f32.xlu1 %v9475_v26  ;;  %23173 = vst [vmem:[#allocation108_spill] sm:$0xff] %v19712_v21  ;;  %v9478_v0 = vsel %vm9321_vm3, %v19712_v21, -inf  ;;  %v9484_v27 = vsel %vm9321_vm3, %v19634_v42, -inf  ;;  %v19726_v26 = vpop.permute.xlu1 %5526 }
 0x424   : > { %v14983_v14 = vpop.f32.mrf.mxu0  ;;  %23177 = vst [vmem:[#allocation57_spill] sm:$0xff] %v19726_v26 }
 0x425   : > { %v9330_v14 = vpop.xlane.xlu0 %9329 }
 0x426   : > { %v19720_v28 = vpop.f32.mrf.mxu0 }
 0x427   : > { %9479 = vmax.xlane.f32.xlu0 %v9478_v0  ;;  %23176 = vst [vmem:[#allocation40_spill] sm:$0xff] %v19720_v28  ;;  %v9481_v16 = vsel %vm9321_vm3, %v19720_v28, -inf  ;;  %v19734_v59 = vpop.permute.xlu1 %5550 }
 0x428   : > { %v14984_v23 = vpop.f32.mrf.mxu0  ;;  %9482 = vmax.xlane.f32.xlu1 %v9481_v16  ;;  %23180 = vst [vmem:[#allocation70_spill] sm:$0xff] %v19734_v59  ;;  %v9487_v16 = vsel %vm9321_vm3, %v19646_v61, -inf }
 0x42a   : > { %v19728_v52 = vpop.f32.mrf.mxu0 }
 0x42b   : > { %9485 = vmax.xlane.f32.xlu0 %v9484_v27  ;;  %23178 = vst [vmem:[#allocation52_spill] sm:$0xff] %v19728_v52  ;;  %v9490_v0 = vsel %vm9321_vm3, %v19728_v52, -inf  ;;  %v9333_v27 = vpop.xlane.xlu0 %9332  ;;  %v9327_v28 = vpop.xlane.xlu1 %9326 }
 0x42c   : > { %v14995_v17 = vpop.f32.mrf.mxu0  ;;  %9491 = vmax.xlane.f32.xlu1 %v9490_v0  ;;  %v9515_v62 = vsub.f32 %v19038_v4, %v9327_v28  ;;  %v9517_v47 = vsub.f32 %v19107_v49, %v9333_v27 }
 0x42d   : > { %v9496_v17 = vsel %vm9321_vm3, %v19656_v41, -inf }
 0x42e   : > { %v19732_v21 = vpop.f32.mrf.mxu0  ;;  %v9580_v13 = vmul.f32 1.442695, %v9515_v62 }
 0x42f   : > { %23179 = vst [vmem:[#allocation69_spill] sm:$0xff] %v19732_v21  ;;  %v9493_v23 = vsel %vm9321_vm3, %v19732_v21, -inf  ;;  %v9339_v52 = vpop.xlane.xlu0 %9338  ;;  %v9336_v32 = vpop.xlane.xlu1 %9335 }
 0x430   : > { %v14996_v26 = vpop.f32.mrf.mxu0  ;;  %9494 = vmax.xlane.f32.xlu0 %v9493_v23  ;;  %9488 = vmax.xlane.f32.xlu1 %v9487_v16 }
 0x432   : > { %v19740_v42 = vpop.f32.mrf.mxu0 }
 0x433   : > { %23181 = vst [vmem:[#allocation71_spill] sm:$0xff] %v19740_v42  ;;  %v9502_v21 = vsel %vm9321_vm3, %v19740_v42, -inf  ;;  %v9345_v26 = vpop.xlane.xlu0 %9344  ;;  %v9342_v23 = vpop.xlane.xlu1 %9341 }
 0x434   : > { %v15007_v0 = vpop.f32.mrf.mxu0  ;;  %9497 = vmax.xlane.f32.xlu1 %v9496_v17  ;;  %v23183_v17 = vld [vmem:[#allocation79_spill] sm:$0xff]  ;;  %v9520_v4 = vsub.f32 %v19370_v24, %v9342_v23 }
 0x436   : > { %v19744_v59 = vpop.f32.mrf.mxu0  ;;  %v9590_v62 = vmul.f32 1.442695, %v9520_v4 }
 0x437   : > { %v19748_v16 = vpop.xlane.xlu0 %9350  ;;  %v9348_v11 = vpop.xlane.xlu1 %9347 }
 0x438   : > { %v15008_v61 = vpop.f32.mrf.mxu0  ;;  %9503 = vmax.xlane.f32.xlu1 %v9502_v21  ;;  %v9514_v21 = vsub.f32 %v18993_v18, %v9324_v45  ;;  %v9584_v45 = vmul.f32 1.442695, %v9517_v47  ;;  %v9522_v24 = vsub.f32 %v19464_v36, %v9348_v11  ;;  %v9505_v47 = vsel %vm9321_vm3, %v19744_v59, -inf }
 0x43a   : > { %v9578_v53 = vmul.f32 1.442695, %v9514_v21 }
 0x43b   : > { %v19752_v41 = vpop.xlane.xlu0 %9356  ;;  %v9354_v0 = vpop.xlane.xlu1 %9353 }
 0x43c   : > { %15492 = vpow2.f32 %v9578_v53 }
 0x43d   : > { %15494 = vpow2.f32 %v9580_v13 }
 0x43f   : > { %v19756_v29 = vpop.xlane.xlu0 %9362  ;;  %v9360_v42 = vpop.xlane.xlu1 %9359 }
 0x443   : > { %v19758_v22 = vpop.xlane.xlu0 %9368  ;;  %v9366_v61 = vpop.xlane.xlu1 %9365 }
 0x444   : > { %v9528_v27 = vsub.f32 %v19424_v1, %v9366_v61 }
 0x446   : > { %5596 = vrot.lane.b32.xlu0 %v23182_v43, %s15967_s11  ;;  %v9516_v43 = vsub.f32 %v19084_v34, %v9330_v14  ;;  %v9519_v34 = vsub.f32 %v19446_v38, %v9339_v52  ;;  %v9526_v38 = vsub.f32 %v19482_v33, %v9360_v42  ;;  %v9508_v52 = vsel %vm9321_vm3, %v19678_v39, -inf }
 0x447   : > { %v19762_v9 = vpop.xlane.xlu0 %9374  ;;  %v19765_v63 = vpop.xlane.xlu1 %9371  ;;  %v9511_v33 = vsel %vm9321_vm3, %v19688_v25, -inf  ;;  %v9606_v1 = vmul.f32 1.442695, %v9528_v27 }
 0x448   : > { %v9582_v19 = vmul.f32 1.442695, %v9516_v43  ;;  %v9499_v43 = vsel %vm9321_vm3, %v19668_v46, -inf  ;;  %v9588_v13 = vmul.f32 1.442695, %v9519_v34  ;;  %v9530_v61 = vsub.f32 %v19500_v58, %v19765_v63 }
 0x449   : > { %5574 = vrot.lane.b32.xlu1 %v23183_v17, %s15966_s9  ;;  %v9518_v17 = vsub.f32 %v19436_v2, %v9336_v32  ;;  %v9524_v2 = vsub.f32 %v19407_v31, %v9354_v0  ;;  %v9594_v31 = vmul.f32 1.442695, %v9522_v24  ;;  %v9521_v32 = vsub.f32 %v19389_v7, %v9345_v26  ;;  %v19791_v11 = vpop.eup %15492 }
 0x44a   : > { %15496 = vpow2.f32 %v9582_v19  ;;  %v9602_v36 = vmul.f32 1.442695, %v9526_v38  ;;  %v19796_v42 = vpop.eup %15494  ;;  %v9523_v26 = vsub.f32 %v19470_v51, %v19748_v16  ;;  %v9525_v16 = vsub.f32 %v19413_v15, %v19752_v41 }
 0x44b   : > { %v19769_v60 = vpop.xlane.xlu0 %9380  ;;  %v9586_v18 = vmul.f32 1.442695, %v9518_v17  ;;  %v19772_v28 = vpop.xlane.xlu1 %9377  ;;  %v9598_v19 = vmul.f32 1.442695, %v9524_v2  ;;  %v9592_v7 = vmul.f32 1.442695, %v9521_v32  ;;  %v9527_v41 = vsub.f32 %v19488_v44, %v19756_v29 }
 0x44c   : > { %v9706_v17 = vsel %vm9321_vm3, %v19791_v11, 0.0  ;;  %v9709_v21 = vsel %vm9321_vm3, %v19796_v42, 0.0  ;;  %v9596_v51 = vmul.f32 1.442695, %v9523_v26  ;;  %v9610_v58 = vmul.f32 1.442695, %v9530_v61 }
 0x44d   : > { %15498 = vpow2.f32 %v9586_v18  ;;  %v9532_v63 = vsub.f32 %v19432_v57, %v19772_v28  ;;  %v9600_v15 = vmul.f32 1.442695, %v9525_v16  ;;  %v9604_v44 = vmul.f32 1.442695, %v9527_v41 }
 0x44e   : > { %15500 = vpow2.f32 %v9584_v45  ;;  %v9529_v29 = vsub.f32 %v19427_v55, %v19758_v22  ;;  %v9531_v22 = vsub.f32 %v19504_v12, %v19762_v9  ;;  %v9533_v12 = vsub.f32 %v19434_v40, %v19769_v60 }
 0x44f   : > { %v19778_v49 = vpop.xlane.xlu0 %9386  ;;  %v19781_v53 = vpop.xlane.xlu1 %9383  ;;  %15502 = vpow2.f32 %v9590_v62  ;;  %v9614_v57 = vmul.f32 1.442695, %v9532_v63 }
 0x450   : > { %15504 = vpow2.f32 %v9588_v13  ;;  %v9534_v28 = vsub.f32 %v19526_v56, %v19781_v53  ;;  %v9608_v55 = vmul.f32 1.442695, %v9529_v29  ;;  %v9616_v40 = vmul.f32 1.442695, %v9533_v12 }
 0x451   : > { %15506 = vpow2.f32 %v9598_v19  ;;  %v9535_v60 = vsub.f32 %v19534_v10, %v19778_v49 }
 0x452   : > { %15508 = vpow2.f32 %v9594_v31  ;;  %v9618_v56 = vmul.f32 1.442695, %v9534_v28 }
 0x453   : > { %v19789_v14 = vpop.xlane.xlu0 %9392  ;;  %v9390_v23 = vpop.xlane.xlu1 %9389  ;;  %15510 = vpow2.f32 %v9602_v36  ;;  %v9620_v10 = vmul.f32 1.442695, %v9535_v60 }
 0x454   : > { %15512 = vpow2.f32 %v9592_v7  ;;  %v9536_v53 = vsub.f32 %v19462_v37, %v9390_v23  ;;  %v9537_v49 = vsub.f32 %v19466_v48, %v19789_v14 }
 0x455   : > { %15514 = vpow2.f32 %v9606_v1 }
 0x456   : > { %15516 = vpow2.f32 %v9596_v51  ;;  %v9622_v37 = vmul.f32 1.442695, %v9536_v53  ;;  %v9624_v53 = vmul.f32 1.442695, %v9537_v49 }
 0x457   : > { %v19802_v0 = vpop.eup %15496  ;;  %v19810_v4 = vpop.xlane.xlu0 %9398  ;;  %15518 = vpow2.f32 %v9610_v58 }
 0x458   : > { %v9396_v45 = vpop.xlane.xlu1 %9395  ;;  %v9712_v34 = vsel %vm9321_vm3, %v19802_v0, 0.0  ;;  %15520 = vpow2.f32 %v9600_v15  ;;  %v9539_v48 = vsub.f32 %v19552_v50, %v19810_v4 }
 0x459   : > { %15522 = vpow2.f32 %v9614_v57  ;;  %v9538_v23 = vsub.f32 %v19542_v54, %v9396_v45 }
 0x45a   : > { %v19808_v18 = vpop.eup %15498  ;;  %15524 = vpow2.f32 %v9604_v44  ;;  %v9628_v50 = vmul.f32 1.442695, %v9539_v48 }
 0x45b   : > { %v19816_v62 = vpop.eup %15500  ;;  %v9718_v2 = vsel %vm9321_vm3, %v19808_v18, 0.0  ;;  %v19828_v24 = vpop.xlane.xlu0 %9404  ;;  %15526 = vpow2.f32 %v9618_v56  ;;  %v9626_v54 = vmul.f32 1.442695, %v9538_v23 }
 0x45c   : > { %v9715_v13 = vsel %vm9321_vm3, %v19816_v62, 0.0  ;;  %v9402_v31 = vpop.xlane.xlu1 %9401  ;;  %15528 = vpow2.f32 %v9608_v55  ;;  %v9541_v4 = vsub.f32 %v19478_v35, %v19828_v24 }
 0x45d   : > { %15530 = vpow2.f32 %v9622_v37  ;;  %v9540_v45 = vsub.f32 %v19472_v3, %v9402_v31 }
 0x45f   : > { %v9630_v3 = vmul.f32 1.442695, %v9540_v45  ;;  %v9632_v45 = vmul.f32 1.442695, %v9541_v4 }
 0x460   : > { %v9408_v7 = vpop.xlane.xlu1 %9407 }
 0x461   : > { %v9542_v41 = vsub.f32 %v19566_v20, %v9408_v7 }
 0x463   : > { %v9634_v20 = vmul.f32 1.442695, %v9542_v41 }
 0x464   : > { %v9414_v63 = vpop.xlane.xlu1 %9413 }
 0x465   : > { %9500 = vmax.xlane.f32.xlu0 %v9499_v43  ;;  %v19822_v43 = vpop.eup %15502  ;;  %v9544_v29 = vsub.f32 %v19486_v8, %v9414_v63 }
 0x466   : > { %v19830_v19 = vpop.eup %15504  ;;  %v9724_v38 = vsel %vm9321_vm3, %v19822_v43, 0.0 }
 0x467   : > { %v9721_v32 = vsel %vm9321_vm3, %v19830_v19, 0.0  ;;  %v9638_v8 = vmul.f32 1.442695, %v9544_v29 }
 0x469   : > { %9506 = vmax.xlane.f32.xlu0 %v9505_v47  ;;  %v19836_v47 = vpop.eup %15506 }
 0x46a   : > { %v9736_v36 = vsel %vm9321_vm3, %v19836_v47, 0.0 }
 0x46d   : > { %9509 = vmax.xlane.f32.xlu1 %v9508_v52  ;;  %9512 = vmax.xlane.f32.xlu0 %v9511_v33  ;;  %v19842_v52 = vpop.eup %15508  ;;  %v19849_v33 = vpop.xlane.xlu0 %9410 }
 0x46e   : > { %v19847_v27 = vpop.eup %15510  ;;  %v9730_v26 = vsel %vm9321_vm3, %v19842_v52, 0.0  ;;  %v9543_v35 = vsub.f32 %v19576_v30, %v19849_v33 }
 0x46f   : > { %23184 = vst [vmem:[#allocation72_spill] sm:$0xff] %v19847_v27  ;;  %v9742_v1 = vsel %vm9321_vm3, %v19847_v27, 0.0 }
 0x470   : > { %v9636_v41 = vmul.f32 1.442695, %v9543_v35 }
 0x471   : > { %9707 = vadd.xlane.f32.xlu1 %v9706_v17  ;;  %9710 = vadd.xlane.f32.xlu0 %v9709_v21  ;;  %v19855_v17 = vpop.eup %15512  ;;  %v9612_v21 = vmul.f32 1.442695, %v9531_v22  ;;  %v19864_v9 = vpop.xlane.xlu0 %9416 }
 0x472   : > { %v19860_v61 = vpop.eup %15514  ;;  %v9727_v51 = vsel %vm9321_vm3, %v19855_v17, 0.0 }
 0x473   : > { %23185 = vst [vmem:[#allocation80_spill] sm:$0xff] %v19860_v61  ;;  %v19868_v16 = vpop.eup %15516  ;;  %15532 = vpow2.f32 %v9612_v21 }
 0x474   : > { %v19873_v58 = vpop.eup %15518  ;;  %15534 = vpow2.f32 %v9626_v54 }
 0x475   : > { %9713 = vadd.xlane.f32.xlu1 %v9712_v34  ;;  %9719 = vadd.xlane.f32.xlu0 %v9718_v2  ;;  %v9748_v34 = vsel %vm9321_vm3, %v19860_v61, 0.0  ;;  %23186 = vst [vmem:[#allocation102_spill] sm:$0xff] %v19873_v58  ;;  %v9733_v2 = vsel %vm9321_vm3, %v19868_v16, 0.0  ;;  %v19879_v15 = vpop.eup %15520  ;;  %15536 = vpow2.f32 %v9616_v40  ;;  %v23195_v40 = vld [vmem:[#allocation96_spill] sm:$0xff] }
 0x476   : > { %v19884_v57 = vpop.eup %15522  ;;  %v9739_v31 = vsel %vm9321_vm3, %v19879_v15, 0.0  ;;  %15538 = vpow2.f32 %v9630_v3 }
 0x477   : > { %23187 = vst [vmem:[#allocation103_spill] sm:$0xff] %v19884_v57  ;;  %v19886_v28 = vpop.xlane.xlu0 %9422  ;;  %v19892_v44 = vpop.eup %15524  ;;  %15540 = vpow2.f32 %v9620_v10 }
 0x478   : > { %23188 = vst [vmem:[#allocation105_spill] sm:$0xff] %v19892_v44  ;;  %v19897_v56 = vpop.eup %15526  ;;  %15542 = vpow2.f32 %v9634_v20 }
 0x479   : > { %9725 = vadd.xlane.f32.xlu1 %v9724_v38  ;;  %9716 = vadd.xlane.f32.xlu0 %v9715_v13  ;;  %v9754_v13 = vsel %vm9321_vm3, %v19873_v58, 0.0  ;;  %v9420_v38 = vpop.xlane.xlu1 %9419  ;;  %23189 = vst [vmem:[#allocation114_spill] sm:$0xff] %v19897_v56  ;;  %v19905_v55 = vpop.eup %15528  ;;  %v9766_v7 = vsel %vm9321_vm3, %v19897_v56, 0.0  ;;  %15544 = vpow2.f32 %v9624_v53 }
 0x47a   : > { %23190 = vst [vmem:[#allocation97_spill] sm:$0xff] %v19905_v55  ;;  %v9546_v22 = vsub.f32 %v19602_v5, %v9420_v38  ;;  %v9751_v23 = vsel %vm9321_vm3, %v19905_v55, 0.0  ;;  %15546 = vpow2.f32 %v9638_v8 }
 0x47b   : > { %v19901_v14 = vpop.xlane.xlu0 %9428  ;;  %15548 = vpow2.f32 %v9628_v50 }
 0x47c   : > { %v9642_v5 = vmul.f32 1.442695, %v9546_v22 }
 0x47d   : > { %9737 = vadd.xlane.f32.xlu1 %v9736_v36  ;;  %9722 = vadd.xlane.f32.xlu0 %v9721_v32  ;;  %v9760_v32 = vsel %vm9321_vm3, %v19884_v57, 0.0  ;;  %v9745_v36 = vsel %vm9321_vm3, %v19892_v44, 0.0  ;;  %v9426_v37 = vpop.xlane.xlu1 %9425  ;;  %v23291_v44 = vld [vmem:[#allocation21_spill] sm:$0xff] }
 0x47e   : > { %v9548_v21 = vsub.f32 %v19518_v6, %v9426_v37  ;;  %15550 = vpow2.f32 %v9642_v5 }
 0x47f   : > { %15552 = vpow2.f32 %v9632_v45 }
 0x480   : > { %v9646_v6 = vmul.f32 1.442695, %v9548_v21 }
 0x481   : > { %9743 = vadd.xlane.f32.xlu1 %v9742_v1  ;;  %9731 = vadd.xlane.f32.xlu0 %v9730_v26  ;;  %v19910_v26 = vpop.eup %15530 }
 0x482   : > { %23191 = vst [vmem:[#allocation58_spill] sm:$0xff] %v19910_v26  ;;  %v19916_v1 = vpop.eup %15532  ;;  %v9772_v12 = vsel %vm9321_vm3, %v19910_v26, 0.0  ;;  %15554 = vpow2.f32 %v9646_v6 }
 0x483   : > { %23192 = vst [vmem:[#allocation25_spill] sm:$0xff] %v19916_v1  ;;  %15556 = vpow2.f32 %v9636_v41 }
 0x485   : > { %9749 = vadd.xlane.f32.xlu1 %v9748_v34  ;;  %9728 = vadd.xlane.f32.xlu0 %v9727_v51  ;;  %v19921_v51 = vpop.eup %15534  ;;  %v9757_v34 = vsel %vm9321_vm3, %v19916_v1, 0.0 }
 0x486   : > { %23193 = vst [vmem:[#allocation68_spill] sm:$0xff] %v19921_v51  ;;  %v19927_v63 = vpop.eup %15536 }
 0x487   : > { %v9432_v24 = vpop.xlane.xlu1 %9431  ;;  %23194 = vst [vmem:[#allocation81_spill] sm:$0xff] %v19927_v63  ;;  %v19932_v3 = vpop.eup %15538  ;;  %v9763_v30 = vsel %vm9321_vm3, %v19927_v63, 0.0 }
 0x488   : > { %23196 = vst [vmem:[#allocation106_spill] sm:$0xff] %v19932_v3  ;;  %v19936_v33 = vpop.eup %15540  ;;  %v9784_v38 = vsel %vm9321_vm3, %v19932_v3, 0.0 }
 0x489   : > { %9755 = vadd.xlane.f32.xlu1 %v9754_v13  ;;  %9734 = vadd.xlane.f32.xlu0 %v9733_v2  ;;  %v9778_v2 = vsel %vm9321_vm3, %v19921_v51, 0.0  ;;  %23197 = vst [vmem:[#allocation119_spill] sm:$0xff] %v19936_v33  ;;  %v23198_v13 = vld [vmem:[#allocation112_spill] sm:$0xff] }
 0x48a   : > { %v9545_v10 = vsub.f32 %v23198_v13, %v19864_v9  ;;  %v23201_v9 = vld [vmem:[#allocation41_spill] sm:$0xff] }
 0x48b   : > { %v9435_v54 = vpop.xlane.xlu0 %9434  ;;  %v9438_v20 = vpop.xlane.xlu1 %9437 }
 0x48c   : > { %v9551_v60 = vsub.f32 %v23195_v40, %v9435_v54  ;;  %v9640_v48 = vmul.f32 1.442695, %v9545_v10  ;;  %v23210_v10 = vld [vmem:[#allocation42_spill] sm:$0xff] }
 0x48d   : > { %9761 = vadd.xlane.f32.xlu1 %v9760_v32  ;;  %9740 = vadd.xlane.f32.xlu0 %v9739_v31  ;;  %v19942_v31 = vpop.eup %15542  ;;  %v9769_v32 = vsel %vm9321_vm3, %v19936_v33, 0.0 }
 0x48e   : > { %v9652_v49 = vmul.f32 1.442695, %v9551_v60  ;;  %23199 = vst [vmem:[#allocation89_spill] sm:$0xff] %v19942_v31  ;;  %v19946_v53 = vpop.eup %15544  ;;  %v9790_v8 = vsel %vm9321_vm3, %v19942_v31, 0.0 }
 0x48f   : > { %v9441_v29 = vpop.xlane.xlu0 %9440  ;;  %23200 = vst [vmem:[#allocation95_spill] sm:$0xff] %v19946_v53  ;;  %v19952_v22 = vpop.eup %15546  ;;  %v9775_v37 = vsel %vm9321_vm3, %v19946_v53, 0.0 }
 0x490   : > { %15558 = vpow2.f32 %v9652_v49  ;;  %23202 = vst [vmem:[#allocation77_spill] sm:$0xff] %v19952_v22  ;;  %v19956_v50 = vpop.eup %15548  ;;  %v9552_v49 = vsub.f32 %v23210_v10, %v9438_v20 }
 0x491   : > { %9767 = vadd.xlane.f32.xlu1 %v9766_v7  ;;  %9746 = vadd.xlane.f32.xlu0 %v9745_v36  ;;  %v9547_v36 = vsub.f32 %v23201_v9, %v19886_v28  ;;  %v9444_v7 = vpop.xlane.xlu1 %9443  ;;  %23203 = vst [vmem:[#allocation96_spill] sm:$0xff] %v19956_v50  ;;  %15560 = vpow2.f32 %v9640_v48  ;;  %v9796_v28 = vsel %vm9321_vm3, %v19952_v22, 0.0  ;;  %v19961_v21 = vpop.eup %15550  ;;  %v9781_v54 = vsel %vm9321_vm3, %v19956_v50, 0.0  ;;  %v23227_v22 = vld [vmem:[#allocation22_spill] sm:$0xff]  ;;  %v23238_v50 = vld [vmem:[#allocation117_spill] sm:$0xff] }
 0x492   : > { %23205 = vst [vmem:[#allocation112_spill] sm:$0xff] %v19961_v21  ;;  %v19967_v45 = vpop.eup %15552  ;;  %v9654_v9 = vmul.f32 1.442695, %v9552_v49 }
 0x493   : > { %v9644_v4 = vmul.f32 1.442695, %v9547_v36  ;;  %23206 = vst [vmem:[#allocation41_spill] sm:$0xff] %v19967_v45  ;;  %v19973_v40 = vpop.eup %15554  ;;  %v9787_v41 = vsel %vm9321_vm3, %v19967_v45, 0.0  ;;  %v23212_v36 = vld [vmem:[#allocation82_spill] sm:$0xff] }
 0x495   : > { %9773 = vadd.xlane.f32.xlu1 %v9772_v12  ;;  %9752 = vadd.xlane.f32.xlu0 %v9751_v23  ;;  %v23204_v23 = vld [vmem:[#allocation63_spill] sm:$0xff]  ;;  %v19963_v12 = vpop.xlane.xlu0 %9446  ;;  %15562 = vpow2.f32 %v9644_v4  ;;  %v9450_v60 = vpop.xlane.xlu1 %9449 }
 0x496   : > { %v9550_v5 = vsub.f32 %v23204_v23, %v9432_v24  ;;  %v9802_v24 = vsel %vm9321_vm3, %v19961_v21, 0.0  ;;  %23208 = vst [vmem:[#allocation63_spill] sm:$0xff] %v19973_v40  ;;  %v23214_v23 = vld [vmem:[#allocation45_spill] sm:$0xff] }
 0x498   : > { %v9650_v35 = vmul.f32 1.442695, %v9550_v5  ;;  %v9554_v5 = vsub.f32 %v23214_v23, %v9444_v7  ;;  %v23220_v7 = vld [vmem:[#allocation88_spill] sm:$0xff]  ;;  %v23222_v23 = vld [vmem:[#allocation19_spill] sm:$0xff] }
 0x499   : > { %9779 = vadd.xlane.f32.xlu1 %v9778_v2  ;;  %9758 = vadd.xlane.f32.xlu0 %v9757_v34  ;;  %v23207_v34 = vld [vmem:[#allocation85_spill] sm:$0xff]  ;;  %v9453_v2 = vpop.xlane.xlu0 %9452 }
 0x49a   : > { %v9549_v6 = vsub.f32 %v23207_v34, %v19901_v14  ;;  %15564 = vpow2.f32 %v9650_v35  ;;  %v9808_v14 = vsel %vm9321_vm3, %v19973_v40, 0.0  ;;  %v23225_v40 = vld [vmem:[#allocation115_spill] sm:$0xff] }
 0x49c   : > { %v9648_v13 = vmul.f32 1.442695, %v9549_v6  ;;  %v23217_v6 = vld [vmem:[#allocation66_spill] sm:$0xff] }
 0x49d   : > { %9785 = vadd.xlane.f32.xlu1 %v9784_v38  ;;  %9764 = vadd.xlane.f32.xlu0 %v9763_v30  ;;  %v19977_v30 = vpop.eup %15556  ;;  %v9459_v4 = vpop.xlane.xlu0 %9458 }
 0x49e   : > { %23209 = vst [vmem:[#allocation85_spill] sm:$0xff] %v19977_v30  ;;  %v19982_v38 = vpop.eup %15558  ;;  %v9793_v48 = vsel %vm9321_vm3, %v19977_v30, 0.0  ;;  %15566 = vpow2.f32 %v9648_v13  ;;  %v23219_v13 = vld [vmem:[#allocation120_spill] sm:$0xff] }
 0x49f   : > { %23211 = vst [vmem:[#allocation42_spill] sm:$0xff] %v19982_v38  ;;  %v19991_v20 = vpop.eup %15560  ;;  %15568 = vpow2.f32 %v9654_v9 }
 0x4a0   : > { %23213 = vst [vmem:[#allocation82_spill] sm:$0xff] %v19991_v20 }
 0x4a1   : > { %9791 = vadd.xlane.f32.xlu1 %v9790_v8  ;;  %9770 = vadd.xlane.f32.xlu0 %v9769_v32  ;;  %v19984_v32 = vpop.xlane.xlu1 %9455  ;;  %v9553_v8 = vsub.f32 %v23212_v36, %v9441_v29  ;;  %v23216_v29 = vld [vmem:[#allocation44_spill] sm:$0xff] }
 0x4a2   : > { %v19996_v35 = vpop.eup %15562 }
 0x4a3   : > { %23215 = vst [vmem:[#allocation45_spill] sm:$0xff] %v19996_v35  ;;  %v9805_v9 = vsel %vm9321_vm3, %v19996_v35, 0.0  ;;  %v23226_v35 = vld [vmem:[#allocation73_spill] sm:$0xff] }
 0x4a4   : > { %v20004_v49 = vpop.xlane.xlu0 %9467  ;;  %v6152_v21 = vcombine.low %v23226_v35, %v23225_v40 }
 0x4a5   : > { %9797 = vadd.xlane.f32.xlu1 %v9796_v28  ;;  %9776 = vadd.xlane.f32.xlu0 %v9775_v37  ;;  %v9817_v37 = vsel %vm9321_vm3, %v19982_v38, 0.0  ;;  %v9656_v28 = vmul.f32 1.442695, %v9553_v8  ;;  %v19998_v34 = vpop.xlane.xlu1 %9461 }
 0x4a7   : > { %15570 = vpow2.f32 %v9656_v28  ;;  %v20009_v36 = vpop.eup %15564  ;;  %v23223_v28 = vld [vmem:[#allocation49_spill] sm:$0xff] }
 0x4a8   : > { %23221 = vst [vmem:[#allocation44_spill] sm:$0xff] %v20009_v36 }
 0x4a9   : > { %9803 = vadd.xlane.f32.xlu1 %v9802_v24  ;;  %9782 = vadd.xlane.f32.xlu0 %v9781_v54  ;;  %v9799_v54 = vsel %vm9321_vm3, %v19991_v20, 0.0  ;;  %v6424_v24 = vcombine.low %v23217_v6, %v23216_v29  ;;  %v20011_v8 = vpop.xlane.xlu1 %9470 }
 0x4ad   : > { %9809 = vadd.xlane.f32.xlu1 %v9808_v14  ;;  %9788 = vadd.xlane.f32.xlu0 %v9787_v41  ;;  %v23218_v41 = vld [vmem:[#allocation16_spill] sm:$0xff]  ;;  %v9658_v14 = vmul.f32 1.442695, %v9554_v5 }
 0x4ae   : > { %v6440_v10 = vcombine.low %v23219_v13, %v23218_v41  ;;  %v6441_v38 = vcombine.high %v23219_v13, %v23218_v41 }
 0x4af   : > { %15572 = vpow2.f32 %v9658_v14  ;;  %v6160_v14 = vrot.slane %v6152_v21, %v23222_v23 }
 0x4b0   : > { %v6448_v5 = vrot.slane %v6440_v10, %v23222_v23  ;;  %v6455_v13 = vrot.slane %v6441_v38, %v23222_v23 }
 0x4b1   : > { %9818 = vadd.xlane.f32.xlu1 %v9817_v37  ;;  %9794 = vadd.xlane.f32.xlu0 %v9793_v48  ;;  %v9556_v48 = vsub.f32 %v23220_v7, %v9450_v60  ;;  %v6425_v37 = vcombine.high %v23217_v6, %v23216_v29  ;;  %v23224_v60 = vld [vmem:[#allocation113_spill] sm:$0xff]  ;;  %v9814_v29 = vsel %vm9321_vm3, %v20009_v36, 0.0  ;;  %v20026_v6 = vpop.eup %15566 }
 0x4b2   : > { %v6168_v7 = vcombine.low %v23224_v60, %v23223_v28  ;;  %23228 = vst [vmem:[#allocation66_spill] sm:$0xff] %v20026_v6  ;;  %v9811_v45 = vsel %vm9321_vm3, %v20026_v6, 0.0  ;;  %v6169_v38 = vcombine.high %v23224_v60, %v23223_v28  ;;  %v23233_v28 = vld [vmem:[#allocation26_spill] sm:$0xff] }
 0x4b3   : > { %v9662_v20 = vmul.f32 1.442695, %v9556_v48  ;;  %v6439_v41 = vrot.slane %v6425_v37, %v23222_v23  ;;  %v20032_v48 = vpop.xlane.xlu1 %9476  ;;  %v6153_v37 = vcombine.high %v23226_v35, %v23225_v40 }
 0x4b4   : > { %v6176_v31 = vrot.slane %v6168_v7, %v23222_v23 }
 0x4b5   : > { %9800 = vadd.xlane.f32.xlu0 %v9799_v54  ;;  %v6432_v54 = vrot.slane %v6424_v24, %v23222_v23  ;;  %v9465_v24 = vpop.xlane.xlu0 %9464  ;;  %15574 = vpow2.f32 %v9662_v20  ;;  %v6504_v20 = vcombine.low %v6439_v41, %v6455_v13  ;;  %v6505_v7 = vcombine.high %v6439_v41, %v6455_v13 }
 0x4b6   : > { %v9561_v60 = vsub.f32 %v23233_v28, %v9465_v24  ;;  %v6167_v35 = vrot.slane %v6153_v37, %v23222_v23  ;;  %v23239_v37 = vld [vmem:[#allocation92_spill] sm:$0xff] }
 0x4b7   : > { %v6488_v10 = vcombine.low %v6432_v54, %v6448_v5  ;;  %v6489_v30 = vcombine.high %v6432_v54, %v6448_v5  ;;  %v23231_v54 = vld [vmem:[#allocation20_spill] sm:$0xff]  ;;  %v20056_v41 = vpop.xlane.xlu1 %9482  ;;  %v9563_v51 = vsub.f32 %v23239_v37, %v20011_v8 }
 0x4b8   : > { %v6519_v13 = vrot.slane %v6505_v7, %v23231_v54 }
 0x4b9   : > { %9806 = vadd.xlane.f32.xlu0 %v9805_v9  ;;  %v9557_v9 = vsub.f32 %v23227_v22, %v9453_v2  ;;  %v23229_v2 = vld [vmem:[#allocation31_spill] sm:$0xff]  ;;  %v6496_v21 = vrot.slane %v6488_v10, %v23231_v54  ;;  %v6503_v5 = vrot.slane %v6489_v30, %v23231_v54  ;;  %v20047_v6 = vpop.xlane.xlu0 %9473  ;;  %v6183_v30 = vrot.slane %v6169_v38, %v23222_v23 }
 0x4ba   : > { %v9559_v36 = vsub.f32 %v23229_v2, %v9459_v4  ;;  %v23232_v4 = vld [vmem:[#allocation79_spill] sm:$0xff]  ;;  %v6217_v2 = vcombine.high %v6160_v14, %v6176_v31 }
 0x4bb   : > { %v9664_v22 = vmul.f32 1.442695, %v9557_v9  ;;  %v6216_v9 = vcombine.low %v6160_v14, %v6176_v31  ;;  %v6512_v31 = vrot.slane %v6504_v20, %v23231_v54  ;;  %v14436_v10 = vcombine.low %v6496_v21, %v6503_v5  ;;  %v23235_v14 = vld [vmem:[#allocation116_spill] sm:$0xff] }
 0x4bc   : > { %v9668_v3 = vmul.f32 1.442695, %v9559_v36  ;;  %v6231_v24 = vrot.slane %v6217_v2, %v23231_v54  ;;  %v14438_v53 = vcombine.high %v6496_v21, %v6503_v5  ;;  %v6233_v26 = vcombine.high %v6167_v35, %v6183_v30  ;;  %v20083_v5 = vpop.xlane.xlu1 %9491 }
 0x4bd   : > { %9815 = vadd.xlane.f32.xlu0 %v9814_v29  ;;  %v20037_v29 = vpop.eup %15568  ;;  %15576 = vpow2.f32 %v9664_v22  ;;  %v6224_v36 = vrot.slane %v6216_v9, %v23231_v54  ;;  %v23236_v22 = vld [vmem:[#allocation83_spill] sm:$0xff]  ;;  %v6232_v9 = vcombine.low %v6167_v35, %v6183_v30  ;;  %v20072_v2 = vpop.xlane.xlu0 %9479  ;;  %v14440_v33 = vcombine.low %v6512_v31, %v6519_v13  ;;  %v23242_v35 = vld [vmem:[#allocation60_spill] sm:$0xff] }
 0x4be   : > { %23230 = vst [vmem:[#allocation16_spill] sm:$0xff] %v20037_v29  ;;  %v20052_v40 = vpop.eup %15570  ;;  %v6288_v28 = vcombine.low %v23236_v22, %v23235_v14  ;;  %15578 = vpow2.f32 %v9668_v3  ;;  %v14442_v56 = vcombine.high %v6512_v31, %v6519_v13  ;;  %v6289_v3 = vcombine.high %v23236_v22, %v23235_v14  ;;  %v23244_v22 = vld [vmem:[#allocation99_spill] sm:$0xff] }
 0x4bf   : > { %23234 = vst [vmem:[#allocation120_spill] sm:$0xff] %v20052_v40  ;;  %v9823_v20 = vsel %vm9321_vm3, %v20052_v40, 0.0  ;;  %v20070_v7 = vpop.eup %15572  ;;  %v14420_v37 = vcombine.low %v6224_v36, %v6231_v24  ;;  %v9676_v30 = vmul.f32 1.442695, %v9563_v51  ;;  %v9565_v31 = vsub.f32 %v23242_v35, %v20032_v48 }
 0x4c0   : > { %23240 = vst [vmem:[#allocation88_spill] sm:$0xff] %v20070_v7  ;;  %v6296_v40 = vrot.slane %v6288_v28, %v23222_v23  ;;  %v9826_v13 = vsel %vm9321_vm3, %v20070_v7, 0.0  ;;  %v9555_v28 = vsub.f32 %v23244_v22, %v19963_v12  ;;  %v20098_v51 = vrot.slane %v14438_v53, %v23222_v23  ;;  %v23251_v22 = vld [vmem:[#allocation86_spill] sm:$0xff]  ;;  %v23253_v7 = vld [vmem:[#allocation93_spill] sm:$0xff] }
 0x4c1   : > { %9812 = vadd.xlane.f32.xlu0 %v9811_v45  ;;  %v9820_v45 = vsel %vm9321_vm3, %v20037_v29, 0.0  ;;  %v23237_v29 = vld [vmem:[#allocation118_spill] sm:$0xff]  ;;  %v20101_v48 = vrot.slane %v14440_v33, %v23222_v23  ;;  %v20111_v12 = vpop.xlane.xlu0 %9485  ;;  %v9680_v53 = vmul.f32 1.442695, %v9565_v31 }
 0x4c2   : > { %5598 = vrot.lane.b32.xlu1 %v23232_v4, %s15967_s11  ;;  %v6304_v38 = vcombine.low %v23238_v50, %v23237_v29  ;;  %v6305_v8 = vcombine.high %v23238_v50, %v23237_v29  ;;  %v20089_v14 = vpop.eup %15574  ;;  %v20092_v50 = vrot.slane %v6232_v9, %v23231_v54  ;;  %v6247_v29 = vrot.slane %v6233_v26, %v23231_v54  ;;  %v23248_v9 = vld [vmem:[#allocation40_spill] sm:$0xff] }
 0x4c3   : > { %23243 = vst [vmem:[#allocation113_spill] sm:$0xff] %v20089_v14  ;;  %23245 = vst [vmem:[#allocation115_spill] sm:$0xff] %v20098_v51  ;;  %v20109_v26 = vrot.slane %v14420_v37, %v23222_v23  ;;  %v9567_v33 = vsub.f32 %v23248_v9, %v20056_v41  ;;  %v9660_v37 = vmul.f32 1.442695, %v9555_v28  ;;  %v6560_v41 = vcombine.low %v23232_v4, %v23251_v22  ;;  %v23252_v9 = vld [vmem:[#allocation87_spill] sm:$0xff] }
 0x4c4   : > { %v6312_v21 = vrot.slane %v6304_v38, %v23222_v23  ;;  %23246 = vst [vmem:[#allocation73_spill] sm:$0xff] %v20101_v48  ;;  %v6303_v38 = vrot.slane %v6289_v3, %v23222_v23  ;;  %v9832_v3 = vsel %vm9321_vm3, %v20089_v14, 0.0  ;;  %v6576_v14 = vcombine.low %v23253_v7, %v23252_v9 }
 0x4c5   : > { %9821 = vadd.xlane.f32.xlu0 %v9820_v45  ;;  %v9672_v45 = vmul.f32 1.442695, %v9561_v60  ;;  %v20079_v60 = vrot.slane %v14436_v10, %v23222_v23  ;;  %v14422_v10 = vcombine.high %v6224_v36, %v6231_v24  ;;  %v14426_v63 = vcombine.high %v20092_v50, %v6247_v29 }
 0x4c6   : > { %v6352_v36 = vcombine.low %v6296_v40, %v6312_v21  ;;  %v6353_v24 = vcombine.high %v6296_v40, %v6312_v21  ;;  %v23250_v40 = vld [vmem:[#allocation43_spill] sm:$0xff]  ;;  %v6561_v28 = vcombine.high %v23232_v4, %v23251_v22  ;;  %v6577_v1 = vcombine.high %v23253_v7, %v23252_v9 }
 0x4c7   : > { %23241 = vst [vmem:[#allocation49_spill] sm:$0xff] %v20079_v60  ;;  %15580 = vpow2.f32 %v9672_v45  ;;  %v6319_v45 = vrot.slane %v6305_v8, %v23222_v23  ;;  %v14424_v8 = vcombine.low %v20092_v50, %v6247_v29  ;;  %v9558_v21 = vsub.f32 %v23250_v40, %v19984_v32  ;;  %v23256_v29 = vld [vmem:[#allocation24_spill] sm:$0xff] }
 0x4c8   : > { %15582 = vpow2.f32 %v9676_v30  ;;  %v6367_v57 = vrot.slane %v6353_v24, %v23231_v54  ;;  %v9684_v32 = vmul.f32 1.442695, %v9567_v33  ;;  %v9495_v24 = vpop.xlane.xlu0 %9494  ;;  %v6568_v33 = vrot.slane %v6560_v41, %v23222_v23 }
 0x4c9   : > { %9824 = vadd.xlane.f32.xlu0 %v9823_v20  ;;  %v20106_v20 = vrot.slane %v14442_v56, %v23222_v23  ;;  %v20120_v56 = vrot.slane %v14422_v10, %v23222_v23  ;;  %v6368_v30 = vcombine.low %v6303_v38, %v6319_v45  ;;  %v6369_v31 = vcombine.high %v6303_v38, %v6319_v45 }
 0x4ca   : > { %v20117_v35 = vpop.eup %15576  ;;  %v6360_v10 = vrot.slane %v6352_v36, %v23231_v54  ;;  %15584 = vpow2.f32 %v9680_v53  ;;  %v9666_v50 = vmul.f32 1.442695, %v9558_v21  ;;  %v9560_v36 = vsub.f32 %v23256_v29, %v19998_v34  ;;  %v23258_v34 = vld [vmem:[#allocation69_spill] sm:$0xff] }
 0x4cb   : > { %23247 = vst [vmem:[#allocation22_spill] sm:$0xff] %v20106_v20  ;;  %23249 = vst [vmem:[#allocation31_spill] sm:$0xff] %v20117_v35  ;;  %v9835_v38 = vsel %vm9321_vm3, %v20117_v35, 0.0  ;;  %v20137_v45 = vpop.eup %15578  ;;  %15586 = vpow2.f32 %v9660_v37  ;;  %v6376_v4 = vrot.slane %v6368_v30, %v23231_v54  ;;  %v6383_v53 = vrot.slane %v6369_v31, %v23231_v54  ;;  %v23257_v37 = vld [vmem:[#allocation91_spill] sm:$0xff] }
 0x4cc   : > { %23255 = vst [vmem:[#allocation20_spill] sm:$0xff] %v20137_v45  ;;  %v20148_v22 = vrot.slane %v14424_v8, %v23222_v23  ;;  %v14430_v7 = vcombine.high %v6360_v10, %v6367_v57  ;;  %v9562_v21 = vsub.f32 %v23257_v37, %v20004_v49  ;;  %15588 = vpow2.f32 %v9684_v32 }
 0x4cd   : > { %9827 = vadd.xlane.f32.xlu0 %v9826_v13  ;;  %v9489_v13 = vpop.xlane.xlu1 %9488  ;;  %v9571_v9 = vsub.f32 %v23258_v34, %v9495_v24  ;;  %v9841_v30 = vsel %vm9321_vm3, %v20137_v45, 0.0  ;;  %v6575_v41 = vrot.slane %v6561_v28, %v23222_v23  ;;  %15590 = vpow2.f32 %v9666_v50  ;;  %v23260_v28 = vld [vmem:[#allocation64_spill] sm:$0xff]  ;;  %v23261_v34 = vld [vmem:[#allocation46_spill] sm:$0xff] }
 0x4ce   : > { %v9670_v8 = vmul.f32 1.442695, %v9560_v36  ;;  %v14432_v49 = vcombine.low %v6376_v4, %v6383_v53  ;;  %v20166_v29 = vrot.slane %v14430_v7, %v23222_v23  ;;  %v14434_v24 = vcombine.high %v6376_v4, %v6383_v53  ;;  %v23264_v7 = vld [vmem:[#allocation61_spill] sm:$0xff] }
 0x4cf   : > { %v9674_v37 = vmul.f32 1.442695, %v9562_v21  ;;  %v9692_v50 = vmul.f32 1.442695, %v9571_v9  ;;  %v23265_v21 = vld [vmem:[#allocation101_spill] sm:$0xff] }
 0x4d0   : > { %v5912_v9 = vcombine.low %v23265_v21, %v23264_v7 }
 0x4d1   : > { %9833 = vadd.xlane.f32.xlu0 %v9832_v3  ;;  %v23254_v3 = vld [vmem:[#allocation107_spill] sm:$0xff] }
 0x4d2   : > { %v9569_v40 = vsub.f32 %v23254_v3, %v9489_v13  ;;  %v6584_v13 = vrot.slane %v6576_v14, %v23222_v23  ;;  %v14428_v3 = vcombine.low %v6360_v10, %v6367_v57  ;;  %v6591_v14 = vrot.slane %v6577_v1, %v23222_v23 }
 0x4d3   : > { %v20160_v57 = vrot.slane %v14426_v63, %v23222_v23  ;;  %v5928_v1 = vcombine.low %v23261_v34, %v23260_v28  ;;  %v5920_v58 = vrot.slane %v5912_v9, %v23222_v23 }
 0x4d4   : > { %v20155_v31 = vpop.eup %15580  ;;  %v6624_v10 = vcombine.low %v6568_v33, %v6584_v13  ;;  %v6625_v32 = vcombine.high %v6568_v33, %v6584_v13  ;;  %v6641_v33 = vcombine.high %v6575_v41, %v6591_v14  ;;  %v23263_v13 = vld [vmem:[#allocation54_spill] sm:$0xff] }
 0x4d5   : > { %9836 = vadd.xlane.f32.xlu0 %v9835_v38  ;;  %v9688_v38 = vmul.f32 1.442695, %v9569_v40  ;;  %23259 = vst [vmem:[#allocation79_spill] sm:$0xff] %v20155_v31  ;;  %v20163_v40 = vrot.slane %v14428_v3, %v23222_v23  ;;  %v9847_v63 = vsel %vm9321_vm3, %v20155_v31, 0.0  ;;  %v20172_v36 = vpop.eup %15582  ;;  %v9564_v3 = vsub.f32 %v23263_v13, %v20047_v6 }
 0x4d6   : > { %23262 = vst [vmem:[#allocation26_spill] sm:$0xff] %v20172_v36  ;;  %v6632_v4 = vrot.slane %v6624_v10, %v23231_v54  ;;  %v6639_v53 = vrot.slane %v6625_v32, %v23231_v54  ;;  %v20183_v31 = vrot.slane %v14432_v49, %v23222_v23  ;;  %v23270_v10 = vld [vmem:[#allocation104_spill] sm:$0xff]  ;;  %v5936_v32 = vrot.slane %v5928_v1, %v23222_v23 }
 0x4d7   : > { %15592 = vpow2.f32 %v9688_v38  ;;  %v5929_v38 = vcombine.high %v23261_v34, %v23260_v28  ;;  %v9853_v45 = vsel %vm9321_vm3, %v20172_v36, 0.0  ;;  %v20194_v28 = vpop.eup %15584  ;;  %v20197_v49 = vrot.slane %v14434_v24, %v23222_v23 }
 0x4d8   : > { %15594 = vpow2.f32 %v9670_v8  ;;  %23266 = vst [vmem:[#allocation116_spill] sm:$0xff] %v20183_v31  ;;  %v23268_v8 = vld [vmem:[#allocation23_spill] sm:$0xff]  ;;  %23271 = vst [vmem:[#allocation83_spill] sm:$0xff] %v20194_v28  ;;  %v20202_v35 = vpop.eup %15586  ;;  %v6655_v1 = vrot.slane %v6641_v33, %v23231_v54  ;;  %v9859_v33 = vsel %vm9321_vm3, %v20194_v28, 0.0 }
 0x4d9   : > { %9842 = vadd.xlane.f32.xlu0 %v9841_v30  ;;  %v6640_v30 = vcombine.low %v6575_v41, %v6591_v14  ;;  %v5913_v41 = vcombine.high %v23265_v21, %v23264_v7  ;;  %v23267_v14 = vld [vmem:[#allocation28_spill] sm:$0xff]  ;;  %15596 = vpow2.f32 %v9674_v37  ;;  %v9678_v7 = vmul.f32 1.442695, %v9564_v3  ;;  %23273 = vst [vmem:[#allocation118_spill] sm:$0xff] %v20202_v35  ;;  %v20216_v9 = vpop.eup %15588 }
 0x4da   : > { %v5656_v6 = vcombine.low %v23268_v8, %v23267_v14  ;;  %15598 = vpow2.f32 %v9692_v50  ;;  %v23272_v21 = vld [vmem:[#allocation108_spill] sm:$0xff]  ;;  %v14444_v50 = vcombine.low %v6632_v4, %v6639_v53  ;;  %v5943_v36 = vrot.slane %v5929_v38, %v23222_v23  ;;  %23274 = vst [vmem:[#allocation117_spill] sm:$0xff] %v20216_v9 }
 0x4db   : > { %v6648_v34 = vrot.slane %v6640_v30, %v23231_v54  ;;  %v9566_v37 = vsub.f32 %v23272_v21, %v20072_v2  ;;  %v5927_v55 = vrot.slane %v5913_v41, %v23222_v23  ;;  %v5657_v30 = vcombine.high %v23268_v8, %v23267_v14  ;;  %v23275_v41 = vld [vmem:[#allocation65_spill] sm:$0xff]  ;;  %v20222_v8 = vpop.eup %15590 }
 0x4dc   : > { %v5664_v2 = vrot.slane %v5656_v6, %v23222_v23  ;;  %v5976_v3 = vcombine.low %v5920_v58, %v5936_v32  ;;  %v5977_v21 = vcombine.high %v5920_v58, %v5936_v32  ;;  %15600 = vpow2.f32 %v9678_v7  ;;  %23276 = vst [vmem:[#allocation92_spill] sm:$0xff] %v20222_v8 }
 0x4dd   : > { %9848 = vadd.xlane.f32.xlu0 %v9847_v63  ;;  %v23269_v63 = vld [vmem:[#allocation27_spill] sm:$0xff]  ;;  %v9682_v38 = vmul.f32 1.442695, %v9566_v37  ;;  %v9568_v61 = vsub.f32 %v23275_v41, %v20111_v12  ;;  %v9829_v14 = vsel %vm9321_vm3, %v20202_v35, 0.0  ;;  %v14446_v6 = vcombine.high %v6632_v4, %v6639_v53  ;;  %v23279_v53 = vld [vmem:[#allocation52_spill] sm:$0xff] }
 0x4de   : > { %v5640_v13 = vcombine.low %v23270_v10, %v23269_v63  ;;  %v5641_v24 = vcombine.high %v23270_v10, %v23269_v63  ;;  %v14448_v63 = vcombine.low %v6648_v34, %v6655_v1  ;;  %v5992_v10 = vcombine.low %v5927_v55, %v5943_v36 }
 0x4df   : > { %v5993_v58 = vcombine.high %v5927_v55, %v5943_v36  ;;  %v20225_v32 = vrot.slane %v14444_v50, %v23222_v23  ;;  %v14450_v7 = vcombine.high %v6648_v34, %v6655_v1  ;;  %v20228_v37 = vrot.slane %v5657_v30, %v23222_v23 }
 0x4e0   : > { %v5984_v41 = vrot.slane %v5976_v3, %v23231_v54  ;;  %v5991_v4 = vrot.slane %v5977_v21, %v23231_v54  ;;  %v9865_v55 = vsel %vm9321_vm3, %v20216_v9, 0.0  ;;  %15602 = vpow2.f32 %v9682_v38 }
 0x4e1   : > { %9854 = vadd.xlane.f32.xlu0 %v9853_v45  ;;  %v5648_v45 = vrot.slane %v5640_v13, %v23222_v23  ;;  %v9498_v13 = vpop.xlane.xlu1 %9497  ;;  %23277 = vst [vmem:[#allocation60_spill] sm:$0xff] %v20225_v32  ;;  %v9570_v34 = vsub.f32 %v23279_v53, %v20083_v5  ;;  %v9686_v1 = vmul.f32 1.442695, %v9568_v61  ;;  %v9838_v50 = vsel %vm9321_vm3, %v20222_v8, 0.0 }
 0x4e2   : > { %v20246_v30 = vrot.slane %v14446_v6, %v23222_v23  ;;  %v20249_v3 = vrot.slane %v5992_v10, %v23231_v54  ;;  %v20252_v21 = vrot.slane %v5993_v58, %v23231_v54  ;;  %v20257_v61 = vrot.slane %v14448_v63, %v23222_v23 }
 0x4e3   : > { %v5704_v12 = vcombine.low %v5648_v45, %v5664_v2  ;;  %v5705_v38 = vcombine.high %v5648_v45, %v5664_v2  ;;  %v20260_v5 = vrot.slane %v14450_v7, %v23222_v23  ;;  %v14405_v58 = vcombine.low %v5984_v41, %v5991_v4  ;;  %v23286_v2 = vld [vmem:[#allocation35_spill] sm:$0xff]  ;;  %v23287_v45 = vld [vmem:[#allocation29_spill] sm:$0xff] }
 0x4e4   : > { %v20237_v36 = vpop.eup %15592  ;;  %23281 = vst [vmem:[#allocation43_spill] sm:$0xff] %v20246_v30  ;;  %23283 = vst [vmem:[#allocation87_spill] sm:$0xff] %v20257_v61  ;;  %v14407_v53 = vcombine.high %v5984_v41, %v5991_v4  ;;  %v5792_v9 = vcombine.low %v23287_v45, %v23286_v2  ;;  %v9690_v7 = vmul.f32 1.442695, %v9570_v34  ;;  %15604 = vpow2.f32 %v9686_v1 }
 0x4e5   : > { %9860 = vadd.xlane.f32.xlu0 %v9859_v33  ;;  %v20231_v33 = vrot.slane %v5641_v24, %v23222_v23  ;;  %23278 = vst [vmem:[#allocation99_spill] sm:$0xff] %v20237_v36  ;;  %v20243_v24 = vpop.eup %15594  ;;  %23284 = vst [vmem:[#allocation93_spill] sm:$0xff] %v20260_v5  ;;  %v9871_v63 = vsel %vm9321_vm3, %v20237_v36, 0.0  ;;  %v14409_v41 = vcombine.low %v20249_v3, %v20252_v21 }
 0x4e6   : > { %9830 = vadd.xlane.f32.xlu1 %v9829_v14  ;;  %23280 = vst [vmem:[#allocation40_spill] sm:$0xff] %v20243_v24  ;;  %v20254_v14 = vpop.permute.xlu0 %5596  ;;  %v20267_v10 = vpop.eup %15596  ;;  %v9844_v35 = vsel %vm9321_vm3, %v20243_v24, 0.0  ;;  %v20281_v4 = vrot.slane %v5705_v38, %v23231_v54  ;;  %v5793_v36 = vcombine.high %v23287_v45, %v23286_v2  ;;  %v5800_v24 = vrot.slane %v5792_v9, %v23222_v23 }
 0x4e7   : > { %23282 = vst [vmem:[#allocation86_spill] sm:$0xff] %v20254_v14  ;;  %v5720_v6 = vcombine.low %v20231_v33, %v20228_v37  ;;  %23285 = vst [vmem:[#allocation107_spill] sm:$0xff] %v20267_v10  ;;  %v20273_v28 = vpop.eup %15598  ;;  %v23290_v14 = vld [vmem:[#allocation47_spill] sm:$0xff]  ;;  %v5721_v1 = vcombine.high %v20231_v33, %v20228_v37  ;;  %15606 = vpow2.f32 %v9690_v7 }
 0x4e8   : > { %23288 = vst [vmem:[#allocation24_spill] sm:$0xff] %v20273_v28  ;;  %v5776_v27 = vcombine.low %v23291_v44, %v23290_v14  ;;  %v9877_v2 = vsel %vm9321_vm3, %v20273_v28, 0.0 }
 0x4e9   : > { %9866 = vadd.xlane.f32.xlu0 %v9865_v55  ;;  %v20263_v55 = vrot.slane %v5704_v12, %v23231_v54  ;;  %v23289_v12 = vld [vmem:[#allocation100_spill] sm:$0xff] }
 0x4ea   : > { %9839 = vadd.xlane.f32.xlu1 %v9838_v50  ;;  %v9504_v50 = vpop.xlane.xlu1 %9503  ;;  %v9572_v8 = vsub.f32 %v23289_v12, %v9498_v13  ;;  %v14411_v13 = vcombine.high %v20249_v3, %v20252_v21  ;;  %v5777_v12 = vcombine.high %v23291_v44, %v23290_v14  ;;  %v23292_v21 = vld [vmem:[#allocation71_spill] sm:$0xff]  ;;  %v20309_v44 = vrot.slane %v14407_v53, %v23222_v23 }
 0x4eb   : > { %v9574_v37 = vsub.f32 %v23292_v21, %v9504_v50  ;;  %v5784_v9 = vrot.slane %v5776_v27, %v23222_v23  ;;  %v5807_v14 = vrot.slane %v5793_v36, %v23222_v23  ;;  %v14391_v50 = vcombine.high %v20263_v55, %v20281_v4  ;;  %v23297_v27 = vld [vmem:[#allocation17_spill] sm:$0xff] }
 0x4ec   : > { %v9694_v3 = vmul.f32 1.442695, %v9572_v8  ;;  %23295 = vst [vmem:[#allocation64_spill] sm:$0xff] %v20309_v44  ;;  %v14389_v8 = vcombine.low %v20263_v55, %v20281_v4  ;;  %v5791_v53 = vrot.slane %v5777_v12, %v23222_v23  ;;  %v20328_v55 = vrot.slane %v14409_v41, %v23222_v23 }
 0x4ed   : > { %9872 = vadd.xlane.f32.xlu0 %v9871_v63  ;;  %v20292_v63 = vrot.slane %v5720_v6, %v23231_v54  ;;  %v20303_v6 = vpop.eup %15600  ;;  %v9698_v21 = vmul.f32 1.442695, %v9574_v37 }
 0x4ee   : > { %v9501_v34 = vpop.xlane.xlu0 %9500  ;;  %9845 = vadd.xlane.f32.xlu1 %v9844_v35  ;;  %v9850_v35 = vsel %vm9321_vm3, %v20267_v10, 0.0  ;;  %23293 = vst [vmem:[#allocation91_spill] sm:$0xff] %v20303_v6  ;;  %v20313_v45 = vpop.permute.xlu1 %5574  ;;  %23300 = vst [vmem:[#allocation61_spill] sm:$0xff] %v20328_v55  ;;  %v5856_v4 = vcombine.low %v5791_v53, %v5807_v14  ;;  %v5857_v12 = vcombine.high %v5791_v53, %v5807_v14 }
 0x4ef   : > { %v9573_v38 = vsub.f32 %v19668_v46, %v9501_v34  ;;  %v20306_v46 = vrot.slane %v14405_v58, %v23222_v23  ;;  %23296 = vst [vmem:[#allocation46_spill] sm:$0xff] %v20313_v45  ;;  %v5840_v34 = vcombine.low %v5784_v9, %v5800_v24  ;;  %v20325_v10 = vpop.eup %15602 }
 0x4f0   : > { %23299 = vst [vmem:[#allocation54_spill] sm:$0xff] %v20325_v10  ;;  %v9862_v45 = vsel %vm9321_vm3, %v20325_v10, 0.0 }
 0x4f1   : > { %v9696_v33 = vmul.f32 1.442695, %v9573_v38  ;;  %9878 = vadd.xlane.f32.xlu0 %v9877_v2  ;;  %23294 = vst [vmem:[#allocation69_spill] sm:$0xff] %v20306_v46  ;;  %v5841_v38 = vcombine.high %v5784_v9, %v5800_v24  ;;  %v23298_v2 = vld [vmem:[#allocation62_spill] sm:$0xff]  ;;  %v23301_v9 = vld [vmem:[#allocation67_spill] sm:$0xff] }
 0x4f2   : > { %v9507_v7 = vpop.xlane.xlu0 %9506  ;;  %9851 = vadd.xlane.f32.xlu1 %v9850_v35  ;;  %v6064_v36 = vcombine.low %v23298_v2, %v23297_v27  ;;  %v9856_v35 = vsel %vm9321_vm3, %v20303_v6, 0.0  ;;  %v5848_v6 = vrot.slane %v5840_v34, %v23231_v54  ;;  %v5871_v34 = vrot.slane %v5857_v12, %v23231_v54 }
 0x4f3   : > { %15608 = vpow2.f32 %v9696_v33  ;;  %v9575_v58 = vsub.f32 %v19744_v59, %v9507_v7  ;;  %v5735_v59 = vrot.slane %v5721_v1, %v23231_v54  ;;  %v23302_v7 = vld [vmem:[#allocation59_spill] sm:$0xff]  ;;  %v5855_v41 = vrot.slane %v5841_v38, %v23231_v54 }
 0x4f4   : > { %15610 = vpow2.f32 %v9694_v3  ;;  %v6048_v3 = vcombine.low %v23302_v7, %v23301_v9  ;;  %v6065_v1 = vcombine.high %v23298_v2, %v23297_v27  ;;  %v6072_v14 = vrot.slane %v6064_v36, %v23222_v23 }
 0x4f5   : > { %v9700_v28 = vmul.f32 1.442695, %v9575_v58  ;;  %v6049_v38 = vcombine.high %v23302_v7, %v23301_v9  ;;  %v14393_v36 = vcombine.low %v20292_v63, %v5735_v59  ;;  %v20360_v7 = vrot.slane %v14389_v8, %v23222_v23 }
 0x4f6   : > { %9857 = vadd.xlane.f32.xlu1 %v9856_v35  ;;  %v9510_v24 = vpop.xlane.xlu1 %9509  ;;  %v9513_v33 = vpop.xlane.xlu0 %9512 }
 0x4f7   : > { %15612 = vpow2.f32 %v9700_v28  ;;  %v9576_v37 = vsub.f32 %v19678_v39, %v9510_v24  ;;  %v9577_v58 = vsub.f32 %v19688_v25, %v9513_v33  ;;  %v20342_v28 = vpop.eup %15604  ;;  %v20345_v39 = vrot.slane %v14411_v13, %v23222_v23  ;;  %23306 = vst [vmem:[#allocation27_spill] sm:$0xff] %v20360_v7 }
 0x4f8   : > { %15614 = vpow2.f32 %v9698_v21  ;;  %23303 = vst [vmem:[#allocation101_spill] sm:$0xff] %v20342_v28  ;;  %v5864_v25 = vrot.slane %v5856_v4, %v23231_v54  ;;  %v14395_v21 = vcombine.high %v20292_v63, %v5735_v59  ;;  %v6056_v24 = vrot.slane %v6048_v3, %v23222_v23  ;;  %v20357_v9 = vpop.eup %15606 }
 0x4f9   : > { %v9702_v53 = vmul.f32 1.442695, %v9576_v37  ;;  %v9704_v35 = vmul.f32 1.442695, %v9577_v58  ;;  %23304 = vst [vmem:[#allocation28_spill] sm:$0xff] %v20345_v39  ;;  %v14397_v33 = vcombine.low %v5848_v6, %v5855_v41  ;;  %v14399_v13 = vcombine.high %v5848_v6, %v5855_v41  ;;  %23305 = vst [vmem:[#allocation23_spill] sm:$0xff] %v20357_v9 }
 0x4fa   : > { %9863 = vadd.xlane.f32.xlu1 %v9862_v45  ;;  %v9708_v27 = vpop.xlane.xlu1 %9707  ;;  %v9711_v2 = vpop.xlane.xlu0 %9710  ;;  %v6079_v37 = vrot.slane %v6065_v1, %v23222_v23  ;;  %v6112_v4 = vcombine.low %v6056_v24, %v6072_v14  ;;  %v6113_v12 = vcombine.high %v6056_v24, %v6072_v14  ;;  %v9868_v45 = vsel %vm9321_vm3, %v20342_v28, 0.0  ;;  %v23315_v24 = vld [vmem:[#allocation109_spill] sm:$0xff] }
 0x4fb   : > { %15616 = vpow2.f32 %v9702_v53  ;;  %v14401_v63 = vcombine.low %v5864_v25, %v5871_v34  ;;  %v6063_v59 = vrot.slane %v6049_v38, %v23222_v23  ;;  %v20364_v58 = vrot.slane %v14391_v50, %v23222_v23 }
 0x4fc   : > { %15618 = vpow2.f32 %v9704_v35  ;;  %v20367_v41 = vrot.slane %v14393_v36, %v23222_v23  ;;  %v20370_v1 = vrot.slane %v14395_v21, %v23222_v23  ;;  %v14403_v14 = vcombine.high %v5864_v25, %v5871_v34 }
 0x4fd   : > { %15620 = vrcp.f32 %v9708_v27  ;;  %23307 = vst [vmem:[#allocation104_spill] sm:$0xff] %v20364_v58  ;;  %v20375_v8 = vrot.slane %v14397_v33, %v23222_v23  ;;  %v20378_v35 = vrot.slane %v14399_v13, %v23222_v23  ;;  %v6128_v38 = vcombine.low %v6063_v59, %v6079_v37  ;;  %v23316_v33 = vld [vmem:[#allocation33_spill] sm:$0xff] }
 0x4fe   : > { %15622 = vrcp.f32 %v9711_v2  ;;  %9869 = vadd.xlane.f32.xlu1 %v9868_v45  ;;  %v9714_v6 = vpop.xlane.xlu1 %9713  ;;  %v9720_v3 = vpop.xlane.xlu0 %9719  ;;  %23308 = vst [vmem:[#allocation108_spill] sm:$0xff] %v20367_v41  ;;  %23309 = vst [vmem:[#allocation65_spill] sm:$0xff] %v20370_v1  ;;  %v6129_v27 = vcombine.high %v6063_v59, %v6079_v37  ;;  %v20381_v50 = vrot.slane %v6112_v4, %v23231_v54  ;;  %v9874_v36 = vsel %vm9321_vm3, %v20357_v9, 0.0 }
 0x4ff   : > { %23311 = vst [vmem:[#allocation35_spill] sm:$0xff] %v20375_v8  ;;  %23312 = vst [vmem:[#allocation29_spill] sm:$0xff] %v20378_v35  ;;  %v20384_v2 = vrot.slane %v6113_v12, %v23231_v54  ;;  %v20393_v21 = vrot.slane %v14401_v63, %v23222_v23  ;;  %v6184_v13 = vcombine.low %v23316_v33, %v23315_v24  ;;  %15624 = vrcp.f32 %v9714_v6 }
 0x500   : > { %v20372_v53 = vpop.eup %15608  ;;  %v6185_v37 = vcombine.high %v23316_v33, %v23315_v24  ;;  %v7304_v45 = vcombine.low %v20109_v26, %v20120_v56  ;;  %v7336_v59 = vcombine.low %v20148_v22, %v20160_v57  ;;  %v7440_v63 = vcombine.low %v20163_v40, %v20166_v29  ;;  %v23320_v24 = vld [vmem:[#allocation32_spill] sm:$0xff] }
 0x501   : > { %23310 = vst [vmem:[#allocation52_spill] sm:$0xff] %v20372_v53  ;;  %v9883_v25 = vsel %vm9321_vm3, %v20372_v53, 0.0  ;;  %v20390_v34 = vpop.eup %15610  ;;  %23314 = vst [vmem:[#allocation47_spill] sm:$0xff] %v20393_v21  ;;  %v7472_v53 = vcombine.low %v20183_v31, %v20197_v49  ;;  %v20412_v6 = vrot.slane %v14403_v14, %v23222_v23  ;;  %v20420_v28 = vrot.slane %v6129_v27, %v23231_v54 }
 0x502   : > { %23313 = vst [vmem:[#allocation100_spill] sm:$0xff] %v20390_v34  ;;  %9875 = vadd.xlane.f32.xlu1 %v9874_v36  ;;  %v20399_v4 = vpop.xlane.xlu1 %9725  ;;  %9884 = vadd.xlane.f32.xlu0 %v9883_v25  ;;  %v9717_v12 = vpop.xlane.xlu0 %9716  ;;  %v20415_v36 = vrot.slane %v6128_v38, %v23231_v54  ;;  %v23319_v25 = vld [vmem:[#allocation74_spill] sm:$0xff]  ;;  %v9880_v21 = vsel %vm9321_vm3, %v20390_v34, 0.0  ;;  %v20431_v38 = vrot.slane %v6184_v13, %v23222_v23 }
 0x503   : > { %23318 = vst [vmem:[#allocation71_spill] sm:$0xff] %v20412_v6  ;;  %v6200_v33 = vcombine.low %v23320_v24, %v23319_v25  ;;  %15626 = vrcp.f32 %v9717_v12  ;;  %v20434_v8 = vrot.slane %v6185_v37, %v23222_v23  ;;  %v6201_v27 = vcombine.high %v23320_v24, %v23319_v25  ;;  %v23324_v25 = vld [vmem:[#allocation51_spill] sm:$0xff] }
 0x504   : > { %v20409_v9 = vpop.eup %15612  ;;  %15628 = vrcp.f32 %v9720_v3  ;;  %v20441_v34 = vrot.slane %v7304_v45, %v23231_v54  ;;  %v20447_v13 = vrot.slane %v7440_v63, %v23231_v54  ;;  %v20450_v37 = vrot.slane %v7472_v53, %v23231_v54 }
 0x505   : > { %23317 = vst [vmem:[#allocation21_spill] sm:$0xff] %v20409_v9  ;;  %v9889_v14 = vsel %vm9321_vm3, %v20409_v9, 0.0  ;;  %v20428_v6 = vpop.eup %15614  ;;  %v20444_v9 = vrot.slane %v7336_v59, %v23231_v54  ;;  %v6208_v3 = vrot.slane %v6200_v33, %v23222_v23  ;;  %v7576_v45 = vcombine.low %v20079_v60, %v20098_v51  ;;  %v23326_v60 = vld [vmem:[#allocation78_spill] sm:$0xff] }
 0x506   : > { %23321 = vst [vmem:[#allocation17_spill] sm:$0xff] %v20428_v6  ;;  %9881 = vadd.xlane.f32.xlu1 %v9880_v21  ;;  %v20438_v12 = vpop.xlane.xlu1 %9737  ;;  %9890 = vadd.xlane.f32.xlu0 %v9889_v14  ;;  %v9723_v10 = vpop.xlane.xlu0 %9722  ;;  %v23323_v21 = vld [vmem:[#allocation94_spill] sm:$0xff]  ;;  %v9886_v59 = vsel %vm9321_vm3, %v20428_v6, 0.0  ;;  %v7608_v53 = vcombine.low %v20101_v48, %v20106_v20  ;;  %v7712_v63 = vcombine.low %v20225_v32, %v20246_v30 }
 0x507   : > { %v6320_v24 = vcombine.low %v23324_v25, %v23323_v21  ;;  %15630 = vrcp.f32 %v9723_v10  ;;  %v7744_v33 = vcombine.low %v20257_v61, %v20260_v5  ;;  %v6215_v10 = vrot.slane %v6201_v27, %v23222_v23  ;;  %v23327_v51 = vld [vmem:[#allocation18_spill] sm:$0xff] }
 0x508   : > { %v20452_v35 = vpop.eup %15616  ;;  %v6321_v39 = vcombine.high %v23324_v25, %v23323_v21  ;;  %v6336_v46 = vcombine.low %v23327_v51, %v23326_v60  ;;  %v6337_v61 = vcombine.high %v23327_v51, %v23326_v60  ;;  %v7368_v21 = vcombine.low %v20441_v34, %v20444_v9 }
 0x509   : > { %23322 = vst [vmem:[#allocation62_spill] sm:$0xff] %v20452_v35  ;;  %v20459_v14 = vpop.eup %15618  ;;  %v7504_v25 = vcombine.low %v20447_v13, %v20450_v37  ;;  %v6249_v5 = vcombine.high %v20431_v38, %v6208_v3  ;;  %v20489_v30 = vrot.slane %v7576_v45, %v23231_v54  ;;  %v9892_v60 = vsel %vm9321_vm3, %v20452_v35, 0.0 }
 0x50a   : > { %23325 = vst [vmem:[#allocation67_spill] sm:$0xff] %v20459_v14  ;;  %v15621_v55 = vpop.eup %15620  ;;  %9887 = vadd.xlane.f32.xlu1 %v9886_v59  ;;  %v20474_v6 = vpop.xlane.xlu1 %9743  ;;  %v9895_v48 = vsel %vm9321_vm3, %v20459_v14, 0.0  ;;  %v6248_v59 = vcombine.low %v20431_v38, %v6208_v3  ;;  %v20497_v51 = vrot.slane %v7712_v63, %v23231_v54  ;;  %15632 = vrcp.f32 %v20399_v4 }
 0x50b   : > { %v9732_v20 = vpop.xlane.xlu0 %9731  ;;  %v15623_v32 = vpop.eup %15622  ;;  %9896 = vadd.xlane.f32.xlu0 %v9895_v48  ;;  %v9962_v27 = vmul.f32 %v15621_v55, %v19791_v11  ;;  %v20494_v11 = vrot.slane %v7608_v53, %v23231_v54  ;;  %v20500_v48 = vrot.slane %v7744_v33, %v23231_v54  ;;  %v14415_v55 = vcombine.high %v20381_v50, %v20384_v2 }
 0x50c   : > { %v9963_v14 = vmul.f32 %v15623_v32, %v19796_v42  ;;  %v6328_v42 = vrot.slane %v6320_v24, %v23222_v23  ;;  %v15625_v45 = vpop.eup %15624  ;;  %v6264_v53 = vcombine.low %v20434_v8, %v6215_v10  ;;  %v6265_v63 = vcombine.high %v20434_v8, %v6215_v10 }
 0x50d   : > { %v6335_v33 = vrot.slane %v6321_v39, %v23222_v23  ;;  %v7786_v35 = vpack.c.bf16 %v7504_v25, %v7368_v21  ;;  %v6256_v44 = vrot.slane %v6248_v59, %v23231_v54  ;;  %v6344_v41 = vrot.slane %v6336_v46, %v23222_v23 }
 0x50e   : > { %v10026_v32 = vpack.c.bf16 %v9963_v14, %v9962_v27  ;;  %9893 = vadd.xlane.f32.xlu1 %v9892_v60  ;;  %v20506_v38 = vpop.xlane.xlu1 %9749  ;;  %v6351_v24 = vrot.slane %v6337_v61, %v23222_v23  ;;  %v6263_v14 = vrot.slane %v6249_v5, %v23231_v54  ;;  %v7640_v27 = vcombine.low %v20489_v30, %v20494_v11 }
 0x50f   : > { %v9729_v3 = vpop.xlane.xlu0 %9728  ;;  %v7776_v39 = vcombine.low %v20497_v51, %v20500_v48  ;;  %v23328_v8 = vmov 0.0   ;;  %v14417_v46 = vcombine.low %v20415_v36, %v20420_v28  ;;  %v9964_v21 = vmul.f32 %v15625_v45, %v19802_v0 }
 0x510   : > { %15018 = vmatmul.mubr.msk.bf16.vlgmr.msra.gmra.mxu0 %vm9321_vm3, %v10026_v32  ;;  %15634 = vrcp.f32 %v9729_v3  ;;  %v15627_v4 = vpop.eup %15626  ;;  %v23329_v25 = vcombine.low %v20381_v50, %v20384_v2  ;;  %v14419_v60 = vcombine.high %v20415_v36, %v20420_v28  ;;  %v6279_v32 = vrot.slane %v6265_v63, %v23231_v54 }
 0x511   : > { %15028 = vmatpush3.bf16.msra.mxu0 %v7786_v35  ;;  %15029 = vmatprep.mubr.msk.bf16.mxu0 %vm15971_vm1, %v23328_v8  ;;  %15636 = vrcp.f32 %v9732_v20  ;;  %v9965_v5 = vmul.f32 %v15627_v4, %v19816_v62  ;;  %v15629_v35 = vpop.eup %15628  ;;  %v6272_v20 = vrot.slane %v6264_v53, %v23231_v54  ;;  %v6384_v3 = vcombine.low %v6328_v42, %v6344_v41 }
 0x512   : > { %v20524_v61 = vpop.xlane.xlu1 %9755  ;;  %15039 = vmatprep.subr.bf16.mxu0 %v23328_v8  ;;  %v20533_v59 = vrot.slane %v23329_v25, %v23222_v23  ;;  %v6385_v0 = vcombine.high %v6328_v42, %v6344_v41  ;;  %v14421_v4 = vcombine.low %v6256_v44, %v6263_v14  ;;  %v6400_v1 = vcombine.low %v6335_v33, %v6351_v24  ;;  %v23338_v25 = vld [vmem:[#allocation38_spill] sm:$0xff] }
 0x513   : > { %v9735_v10 = vpop.xlane.xlu0 %9734  ;;  %v10027_v62 = vpack.c.bf16 %v9965_v5, %v9964_v21  ;;  %v6401_v7 = vcombine.high %v6335_v33, %v6351_v24  ;;  %v7787_v58 = vpack.c.bf16 %v7776_v39, %v7640_v27  ;;  %v14423_v31 = vcombine.high %v6256_v44, %v6263_v14  ;;  %v23333_v14 = vld [vmem:[#allocation76_spill] sm:$0xff]  ;;  %v23334_v27 = vld [vmem:[#allocation90_spill] sm:$0xff] }
 0x514   : > { %23330 = vst [vmem:[#allocation59_spill] sm:$0xff] %v20533_v59  ;;  %15638 = vrcp.f32 %v9735_v10  ;;  %v15631_v45 = vpop.eup %15630  ;;  %v9966_v2 = vmul.f32 %v15629_v35, %v19808_v18  ;;  %v20546_v41 = vrot.slane %v14415_v55, %v23222_v23  ;;  %v20549_v42 = vrot.slane %v14417_v46, %v23222_v23  ;;  %v23335_v21 = vld [vmem:[#allocation84_spill] sm:$0xff]  ;;  %v23337_v5 = vld [vmem:[#allocation34_spill] sm:$0xff] }
 0x515   : > { %15640 = vrcp.f32 %v20438_v12  ;;  %15024 = vmatmul.mubr.msk.bf16.vlgmr.msra.gmra.mxu1 %vm9321_vm3, %v10027_v62  ;;  %v9967_v36 = vmul.f32 %v15631_v45, %v19830_v19  ;;  %v14425_v53 = vcombine.low %v6272_v20, %v6279_v32  ;;  %v20554_v44 = vrot.slane %v14419_v60, %v23222_v23  ;;  %v23339_v60 = vld [vmem:[#allocation37_spill] sm:$0xff]  ;;  %v23342_v62 = vld [vmem:[#allocation56_spill] sm:$0xff]  ;;  %v23343_v45 = vld [vmem:[#allocation55_spill] sm:$0xff] }
 0x516   : > { %v20541_v50 = vpop.xlane.xlu1 %9761  ;;  %23331 = vst [vmem:[#allocation109_spill] sm:$0xff] %v20549_v42  ;;  %15034 = vmatpush3.bf16.msra.mxu1 %v7787_v58  ;;  %15035 = vmatprep.mubr.msk.bf16.mxu1 %vm15971_vm1, %v23328_v8  ;;  %v14427_v12 = vcombine.high %v6272_v20, %v6279_v32  ;;  %v6392_v18 = vrot.slane %v6384_v3, %v23231_v54  ;;  %v23340_v32 = vld [vmem:[#allocation48_spill] sm:$0xff]  ;;  %v23341_v3 = vld [vmem:[#allocation39_spill] sm:$0xff] }
 0x517   : > { %v9741_v28 = vpop.xlane.xlu0 %9740  ;;  %23332 = vst [vmem:[#allocation33_spill] sm:$0xff] %v20554_v44  ;;  %v10028_v63 = vpack.c.bf16 %v9967_v36, %v9966_v2  ;;  %15045 = vmatprep.subr.bf16.mxu1 %v23328_v8  ;;  %v6399_v19 = vrot.slane %v6385_v0, %v23231_v54  ;;  %v20560_v55 = vrot.slane %v6400_v1, %v23231_v54  ;;  %v15633_v10 = vpop.eup %15632 }
 0x518   : > { %15642 = vrcp.f32 %v9741_v28  ;;  %v20563_v58 = vrot.slane %v6401_v7, %v23231_v54  ;;  %v20566_v33 = vrot.slane %v14421_v4, %v23222_v23  ;;  %v20569_v24 = vrot.slane %v14423_v31, %v23222_v23  ;;  %v23336_v31 = vld [vmem:[#allocation36_spill] sm:$0xff] }
 0x519   : > { %v6456_v39 = vcombine.low %v23334_v27, %v23333_v14  ;;  %15644 = vrcp.f32 %v20474_v6  ;;  %15030 = vmatmul.mubr.msk.bf16.vlgmr.msra.gmra.mxu0 %vm9321_vm3, %v10028_v63  ;;  %v20578_v7 = vrot.slane %v14425_v53, %v23222_v23  ;;  %v7033_v35 = vcombine.high %v23337_v5, %v23336_v31  ;;  %v23344_v63 = vld [vmem:[#allocation75_spill] sm:$0xff] }
 0x51a   : > { %v20575_v46 = vpop.xlane.xlu1 %9767  ;;  %15040 = vmatpush3.bf16.msra.mxu0 %v23335_v21  ;;  %15041 = vmatprep.mubr.msk.bf16.mxu0 %vm15971_vm1, %v23328_v8  ;;  %v7065_v6 = vcombine.high %v23339_v60, %v23338_v25  ;;  %v20588_v20 = vrot.slane %v14427_v12, %v23222_v23  ;;  %v7169_v0 = vcombine.high %v23341_v3, %v23340_v32  ;;  %v23345_v21 = vld [vmem:[#allocation30_spill] sm:$0xff] }
 0x51b   : > { %v9747_v1 = vpop.xlane.xlu0 %9746  ;;  %15051 = vmatprep.subr.bf16.mxu0 %v23328_v8  ;;  %v7201_v4 = vcombine.high %v23343_v45, %v23342_v62  ;;  %v14429_v2 = vcombine.low %v6392_v18, %v6399_v19  ;;  %v14431_v36 = vcombine.high %v6392_v18, %v6399_v19  ;;  %v14433_v53 = vcombine.low %v20560_v55, %v20563_v58  ;;  %v23346_v19 = vld [vmem:[#allocation53_spill] sm:$0xff]  ;;  %v23347_v3 = vld [vmem:[#allocation50_spill] sm:$0xff] }
 0x51c   : > { %15646 = vrcp.f32 %v9747_v1  ;;  %v7233_v31 = vcombine.high %v23345_v21, %v23344_v63  ;;  %v14435_v12 = vcombine.high %v20560_v55, %v20563_v58  ;;  %v9968_v25 = vmul.f32 %v15633_v10, %v19822_v43 }
 0x51d   : > { %v15635_v28 = vpop.eup %15634  ;;  %15648 = vrcp.f32 %v20506_v38  ;;  %v6457_v18 = vcombine.high %v23334_v27, %v23333_v14  ;;  %v7097_v62 = vcombine.high %v23347_v3, %v23346_v19  ;;  %v7047_v45 = vrot.slane %v7033_v35, %v23231_v54 }
 0x51e   : > { %v20602_v1 = vpop.xlane.xlu1 %9773  ;;  %v9969_v60 = vmul.f32 %v15635_v28, %v19855_v17  ;;  %v15637_v32 = vpop.eup %15636  ;;  %v7079_v55 = vrot.slane %v7065_v6, %v23231_v54  ;;  %v7183_v58 = vrot.slane %v7169_v0, %v23231_v54  ;;  %v7215_v63 = vrot.slane %v7201_v4, %v23231_v54 }
 0x51f   : > { %v9753_v5 = vpop.xlane.xlu0 %9752  ;;  %v20615_v17 = vrot.slane %v6456_v39, %v23222_v23  ;;  %v7789_v10 = vpack.c.bf16 %v7233_v31, %v7097_v62  ;;  %v7369_v14 = vcombine.high %v20441_v34, %v20444_v9  ;;  %v7505_v27 = vcombine.high %v20447_v13, %v20450_v37 }
 0x520   : > { %15650 = vrcp.f32 %v9753_v5  ;;  %v10029_v38 = vpack.c.bf16 %v9969_v60, %v9968_v25  ;;  %v20622_v35 = vrot.slane %v14429_v2, %v23222_v23  ;;  %v9970_v39 = vmul.f32 %v15637_v32, %v19842_v52 }
 0x521   : > { %v15639_v43 = vpop.eup %15638  ;;  %15652 = vrcp.f32 %v20524_v61  ;;  %v20631_v9 = vrot.slane %v14431_v36, %v23222_v23  ;;  %v20634_v34 = vrot.slane %v14433_v53, %v23222_v23  ;;  %v7098_v13 = vcombine.low %v7047_v45, %v7079_v55 }
 0x522   : > { %15036 = vmatmul.mubr.msk.bf16.vlgmr.msra.gmra.mxu1 %vm9321_vm3, %v10029_v38  ;;  %v20626_v6 = vpop.xlane.xlu1 %9779  ;;  %v9971_v4 = vmul.f32 %v15639_v43, %v19868_v16  ;;  %v15641_v28 = vpop.eup %15640  ;;  %v7234_v61 = vcombine.low %v7183_v58, %v7215_v63  ;;  %v7099_v52 = vcombine.high %v7047_v45, %v7079_v55  ;;  %v7790_v16 = vpack.c.bf16 %v7505_v27, %v7369_v14  ;;  %v23352_v45 = vld [vmem:[#allocation105_spill] sm:$0xff]  ;;  %v23354_v27 = vld [vmem:[#allocation108_spill] sm:$0xff] }
 0x523   : > { %v9759_v0 = vpop.xlane.xlu0 %9758  ;;  %15046 = vmatpush3.bf16.msra.mxu1 %v7789_v10  ;;  %15047 = vmatprep.mubr.msk.bf16.mxu1 %vm15971_vm1, %v23328_v8  ;;  %v7641_v36 = vcombine.high %v20489_v30, %v20494_v11  ;;  %v7777_v53 = vcombine.high %v20497_v51, %v20500_v48  ;;  %v7235_v21 = vcombine.high %v7183_v58, %v7215_v63  ;;  %v23348_v51 = vld [vmem:[#allocation116_spill] sm:$0xff]  ;;  %v23353_v14 = vld [vmem:[#allocation65_spill] sm:$0xff] }
 0x524   : > { %15654 = vrcp.f32 %v9759_v0  ;;  %v10030_v37 = vpack.c.bf16 %v9971_v4, %v9970_v39  ;;  %15057 = vmatprep.subr.bf16.mxu1 %v23328_v8  ;;  %v9972_v25 = vmul.f32 %v15641_v28, %v19836_v47  ;;  %v7305_v32 = vcombine.high %v20109_v26, %v20120_v56  ;;  %v23355_v39 = vld [vmem:[#allocation64_spill] sm:$0xff]  ;;  %v23356_v4 = vld [vmem:[#allocation69_spill] sm:$0xff] }
 0x525   : > { %v15643_v2 = vpop.eup %15642  ;;  %15656 = vrcp.f32 %v20541_v50  ;;  %v7337_v30 = vcombine.high %v20148_v22, %v20160_v57  ;;  %v7441_v11 = vcombine.high %v20163_v40, %v20166_v29  ;;  %v7473_v48 = vcombine.high %v23348_v51, %v20197_v49  ;;  %v23349_v57 = vld [vmem:[#allocation104_spill] sm:$0xff]  ;;  %v23350_v40 = vld [vmem:[#allocation27_spill] sm:$0xff] }
 0x526   : > { %15042 = vmatmul.mubr.msk.bf16.vlgmr.msra.gmra.mxu0 %vm9321_vm3, %v10030_v37  ;;  %v20645_v31 = vpop.xlane.xlu1 %9785  ;;  %v9973_v60 = vmul.f32 %v15643_v2, %v19879_v15  ;;  %v15645_v19 = vpop.eup %15644  ;;  %v20660_v47 = vrot.slane %v14435_v12, %v23222_v23  ;;  %v20663_v15 = vrot.slane %v6457_v18, %v23222_v23  ;;  %v7791_v50 = vpack.c.bf16 %v7777_v53, %v7641_v36  ;;  %v23351_v18 = vld [vmem:[#allocation72_spill] sm:$0xff]  ;;  %v23357_v37 = vld [vmem:[#allocation115_spill] sm:$0xff]  ;;  %v23359_v2 = vld [vmem:[#allocation22_spill] sm:$0xff] }
 0x527   : > { %v9765_v5 = vpop.xlane.xlu0 %9764  ;;  %15052 = vmatpush3.bf16.msra.mxu0 %v7790_v16  ;;  %15053 = vmatprep.mubr.msk.bf16.mxu0 %vm15971_vm1, %v23328_v8  ;;  %v7793_v3 = vpack.c.bf16 %v7234_v61, %v7098_v13  ;;  %v20666_v22 = vpack.c.bf16 %v7235_v21, %v7099_v52  ;;  %v6776_v29 = vcombine.low %v23350_v40, %v23349_v57  ;;  %v23358_v61 = vld [vmem:[#allocation49_spill] sm:$0xff]  ;;  %v23361_v53 = vld [vmem:[#allocation43_spill] sm:$0xff]  ;;  %v23362_v21 = vld [vmem:[#allocation60_spill] sm:$0xff] }
 0x528   : > { %15658 = vrcp.f32 %v9765_v5  ;;  %v10031_v26 = vpack.c.bf16 %v9973_v60, %v9972_v25  ;;  %15063 = vmatprep.subr.bf16.mxu0 %v23328_v8  ;;  %v9974_v62 = vmul.f32 %v15645_v19, %v23351_v18  ;;  %v20677_v38 = vrot.slane %v7305_v32, %v23231_v54  ;;  %v23360_v16 = vld [vmem:[#allocation73_spill] sm:$0xff]  ;;  %v23364_v60 = vld [vmem:[#allocation87_spill] sm:$0xff] }
 0x529   : > { %v15647_v56 = vpop.eup %15646  ;;  %15660 = vrcp.f32 %v20575_v46  ;;  %v20682_v63 = vrot.slane %v7337_v30, %v23231_v54  ;;  %v20685_v46 = vrot.slane %v7441_v11, %v23231_v54  ;;  %v20688_v43 = vrot.slane %v7473_v48, %v23231_v54  ;;  %v23363_v25 = vld [vmem:[#allocation93_spill] sm:$0xff]  ;;  %v23365_v11 = vld [vmem:[#allocation80_spill] sm:$0xff] }
 0x52a   : > { %15048 = vmatmul.mubr.msk.bf16.vlgmr.msra.gmra.mxu1 %vm9321_vm3, %v10031_v26  ;;  %v20672_v49 = vpop.xlane.xlu1 %9791  ;;  %v9975_v55 = vmul.f32 %v15647_v56, %v23352_v45  ;;  %v15649_v58 = vpop.eup %15648  ;;  %v6808_v0 = vcombine.low %v23354_v27, %v23353_v14  ;;  %v7048_v28 = vcombine.low %v23356_v4, %v23355_v39  ;;  %v7577_v52 = vcombine.high %v23358_v61, %v23357_v37  ;;  %v23366_v48 = vld [vmem:[#allocation97_spill] sm:$0xff]  ;;  %v23367_v56 = vld [vmem:[#allocation28_spill] sm:$0xff]  ;;  %v23372_v61 = vld [vmem:[#allocation71_spill] sm:$0xff] }
 0x52b   : > { %v9771_v12 = vpop.xlane.xlu0 %9770  ;;  %15058 = vmatpush3.bf16.msra.mxu1 %v7791_v50  ;;  %15059 = vmatprep.mubr.msk.bf16.mxu1 %vm15971_vm1, %v23328_v8  ;;  %v7609_v36 = vcombine.high %v23360_v16, %v23359_v2  ;;  %v7713_v5 = vcombine.high %v23362_v21, %v23361_v53  ;;  %v7745_v32 = vcombine.high %v23364_v60, %v23363_v25  ;;  %v23368_v50 = vld [vmem:[#allocation61_spill] sm:$0xff]  ;;  %v23373_v2 = vld [vmem:[#allocation47_spill] sm:$0xff] }
 0x52c   : > { %15662 = vrcp.f32 %v9771_v12  ;;  %v10032_v10 = vpack.c.bf16 %v9975_v55, %v9974_v62  ;;  %15069 = vmatprep.subr.bf16.mxu1 %v23328_v8  ;;  %v9976_v51 = vmul.f32 %v15649_v58, %v23365_v11  ;;  %v23369_v62 = vld [vmem:[#allocation110_spill] sm:$0xff]  ;;  %v7506_v45 = vcombine.low %v20685_v46, %v20688_v43 }
 0x52d   : > { %v15651_v13 = vpop.eup %15650  ;;  %15664 = vrcp.f32 %v20602_v1  ;;  %v7370_v1 = vcombine.low %v20677_v38, %v20682_v63  ;;  %v20719_v55 = vrot.slane %v6776_v29, %v23231_v54  ;;  %v6944_v16 = vcombine.low %v23373_v2, %v23372_v61 }
 0x52e   : > { %15054 = vmatmul.mubr.msk.bf16.vlgmr.msra.gmra.mxu0 %vm9321_vm3, %v10032_v10  ;;  %v20705_v19 = vpop.xlane.xlu1 %9797  ;;  %v9977_v26 = vmul.f32 %v15651_v13, %v23366_v48  ;;  %v15653_v18 = vpop.eup %15652  ;;  %v23370_v10 = vld [vmem:[#allocation29_spill] sm:$0xff]  ;;  %v23371_v13 = vld [vmem:[#allocation35_spill] sm:$0xff]  ;;  %v7591_v21 = vrot.slane %v7577_v52, %v23231_v54  ;;  %v7623_v25 = vrot.slane %v7609_v36, %v23231_v54  ;;  %v7727_v60 = vrot.slane %v7713_v5, %v23231_v54 }
 0x52f   : > { %v9777_v30 = vpop.xlane.xlu0 %9776  ;;  %15064 = vmatpush3.bf16.msra.mxu0 %v23369_v62  ;;  %15065 = vmatprep.mubr.msk.bf16.mxu0 %vm15971_vm1, %v23328_v8  ;;  %v6912_v37 = vcombine.low %v23371_v13, %v23370_v10  ;;  %v7759_v29 = vrot.slane %v7745_v32, %v23231_v54  ;;  %v20737_v12 = vrot.slane %v6808_v0, %v23231_v54 }
 0x530   : > { %15666 = vrcp.f32 %v9777_v30  ;;  %v10033_v58 = vpack.c.bf16 %v9977_v26, %v9976_v51  ;;  %15075 = vmatprep.subr.bf16.mxu0 %v23328_v8  ;;  %v23374_v51 = vld [vmem:[#allocation102_spill] sm:$0xff]  ;;  %v23375_v26 = vld [vmem:[#allocation25_spill] sm:$0xff]  ;;  %v7794_v36 = vpack.c.bf16 %v7506_v45, %v7370_v1  ;;  %v20744_v5 = vrot.slane %v7048_v28, %v23231_v54 }
 0x531   : > { %v15655_v53 = vpop.eup %15654  ;;  %15668 = vrcp.f32 %v20626_v6  ;;  %v9978_v48 = vmul.f32 %v15653_v18, %v23374_v51  ;;  %v7371_v6 = vcombine.high %v20677_v38, %v20682_v63  ;;  %v20748_v18 = vrot.slane %v6912_v37, %v23231_v54  ;;  %v23376_v63 = vld [vmem:[#allocation86_spill] sm:$0xff] }
 0x532   : > { %15060 = vmatmul.mubr.msk.bf16.vlgmr.msra.gmra.mxu1 %vm9321_vm3, %v10033_v58  ;;  %v20732_v30 = vpop.xlane.xlu1 %9803  ;;  %v9979_v62 = vmul.f32 %v15655_v53, %v23375_v26  ;;  %v15657_v52 = vpop.eup %15656  ;;  %v20751_v0 = vrot.slane %v6944_v16, %v23231_v54  ;;  %v7642_v1 = vcombine.low %v7591_v21, %v7623_v25  ;;  %v7778_v45 = vcombine.low %v7727_v60, %v7759_v29  ;;  %v23377_v28 = vld [vmem:[#allocation98_spill] sm:$0xff] }
 0x533   : > { %v9783_v11 = vpop.xlane.xlu0 %9782  ;;  %15070 = vmatpush3.bf16.msra.mxu1 %v7793_v3  ;;  %15071 = vmatprep.mubr.msk.bf16.mxu1 %vm15971_vm1, %v23328_v8  ;;  %v7184_v58 = vcombine.low %v20533_v59, %v20546_v41  ;;  %v7216_v38 = vcombine.low %v20549_v42, %v20554_v44  ;;  %v6472_v53 = vcombine.low %v23377_v28, %v23376_v63 }
 0x534   : > { %15670 = vrcp.f32 %v9783_v11  ;;  %v10034_v32 = vpack.c.bf16 %v9979_v62, %v9978_v48  ;;  %15081 = vmatprep.subr.bf16.mxu1 %v23328_v8  ;;  %v23378_v11 = vld [vmem:[#allocation103_spill] sm:$0xff]  ;;  %v23379_v48 = vld [vmem:[#allocation81_spill] sm:$0xff]  ;;  %v7507_v42 = vcombine.high %v20685_v46, %v20688_v43  ;;  %v7643_v44 = vcombine.high %v7591_v21, %v7623_v25 }
 0x535   : > { %v15659_v3 = vpop.eup %15658  ;;  %15672 = vrcp.f32 %v20645_v31  ;;  %v9980_v51 = vmul.f32 %v15657_v52, %v23378_v11  ;;  %v7779_v59 = vcombine.high %v7727_v60, %v7759_v29  ;;  %v6473_v31 = vcombine.high %v23377_v28, %v23376_v63  ;;  %v23380_v60 = vld [vmem:[#allocation114_spill] sm:$0xff] }
 0x536   : > { %15066 = vmatmul.mubr.msk.bf16.vlgmr.msra.gmra.mxu0 %vm9321_vm3, %v10034_v32  ;;  %v20761_v37 = vpop.xlane.xlu1 %9809  ;;  %v9981_v26 = vmul.f32 %v15659_v3, %v23379_v48  ;;  %v15661_v62 = vpop.eup %15660  ;;  %v6964_v52 = vcombine.low %v20748_v18, %v20751_v0  ;;  %v6828_v11 = vcombine.low %v20719_v55, %v20737_v12  ;;  %v20777_v48 = vrot.slane %v7184_v58, %v23231_v54 }
 0x537   : > { %v9789_v16 = vpop.xlane.xlu0 %9788  ;;  %15076 = vmatpush3.bf16.msra.mxu0 %v7794_v36  ;;  %15077 = vmatprep.mubr.msk.bf16.mxu0 %vm15971_vm1, %v23328_v8  ;;  %v7795_v36 = vpack.c.bf16 %v7778_v45, %v7642_v1  ;;  %v20780_v46 = vrot.slane %v7216_v38, %v23231_v54  ;;  %v6480_v43 = vrot.slane %v6472_v53, %v23222_v23  ;;  %v23381_v1 = vld [vmem:[#allocation119_spill] sm:$0xff] }
 0x538   : > { %15674 = vrcp.f32 %v9789_v16  ;;  %v10035_v32 = vpack.c.bf16 %v9981_v26, %v9980_v51  ;;  %15087 = vmatprep.subr.bf16.mxu0 %v23328_v8  ;;  %v9982_v29 = vmul.f32 %v15661_v62, %v23380_v60  ;;  %v20791_v58 = vpack.c.bf16 %v7507_v42, %v7371_v6  ;;  %v23383_v62 = vld [vmem:[#allocation46_spill] sm:$0xff]  ;;  %v23384_v42 = vld [vmem:[#allocation57_spill] sm:$0xff] }
 0x539   : > { %v15663_v3 = vpop.eup %15662  ;;  %15676 = vrcp.f32 %v20672_v49  ;;  %v20793_v38 = vpack.c.bf16 %v7779_v59, %v7643_v44  ;;  %v23382_v49 = vcombine.low %v23368_v50, %v23367_v56  ;;  %v6487_v53 = vrot.slane %v6473_v31, %v23222_v23 }
 0x53a   : > { %15072 = vmatmul.mubr.msk.bf16.vlgmr.msra.gmra.mxu1 %vm9321_vm3, %v10035_v32  ;;  %v20785_v21 = vpop.xlane.xlu1 %9818  ;;  %v9983_v45 = vmul.f32 %v15663_v3, %v23381_v1  ;;  %v15665_v63 = vpop.eup %15664  ;;  %v20803_v51 = vpack.c.bf16 %v6964_v52, %v6828_v11  ;;  %v6592_v6 = vcombine.low %v23384_v42, %v23383_v62  ;;  %v6593_v59 = vcombine.high %v23384_v42, %v23383_v62  ;;  %v23385_v52 = vld [vmem:[#allocation58_spill] sm:$0xff]  ;;  %v23386_v11 = vld [vmem:[#allocation95_spill] sm:$0xff] }
 0x53b   : > { %v9795_v25 = vpop.xlane.xlu0 %9794  ;;  %15082 = vmatpush3.bf16.msra.mxu1 %v7795_v36  ;;  %15083 = vmatprep.mubr.msk.bf16.mxu1 %vm15971_vm1, %v23328_v8  ;;  %v20799_v28 = vrot.slane %v23382_v49, %v23231_v54  ;;  %v6520_v31 = vcombine.low %v20615_v17, %v6480_v43  ;;  %v9984_v36 = vmul.f32 %v15665_v63, %v23385_v52  ;;  %v23387_v1 = vld [vmem:[#allocation111_spill] sm:$0xff] }
 0x53c   : > { %15678 = vrcp.f32 %v9795_v25  ;;  %v10036_v16 = vpack.c.bf16 %v9983_v45, %v9982_v29  ;;  %15093 = vmatprep.subr.bf16.mxu1 %v23328_v8  ;;  %v7320_v60 = vcombine.low %v20566_v33, %v20569_v24  ;;  %v6521_v63 = vcombine.high %v20615_v17, %v6480_v43 }
 0x53d   : > { %v15667_v26 = vpop.eup %15666  ;;  %15680 = vrcp.f32 %v20705_v19  ;;  %v23388_v19 = vld [vmem:[#allocation70_spill] sm:$0xff]  ;;  %v6537_v62 = vcombine.high %v20663_v15, %v6487_v53 }
 0x53e   : > { %15078 = vmatmul.mubr.msk.bf16.vlgmr.msra.gmra.mxu0 %vm9321_vm3, %v10036_v16  ;;  %v5599_v32 = vpop.permute.xlu1 %5598  ;;  %v9985_v25 = vmul.f32 %v15667_v26, %v23386_v11  ;;  %v15669_v29 = vpop.eup %15668  ;;  %v6536_v26 = vcombine.low %v20663_v15, %v6487_v53  ;;  %v6600_v11 = vrot.slane %v6592_v6, %v23222_v23  ;;  %v23389_v15 = vld [vmem:[#allocation68_spill] sm:$0xff] }
 0x53f   : > { %v9801_v3 = vpop.xlane.xlu0 %9800  ;;  %15088 = vmatpush3.bf16.msra.mxu0 %v23387_v1  ;;  %v6608_v45 = vcombine.low %v23388_v19, %v5599_v32  ;;  %v6609_v49 = vcombine.high %v23388_v19, %v5599_v32  ;;  %15089 = vmatprep.mubr.msk.bf16.mxu0 %vm15971_vm1, %v23328_v8  ;;  %v6607_v32 = vrot.slane %v6593_v59, %v23222_v23  ;;  %v23390_v53 = vld [vmem:[#allocation96_spill] sm:$0xff] }
 0x540   : > { %15682 = vrcp.f32 %v9801_v3  ;;  %v10037_v42 = vpack.c.bf16 %v9985_v25, %v9984_v36  ;;  %15099 = vmatprep.subr.bf16.mxu0 %v23328_v8  ;;  %v20834_v19 = vrot.slane %v6520_v31, %v23231_v54  ;;  %v9986_v43 = vmul.f32 %v15669_v29, %v23389_v15 }
 0x541   : > { %v15671_v52 = vpop.eup %15670  ;;  %v6616_v3 = vrot.slane %v6608_v45, %v23222_v23  ;;  %v6623_v1 = vrot.slane %v6609_v49, %v23222_v23  ;;  %15684 = vrcp.f32 %v20732_v30  ;;  %v6535_v45 = vrot.slane %v6521_v63, %v23231_v54 }
 0x542   : > { %15084 = vmatmul.mubr.msk.bf16.vlgmr.msra.gmra.mxu1 %vm9321_vm3, %v10037_v42  ;;  %v9987_v36 = vmul.f32 %v15671_v52, %v23390_v53  ;;  %v15673_v25 = vpop.eup %15672  ;;  %v6544_v31 = vrot.slane %v6536_v26, %v23231_v54  ;;  %v6551_v49 = vrot.slane %v6537_v62, %v23231_v54 }
 0x543   : > { %v9807_v17 = vpop.xlane.xlu0 %9806  ;;  %v6656_v6 = vcombine.low %v6600_v11, %v6616_v3  ;;  %v6657_v44 = vcombine.high %v6600_v11, %v6616_v3  ;;  %v6672_v59 = vcombine.low %v6607_v32, %v6623_v1  ;;  %v6673_v16 = vcombine.high %v6607_v32, %v6623_v1  ;;  %15094 = vmatpush3.bf16.msra.mxu1 %v20666_v22  ;;  %v23391_v11 = vld [vmem:[#allocation106_spill] sm:$0xff]  ;;  %v23392_v3 = vld [vmem:[#allocation41_spill] sm:$0xff] }
 0x544   : > { %15686 = vrcp.f32 %v9807_v17  ;;  %v10038_v30 = vpack.c.bf16 %v9987_v36, %v9986_v43  ;;  %15095 = vmatprep.mubr.msk.bf16.mxu1 %vm15971_vm1, %v23328_v8  ;;  %15105 = vmatprep.subr.bf16.mxu1 %v23328_v8  ;;  %v9988_v32 = vmul.f32 %v15673_v25, %v23391_v11  ;;  %v7456_v17 = vcombine.low %v20622_v35, %v20631_v9 }
 0x545   : > { %v15675_v29 = vpop.eup %15674  ;;  %v6664_v42 = vrot.slane %v6656_v6, %v23231_v54  ;;  %v6671_v52 = vrot.slane %v6657_v44, %v23231_v54  ;;  %v6680_v22 = vrot.slane %v6672_v59, %v23231_v54  ;;  %v6687_v63 = vrot.slane %v6673_v16, %v23231_v54 }
 0x546   : > { %15090 = vmatmul.mubr.msk.bf16.vlgmr.msra.gmra.mxu0 %vm9321_vm3, %v10038_v30  ;;  %v9989_v1 = vmul.f32 %v15675_v29, %v23392_v3  ;;  %v15677_v15 = vpop.eup %15676  ;;  %v7488_v44 = vcombine.low %v20634_v34, %v20660_v47  ;;  %v14437_v6 = vcombine.low %v20834_v19, %v6535_v45  ;;  %v14439_v59 = vcombine.high %v20834_v19, %v6535_v45 }
 0x547   : > { %v9816_v26 = vpop.xlane.xlu0 %9815  ;;  %v14445_v62 = vcombine.low %v6664_v42, %v6671_v52  ;;  %v14447_v43 = vcombine.high %v6664_v42, %v6671_v52  ;;  %15100 = vmatpush3.bf16.msra.mxu0 %v20791_v58  ;;  %15101 = vmatprep.mubr.msk.bf16.mxu0 %vm15971_vm1, %v23328_v8  ;;  %v14449_v16 = vcombine.low %v6680_v22, %v6687_v63  ;;  %v23393_v52 = vld [vmem:[#allocation89_spill] sm:$0xff] }
 0x548   : > { %v14451_v53 = vcombine.high %v6680_v22, %v6687_v63  ;;  %15688 = vrcp.f32 %v9816_v26  ;;  %v10039_v36 = vpack.c.bf16 %v9989_v1, %v9988_v32  ;;  %15111 = vmatprep.subr.bf16.mxu0 %v23328_v8  ;;  %v14441_v30 = vcombine.low %v6544_v31, %v6551_v49  ;;  %v23394_v63 = vld [vmem:[#allocation85_spill] sm:$0xff]  ;;  %v23397_v1 = vld [vmem:[#allocation82_spill] sm:$0xff] }
 0x549   : > { %v15679_v25 = vpop.eup %15678  ;;  %15690 = vrcp.f32 %v20761_v37  ;;  %v14443_v29 = vcombine.high %v6544_v31, %v6551_v49  ;;  %v9990_v22 = vmul.f32 %v15677_v15, %v23393_v52  ;;  %v20870_v11 = vrot.slane %v14445_v62, %v23222_v23 }
 0x54a   : > { %v15681_v58 = vpop.eup %15680  ;;  %15692 = vrcp.f32 %v20785_v21  ;;  %15096 = vmatmul.mubr.msk.bf16.vlgmr.msra.gmra.mxu1 %vm9321_vm3, %v10039_v36  ;;  %v9991_v26 = vmul.f32 %v15679_v25, %v23394_v63  ;;  %v20879_v37 = vrot.slane %v7320_v60, %v23231_v54  ;;  %v23395_v21 = vcombine.low %v20578_v7, %v20588_v20  ;;  %v23396_v60 = vld [vmem:[#allocation77_spill] sm:$0xff] }
 0x54b   : > { %v9813_v42 = vpop.xlane.xlu0 %9812  ;;  %15106 = vmatpush3.bf16.msra.mxu1 %v20793_v38  ;;  %15107 = vmatprep.mubr.msk.bf16.mxu1 %vm15971_vm1, %v23328_v8  ;;  %v20888_v31 = vrot.slane %v14447_v43, %v23222_v23  ;;  %v20891_v38 = vrot.slane %v14449_v16, %v23222_v23  ;;  %v20894_v49 = vrot.slane %v14451_v53, %v23222_v23 }
 0x54c   : > { %15694 = vrcp.f32 %v9813_v42  ;;  %v20885_v19 = vrot.slane %v23395_v21, %v23231_v54  ;;  %v10040_v32 = vpack.c.bf16 %v9991_v26, %v9990_v22  ;;  %15117 = vmatprep.subr.bf16.mxu1 %v23328_v8  ;;  %v9992_v3 = vmul.f32 %v15681_v58, %v23396_v60  ;;  %v23402_v26 = vld [vmem:[#allocation112_spill] sm:$0xff] }
 0x54d   : > { %v15683_v45 = vpop.eup %15682  ;;  %v20900_v62 = vrot.slane %v7456_v17, %v23231_v54  ;;  %v20903_v36 = vrot.slane %v7488_v44, %v23231_v54  ;;  %v20906_v43 = vrot.slane %v14437_v6, %v23222_v23  ;;  %v20909_v16 = vrot.slane %v14439_v59, %v23222_v23 }
 0x54e   : > { %v9993_v15 = vmul.f32 %v15683_v45, %v23397_v1  ;;  %v20912_v53 = vrot.slane %v14441_v30, %v23222_v23  ;;  %v20915_v25 = vrot.slane %v14443_v29, %v23222_v23  ;;  %15102 = vmatmul.mubr.msk.bf16.vlgmr.msra.gmra.mxu0 %vm9321_vm3, %v10040_v32  ;;  %v15685_v17 = vpop.eup %15684  ;;  %v7100_v44 = vcombine.low %v20744_v5, %v20799_v28  ;;  %v23403_v45 = vld [vmem:[#allocation45_spill] sm:$0xff] }
 0x54f   : > { %23398 = vst [vmem:[#allocation74_spill] sm:$0xff] %v20906_v43  ;;  %v9822_v58 = vpop.xlane.xlu0 %9821  ;;  %15112 = vmatpush3.bf16.msra.mxu0 %v20803_v51  ;;  %15113 = vmatprep.mubr.msk.bf16.mxu0 %vm15971_vm1, %v23328_v8  ;;  %v7728_v6 = vcombine.low %v20870_v11, %v20888_v31  ;;  %v7760_v59 = vcombine.low %v20891_v38, %v20894_v49 }
 0x550   : > { %23399 = vst [vmem:[#allocation32_spill] sm:$0xff] %v20912_v53  ;;  %23400 = vst [vmem:[#allocation94_spill] sm:$0xff] %v20915_v25  ;;  %v10041_v42 = vpack.c.bf16 %v9993_v15, %v9992_v3  ;;  %15123 = vmatprep.subr.bf16.mxu0 %v23328_v8  ;;  %15696 = vrcp.f32 %v9822_v58  ;;  %v23401_v29 = vcombine.low %v20777_v48, %v20780_v46 }
 0x551   : > { %v15687_v30 = vpop.eup %15686  ;;  %v7372_v52 = vcombine.low %v20879_v37, %v20885_v19  ;;  %v7508_v22 = vcombine.low %v20900_v62, %v20903_v36  ;;  %v9994_v21 = vmul.f32 %v15685_v17, %v23402_v26  ;;  %v7592_v60 = vcombine.low %v20906_v43, %v20909_v16 }
 0x552   : > { %v7801_v51 = vpack.c.bf16 %v23401_v29, %v7100_v44  ;;  %15108 = vmatmul.mubr.msk.bf16.vlgmr.msra.gmra.mxu1 %vm9321_vm3, %v10041_v42  ;;  %v9995_v32 = vmul.f32 %v15687_v30, %v23403_v45  ;;  %v7624_v3 = vcombine.low %v20912_v53, %v20915_v25  ;;  %v20946_v15 = vrot.slane %v7728_v6, %v23231_v54  ;;  %v23406_v45 = vld [vmem:[#allocation66_spill] sm:$0xff] }
 0x553   : > { %v9825_v63 = vpop.xlane.xlu0 %9824  ;;  %15119 = vmatprep.mubr.msk.bf16.mxu1 %vm15971_vm1, %v23328_v8  ;;  %v20949_v58 = vrot.slane %v7760_v59, %v23231_v54  ;;  %v7802_v42 = vpack.c.bf16 %v7508_v22, %v7372_v52  ;;  %v7600_v29 = vrot.slane %v7592_v60, %v23231_v54  ;;  %v23404_v59 = vld [vmem:[#allocation44_spill] sm:$0xff]  ;;  %v23405_v22 = vld [vmem:[#allocation63_spill] sm:$0xff]  ;;  %v6965_v60 = vcombine.high %v20748_v18, %v20751_v0 }
 0x554   : > { %15118 = vmatpush3.bf16.msra.mxu1 %v7801_v51  ;;  %15698 = vrcp.f32 %v9825_v63  ;;  %v10042_v1 = vpack.c.bf16 %v9995_v32, %v9994_v21  ;;  %v7632_v51 = vrot.slane %v7624_v3, %v23231_v54  ;;  %v6829_v25 = vcombine.high %v20719_v55, %v20737_v12  ;;  %v23408_v12 = vld [vmem:[#allocation16_spill] sm:$0xff] }
 0x555   : > { %15129 = vmatprep.subr.bf16.mxu1 %v23328_v8  ;;  %v15689_v17 = vpop.eup %15688  ;;  %v7780_v52 = vcombine.low %v20946_v15, %v20949_v58  ;;  %v23409_v0 = vld [vmem:[#allocation120_spill] sm:$0xff] }
 0x556   : > { %v15691_v44 = vpop.eup %15690  ;;  %15114 = vmatmul.mubr.msk.bf16.vlgmr.msra.gmra.mxu0 %vm9321_vm3, %v10042_v1  ;;  %v9998_v26 = vmul.f32 %v15689_v17, %v23404_v59  ;;  %v23407_v1 = vld [vmem:[#allocation42_spill] sm:$0xff]  ;;  %v7644_v23 = vcombine.low %v7600_v29, %v7632_v51  ;;  %v7804_v59 = vpack.c.bf16 %v6965_v60, %v6829_v25 }
 0x557   : > { %v9828_v30 = vpop.xlane.xlu0 %9827  ;;  %v15693_v63 = vpop.eup %15692  ;;  %15124 = vmatpush3.bf16.msra.mxu0 %v7802_v42  ;;  %15125 = vmatprep.mubr.msk.bf16.mxu0 %vm15971_vm1, %v23328_v8  ;;  %v9996_v21 = vmul.f32 %v15691_v44, %v23405_v22  ;;  %v7781_v22 = vcombine.high %v20946_v15, %v20949_v58 }
 0x558   : > { %15135 = vmatprep.subr.bf16.mxu0 %v23328_v8  ;;  %v9999_v42 = vmul.f32 %v15693_v63, %v23407_v1  ;;  %v7803_v17 = vpack.c.bf16 %v7780_v52, %v7644_v23  ;;  %v7237_v23 = vcombine.high %v20777_v48, %v20780_v46 }
 0x559   : > { %v15695_v6 = vpop.eup %15694 }
 0x55a   : > { %v9997_v32 = vmul.f32 %v15695_v6, %v23406_v45  ;;  %v10044_v43 = vpack.c.bf16 %v9999_v42, %v9998_v26 }
 0x55b   : > { %v9834_v3 = vpop.xlane.xlu0 %9833 }
 0x55c   : > { %v10043_v53 = vpack.c.bf16 %v9997_v32, %v9996_v21  ;;  %15700 = vrcp.f32 %v9834_v3  ;;  %v23410_v21 = vld [vmem:[#allocation113_spill] sm:$0xff]  ;;  %v7645_v32 = vcombine.high %v7600_v29, %v7632_v51  ;;  %v6945_v29 = vcombine.high %v23373_v2, %v23372_v61 }
 0x55d   : > { %v15697_v44 = vpop.eup %15696  ;;  %v6777_v51 = vcombine.high %v23350_v40, %v23349_v57  ;;  %v23412_v57 = vld [vmem:[#allocation59_spill] sm:$0xff]  ;;  %v23413_v61 = vld [vmem:[#allocation33_spill] sm:$0xff]  ;;  %v7509_v2 = vcombine.high %v20900_v62, %v20903_v36 }
 0x55e   : > { %15120 = vmatmul.mubr.msk.bf16.vlgmr.msra.gmra.mxu1 %vm9321_vm3, %v10043_v53  ;;  %15126 = vmatmul.mubr.msk.bf16.vlgmr.msra.gmra.mxu0 %vm9321_vm3, %v10044_v43  ;;  %v10000_v55 = vmul.f32 %v15697_v44, %v23408_v12  ;;  %v7101_v53 = vcombine.high %v20744_v5, %v20799_v28  ;;  %v23411_v5 = vld [vmem:[#allocation31_spill] sm:$0xff]  ;;  %v7807_v42 = vpack.c.bf16 %v7781_v22, %v7645_v32 }
 0x55f   : > { %15130 = vmatpush3.bf16.msra.mxu1 %v7803_v17  ;;  %v9837_v6 = vpop.xlane.xlu0 %9836  ;;  %15136 = vmatpush3.bf16.msra.mxu0 %v7804_v59  ;;  %v6809_v59 = vcombine.high %v23354_v27, %v23353_v14  ;;  %v7049_v44 = vcombine.high %v23356_v4, %v23355_v39  ;;  %v7185_v40 = vcombine.high %v23412_v57, %v20546_v41  ;;  %v23414_v14 = vld [vmem:[#allocation109_spill] sm:$0xff] }
 0x560   : > { %15702 = vrcp.f32 %v9837_v6  ;;  %15131 = vmatprep.mubr.msk.bf16.mxu1 %vm15971_vm1, %v23328_v8  ;;  %15141 = vmatprep.subr.bf16.mxu1 %v23328_v8  ;;  %v7805_v26 = vpack.c.bf16 %v7237_v23, %v7101_v53  ;;  %v7081_v6 = vcombine.high %v23368_v50, %v23367_v56  ;;  %v7217_v27 = vcombine.high %v23414_v14, %v23413_v61 }
 0x561   : > { %v15699_v18 = vpop.eup %15698  ;;  %15137 = vmatprep.mubr.msk.bf16.mxu0 %vm15971_vm1, %v23328_v8  ;;  %15147 = vmatprep.subr.bf16.mxu0 %v23328_v8  ;;  %15704 = vrcp.f32 %v9828_v30  ;;  %v6913_v30 = vcombine.high %v23371_v13, %v23370_v10  ;;  %v21009_v13 = vrot.slane %v6945_v29, %v23231_v54  ;;  %v21016_v39 = vrot.slane %v6777_v51, %v23231_v54  ;;  %v23419_v51 = vld [vmem:[#allocation79_spill] sm:$0xff] }
 0x562   : > { %v10001_v43 = vmul.f32 %v15699_v18, %v23409_v0  ;;  %v21019_v4 = vrot.slane %v6809_v59, %v23231_v54  ;;  %v7373_v50 = vcombine.high %v20879_v37, %v20885_v19  ;;  %v21026_v41 = vrot.slane %v7049_v44, %v23231_v54 }
 0x563   : > { %v9843_v63 = vpop.xlane.xlu0 %9842  ;;  %v21006_v10 = vrot.slane %v6913_v30, %v23231_v54  ;;  %v21036_v37 = vrot.slane %v7185_v40, %v23231_v54  ;;  %v21039_v19 = vrot.slane %v7217_v27, %v23231_v54  ;;  %v7729_v30 = vcombine.high %v20870_v11, %v20888_v31  ;;  %v23422_v11 = vld [vmem:[#allocation94_spill] sm:$0xff]  ;;  %v23423_v31 = vld [vmem:[#allocation32_spill] sm:$0xff] }
 0x564   : > { %v10045_v25 = vpack.c.bf16 %v10001_v43, %v10000_v55  ;;  %v23415_v55 = vld [vmem:[#allocation88_spill] sm:$0xff]  ;;  %v23416_v43 = vld [vmem:[#allocation118_spill] sm:$0xff] }
 0x565   : > { %v7238_v32 = vcombine.low %v21036_v37, %v21039_v19  ;;  %v21084_v61 = vrot.slane %v7729_v30, %v23231_v54  ;;  %v23428_v30 = vld [vmem:[#allocation54_spill] sm:$0xff] }
 0x566   : > { %15132 = vmatmul.mubr.msk.bf16.vlgmr.msra.gmra.mxu1 %vm9321_vm3, %v10045_v25  ;;  %v21031_v25 = vrot.slane %v7081_v6, %v23231_v54 }
 0x567   : > { %15142 = vmatpush3.bf16.msra.mxu1 %v7805_v26  ;;  %15143 = vmatprep.mubr.msk.bf16.mxu1 %vm15971_vm1, %v23328_v8  ;;  %v9849_v48 = vpop.xlane.xlu0 %9848  ;;  %v6966_v26 = vcombine.low %v21006_v10, %v21009_v13 }
 0x568   : > { %15153 = vmatprep.subr.bf16.mxu1 %v23328_v8 }
 0x569   : > { %v15701_v46 = vpop.eup %15700 }
 0x56a   : > { %v10004_v45 = vmul.f32 %v15701_v46, %v23410_v21  ;;  %v7806_v46 = vpack.c.bf16 %v7509_v2, %v7373_v50  ;;  %v7102_v21 = vcombine.low %v21026_v41, %v21031_v25 }
 0x56b   : > { %v9855_v3 = vpop.xlane.xlu0 %9854 }
 0x56d   : > { %v15703_v52 = vpop.eup %15702 }
 0x56e   : > { %v10005_v28 = vmul.f32 %v15703_v52, %v23411_v5  ;;  %v15705_v18 = vpop.eup %15704  ;;  %v6830_v52 = vcombine.low %v21016_v39, %v21019_v4 }
 0x56f   : > { %v9831_v1 = vpop.xlane.xlu1 %9830  ;;  %v9861_v15 = vpop.xlane.xlu0 %9860  ;;  %v10002_v0 = vmul.f32 %v15705_v18, %v23415_v55  ;;  %v7625_v18 = vcombine.high %v23423_v31, %v23422_v11  ;;  %v6831_v11 = vcombine.high %v21016_v39, %v21019_v4  ;;  %v7103_v31 = vcombine.high %v21026_v41, %v21031_v25 }
 0x570   : > { %v10047_v60 = vpack.c.bf16 %v10005_v28, %v10004_v45  ;;  %15706 = vrcp.f32 %v9831_v1  ;;  %v7808_v28 = vpack.c.bf16 %v6966_v26, %v6830_v52 }
 0x571   : > { %v21095_v55 = vrot.slane %v7625_v18, %v23231_v54 }
 0x572   : > { %15144 = vmatmul.mubr.msk.bf16.vlgmr.msra.gmra.mxu1 %vm9321_vm3, %v10047_v60  ;;  %v7321_v60 = vcombine.high %v20566_v33, %v20569_v24  ;;  %v7761_v33 = vcombine.high %v20891_v38, %v20894_v49  ;;  %v23418_v24 = vld [vmem:[#allocation20_spill] sm:$0xff] }
 0x573   : > { %15154 = vmatpush3.bf16.msra.mxu1 %v7807_v42  ;;  %15155 = vmatprep.mubr.msk.bf16.mxu1 %vm15971_vm1, %v23328_v8  ;;  %v9840_v17 = vpop.xlane.xlu1 %9839  ;;  %v9867_v23 = vpop.xlane.xlu0 %9866  ;;  %v7353_v42 = vcombine.high %v20578_v7, %v20588_v20  ;;  %v23420_v7 = vld [vmem:[#allocation40_spill] sm:$0xff] }
 0x574   : > { %15165 = vmatprep.subr.bf16.mxu1 %v23328_v8  ;;  %15708 = vrcp.f32 %v9840_v17  ;;  %v7457_v17 = vcombine.high %v20622_v35, %v20631_v9  ;;  %v7809_v9 = vpack.c.bf16 %v7238_v32, %v7102_v21  ;;  %v21068_v6 = vrot.slane %v7321_v60, %v23231_v54 }
 0x575   : > { %15710 = vrcp.f32 %v9843_v63 }
 0x576   : > { %15712 = vrcp.f32 %v9849_v48  ;;  %v21078_v57 = vrot.slane %v7457_v17, %v23231_v54 }
 0x577   : > { %v9846_v58 = vpop.xlane.xlu1 %9845  ;;  %v9873_v48 = vpop.xlane.xlu0 %9872 }
 0x578   : > { %15714 = vrcp.f32 %v9846_v58  ;;  %v7489_v58 = vcombine.high %v20634_v34, %v20660_v47  ;;  %v23421_v34 = vld [vmem:[#allocation74_spill] sm:$0xff] }
 0x579   : > { %v7593_v47 = vcombine.high %v23421_v34, %v20909_v16  ;;  %v21087_v16 = vrot.slane %v7761_v33, %v23231_v54 }
 0x57a   : > { %v21081_v40 = vrot.slane %v7489_v58, %v23231_v54 }
 0x57b   : > { %v9852_v12 = vpop.xlane.xlu1 %9851  ;;  %v9879_v44 = vpop.xlane.xlu0 %9878  ;;  %v21092_v2 = vrot.slane %v7593_v47, %v23231_v54  ;;  %v7783_v25 = vcombine.high %v21084_v61, %v21087_v16 }
 0x57c   : > { %15716 = vrcp.f32 %v9852_v12  ;;  %v7510_v26 = vcombine.low %v21078_v57, %v21081_v40  ;;  %v7511_v41 = vcombine.high %v21078_v57, %v21081_v40  ;;  %v23436_v40 = vld [vmem:[#allocation17_spill] sm:$0xff] }
 0x57d   : > { %v15707_v56 = vpop.eup %15706  ;;  %15718 = vrcp.f32 %v9855_v3  ;;  %v23417_v3 = vld [vmem:[#allocation92_spill] sm:$0xff] }
 0x57e   : > { %15720 = vrcp.f32 %v9861_v15  ;;  %v10003_v53 = vmul.f32 %v15707_v56, %v23416_v43 }
 0x57f   : > { %v9858_v63 = vpop.xlane.xlu1 %9857 }
 0x580   : > { %15722 = vrcp.f32 %v9858_v63  ;;  %v10046_v62 = vpack.c.bf16 %v10003_v53, %v10002_v0  ;;  %v23424_v0 = vld [vmem:[#allocation107_spill] sm:$0xff] }
 0x581   : > { %v15709_v36 = vpop.eup %15708 }
 0x582   : > { %v15711_v22 = vpop.eup %15710  ;;  %15138 = vmatmul.mubr.msk.bf16.vlgmr.msra.gmra.mxu0 %vm9321_vm3, %v10046_v62  ;;  %v10006_v1 = vmul.f32 %v15709_v36, %v23417_v3  ;;  %v7782_v62 = vcombine.low %v21084_v61, %v21087_v16  ;;  %v23425_v36 = vld [vmem:[#allocation26_spill] sm:$0xff] }
 0x583   : > { %v15713_v45 = vpop.eup %15712  ;;  %15148 = vmatpush3.bf16.msra.mxu0 %v7806_v46  ;;  %v9864_v5 = vpop.xlane.xlu1 %9863  ;;  %15149 = vmatprep.mubr.msk.bf16.mxu0 %vm15971_vm1, %v23328_v8  ;;  %v10007_v29 = vmul.f32 %v15711_v22, %v23418_v24  ;;  %v23426_v46 = vld [vmem:[#allocation83_spill] sm:$0xff] }
 0x584   : > { %15724 = vrcp.f32 %v9864_v5  ;;  %15159 = vmatprep.subr.bf16.mxu0 %v23328_v8  ;;  %v10009_v59 = vmul.f32 %v15713_v45, %v23419_v51  ;;  %v23427_v22 = vld [vmem:[#allocation91_spill] sm:$0xff]  ;;  %v6967_v51 = vcombine.high %v21006_v10, %v21009_v13 }
 0x585   : > { %v15715_v15 = vpop.eup %15714  ;;  %15726 = vrcp.f32 %v9867_v23  ;;  %v10048_v38 = vpack.c.bf16 %v10007_v29, %v10006_v1  ;;  %v21075_v23 = vrot.slane %v7353_v42, %v23231_v54 }
 0x586   : > { %15728 = vrcp.f32 %v9873_v48  ;;  %v10008_v20 = vmul.f32 %v15715_v15, %v23420_v7  ;;  %v23429_v7 = vld [vmem:[#allocation117_spill] sm:$0xff]  ;;  %v7812_v13 = vpack.c.bf16 %v6967_v51, %v6831_v11 }
 0x587   : > { %v9870_v35 = vpop.xlane.xlu1 %9869  ;;  %v7374_v63 = vcombine.low %v21068_v6, %v21075_v23  ;;  %v7375_v4 = vcombine.high %v21068_v6, %v21075_v23 }
 0x588   : > { %v10049_v49 = vpack.c.bf16 %v10009_v59, %v10008_v20  ;;  %15730 = vrcp.f32 %v9870_v35  ;;  %v7239_v59 = vcombine.high %v21036_v37, %v21039_v19 }
 0x589   : > { %v15717_v12 = vpop.eup %15716  ;;  %v7810_v1 = vpack.c.bf16 %v7510_v26, %v7374_v63  ;;  %v7647_v63 = vcombine.high %v21092_v2, %v21095_v55 }
 0x58a   : > { %v15719_v14 = vpop.eup %15718  ;;  %15150 = vmatmul.mubr.msk.bf16.vlgmr.msra.gmra.mxu0 %vm9321_vm3, %v10048_v38  ;;  %15156 = vmatmul.mubr.msk.bf16.vlgmr.msra.gmra.mxu1 %vm9321_vm3, %v10049_v49  ;;  %v10010_v43 = vmul.f32 %v15717_v12, %v23424_v0  ;;  %v7813_v37 = vpack.c.bf16 %v7239_v59, %v7103_v31  ;;  %v23432_v12 = vld [vmem:[#allocation23_spill] sm:$0xff] }
 0x58b   : > { %v15721_v27 = vpop.eup %15720  ;;  %15160 = vmatpush3.bf16.msra.mxu0 %v7808_v28  ;;  %15166 = vmatpush3.bf16.msra.mxu1 %v7809_v9  ;;  %v9876_v56 = vpop.xlane.xlu1 %9875  ;;  %v10011_v48 = vmul.f32 %v15719_v14, %v23425_v36  ;;  %v7646_v28 = vcombine.low %v21092_v2, %v21095_v55  ;;  %v23431_v9 = vld [vmem:[#allocation101_spill] sm:$0xff]  ;;  %v7815_v6 = vpack.c.bf16 %v7783_v25, %v7647_v63 }
 0x58c   : > { %v9885_v50 = vpop.xlane.xlu0 %9884  ;;  %15732 = vrcp.f32 %v9876_v56  ;;  %15161 = vmatprep.mubr.msk.bf16.mxu0 %vm15971_vm1, %v23328_v8  ;;  %15167 = vmatprep.mubr.msk.bf16.mxu1 %vm15971_vm1, %v23328_v8  ;;  %v10013_v52 = vmul.f32 %v15721_v27, %v23426_v46  ;;  %v23433_v27 = vld [vmem:[#allocation24_spill] sm:$0xff]  ;;  %v23437_v2 = vld [vmem:[#allocation21_spill] sm:$0xff]  ;;  %v23438_v46 = vld [vmem:[#allocation67_spill] sm:$0xff] }
 0x58d   : > { %v15723_v53 = vpop.eup %15722  ;;  %15734 = vrcp.f32 %v9879_v44  ;;  %15171 = vmatprep.subr.bf16.mxu0 %v23328_v8  ;;  %15177 = vmatprep.subr.bf16.mxu1 %v23328_v8  ;;  %v10050_v32 = vpack.c.bf16 %v10011_v48, %v10010_v43  ;;  %v7811_v42 = vpack.c.bf16 %v7782_v62, %v7646_v28  ;;  %v23430_v44 = vld [vmem:[#allocation99_spill] sm:$0xff]  ;;  %v23435_v43 = vld [vmem:[#allocation100_spill] sm:$0xff]  ;;  %v7814_v48 = vpack.c.bf16 %v7511_v41, %v7375_v4 }
 0x58e   : > { %v10012_v21 = vmul.f32 %v15723_v53, %v23427_v22  ;;  %15736 = vrcp.f32 %v9885_v50  ;;  %v23434_v50 = vld [vmem:[#allocation52_spill] sm:$0xff]  ;;  %v23439_v22 = vld [vmem:[#allocation62_spill] sm:$0xff] }
 0x58f   : > { %v9882_v45 = vpop.xlane.xlu1 %9881 }
 0x590   : > { %v9891_v5 = vpop.xlane.xlu0 %9890  ;;  %v10051_v60 = vpack.c.bf16 %v10013_v52, %v10012_v21  ;;  %15738 = vrcp.f32 %v9882_v45 }
 0x591   : > { %v15725_v3 = vpop.eup %15724 }
 0x592   : > { %v15727_v17 = vpop.eup %15726  ;;  %15162 = vmatmul.mubr.msk.bf16.vlgmr.msra.gmra.mxu0 %vm9321_vm3, %v10050_v32  ;;  %15168 = vmatmul.mubr.msk.bf16.vlgmr.msra.gmra.mxu1 %vm9321_vm3, %v10051_v60  ;;  %v10014_v33 = vmul.f32 %v15725_v3, %v23428_v30 }
 0x593   : > { %v15729_v15 = vpop.eup %15728  ;;  %15172 = vmatpush3.bf16.msra.mxu0 %v7810_v1  ;;  %15178 = vmatpush3.bf16.msra.mxu1 %v7811_v42  ;;  %v9888_v58 = vpop.xlane.xlu1 %9887  ;;  %v10015_v20 = vmul.f32 %v15727_v17, %v23429_v7 }
 0x594   : > { %15740 = vrcp.f32 %v9888_v58  ;;  %v9897_v24 = vpop.xlane.xlu0 %9896  ;;  %15173 = vmatprep.mubr.msk.bf16.mxu0 %vm15971_vm1, %v23328_v8  ;;  %15179 = vmatprep.mubr.msk.bf16.mxu1 %vm15971_vm1, %v23328_v8  ;;  %v10017_v35 = vmul.f32 %v15729_v15, %v23430_v44 }
 0x595   : > { %v15731_v29 = vpop.eup %15730  ;;  %15742 = vrcp.f32 %v9891_v5  ;;  %15183 = vmatprep.subr.bf16.mxu0 %v23328_v8  ;;  %15189 = vmatprep.subr.bf16.mxu1 %v23328_v8  ;;  %v10052_v18 = vpack.c.bf16 %v10015_v20, %v10014_v33 }
 0x596   : > { %v10016_v34 = vmul.f32 %v15731_v29, %v23431_v9  ;;  %15744 = vrcp.f32 %v9897_v24 }
 0x597   : > { %v9894_v47 = vpop.xlane.xlu1 %9893 }
 0x598   : > { %v10053_v38 = vpack.c.bf16 %v10017_v35, %v10016_v34  ;;  %15746 = vrcp.f32 %v9894_v47 }
 0x599   : > { %v15733_v10 = vpop.eup %15732 }
 0x59a   : > { %v15735_v19 = vpop.eup %15734  ;;  %15174 = vmatmul.mubr.msk.bf16.vlgmr.msra.gmra.mxu0 %vm9321_vm3, %v10052_v18  ;;  %15180 = vmatmul.mubr.msk.bf16.vlgmr.msra.gmra.mxu1 %vm9321_vm3, %v10053_v38  ;;  %v10018_v14 = vmul.f32 %v15733_v10, %v23432_v12 }
 0x59b   : > { %v15737_v49 = vpop.eup %15736  ;;  %15184 = vmatpush3.bf16.msra.mxu0 %v7812_v13  ;;  %15190 = vmatpush3.bf16.msra.mxu1 %v7813_v37  ;;  %v10019_v56 = vmul.f32 %v15735_v19, %v23433_v27 }
 0x59c   : > { %15185 = vmatprep.mubr.msk.bf16.mxu0 %vm15971_vm1, %v23328_v8  ;;  %15191 = vmatprep.mubr.msk.bf16.mxu1 %vm15971_vm1, %v23328_v8  ;;  %v10021_v0 = vmul.f32 %v15737_v49, %v23434_v50 }
 0x59d   : > { %v15739_v39 = vpop.eup %15738  ;;  %15195 = vmatprep.subr.bf16.mxu0 %v23328_v8  ;;  %15201 = vmatprep.subr.bf16.mxu1 %v23328_v8  ;;  %v10054_v26 = vpack.c.bf16 %v10019_v56, %v10018_v14 }
 0x59e   : > { %v10020_v53 = vmul.f32 %v15739_v39, %v23435_v43 }
 0x5a0   : > { %v10055_v62 = vpack.c.bf16 %v10021_v0, %v10020_v53 }
 0x5a1   : > { %v15741_v36 = vpop.eup %15740 }
 0x5a2   : > { %v15743_v23 = vpop.eup %15742  ;;  %15186 = vmatmul.mubr.msk.bf16.vlgmr.msra.gmra.mxu0 %vm9321_vm3, %v10054_v26  ;;  %15192 = vmatmul.mubr.msk.bf16.vlgmr.msra.gmra.mxu1 %vm9321_vm3, %v10055_v62  ;;  %v10022_v61 = vmul.f32 %v15741_v36, %v23436_v40 }
 0x5a3   : > { %v15745_v57 = vpop.eup %15744  ;;  %15196 = vmatpush3.bf16.msra.mxu0 %v7814_v48  ;;  %15202 = vmatpush3.bf16.msra.mxu1 %v7815_v6  ;;  %v10023_v55 = vmul.f32 %v15743_v23, %v23437_v2  ;;  %v23440_v23 = vld [vmem:[#allocation19_spill] sm:$0xff] }
 0x5a4   : > { %15197 = vmatprep.mubr.msk.bf16.mxu0 %vm15971_vm1, %v23328_v8  ;;  %15203 = vmatprep.mubr.msk.bf16.mxu1 %vm15971_vm1, %v23328_v8  ;;  %v10025_v52 = vmul.f32 %v15745_v57, %v23438_v46 }
 0x5a5   : > { %v15747_v16 = vpop.eup %15746  ;;  %v10056_v45 = vpack.c.bf16 %v10023_v55, %v10022_v61 }
 0x5a6   : > { %v10024_v21 = vmul.f32 %v15747_v16, %v23439_v22 }
 0x5a8   : > { %v10057_v5 = vpack.c.bf16 %v10025_v52, %v10024_v21 }
 0x5aa   : > { %15198 = vmatmul.mubr.msk.bf16.vlgmr.msra.gmra.mxu0 %vm9321_vm3, %v10056_v45  ;;  %15204 = vmatmul.mubr.msk.bf16.vlgmr.msra.gmra.mxu1 %vm9321_vm3, %v10057_v5 }
 0x5d0   : > { %v10095_v28 = vpop.f32.mrf.mxu0 }
 0x5d2   : > { %v15019_v32 = vpop.f32.mrf.mxu0 }
 0x5d4   : > { %v10098_v60 = vpop.f32.mrf.mxu0 }
 0x5d5   : > { %v10139_v1 = vpop.f32.mrf.mxu1 }
 0x5d6   : > { %v15020_v3 = vpop.f32.mrf.mxu0 }
 0x5d7   : > { %v15025_v42 = vpop.f32.mrf.mxu1 }
 0x5d9   : > { %v21167_v8 = vpop.f32.mrf.mxu1  ;;  %v21169_v17 = vpop.f32.mrf.mxu0 }
 0x5db   : > { %v15026_v15 = vpop.f32.mrf.mxu1  ;;  %v15031_v58 = vpop.f32.mrf.mxu0 }
 0x5dd   : > { %v21171_v30 = vpop.f32.mrf.mxu0 }
 0x5df   : > { %v15032_v33 = vpop.f32.mrf.mxu0 }
 0x5e2   : > { %v21173_v24 = vpop.f32.mrf.mxu1 }
 0x5e4   : > { %v15037_v29 = vpop.f32.mrf.mxu1 }
 0x5e6   : > { %v21175_v51 = vpop.f32.mrf.mxu1  ;;  %v21177_v59 = vpop.f32.mrf.mxu0 }
 0x5e8   : > { %v15038_v7 = vpop.f32.mrf.mxu1  ;;  %v15043_v20 = vpop.f32.mrf.mxu0 }
 0x5ea   : > { %v21179_v44 = vpop.f32.mrf.mxu0  ;;  %v21181_v35 = vpop.f32.mrf.mxu1 }
 0x5ec   : > { %v15044_v9 = vpop.f32.mrf.mxu0  ;;  %v15049_v34 = vpop.f32.mrf.mxu1 }
 0x5ee   : > { %v21183_v47 = vpop.f32.mrf.mxu1  ;;  %v21185_v11 = vpop.f32.mrf.mxu0 }
 0x5f0   : > { %v15050_v31 = vpop.f32.mrf.mxu1  ;;  %v15055_v18 = vpop.f32.mrf.mxu0 }
 0x5f2   : > { %v21187_v38 = vpop.f32.mrf.mxu0  ;;  %v21189_v10 = vpop.f32.mrf.mxu1 }
 0x5f4   : > { %v15056_v13 = vpop.f32.mrf.mxu0  ;;  %v15061_v37 = vpop.f32.mrf.mxu1 }
 0x5f6   : > { %v21191_v19 = vpop.f32.mrf.mxu1  ;;  %v10447_v49 = vpop.f32.mrf.mxu0 }
 0x5f7   : > { %v11466_v50 = vcombine.low %v10095_v28, %v10447_v49  ;;  %v11467_v0 = vcombine.high %v10095_v28, %v10447_v49 }
 0x5f8   : > { %v15062_v12 = vpop.f32.mrf.mxu1  ;;  %v15067_v14 = vpop.f32.mrf.mxu0 }
 0x5f9   : > { %v11474_v57 = vrot.slane %v11466_v50, %v23440_v23  ;;  %v11481_v40 = vrot.slane %v11467_v0, %v23440_v23 }
 0x5fa   : > { %v10450_v39 = vpop.f32.mrf.mxu0  ;;  %v10491_v4 = vpop.f32.mrf.mxu1 }
 0x5fb   : > { %v11602_v63 = vcombine.low %v10098_v60, %v10450_v39  ;;  %v11603_v26 = vcombine.high %v10098_v60, %v10450_v39  ;;  %v11738_v62 = vcombine.low %v10139_v1, %v10491_v4  ;;  %v11739_v36 = vcombine.high %v10139_v1, %v10491_v4 }
 0x5fc   : > { %v15068_v41 = vpop.f32.mrf.mxu0  ;;  %v15073_v25 = vpop.f32.mrf.mxu1 }
 0x5fd   : > { %v21200_v22 = vrot.slane %v11602_v63, %v23440_v23  ;;  %v21203_v21 = vrot.slane %v11603_v26, %v23440_v23  ;;  %v21208_v28 = vrot.slane %v11738_v62, %v23440_v23  ;;  %v21211_v32 = vrot.slane %v11739_v36, %v23440_v23 }
 0x5fe   : > { %v10494_v27 = vpop.f32.mrf.mxu1  ;;  %v10535_v56 = vpop.f32.mrf.mxu0 }
 0x5ff   : > { %v11874_v61 = vcombine.low %v21167_v8, %v10494_v27  ;;  %v11875_v16 = vcombine.high %v21167_v8, %v10494_v27  ;;  %v12010_v2 = vcombine.low %v21169_v17, %v10535_v56  ;;  %v12011_v55 = vcombine.high %v21169_v17, %v10535_v56 }
 0x600   : > { %v15074_v43 = vpop.f32.mrf.mxu1  ;;  %v15079_v53 = vpop.f32.mrf.mxu0 }
 0x601   : > { %v21223_v33 = vrot.slane %v11875_v16, %v23440_v23  ;;  %v21226_v29 = vrot.slane %v12010_v2, %v23440_v23 }
 0x602   : > { %v10538_v48 = vpop.f32.mrf.mxu0  ;;  %v10579_v6 = vpop.f32.mrf.mxu1 }
 0x603   : > { %v12146_v45 = vcombine.low %v21171_v30, %v10538_v48  ;;  %v12147_v5 = vcombine.high %v21171_v30, %v10538_v48  ;;  %v12282_v60 = vcombine.low %v21173_v24, %v10579_v6  ;;  %v12283_v3 = vcombine.high %v21173_v24, %v10579_v6 }
 0x604   : > { %v15080_v46 = vpop.f32.mrf.mxu0  ;;  %v15085_v52 = vpop.f32.mrf.mxu1  ;;  %v21220_v30 = vrot.slane %v11874_v61, %v23440_v23  ;;  %v21229_v24 = vrot.slane %v12011_v55, %v23440_v23 }
 0x605   : > { %v21235_v9 = vrot.slane %v12147_v5, %v23440_v23  ;;  %v21240_v31 = vrot.slane %v12282_v60, %v23440_v23  ;;  %v21243_v18 = vrot.slane %v12283_v3, %v23440_v23 }
 0x606   : > { %v10582_v1 = vpop.f32.mrf.mxu1  ;;  %v10623_v42 = vpop.f32.mrf.mxu0 }
 0x607   : > { %v12418_v8 = vcombine.low %v21175_v51, %v10582_v1  ;;  %v12419_v17 = vcombine.high %v21175_v51, %v10582_v1  ;;  %v11482_v15 = vcombine.low %v21177_v59, %v10623_v42  ;;  %v11483_v58 = vcombine.high %v21177_v59, %v10623_v42 }
 0x608   : > { %v15086_v7 = vpop.f32.mrf.mxu1  ;;  %v15091_v20 = vpop.f32.mrf.mxu0  ;;  %v21232_v51 = vrot.slane %v12146_v45, %v23440_v23 }
 0x609   : > { %v11490_v59 = vrot.slane %v11482_v15, %v23440_v23  ;;  %v11497_v34 = vrot.slane %v11483_v58, %v23440_v23  ;;  %v21246_v13 = vrot.slane %v12418_v8, %v23440_v23  ;;  %v21249_v37 = vrot.slane %v12419_v17, %v23440_v23 }
 0x60a   : > { %v10626_v49 = vpop.f32.mrf.mxu0  ;;  %v10667_v12 = vpop.f32.mrf.mxu1 }
 0x60b   : > { %v11530_v14 = vcombine.low %v11474_v57, %v11490_v59  ;;  %v11531_v39 = vcombine.high %v11474_v57, %v11490_v59  ;;  %v11546_v4 = vcombine.low %v11481_v40, %v11497_v34  ;;  %v11547_v41 = vcombine.high %v11481_v40, %v11497_v34 }
 0x60c   : > { %v11618_v25 = vcombine.low %v21179_v44, %v10626_v49  ;;  %v11619_v27 = vcombine.high %v21179_v44, %v10626_v49  ;;  %v11754_v56 = vcombine.low %v21181_v35, %v10667_v12  ;;  %v11755_v50 = vcombine.high %v21181_v35, %v10667_v12  ;;  %v15092_v0 = vpop.f32.mrf.mxu0  ;;  %v15097_v43 = vpop.f32.mrf.mxu1 }
 0x60d   : > { %v11538_v53 = vrot.slane %v11530_v14, %v23231_v54  ;;  %v11545_v63 = vrot.slane %v11531_v39, %v23231_v54  ;;  %v11554_v26 = vrot.slane %v11546_v4, %v23231_v54  ;;  %v11561_v62 = vrot.slane %v11547_v41, %v23231_v54 }
 0x60e   : > { %v11626_v36 = vrot.slane %v11618_v25, %v23440_v23  ;;  %v11633_v48 = vrot.slane %v11619_v27, %v23440_v23  ;;  %v11762_v44 = vrot.slane %v11754_v56, %v23440_v23  ;;  %v11769_v6 = vrot.slane %v11755_v50, %v23440_v23  ;;  %v10670_v57 = vpop.f32.mrf.mxu1  ;;  %v10711_v35 = vpop.f32.mrf.mxu0 }
 0x60f   : > { %v14516_v40 = vcombine.low %v11538_v53, %v11545_v63  ;;  %v14518_v61 = vcombine.high %v11538_v53, %v11545_v63  ;;  %v14520_v16 = vcombine.low %v11554_v26, %v11561_v62  ;;  %v14522_v2 = vcombine.high %v11554_v26, %v11561_v62 }
 0x610   : > { %v11666_v55 = vcombine.low %v21200_v22, %v11626_v36  ;;  %v11667_v46 = vcombine.high %v21200_v22, %v11626_v36  ;;  %v11682_v52 = vcombine.low %v21203_v21, %v11633_v48  ;;  %v11683_v45 = vcombine.high %v21203_v21, %v11633_v48  ;;  %v15098_v5 = vpop.f32.mrf.mxu1  ;;  %v15103_v60 = vpop.f32.mrf.mxu0 }
 0x611   : > { %v21268_v3 = vrot.slane %v14516_v40, %v23440_v23  ;;  %v21271_v1 = vrot.slane %v14518_v61, %v23440_v23  ;;  %v21274_v42 = vrot.slane %v14520_v16, %v23440_v23  ;;  %v21277_v8 = vrot.slane %v14522_v2, %v23440_v23 }
 0x612   : > { %v11674_v22 = vrot.slane %v11666_v55, %v23231_v54  ;;  %v11681_v17 = vrot.slane %v11667_v46, %v23231_v54  ;;  %v11690_v21 = vrot.slane %v11682_v52, %v23231_v54  ;;  %v11697_v15 = vrot.slane %v11683_v45, %v23231_v54  ;;  %v21283_v58 = vpop.f32.mrf.mxu0  ;;  %v21285_v7 = vpop.f32.mrf.mxu1 }
 0x613   : > { %v11802_v20 = vcombine.low %v21208_v28, %v11762_v44  ;;  %v11803_v59 = vcombine.high %v21208_v28, %v11762_v44  ;;  %v11818_v34 = vcombine.low %v21211_v32, %v11769_v6  ;;  %v11819_v49 = vcombine.high %v21211_v32, %v11769_v6 }
 0x614   : > { %v14524_v12 = vcombine.low %v11674_v22, %v11681_v17  ;;  %v14526_v14 = vcombine.high %v11674_v22, %v11681_v17  ;;  %v14528_v39 = vcombine.low %v11690_v21, %v11697_v15  ;;  %v14530_v4 = vcombine.high %v11690_v21, %v11697_v15  ;;  %v15104_v41 = vpop.f32.mrf.mxu0  ;;  %v15109_v25 = vpop.f32.mrf.mxu1 }
 0x615   : > { %v11810_v27 = vrot.slane %v11802_v20, %v23231_v54  ;;  %v11817_v56 = vrot.slane %v11803_v59, %v23231_v54  ;;  %v11826_v50 = vrot.slane %v11818_v34, %v23231_v54  ;;  %v11833_v0 = vrot.slane %v11819_v49, %v23231_v54 }
 0x616   : > { %v21296_v28 = vrot.slane %v14524_v12, %v23440_v23  ;;  %v21299_v43 = vrot.slane %v14526_v14, %v23440_v23  ;;  %v21302_v32 = vrot.slane %v14528_v39, %v23440_v23  ;;  %v21305_v53 = vrot.slane %v14530_v4, %v23440_v23  ;;  %v21307_v63 = vpop.f32.mrf.mxu1  ;;  %v21309_v26 = vpop.f32.mrf.mxu0 }
 0x617   : > { %v14532_v62 = vcombine.low %v11810_v27, %v11817_v56  ;;  %v14534_v36 = vcombine.high %v11810_v27, %v11817_v56  ;;  %v14536_v48 = vcombine.low %v11826_v50, %v11833_v0  ;;  %v14538_v44 = vcombine.high %v11826_v50, %v11833_v0 }
 0x618   : > { %v11890_v6 = vcombine.low %v21183_v47, %v10670_v57  ;;  %v11891_v40 = vcombine.high %v21183_v47, %v10670_v57  ;;  %v12026_v61 = vcombine.low %v21185_v11, %v10711_v35  ;;  %v12027_v16 = vcombine.high %v21185_v11, %v10711_v35  ;;  %v15110_v2 = vpop.f32.mrf.mxu1  ;;  %v15115_v55 = vpop.f32.mrf.mxu0 }
 0x619   : > { %v21316_v46 = vrot.slane %v14532_v62, %v23440_v23  ;;  %v21319_v52 = vrot.slane %v14534_v36, %v23440_v23  ;;  %v21322_v45 = vrot.slane %v14536_v48, %v23440_v23  ;;  %v21325_v5 = vrot.slane %v14538_v44, %v23440_v23 }
 0x61a   : > { %v11898_v47 = vrot.slane %v11890_v6, %v23440_v23  ;;  %v11905_v57 = vrot.slane %v11891_v40, %v23440_v23  ;;  %v12034_v11 = vrot.slane %v12026_v61, %v23440_v23  ;;  %v12041_v35 = vrot.slane %v12027_v16, %v23440_v23  ;;  %v21331_v60 = vpop.f32.mrf.mxu0 }
 0x61b   : > { %v12162_v22 = vcombine.low %v21187_v38, %v21283_v58  ;;  %v12163_v17 = vcombine.high %v21187_v38, %v21283_v58  ;;  %v12298_v21 = vcombine.low %v21189_v10, %v21285_v7  ;;  %v12299_v15 = vcombine.high %v21189_v10, %v21285_v7 }
 0x61c   : > { %v11938_v20 = vcombine.low %v21220_v30, %v11898_v47  ;;  %v11939_v59 = vcombine.high %v21220_v30, %v11898_v47  ;;  %v11954_v34 = vcombine.low %v21223_v33, %v11905_v57  ;;  %v11955_v49 = vcombine.high %v21223_v33, %v11905_v57  ;;  %v15116_v12 = vpop.f32.mrf.mxu0 }
 0x61d   : > { %v12074_v14 = vcombine.low %v21226_v29, %v12034_v11  ;;  %v12075_v39 = vcombine.high %v21226_v29, %v12034_v11  ;;  %v12090_v38 = vcombine.low %v21229_v24, %v12041_v35  ;;  %v12091_v58 = vcombine.high %v21229_v24, %v12041_v35 }
 0x61e   : > { %v21349_v4 = vpop.f32.mrf.mxu1  ;;  %v11946_v10 = vrot.slane %v11938_v20, %v23231_v54  ;;  %v11953_v7 = vrot.slane %v11939_v59, %v23231_v54  ;;  %v11962_v30 = vrot.slane %v11954_v34, %v23231_v54  ;;  %v11969_v41 = vrot.slane %v11955_v49, %v23231_v54  ;;  %v21355_v33 = vpop.f32.mrf.mxu0 }
 0x61f   : > { %v12082_v25 = vrot.slane %v12074_v14, %v23231_v54  ;;  %v12089_v29 = vrot.slane %v12075_v39, %v23231_v54  ;;  %v12098_v27 = vrot.slane %v12090_v38, %v23231_v54  ;;  %v12105_v24 = vrot.slane %v12091_v58, %v23231_v54 }
 0x620   : > { %v15121_v56 = vpop.f32.mrf.mxu1  ;;  %v14540_v50 = vcombine.low %v11946_v10, %v11953_v7  ;;  %v14542_v0 = vcombine.high %v11946_v10, %v11953_v7  ;;  %v14544_v62 = vcombine.low %v11962_v30, %v11969_v41  ;;  %v14546_v36 = vcombine.high %v11962_v30, %v11969_v41  ;;  %v15127_v48 = vpop.f32.mrf.mxu0 }
 0x621   : > { %v14548_v44 = vcombine.low %v12082_v25, %v12089_v29  ;;  %v14550_v6 = vcombine.high %v12082_v25, %v12089_v29  ;;  %v14552_v40 = vcombine.low %v12098_v27, %v12105_v24  ;;  %v14554_v61 = vcombine.high %v12098_v27, %v12105_v24 }
 0x622   : > { %v21361_v16 = vpop.f32.mrf.mxu1  ;;  %v21364_v2 = vrot.slane %v14540_v50, %v23440_v23  ;;  %v21367_v55 = vrot.slane %v14542_v0, %v23440_v23  ;;  %v21370_v47 = vrot.slane %v14544_v62, %v23440_v23  ;;  %v21373_v57 = vrot.slane %v14546_v36, %v23440_v23  ;;  %v21375_v11 = vpop.f32.mrf.mxu0 }
 0x623   : > { %v21378_v35 = vrot.slane %v14548_v44, %v23440_v23  ;;  %v21381_v20 = vrot.slane %v14550_v6, %v23440_v23  ;;  %v21384_v59 = vrot.slane %v14552_v40, %v23440_v23  ;;  %v21387_v34 = vrot.slane %v14554_v61, %v23440_v23 }
 0x624   : > { %v15122_v49 = vpop.f32.mrf.mxu1  ;;  %v12170_v12 = vrot.slane %v12162_v22, %v23440_v23  ;;  %v12177_v14 = vrot.slane %v12163_v17, %v23440_v23  ;;  %v12306_v39 = vrot.slane %v12298_v21, %v23440_v23  ;;  %v12313_v38 = vrot.slane %v12299_v15, %v23440_v23  ;;  %v15128_v58 = vpop.f32.mrf.mxu0 }
 0x625   : > { %v12434_v10 = vcombine.low %v21191_v19, %v21307_v63  ;;  %v12435_v7 = vcombine.high %v21191_v19, %v21307_v63  ;;  %v12619_v30 = vcombine.high %v21268_v3, %v21271_v1  ;;  %v12651_v41 = vcombine.high %v21274_v42, %v21277_v8 }
 0x626   : > { %v21401_v22 = vpop.f32.mrf.mxu1  ;;  %v12210_v17 = vcombine.low %v21232_v51, %v12170_v12  ;;  %v12211_v21 = vcombine.high %v21232_v51, %v12170_v12  ;;  %v12226_v15 = vcombine.low %v21235_v9, %v12177_v14  ;;  %v12227_v25 = vcombine.high %v21235_v9, %v12177_v14 }
 0x627   : > { %v12346_v29 = vcombine.low %v21240_v31, %v12306_v39  ;;  %v12347_v19 = vcombine.high %v21240_v31, %v12306_v39  ;;  %v12362_v63 = vcombine.low %v21243_v18, %v12313_v38  ;;  %v12363_v27 = vcombine.high %v21243_v18, %v12313_v38 }
 0x628   : > { %v15133_v24 = vpop.f32.mrf.mxu1  ;;  %v12218_v56 = vrot.slane %v12210_v17, %v23231_v54  ;;  %v12225_v50 = vrot.slane %v12211_v21, %v23231_v54  ;;  %v12234_v0 = vrot.slane %v12226_v15, %v23231_v54  ;;  %v12241_v51 = vrot.slane %v12227_v25, %v23231_v54 }
 0x629   : > { %v12354_v62 = vrot.slane %v12346_v29, %v23231_v54  ;;  %v12361_v9 = vrot.slane %v12347_v19, %v23231_v54  ;;  %v12370_v36 = vrot.slane %v12362_v63, %v23231_v54  ;;  %v12377_v31 = vrot.slane %v12363_v27, %v23231_v54 }
 0x62a   : > { %v21419_v48 = vpop.f32.mrf.mxu1  ;;  %v14556_v18 = vcombine.low %v12218_v56, %v12225_v50  ;;  %v14558_v44 = vcombine.high %v12218_v56, %v12225_v50  ;;  %v14560_v6 = vcombine.low %v12234_v0, %v12241_v51  ;;  %v14562_v40 = vcombine.high %v12234_v0, %v12241_v51 }
 0x62b   : > { %v14564_v61 = vcombine.low %v12354_v62, %v12361_v9  ;;  %v14566_v49 = vcombine.high %v12354_v62, %v12361_v9  ;;  %v14568_v12 = vcombine.low %v12370_v36, %v12377_v31  ;;  %v14570_v14 = vcombine.high %v12370_v36, %v12377_v31 }
 0x62c   : > { %v15134_v39 = vpop.f32.mrf.mxu1  ;;  %v21422_v38 = vrot.slane %v14556_v18, %v23440_v23  ;;  %v21425_v58 = vrot.slane %v14558_v44, %v23440_v23  ;;  %v21428_v17 = vrot.slane %v14560_v6, %v23440_v23  ;;  %v21431_v21 = vrot.slane %v14562_v40, %v23440_v23 }
 0x62d   : > { %v21434_v15 = vrot.slane %v14564_v61, %v23440_v23  ;;  %v21437_v25 = vrot.slane %v14566_v49, %v23440_v23  ;;  %v21440_v29 = vrot.slane %v14568_v12, %v23440_v23  ;;  %v21443_v19 = vrot.slane %v14570_v14, %v23440_v23 }
 0x62e   : > { %v12442_v63 = vrot.slane %v12434_v10, %v23440_v23  ;;  %v12449_v27 = vrot.slane %v12435_v7, %v23440_v23  ;;  %v12633_v24 = vrot.slane %v12619_v30, %v23231_v54  ;;  %v12665_v56 = vrot.slane %v12651_v41, %v23231_v54 }
 0x62f   : > { %v12755_v50 = vcombine.high %v21296_v28, %v21299_v43  ;;  %v12787_v0 = vcombine.high %v21302_v32, %v21305_v53  ;;  %v12618_v51 = vcombine.low %v21268_v3, %v21271_v1  ;;  %v12650_v62 = vcombine.low %v21274_v42, %v21277_v8 }
 0x630   : > { %v12482_v10 = vcombine.low %v21246_v13, %v12442_v63  ;;  %v12483_v7 = vcombine.high %v21246_v13, %v12442_v63  ;;  %v12498_v30 = vcombine.low %v21249_v37, %v12449_v27  ;;  %v12499_v41 = vcombine.high %v21249_v37, %v12449_v27 }
 0x631   : > { %v12685_v9 = vcombine.high %v12633_v24, %v12665_v56  ;;  %v12769_v36 = vrot.slane %v12755_v50, %v23231_v54  ;;  %v12801_v31 = vrot.slane %v12787_v0, %v23231_v54  ;;  %v21464_v18 = vrot.slane %v12618_v51, %v23231_v54 }
 0x632   : > { %v21466_v3 = vpop.f32.mrf.mxu1  ;;  %v12490_v1 = vrot.slane %v12482_v10, %v23231_v54  ;;  %v12497_v42 = vrot.slane %v12483_v7, %v23231_v54  ;;  %v12506_v13 = vrot.slane %v12498_v30, %v23231_v54  ;;  %v12513_v8 = vrot.slane %v12499_v41, %v23231_v54 }
 0x633   : > { %v12821_v44 = vcombine.high %v12769_v36, %v12801_v31  ;;  %v21473_v37 = vrot.slane %v12650_v62, %v23231_v54  ;;  %v12754_v6 = vcombine.low %v21296_v28, %v21299_v43  ;;  %v12786_v40 = vcombine.low %v21302_v32, %v21305_v53 }
 0x634   : > { %v15145_v61 = vpop.f32.mrf.mxu1  ;;  %v14572_v49 = vcombine.low %v12490_v1, %v12497_v42  ;;  %v14574_v12 = vcombine.high %v12490_v1, %v12497_v42  ;;  %v14576_v14 = vcombine.low %v12506_v13, %v12513_v8  ;;  %v14578_v39 = vcombine.high %v12506_v13, %v12513_v8 }
 0x635   : > { %v15342_v63 = vpack.i.bf16 %v12821_v44, %v12685_v9  ;;  %v12683_v27 = vcombine.high %v21464_v18, %v21473_v37  ;;  %v21482_v50 = vrot.slane %v12754_v6, %v23231_v54  ;;  %v21485_v0 = vrot.slane %v12786_v40, %v23231_v54 }
 0x636   : > { %v21487_v51 = vpop.f32.mrf.mxu1  ;;  %v21490_v28 = vrot.slane %v14572_v49, %v23440_v23  ;;  %v21493_v43 = vrot.slane %v14574_v12, %v23440_v23  ;;  %v21496_v32 = vrot.slane %v14576_v14, %v23440_v23  ;;  %v21499_v53 = vrot.slane %v14578_v39, %v23440_v23 }
 0x637   : > { %15343 = vrot.lane.b32.xlu0 %v15342_v63, %s15972_s20  ;;  %v12819_v62 = vcombine.high %v21482_v50, %v21485_v0  ;;  %v12684_v10 = vcombine.low %v12633_v24, %v12665_v56  ;;  %v12820_v7 = vcombine.low %v12769_v36, %v12801_v31  ;;  %v12890_v30 = vcombine.low %v21316_v46, %v21319_v52 }
 0x638   : > { %v15146_v41 = vpop.f32.mrf.mxu1  ;;  %v12922_v9 = vcombine.low %v21322_v45, %v21325_v5  ;;  %v13026_v1 = vcombine.low %v21364_v2, %v21367_v55  ;;  %v13058_v42 = vcombine.low %v21370_v47, %v21373_v57  ;;  %v12891_v13 = vcombine.high %v21316_v46, %v21319_v52 }
 0x639   : > { %v15332_v8 = vpack.i.bf16 %v12819_v62, %v12683_v27  ;;  %v15337_v44 = vpack.i.bf16 %v12820_v7, %v12684_v10  ;;  %v21515_v24 = vrot.slane %v12890_v30, %v23231_v54  ;;  %v12923_v56 = vcombine.high %v21322_v45, %v21325_v5 }
 0x63a   : > { %v21520_v36 = vrot.slane %v12922_v9, %v23231_v54  ;;  %v21523_v31 = vrot.slane %v13026_v1, %v23231_v54  ;;  %v21526_v6 = vrot.slane %v13058_v42, %v23231_v54  ;;  %v12905_v40 = vrot.slane %v12891_v13, %v23231_v54 }
 0x63b   : > { %15333 = vrot.lane.b32.xlu1 %v15332_v8, %s15973_s30  ;;  %v12937_v46 = vrot.slane %v12923_v56, %v23231_v54  ;;  %v13027_v52 = vcombine.high %v21364_v2, %v21367_v55  ;;  %v13059_v45 = vcombine.high %v21370_v47, %v21373_v57  ;;  %v13162_v5 = vcombine.low %v21378_v35, %v21381_v20 }
 0x63c   : > { %v12955_v61 = vcombine.high %v21515_v24, %v21520_v36  ;;  %v13091_v49 = vcombine.high %v21523_v31, %v21526_v6  ;;  %v13194_v12 = vcombine.low %v21384_v59, %v21387_v34  ;;  %v13298_v14 = vcombine.low %v21422_v38, %v21425_v58 }
 0x63d   : > { %v12956_v39 = vcombine.low %v12905_v40, %v12937_v46  ;;  %v13041_v2 = vrot.slane %v13027_v52, %v23231_v54  ;;  %v13073_v55 = vrot.slane %v13059_v45, %v23231_v54  ;;  %v21548_v47 = vrot.slane %v13162_v5, %v23231_v54 }
 0x63e   : > { %v15347_v57 = vpack.i.bf16 %v13091_v49, %v12955_v61  ;;  %v21551_v63 = vrot.slane %v13194_v12, %v23231_v54  ;;  %v21554_v27 = vrot.slane %v13298_v14, %v23231_v54  ;;  %v13330_v62 = vcombine.low %v21428_v17, %v21431_v21 }
 0x63f   : > { %23441 = vst [vmem:[#allocation51_spill] sm:$0xff] %v21548_v47  ;;  %15338 = vrot.lane.b32.xlu1 %v15337_v44, %s15974_s17  ;;  %v13092_v10 = vcombine.low %v13041_v2, %v13073_v55  ;;  %v12957_v7 = vcombine.high %v12905_v40, %v12937_v46  ;;  %v13093_v30 = vcombine.high %v13041_v2, %v13073_v55 }
 0x640   : > { %23442 = vst [vmem:[#allocation78_spill] sm:$0xff] %v21551_v63  ;;  %v13163_v41 = vcombine.high %v21378_v35, %v21381_v20  ;;  %15348 = vrot.lane.b32.xlu0 %v15347_v57, %s15973_s30  ;;  %v13227_v9 = vcombine.high %v21548_v47, %v21551_v63  ;;  %v21565_v1 = vrot.slane %v13330_v62, %v23231_v54 }
 0x641   : > { %v13195_v42 = vcombine.high %v21384_v59, %v21387_v34  ;;  %v13299_v13 = vcombine.high %v21422_v38, %v21425_v58  ;;  %v15352_v8 = vpack.i.bf16 %v13092_v10, %v12956_v39  ;;  %v15357_v44 = vpack.i.bf16 %v13093_v30, %v12957_v7 }
 0x642   : > { %23443 = vst [vmem:[#allocation18_spill] sm:$0xff] %v21565_v1  ;;  %v13177_v56 = vrot.slane %v13163_v41, %v23231_v54  ;;  %v13331_v35 = vcombine.high %v21428_v17, %v21431_v21  ;;  %v13363_v20 = vcombine.high %v21554_v27, %v21565_v1  ;;  %v13434_v59 = vcombine.low %v21434_v15, %v21437_v25  ;;  %v21580_v34 = vpop.f32.mrf.mxu0 }
 0x643   : > { %v13209_v40 = vrot.slane %v13195_v42, %v23231_v54  ;;  %v13313_v46 = vrot.slane %v13299_v13, %v23231_v54  ;;  %15353 = vrot.lane.b32.xlu1 %v15352_v8, %s15974_s17  ;;  %v13466_v58 = vcombine.low %v21440_v29, %v21443_v19  ;;  %v13570_v17 = vcombine.low %v21490_v28, %v21493_v43 }
 0x644   : > { %v13345_v38 = vrot.slane %v13331_v35, %v23231_v54  ;;  %v13602_v21 = vcombine.low %v21496_v32, %v21499_v53  ;;  %v15362_v52 = vpack.i.bf16 %v13363_v20, %v13227_v9  ;;  %v21591_v61 = vrot.slane %v13434_v59, %v23231_v54  ;;  %v15139_v49 = vpop.f32.mrf.mxu0 }
 0x645   : > { %v13228_v45 = vcombine.low %v13177_v56, %v13209_v40  ;;  %v13229_v5 = vcombine.high %v13177_v56, %v13209_v40  ;;  %v21594_v39 = vrot.slane %v13466_v58, %v23231_v54  ;;  %v21597_v2 = vrot.slane %v13570_v17, %v23231_v54 }
 0x646   : > { %23444 = vst [vmem:[#allocation76_spill] sm:$0xff] %v21591_v61  ;;  %v13364_v12 = vcombine.low %v13313_v46, %v13345_v38  ;;  %v13365_v14 = vcombine.high %v13313_v46, %v13345_v38  ;;  %15363 = vrot.lane.b32.xlu0 %v15362_v52, %s15973_s30  ;;  %v21601_v55 = vrot.slane %v13602_v21, %v23231_v54  ;;  %v21609_v7 = vpop.f32.mrf.mxu0 }
 0x647   : > { %23445 = vst [vmem:[#allocation90_spill] sm:$0xff] %v21594_v39  ;;  %23446 = vst [vmem:[#allocation84_spill] sm:$0xff] %v21597_v2  ;;  %v13435_v57 = vcombine.high %v21434_v15, %v21437_v25  ;;  %v13467_v62 = vcombine.high %v21440_v29, %v21443_v19  ;;  %v13571_v10 = vcombine.high %v21490_v28, %v21493_v43  ;;  %15358 = vrot.lane.b32.xlu1 %v15357_v44, %s15972_s20 }
 0x648   : > { %23447 = vst [vmem:[#allocation36_spill] sm:$0xff] %v21601_v55  ;;  %v15367_v30 = vpack.i.bf16 %v13364_v12, %v13228_v45  ;;  %v15372_v41 = vpack.i.bf16 %v13365_v14, %v13229_v5  ;;  %v13499_v9 = vcombine.high %v21591_v61, %v21594_v39  ;;  %v13603_v42 = vcombine.high %v21496_v32, %v21499_v53  ;;  %v15140_v28 = vpop.f32.mrf.mxu0 }
 0x649   : > { %v13635_v15 = vcombine.high %v21597_v2, %v21601_v55  ;;  %v13449_v25 = vrot.slane %v13435_v57, %v23231_v54  ;;  %v13481_v29 = vrot.slane %v13467_v62, %v23231_v54  ;;  %v13585_v19 = vrot.slane %v13571_v10, %v23231_v54 }
 0x64a   : > { %v13617_v43 = vrot.slane %v13603_v42, %v23231_v54  ;;  %15368 = vrot.lane.b32.xlu0 %v15367_v30, %s15974_s17  ;;  %v21629_v35 = vpop.f32.mrf.mxu0  ;;  %v21631_v20 = vpop.f32.mrf.mxu1 }
 0x64b   : > { %v15377_v53 = vpack.i.bf16 %v13635_v15, %v13499_v9  ;;  %v13500_v44 = vcombine.low %v13449_v25, %v13481_v29  ;;  %v13501_v56 = vcombine.high %v13449_v25, %v13481_v29 }
 0x64c   : > { %v13636_v46 = vcombine.low %v13585_v19, %v13617_v43  ;;  %v13637_v59 = vcombine.high %v13585_v19, %v13617_v43  ;;  %v15151_v17 = vpop.f32.mrf.mxu0  ;;  %v15157_v21 = vpop.f32.mrf.mxu1 }
 0x64d   : > { %15378 = vrot.lane.b32.xlu1 %v15377_v53, %s15973_s30  ;;  %s15880_s30 = scalar_lea.vmem %s22140_s8, 512 }
 0x64e   : > { %v15382_v5 = vpack.i.bf16 %v13636_v46, %v13500_v44  ;;  %v15387_v49 = vpack.i.bf16 %v13637_v59, %v13501_v56  ;;  %15373 = vrot.lane.b32.xlu0 %v15372_v41, %s15972_s20  ;;  %v21645_v12 = vpop.f32.mrf.mxu0  ;;  %v21647_v14 = vpop.f32.mrf.mxu1  ;;  %p15881_p10 = scmp.ne.s32.totalorder %s22140_s8, %s15880_s30 }
 0x650   : > { %v15152_v57 = vpop.f32.mrf.mxu0  ;;  %v15158_v62 = vpop.f32.mrf.mxu1  ;;  %p15882_p7 = pnand %p15881_p10, %p23463_p12 }
 0x651   : > { %15383 = vrot.lane.b32.xlu1 %v15382_v5, %s15974_s17  ;;  %s15979_s17 = smov [#allocation11]  }
 0x652   : > { %v11151_v10 = vpop.f32.mrf.mxu0  ;;  %v11195_v30 = vpop.f32.mrf.mxu1  ;;  %p15883_p1 = pneg %p15882_p7 }
 0x653   : > { %v11498_v43 = vcombine.low %v21309_v26, %v11151_v10  ;;  %v11499_v53 = vcombine.high %v21309_v26, %v11151_v10  ;;  %v11770_v44 = vcombine.low %v21349_v4, %v11195_v30  ;;  %v11771_v56 = vcombine.high %v21349_v4, %v11195_v30 }
 0x654   : > { %v15163_v9 = vpop.f32.mrf.mxu0  ;;  %v15169_v42 = vpop.f32.mrf.mxu1 }
 0x655   : > { %15388 = vrot.lane.b32.xlu1 %v15387_v49, %s15972_s20  ;;  %v11506_v9 = vrot.slane %v11498_v43, %v23440_v23  ;;  %v11513_v26 = vrot.slane %v11499_v53, %v23440_v23  ;;  %v11778_v10 = vrot.slane %v11770_v44, %v23440_v23  ;;  %v11785_v4 = vrot.slane %v11771_v56, %v23440_v23  ;;  %s22138_s20 = scalar_lea.hbm %s22191_s6, %s14614_s15 }
 0x656   : > { %v11154_v15 = vpop.f32.mrf.mxu0  ;;  %v11198_v25 = vpop.f32.mrf.mxu1 }
 0x657   : > { %v11634_v17 = vcombine.low %v21331_v60, %v11154_v15  ;;  %v11635_v21 = vcombine.high %v21331_v60, %v11154_v15  ;;  %v11906_v5 = vcombine.low %v21361_v16, %v11198_v25  ;;  %v11907_v49 = vcombine.high %v21361_v16, %v11198_v25 }
 0x658   : > { %v15164_v29 = vpop.f32.mrf.mxu0  ;;  %v15170_v19 = vpop.f32.mrf.mxu1 }
 0x659   : > { %v21668_v25 = vrot.slane %v11634_v17, %v23440_v23  ;;  %v21671_v19 = vrot.slane %v11635_v21, %v23440_v23  ;;  %v21674_v43 = vrot.slane %v11906_v5, %v23440_v23  ;;  %v21677_v53 = vrot.slane %v11907_v49, %v23440_v23 }
 0x65a   : > { %v11239_v28 = vpop.f32.mrf.mxu0  ;;  %v11283_v41 = vpop.f32.mrf.mxu1 }
 0x65b   : > { %v12042_v30 = vcombine.low %v21355_v33, %v11239_v28  ;;  %v12043_v42 = vcombine.high %v21355_v33, %v11239_v28  ;;  %v12314_v60 = vcombine.low %v21401_v22, %v11283_v41  ;;  %v12315_v15 = vcombine.high %v21401_v22, %v11283_v41 }
 0x65c   : > { %v15175_v46 = vpop.f32.mrf.mxu0  ;;  %v15181_v59 = vpop.f32.mrf.mxu1 }
 0x65d   : > { %v21688_v5 = vrot.slane %v12042_v30, %v23440_v23  ;;  %v21691_v49 = vrot.slane %v12043_v42, %v23440_v23 }
 0x65e   : > { %v11242_v57 = vpop.f32.mrf.mxu0  ;;  %v11286_v62 = vpop.f32.mrf.mxu1 }
 0x65f   : > { %v12178_v33 = vcombine.low %v21375_v11, %v11242_v57  ;;  %v12179_v28 = vcombine.high %v21375_v11, %v11242_v57  ;;  %v12450_v22 = vcombine.low %v21419_v48, %v11286_v62  ;;  %v12451_v41 = vcombine.high %v21419_v48, %v11286_v62 }
 0x660   : > { %v15176_v29 = vpop.f32.mrf.mxu0  ;;  %v15182_v16 = vpop.f32.mrf.mxu1  ;;  %v21694_v11 = vrot.slane %v12314_v60, %v23440_v23  ;;  %v21697_v48 = vrot.slane %v12315_v15, %v23440_v23 }
 0x661   : > { %v21704_v16 = vrot.slane %v12178_v33, %v23440_v23  ;;  %v21707_v42 = vrot.slane %v12179_v28, %v23440_v23  ;;  %v21710_v60 = vrot.slane %v12450_v22, %v23440_v23  ;;  %v21713_v15 = vrot.slane %v12451_v41, %v23440_v23 }
 0x662   : > { %v11327_v44 = vpop.f32.mrf.mxu0  ;;  %v11371_v56 = vpop.f32.mrf.mxu1 }
 0x663   : > { %v11514_v46 = vcombine.low %v21580_v34, %v11327_v44  ;;  %v11515_v59 = vcombine.high %v21580_v34, %v11327_v44  ;;  %v11786_v17 = vcombine.low %v21466_v3, %v11371_v56  ;;  %v11787_v21 = vcombine.high %v21466_v3, %v11371_v56 }
 0x664   : > { %v15187_v57 = vpop.f32.mrf.mxu0  ;;  %v15193_v62 = vpop.f32.mrf.mxu1 }
 0x665   : > { %v11522_v34 = vrot.slane %v11514_v46, %v23440_v23  ;;  %v11529_v29 = vrot.slane %v11515_v59, %v23440_v23  ;;  %v11794_v3 = vrot.slane %v11786_v17, %v23440_v23  ;;  %v11801_v30 = vrot.slane %v11787_v21, %v23440_v23 }
 0x666   : > { %v11330_v44 = vpop.f32.mrf.mxu0  ;;  %v11374_v56 = vpop.f32.mrf.mxu1 }
 0x667   : > { %v11562_v46 = vcombine.low %v11506_v9, %v11522_v34  ;;  %v11563_v59 = vcombine.high %v11506_v9, %v11522_v34  ;;  %v11578_v57 = vcombine.low %v11513_v26, %v11529_v29  ;;  %v11579_v17 = vcombine.high %v11513_v26, %v11529_v29 }
 0x668   : > { %v11834_v62 = vcombine.low %v11778_v10, %v11794_v3  ;;  %v11835_v21 = vcombine.high %v11778_v10, %v11794_v3  ;;  %v11850_v45 = vcombine.low %v11785_v4, %v11801_v30  ;;  %v11851_v33 = vcombine.high %v11785_v4, %v11801_v30  ;;  %v15188_v52 = vpop.f32.mrf.mxu0  ;;  %v15194_v38 = vpop.f32.mrf.mxu1 }
 0x669   : > { %v11570_v28 = vrot.slane %v11562_v46, %v23231_v54  ;;  %v11577_v22 = vrot.slane %v11563_v59, %v23231_v54  ;;  %v11586_v58 = vrot.slane %v11578_v57, %v23231_v54  ;;  %v11593_v41 = vrot.slane %v11579_v17, %v23231_v54 }
 0x66a   : > { %v11842_v40 = vrot.slane %v11834_v62, %v23231_v54  ;;  %v11849_v9 = vrot.slane %v11835_v21, %v23231_v54  ;;  %v11858_v26 = vrot.slane %v11850_v45, %v23231_v54  ;;  %v11865_v10 = vrot.slane %v11851_v33, %v23231_v54  ;;  %v11415_v34 = vpop.f32.mrf.mxu0  ;;  %v11459_v4 = vpop.f32.mrf.mxu1 }
 0x66b   : > { %v14517_v52 = vcombine.low %v11570_v28, %v11577_v22  ;;  %v14519_v38 = vcombine.high %v11570_v28, %v11577_v22  ;;  %v14521_v29 = vcombine.low %v11586_v58, %v11593_v41  ;;  %v14523_v3 = vcombine.high %v11586_v58, %v11593_v41 }
 0x66c   : > { %v14533_v30 = vcombine.low %v11842_v40, %v11849_v9  ;;  %v14535_v46 = vcombine.high %v11842_v40, %v11849_v9  ;;  %v14537_v59 = vcombine.low %v11858_v26, %v11865_v10  ;;  %v14539_v57 = vcombine.high %v11858_v26, %v11865_v10  ;;  %v15199_v32 = vpop.f32.mrf.mxu0  ;;  %v15205_v17 = vpop.f32.mrf.mxu1 }
 0x66d   : > { %v21724_v62 = vrot.slane %v14517_v52, %v23440_v23  ;;  %v21727_v21 = vrot.slane %v14519_v38, %v23440_v23  ;;  %v21730_v45 = vrot.slane %v14521_v29, %v23440_v23  ;;  %v21733_v33 = vrot.slane %v14523_v3, %v23440_v23 }
 0x66e   : > { %v21736_v58 = vrot.slane %v14533_v30, %v23440_v23  ;;  %v21739_v40 = vrot.slane %v14535_v46, %v23440_v23  ;;  %v21742_v32 = vrot.slane %v14537_v59, %v23440_v23  ;;  %v21745_v28 = vrot.slane %v14539_v57, %v23440_v23  ;;  %v21747_v22 = vpop.f32.mrf.mxu0  ;;  %v21749_v41 = vpop.f32.mrf.mxu1 }
 0x66f   : > { %v11650_v9 = vcombine.low %v21609_v7, %v11330_v44  ;;  %v11651_v26 = vcombine.high %v21609_v7, %v11330_v44  ;;  %v11922_v10 = vcombine.low %v21487_v51, %v11374_v56  ;;  %v11923_v52 = vcombine.high %v21487_v51, %v11374_v56 }
 0x670   : > { %v12058_v38 = vcombine.low %v21629_v35, %v11415_v34  ;;  %v12059_v29 = vcombine.high %v21629_v35, %v11415_v34  ;;  %v12330_v3 = vcombine.low %v21631_v20, %v11459_v4  ;;  %v12331_v30 = vcombine.high %v21631_v20, %v11459_v4  ;;  %v15200_v46 = vpop.f32.mrf.mxu0  ;;  %v15206_v59 = vpop.f32.mrf.mxu1 }
 0x671   : > { %v11658_v57 = vrot.slane %v11650_v9, %v23440_v23  ;;  %v11665_v17 = vrot.slane %v11651_v26, %v23440_v23  ;;  %v11930_v7 = vrot.slane %v11922_v10, %v23440_v23  ;;  %v11937_v44 = vrot.slane %v11923_v52, %v23440_v23 }
 0x672   : > { %v12066_v51 = vrot.slane %v12058_v38, %v23440_v23  ;;  %v12073_v56 = vrot.slane %v12059_v29, %v23440_v23  ;;  %v12338_v35 = vrot.slane %v12330_v3, %v23440_v23  ;;  %v12345_v34 = vrot.slane %v12331_v30, %v23440_v23 }
 0x673   : > { %v11698_v20 = vcombine.low %v21668_v25, %v11658_v57  ;;  %v11699_v4 = vcombine.high %v21668_v25, %v11658_v57  ;;  %v11714_v9 = vcombine.low %v21671_v19, %v11665_v17  ;;  %v11715_v26 = vcombine.high %v21671_v19, %v11665_v17 }
 0x674   : > { %v11970_v10 = vcombine.low %v21674_v43, %v11930_v7  ;;  %v11971_v52 = vcombine.high %v21674_v43, %v11930_v7  ;;  %v11986_v38 = vcombine.low %v21677_v53, %v11937_v44  ;;  %v11987_v29 = vcombine.high %v21677_v53, %v11937_v44 }
 0x675   : > { %v11706_v3 = vrot.slane %v11698_v20, %v23231_v54  ;;  %v11713_v30 = vrot.slane %v11699_v4, %v23231_v54  ;;  %v11722_v46 = vrot.slane %v11714_v9, %v23231_v54  ;;  %v11729_v25 = vrot.slane %v11715_v26, %v23231_v54 }
 0x676   : > { %v11978_v59 = vrot.slane %v11970_v10, %v23231_v54  ;;  %v11985_v19 = vrot.slane %v11971_v52, %v23231_v54  ;;  %v11994_v57 = vrot.slane %v11986_v38, %v23231_v54  ;;  %v12001_v43 = vrot.slane %v11987_v29, %v23231_v54 }
 0x677   : > { %v14525_v17 = vcombine.low %v11706_v3, %v11713_v30  ;;  %v14527_v7 = vcombine.high %v11706_v3, %v11713_v30  ;;  %v14529_v8 = vcombine.low %v11722_v46, %v11729_v25  ;;  %v14531_v53 = vcombine.high %v11722_v46, %v11729_v25 }
 0x678   : > { %v14541_v44 = vcombine.low %v11978_v59, %v11985_v19  ;;  %v14543_v20 = vcombine.high %v11978_v59, %v11985_v19  ;;  %v14545_v13 = vcombine.low %v11994_v57, %v12001_v43  ;;  %v14547_v4 = vcombine.high %v11994_v57, %v12001_v43 }
 0x679   : > { %v21784_v9 = vrot.slane %v14525_v17, %v23440_v23  ;;  %v21787_v26 = vrot.slane %v14527_v7, %v23440_v23  ;;  %v21790_v10 = vrot.slane %v14529_v8, %v23440_v23  ;;  %v21793_v52 = vrot.slane %v14531_v53, %v23440_v23 }
 0x67a   : > { %v21796_v38 = vrot.slane %v14541_v44, %v23440_v23  ;;  %v21799_v29 = vrot.slane %v14543_v20, %v23440_v23  ;;  %v21802_v3 = vrot.slane %v14545_v13, %v23440_v23  ;;  %v21805_v30 = vrot.slane %v14547_v4, %v23440_v23 }
 0x67b   : > { %v12106_v46 = vcombine.low %v21688_v5, %v12066_v51  ;;  %v12107_v8 = vcombine.high %v21688_v5, %v12066_v51  ;;  %v12122_v25 = vcombine.low %v21691_v49, %v12073_v56  ;;  %v12123_v59 = vcombine.high %v21691_v49, %v12073_v56 }
 0x67c   : > { %v12378_v19 = vcombine.low %v21694_v11, %v12338_v35  ;;  %v12379_v57 = vcombine.high %v21694_v11, %v12338_v35  ;;  %v12394_v43 = vcombine.low %v21697_v48, %v12345_v34  ;;  %v12395_v13 = vcombine.high %v21697_v48, %v12345_v34 }
 0x67d   : > { %v12114_v17 = vrot.slane %v12106_v46, %v23231_v54  ;;  %v12121_v7 = vrot.slane %v12107_v8, %v23231_v54  ;;  %v12130_v53 = vrot.slane %v12122_v25, %v23231_v54  ;;  %v12137_v5 = vrot.slane %v12123_v59, %v23231_v54 }
 0x67e   : > { %v12386_v51 = vrot.slane %v12378_v19, %v23231_v54  ;;  %v12393_v49 = vrot.slane %v12379_v57, %v23231_v54  ;;  %v12402_v56 = vrot.slane %v12394_v43, %v23231_v54  ;;  %v12409_v11 = vrot.slane %v12395_v13, %v23231_v54 }
 0x67f   : > { %v14549_v35 = vcombine.low %v12114_v17, %v12121_v7  ;;  %v14551_v44 = vcombine.high %v12114_v17, %v12121_v7  ;;  %v14553_v20 = vcombine.low %v12130_v53, %v12137_v5  ;;  %v14555_v48 = vcombine.high %v12130_v53, %v12137_v5 }
 0x680   : > { %v14565_v34 = vcombine.low %v12386_v51, %v12393_v49  ;;  %v14567_v4 = vcombine.high %v12386_v51, %v12393_v49  ;;  %v14569_v46 = vcombine.low %v12402_v56, %v12409_v11  ;;  %v14571_v8 = vcombine.high %v12402_v56, %v12409_v11 }
 0x681   : > { %v21824_v25 = vrot.slane %v14549_v35, %v23440_v23  ;;  %v21827_v59 = vrot.slane %v14551_v44, %v23440_v23  ;;  %v21830_v19 = vrot.slane %v14553_v20, %v23440_v23  ;;  %v21833_v57 = vrot.slane %v14555_v48, %v23440_v23 }
 0x682   : > { %v21836_v43 = vrot.slane %v14565_v34, %v23440_v23  ;;  %v21839_v13 = vrot.slane %v14567_v4, %v23440_v23  ;;  %v21842_v17 = vrot.slane %v14569_v46, %v23440_v23  ;;  %v21845_v7 = vrot.slane %v14571_v8, %v23440_v23 }
 0x683   : > { %v12194_v53 = vcombine.low %v21645_v12, %v21747_v22  ;;  %v12195_v5 = vcombine.high %v21645_v12, %v21747_v22  ;;  %v12466_v51 = vcombine.low %v21647_v14, %v21749_v41  ;;  %v12467_v49 = vcombine.high %v21647_v14, %v21749_v41 }
 0x684   : > { %v12634_v56 = vcombine.low %v21724_v62, %v21727_v21  ;;  %v12666_v11 = vcombine.low %v21730_v45, %v21733_v33  ;;  %v12770_v35 = vcombine.low %v21784_v9, %v21787_v26  ;;  %v12802_v44 = vcombine.low %v21790_v10, %v21793_v52 }
 0x685   : > { %v12202_v12 = vrot.slane %v12194_v53, %v23440_v23  ;;  %v12209_v22 = vrot.slane %v12195_v5, %v23440_v23  ;;  %v12474_v20 = vrot.slane %v12466_v51, %v23440_v23  ;;  %v12481_v14 = vrot.slane %v12467_v49, %v23440_v23 }
 0x686   : > { %v12642_v41 = vrot.slane %v12634_v56, %v23231_v54  ;;  %v12674_v48 = vrot.slane %v12666_v11, %v23231_v54  ;;  %v12778_v34 = vrot.slane %v12770_v35, %v23231_v54  ;;  %v12810_v4 = vrot.slane %v12802_v44, %v23231_v54 }
 0x687   : > { %v12242_v46 = vcombine.low %v21704_v16, %v12202_v12  ;;  %v12243_v8 = vcombine.high %v21704_v16, %v12202_v12  ;;  %v12258_v53 = vcombine.low %v21707_v42, %v12209_v22  ;;  %v12259_v5 = vcombine.high %v21707_v42, %v12209_v22 }
 0x688   : > { %v12514_v51 = vcombine.low %v21710_v60, %v12474_v20  ;;  %v12515_v49 = vcombine.high %v21710_v60, %v12474_v20  ;;  %v12530_v56 = vcombine.low %v21713_v15, %v12481_v14  ;;  %v12531_v11 = vcombine.high %v21713_v15, %v12481_v14 }
 0x689   : > { %v12250_v35 = vrot.slane %v12242_v46, %v23231_v54  ;;  %v12257_v44 = vrot.slane %v12243_v8, %v23231_v54  ;;  %v12266_v55 = vrot.slane %v12258_v53, %v23231_v54  ;;  %v12273_v16 = vrot.slane %v12259_v5, %v23231_v54 }
 0x68a   : > { %v12522_v12 = vrot.slane %v12514_v51, %v23231_v54  ;;  %v12529_v42 = vrot.slane %v12515_v49, %v23231_v54  ;;  %v12538_v22 = vrot.slane %v12530_v56, %v23231_v54  ;;  %v12545_v60 = vrot.slane %v12531_v11, %v23231_v54  ;;  %v15488_v56 = vld [vmem:[#allocation10 + $0x18] sm:$0xff]  }
 0x68b   : > { %v14557_v20 = vcombine.low %v12250_v35, %v12257_v44  ;;  %v14559_v2 = vcombine.high %v12250_v35, %v12257_v44  ;;  %v14561_v39 = vcombine.low %v12266_v55, %v12273_v16  ;;  %v14563_v15 = vcombine.high %v12266_v55, %v12273_v16  ;;  %15207 = vmatprep.subr.bf16.mxu0 %v15488_v56 }
 0x68c   : > { %v14573_v14 = vcombine.low %v12522_v12, %v12529_v42  ;;  %v14575_v46 = vcombine.high %v12522_v12, %v12529_v42  ;;  %v14577_v61 = vcombine.low %v12538_v22, %v12545_v60  ;;  %v14579_v8 = vcombine.high %v12538_v22, %v12545_v60  ;;  %15208 = vmatpush3.bf16.msra.mxu0 %v15488_v56 }
 0x68d   : > { %v21888_v53 = vrot.slane %v14557_v20, %v23440_v23  ;;  %v21891_v5 = vrot.slane %v14559_v2, %v23440_v23  ;;  %v21894_v51 = vrot.slane %v14561_v39, %v23440_v23  ;;  %v21897_v49 = vrot.slane %v14563_v15, %v23440_v23 }
 0x68e   : > { %v21900_v11 = vrot.slane %v14573_v14, %v23440_v23  ;;  %v21903_v55 = vrot.slane %v14575_v46, %v23440_v23  ;;  %v21906_v35 = vrot.slane %v14577_v61, %v23440_v23  ;;  %v21909_v44 = vrot.slane %v14579_v8, %v23440_v23  ;;  %v15489_v46 = vld [vmem:[#allocation10 + $0x10] sm:$0xff]  }
 0x68f   : > { %v12686_v2 = vcombine.low %v12642_v41, %v12674_v48  ;;  %v12822_v16 = vcombine.low %v12778_v34, %v12810_v4  ;;  %v12906_v39 = vcombine.low %v21736_v58, %v21739_v40  ;;  %v12938_v12 = vcombine.low %v21742_v32, %v21745_v28  ;;  %15209 = vmatprep.subr.bf16.mxu0 %v15489_v46 }
 0x690   : > { %v13042_v42 = vcombine.low %v21796_v38, %v21799_v29  ;;  %v13074_v22 = vcombine.low %v21802_v3, %v21805_v30  ;;  %v12687_v61 = vcombine.high %v12642_v41, %v12674_v48  ;;  %v12823_v60 = vcombine.high %v12778_v34, %v12810_v4  ;;  %15210 = vmatpush3.bf16.msra.mxu0 %v15489_v46 }
 0x691   : > { %v15392_v23 = vpack.i.bf16 %v12822_v16, %v12686_v2  ;;  %v12914_v20 = vrot.slane %v12906_v39, %v23231_v54  ;;  %v12946_v15 = vrot.slane %v12938_v12, %v23231_v54  ;;  %v12635_v14 = vcombine.high %v21724_v62, %v21727_v21 }
 0x692   : > { %v13050_v8 = vrot.slane %v13042_v42, %v23231_v54  ;;  %v13082_v63 = vrot.slane %v13074_v22, %v23231_v54  ;;  %v15397_v47 = vpack.i.bf16 %v12823_v60, %v12687_v61  ;;  %v12667_v1 = vcombine.high %v21730_v45, %v21733_v33 }
 0x693   : > { %15393 = vrot.lane.b32.xlu0 %v15392_v23, %s15975_s7  ;;  %v12958_v41 = vcombine.low %v12914_v20, %v12946_v15  ;;  %v12959_v48 = vcombine.high %v12914_v20, %v12946_v15  ;;  %v12649_v34 = vrot.slane %v12635_v14, %v23231_v54  ;;  %v12771_v4 = vcombine.high %v21784_v9, %v21787_v26  ;;  %v15490_v9 = vld [vmem:[#allocation10 + $0x8] sm:$0xff]   ;;  %v15491_v20 = vld [vmem:[#allocation10] sm:$0xff]  }
 0x694   : > { %v13094_v62 = vcombine.low %v13050_v8, %v13082_v63  ;;  %v13095_v21 = vcombine.high %v13050_v8, %v13082_v63  ;;  %v12681_v56 = vrot.slane %v12667_v1, %v23231_v54  ;;  %v12803_v2 = vcombine.high %v21790_v10, %v21793_v52  ;;  %15211 = vmatprep.subr.bf16.mxu0 %v15490_v9 }
 0x695   : > { %v12785_v45 = vrot.slane %v12771_v4, %v23231_v54  ;;  %v12907_v33 = vcombine.high %v21736_v58, %v21739_v40  ;;  %v12939_v16 = vcombine.high %v21742_v32, %v21745_v28  ;;  %v13043_v39 = vcombine.high %v21796_v38, %v21799_v29  ;;  %15212 = vmatpush3.bf16.msra.mxu0 %v15490_v9 }
 0x696   : > { %v15412_v63 = vpack.i.bf16 %v13094_v62, %v12958_v41  ;;  %v15417_v26 = vpack.i.bf16 %v13095_v21, %v12959_v48  ;;  %v12688_v1 = vcombine.low %v12649_v34, %v12681_v56  ;;  %v12817_v12 = vrot.slane %v12803_v2, %v23231_v54  ;;  %15213 = vmatprep.subr.bf16.mxu0 %v15491_v20 }
 0x697   : > { %15398 = vrot.lane.b32.xlu0 %v15397_v47, %s15976_s26  ;;  %v12921_v10 = vrot.slane %v12907_v33, %v23231_v54  ;;  %v12953_v58 = vrot.slane %v12939_v16, %v23231_v54  ;;  %v13057_v40 = vrot.slane %v13043_v39, %v23231_v54  ;;  %v13075_v32 = vcombine.high %v21802_v3, %v21805_v30 }
 0x698   : > { %15413 = vrot.lane.b32.xlu1 %v15412_v63, %s15975_s7  ;;  %v12824_v28 = vcombine.low %v12785_v45, %v12817_v12  ;;  %v12689_v52 = vcombine.high %v12649_v34, %v12681_v56  ;;  %v12825_v38 = vcombine.high %v12785_v45, %v12817_v12  ;;  %v13178_v29 = vcombine.low %v21824_v25, %v21827_v59 }
 0x699   : > { %v12960_v42 = vcombine.low %v12921_v10, %v12953_v58  ;;  %v13089_v47 = vrot.slane %v13075_v32, %v23231_v54  ;;  %v12961_v22 = vcombine.high %v12921_v10, %v12953_v58  ;;  %v13210_v61 = vcombine.low %v21830_v19, %v21833_v57  ;;  %15214 = vmatpush3.bf16.msra.mxu0 %v15491_v20 }
 0x69a   : > { %v15402_v60 = vpack.i.bf16 %v12824_v28, %v12688_v1  ;;  %v15407_v23 = vpack.i.bf16 %v12825_v38, %v12689_v52  ;;  %v13186_v3 = vrot.slane %v13178_v29, %v23231_v54  ;;  %v13314_v30 = vcombine.low %v21888_v53, %v21891_v5 }
 0x69b   : > { %v13096_v15 = vcombine.low %v13057_v40, %v13089_v47  ;;  %v13097_v14 = vcombine.high %v13057_v40, %v13089_v47  ;;  %v13218_v46 = vrot.slane %v13210_v61, %v23231_v54  ;;  %v13346_v8 = vcombine.low %v21894_v51, %v21897_v49 }
 0x69c   : > { %15418 = vrot.lane.b32.xlu1 %v15417_v26, %s15976_s26  ;;  %15403 = vrot.lane.b32.xlu0 %v15402_v60, %s15977_s13  ;;  %v13322_v41 = vrot.slane %v13314_v30, %v23231_v54  ;;  %v13450_v48 = vcombine.low %v21836_v43, %v21839_v13  ;;  %v13482_v34 = vcombine.low %v21842_v17, %v21845_v7 }
 0x69d   : > { %v15422_v4 = vpack.i.bf16 %v13096_v15, %v12960_v42  ;;  %v15427_v62 = vpack.i.bf16 %v13097_v14, %v12961_v22  ;;  %v13230_v21 = vcombine.low %v13186_v3, %v13218_v46  ;;  %v13354_v56 = vrot.slane %v13346_v8, %v23231_v54 }
 0x69e   : > { %v13458_v2 = vrot.slane %v13450_v48, %v23231_v54  ;;  %v13490_v45 = vrot.slane %v13482_v34, %v23231_v54  ;;  %v13586_v33 = vcombine.low %v21900_v11, %v21903_v55  ;;  %v13618_v16 = vcombine.low %v21906_v35, %v21909_v44 }
 0x69f   : > { %v13366_v39 = vcombine.low %v13322_v41, %v13354_v56  ;;  %v13231_v9 = vcombine.high %v13186_v3, %v13218_v46  ;;  %v13367_v63 = vcombine.high %v13322_v41, %v13354_v56  ;;  %v13179_v26 = vcombine.high %v21824_v25, %v21827_v59 }
 0x6a0   : > { %15423 = vrot.lane.b32.xlu1 %v15422_v4, %s15977_s13  ;;  %15408 = vrot.lane.b32.xlu0 %v15407_v23, %s15978_s27  ;;  %v13502_v1 = vcombine.low %v13458_v2, %v13490_v45  ;;  %v13594_v12 = vrot.slane %v13586_v33, %v23231_v54  ;;  %v13626_v10 = vrot.slane %v13618_v16, %v23231_v54 }
 0x6a1   : > { %v15432_v58 = vpack.i.bf16 %v13366_v39, %v13230_v21  ;;  %v15437_v40 = vpack.i.bf16 %v13367_v63, %v13231_v9  ;;  %v13503_v32 = vcombine.high %v13458_v2, %v13490_v45  ;;  %v13193_v28 = vrot.slane %v13179_v26, %v23231_v54 }
 0x6a2   : > { %v13638_v52 = vcombine.low %v13594_v12, %v13626_v10  ;;  %v13639_v38 = vcombine.high %v13594_v12, %v13626_v10  ;;  %v13211_v25 = vcombine.high %v21830_v19, %v21833_v57  ;;  %v13315_v59 = vcombine.high %v21888_v53, %v21891_v5 }
 0x6a3   : > { %v13347_v29 = vcombine.high %v21894_v51, %v21897_v49  ;;  %v13451_v42 = vcombine.high %v21836_v43, %v21839_v13  ;;  %v13483_v47 = vcombine.high %v21842_v17, %v21845_v7  ;;  %v13587_v22 = vcombine.high %v21900_v11, %v21903_v55 }
 0x6a4   : > { %15428 = vrot.lane.b32.xlu1 %v15427_v62, %s15978_s27  ;;  %15433 = vrot.lane.b32.xlu0 %v15432_v58, %s15975_s7  ;;  %v15447_v19 = vpack.i.bf16 %v13638_v52, %v13502_v1  ;;  %v15452_v57 = vpack.i.bf16 %v13639_v38, %v13503_v32  ;;  %v13225_v53 = vrot.slane %v13211_v25, %v23231_v54 }
 0x6a5   : > { %v13329_v5 = vrot.slane %v13315_v59, %v23231_v54  ;;  %v13361_v51 = vrot.slane %v13347_v29, %v23231_v54  ;;  %v13465_v43 = vrot.slane %v13451_v42, %v23231_v54  ;;  %v13497_v13 = vrot.slane %v13483_v47, %v23231_v54 }
 0x6a6   : > { %v13232_v17 = vcombine.low %v13193_v28, %v13225_v53  ;;  %v13601_v7 = vrot.slane %v13587_v22, %v23231_v54  ;;  %v13619_v49 = vcombine.high %v21906_v35, %v21909_v44  ;;  %v13233_v11 = vcombine.high %v13193_v28, %v13225_v53 }
 0x6a7   : > { %v13368_v55 = vcombine.low %v13329_v5, %v13361_v51  ;;  %v13504_v61 = vcombine.low %v13465_v43, %v13497_v13  ;;  %v13369_v60 = vcombine.high %v13329_v5, %v13361_v51  ;;  %v13505_v23 = vcombine.high %v13465_v43, %v13497_v13 }
 0x6a8   : > { %15448 = vrot.lane.b32.xlu1 %v15447_v19, %s15975_s7  ;;  %15438 = vrot.lane.b32.xlu0 %v15437_v40, %s15976_s26  ;;  %v13633_v3 = vrot.slane %v13619_v49, %v23231_v54  ;;  %v23448_v12 = vcombine.low %v21464_v18, %v21473_v37  ;;  %v23449_v58 = vcombine.low %v21482_v50, %v21485_v0  ;;  %s15884_s7 = sshll.u32 %s15979_s17, 4  ;;  %s15885_s7 = int_to_ptr.vmem [resolvable:$false] %s15884_s7 }
 0x6a9   : > { %v15442_v30 = vpack.i.bf16 %v13368_v55, %v13232_v17  ;;  %v15462_v20 = vpack.i.bf16 %v13369_v60, %v13233_v11  ;;  %v15344_v41 = vpop.permute.xlu0 %15343  ;;  %v23450_v50 = vcombine.low %v21515_v24, %v21520_v36  ;;  %v23451_v53 = vcombine.low %v21523_v31, %v21526_v6  ;;  %p15887_p13 = scmp.lt.s32.totalorder %s22140_s8, %s15885_s7 }
 0x6aa   : > { %v13640_v15 = vcombine.low %v13601_v7, %v13633_v3  ;;  %v13641_v14 = vcombine.high %v13601_v7, %v13633_v3  ;;  %v15346_v29 = vunpack.i.h.bf16 %v15344_v41  ;;  %v15345_v42 = vunpack.i.l.bf16 %v15344_v41 }
 0x6ac   : > { %15453 = vrot.lane.b32.xlu1 %v15452_v57, %s15976_s26  ;;  %15443 = vrot.lane.b32.xlu0 %v15442_v30, %s15977_s13  ;;  %v15457_v35 = vpack.i.bf16 %v13640_v15, %v13504_v61  ;;  %v15467_v44 = vpack.i.bf16 %v13641_v14, %v13505_v23  ;;  %s15886_s26 = scalar_lea.vmem %s15885_s7, 1024 }
 0x6ad   : > { %v15334_v46 = vpop.permute.xlu1 %15333  ;;  %p15888_p0 = scmp.lt.s32.totalorder %s15886_s26, %s15880_s30 }
 0x6ae   : > { %v15336_v16 = vunpack.i.h.bf16 %v15334_v46  ;;  %v15335_v39 = vunpack.i.l.bf16 %v15334_v46 }
 0x6af   : > { %p15889_p11 = por %p15888_p0, %p15887_p13 }
 0x6b0   : > { %15458 = vrot.lane.b32.xlu1 %v15457_v35, %s15977_s13  ;;  %15463 = vrot.lane.b32.xlu0 %v15462_v20, %s15978_s27  ;;  %v13866_v10 = vsel %vm7816_vm2, %v23448_v12, %v15335_v39  ;;  %v13867_v40 = vsel %vm7816_vm2, %v23449_v58, %v15336_v16 }
 0x6b1   : > { %v15339_v8 = vpop.permute.xlu1 %15338  ;;  %p15890_p5 = pnand %p15889_p11, %p15883_p1 }
 0x6b2   : > { %v15349_v48 = vpop.permute.xlu0 %15348  ;;  %v15341_v9 = vunpack.i.h.bf16 %v15339_v8  ;;  %v15340_v63 = vunpack.i.l.bf16 %v15339_v8 }
 0x6b3   : > { %v15351_v32 = vunpack.i.h.bf16 %v15349_v48  ;;  %v15350_v28 = vunpack.i.l.bf16 %v15349_v48 }
 0x6b4   : > { %15468 = vrot.lane.b32.xlu1 %v15467_v44, %s15978_s27  ;;  %v13874_v52 = vsel %vm9321_vm3, %v13866_v10, %v15340_v63  ;;  %v13875_v38 = vsel %vm9321_vm3, %v13867_v40, %v15341_v9 }
 0x6b5   : > { %v15354_v54 = vpop.permute.xlu1 %15353  ;;  %v13868_v0 = vsel %vm7816_vm2, %v23450_v50, %v15350_v28  ;;  %v13869_v5 = vsel %vm7816_vm2, %v23451_v53, %v15351_v32  ;;  %v13883_v51 = vsel %vm13882_vm4, %v13874_v52, %v15345_v42  ;;  %v13884_v43 = vsel %vm13882_vm4, %v13875_v38, %v15346_v29  ;;  %v23452_v50 = vld [vmem:[#allocation18_spill] sm:$0xff]  ;;  %v23454_v53 = vld [vmem:[#allocation51_spill] sm:$0xff] }
 0x6b6   : > { %v15356_v25 = vunpack.i.h.bf16 %v15354_v54  ;;  %v15355_v59 = vunpack.i.l.bf16 %v15354_v54 }
 0x6b8   : > { %v22013_v4 = vpop.permute.xlu0 %15363  ;;  %v13876_v13 = vsel %vm9321_vm3, %v13868_v0, %v15355_v59  ;;  %v13877_v17 = vsel %vm9321_vm3, %v13869_v5, %v15356_v25  ;;  %v23455_v5 = vld [vmem:[#allocation78_spill] sm:$0xff] }
 0x6b9   : > { %v22011_v34 = vpop.permute.xlu1 %15358  ;;  %v15366_v32 = vunpack.i.h.bf16 %v22013_v4  ;;  %v15365_v28 = vunpack.i.l.bf16 %v22013_v4 }
 0x6ba   : > { %v15361_v11 = vunpack.i.h.bf16 %v22011_v34  ;;  %v15360_v24 = vunpack.i.l.bf16 %v22011_v34 }
 0x6bc   : > { %v22017_v21 = vpop.permute.xlu0 %15368  ;;  %v13885_v41 = vsel %vm13882_vm4, %v13876_v13, %v15360_v24  ;;  %v13886_v54 = vsel %vm13882_vm4, %v13877_v17, %v15361_v11 }
 0x6bd   : > { %v15371_v25 = vunpack.i.h.bf16 %v22017_v21  ;;  %v15370_v59 = vunpack.i.l.bf16 %v22017_v21  ;;  %v23453_v21 = vcombine.low %v21554_v27, %v23452_v50  ;;  %v14580_v50 = vld [vmem:[%s22190_s5] ss:$0 sm:$0xff] }
 0x6bf   : > { %v22015_v62 = vpop.permute.xlu1 %15378  ;;  %v13871_v0 = vsel %vm7816_vm2, %v23453_v21, %v15366_v32 }
 0x6c0   : > { %v22021_v2 = vpop.permute.xlu0 %15373  ;;  %v13879_v17 = vsel %vm9321_vm3, %v13871_v0, %v15371_v25 }
 0x6c3   : > { %v22019_v56 = vpop.permute.xlu1 %15383 }
 0x6c4   : > { %v15386_v4 = vunpack.i.h.bf16 %v22019_v56 }
 0x6c7   : > { %v22023_v33 = vpop.permute.xlu1 %15388 }
 0x705   : > { %v15394_v45 = vpop.permute.xlu0 %15393 }
 0x706   : > { %v15396_v47 = vunpack.i.h.bf16 %v15394_v45  ;;  %v15395_v22 = vunpack.i.l.bf16 %v15394_v45 }
 0x708   : > { %v13893_v36 = vsel %vm13891_vm5, %v13884_v43, %v15396_v47  ;;  %v13892_v31 = vsel %vm13891_vm5, %v13883_v51, %v15395_v22  ;;  %v15376_v22 = vunpack.i.h.bf16 %v22021_v2  ;;  %v23456_v51 = vcombine.low %v23454_v53, %v23455_v5 }
 0x709   : > { %v15399_v26 = vpop.permute.xlu0 %15398 }
 0x70a   : > { %v15414_v1 = vpop.permute.xlu1 %15413  ;;  %v15401_v18 = vunpack.i.h.bf16 %v15399_v26  ;;  %v15400_v37 = vunpack.i.l.bf16 %v15399_v26  ;;  %v13888_v27 = vsel %vm13882_vm4, %v13879_v17, %v15376_v22 }
 0x70b   : > { %v15416_v6 = vunpack.i.h.bf16 %v15414_v1  ;;  %v15415_v55 = vunpack.i.l.bf16 %v15414_v1 }
 0x70c   : > { %v13901_v61 = vsel %vm13900_vm6, %v13892_v31, %v15400_v37  ;;  %v13902_v60 = vsel %vm13900_vm6, %v13893_v36, %v15401_v18  ;;  %v15375_v18 = vunpack.i.l.bf16 %v22021_v2  ;;  %v15381_v37 = vunpack.i.h.bf16 %v22015_v62  ;;  %v23457_v36 = vld [vmem:[#allocation76_spill] sm:$0xff]  ;;  %v23458_v31 = vld [vmem:[#allocation90_spill] sm:$0xff] }
 0x70d   : > { %v13895_v45 = vsel %vm13891_vm5, %v13886_v54, %v15416_v6  ;;  %v13894_v16 = vsel %vm13891_vm5, %v13885_v41, %v15415_v55  ;;  %v13870_v2 = vsel %vm7816_vm2, %v23456_v51, %v15365_v28  ;;  %v23459_v6 = vcombine.low %v23457_v36, %v23458_v31 }
 0x70e   : > { %v15419_v19 = vpop.permute.xlu1 %15418  ;;  %v15404_v57 = vpop.permute.xlu0 %15403 }
 0x70f   : > { %v15406_v7 = vunpack.i.h.bf16 %v15404_v57  ;;  %v15405_v49 = vunpack.i.l.bf16 %v15404_v57  ;;  %v15421_v30 = vunpack.i.h.bf16 %v15419_v19  ;;  %v15420_v20 = vunpack.i.l.bf16 %v15419_v19 }
 0x710   : > { %v15380_v19 = vunpack.i.l.bf16 %v22015_v62  ;;  %v15385_v57 = vunpack.i.l.bf16 %v22019_v56  ;;  %v13878_v62 = vsel %vm9321_vm3, %v13870_v2, %v15370_v59 }
 0x711   : > { %v13910_v35 = vsel %vm13909_vm7, %v13901_v61, %v15405_v49  ;;  %v13911_v44 = vsel %vm13909_vm7, %v13902_v60, %v15406_v7  ;;  %v13903_v26 = vsel %vm13900_vm6, %v13894_v16, %v15420_v20  ;;  %v13904_v1 = vsel %vm13900_vm6, %v13895_v45, %v15421_v30  ;;  %v23460_v61 = vld [vmem:[#allocation84_spill] sm:$0xff] }
 0x712   : > { %v15424_v23 = vpop.permute.xlu1 %15423  ;;  %v15409_v3 = vpop.permute.xlu0 %15408  ;;  %v13887_v24 = vsel %vm13882_vm4, %v13878_v62, %v15375_v18  ;;  %v13872_v55 = vsel %vm7816_vm2, %v23459_v6, %v15380_v19  ;;  %v23461_v60 = vld [vmem:[#allocation36_spill] sm:$0xff] }
 0x713   : > { %v15411_v15 = vunpack.i.h.bf16 %v15409_v3  ;;  %v15410_v14 = vunpack.i.l.bf16 %v15409_v3  ;;  %v15426_v46 = vunpack.i.h.bf16 %v15424_v23  ;;  %v15425_v8 = vunpack.i.l.bf16 %v15424_v23 }
 0x714   : > { %v23462_v23 = vcombine.low %v23460_v61, %v23461_v60  ;;  %v13880_v30 = vsel %vm9321_vm3, %v13872_v55, %v15385_v57 }
 0x715   : > { %v13919_v48 = vsel %vm13918_vm8, %v13910_v35, %v15410_v14  ;;  %v13920_v34 = vsel %vm13918_vm8, %v13911_v44, %v15411_v15  ;;  %v13912_v58 = vsel %vm13909_vm7, %v13903_v26, %v15425_v8  ;;  %v13913_v40 = vsel %vm13909_vm7, %v13904_v1, %v15426_v46 }
 0x716   : > { %v13927_v39 = vpack.c.bf16 %v13920_v34, %v13919_v48  ;;  %v15429_v9 = vpop.permute.xlu1 %15428  ;;  %v15434_v63 = vpop.permute.xlu0 %15433  ;;  %v13873_v3 = vsel %vm7816_vm2, %v23462_v23, %v15381_v37  ;;  %v15391_v35 = vunpack.i.h.bf16 %v22023_v33  ;;  %v15390_v44 = vunpack.i.l.bf16 %v22023_v33 }
 0x717   : > { %v15431_v12 = vunpack.i.h.bf16 %v15429_v9  ;;  %v15430_v10 = vunpack.i.l.bf16 %v15429_v9  ;;  %v15436_v43 = vunpack.i.h.bf16 %v15434_v63  ;;  %v15435_v13 = vunpack.i.l.bf16 %v15434_v63 }
 0x718   : > { %15215 = vmatprep.mubr.msk.bf16.mxu0 %vm392_vm0, %v13927_v39  ;;  %v13881_v20 = vsel %vm9321_vm3, %v13873_v3, %v15386_v4 }
 0x719   : > { %v13921_v52 = vsel %vm13918_vm8, %v13912_v58, %v15430_v10  ;;  %v13922_v38 = vsel %vm13918_vm8, %v13913_v40, %v15431_v12  ;;  %v13896_v46 = vsel %vm13891_vm5, %v13887_v24, %v15435_v13  ;;  %v13897_v8 = vsel %vm13891_vm5, %v13888_v27, %v15436_v43 }
 0x71a   : > { %v13928_v29 = vpack.c.bf16 %v13922_v38, %v13921_v52  ;;  %v15449_v42 = vpop.permute.xlu1 %15448  ;;  %v15439_v47 = vpop.permute.xlu0 %15438  ;;  %v13889_v58 = vsel %vm13882_vm4, %v13880_v30, %v15390_v44  ;;  %v13890_v40 = vsel %vm13882_vm4, %v13881_v20, %v15391_v35 }
 0x71b   : > { %v15441_v7 = vunpack.i.h.bf16 %v15439_v47  ;;  %v15440_v56 = vunpack.i.l.bf16 %v15439_v47  ;;  %v15451_v41 = vunpack.i.h.bf16 %v15449_v42  ;;  %v15450_v54 = vunpack.i.l.bf16 %v15449_v42 }
 0x71c   : > { %15216 = vmatmul.mubr.msk.bf16.vlgmr.msra.gmra.mxu0 %vm392_vm0, %v13928_v29 }
 0x71d   : > { %v13905_v48 = vsel %vm13900_vm6, %v13896_v46, %v15440_v56  ;;  %v13906_v34 = vsel %vm13900_vm6, %v13897_v8, %v15441_v7  ;;  %v13899_v52 = vsel %vm13891_vm5, %v13890_v40, %v15451_v41  ;;  %v13898_v38 = vsel %vm13891_vm5, %v13889_v58, %v15450_v54 }
 0x71e   : > { %v15454_v49 = vpop.permute.xlu1 %15453  ;;  %v15444_v11 = vpop.permute.xlu0 %15443 }
 0x71f   : > { %v15446_v15 = vunpack.i.h.bf16 %v15444_v11  ;;  %v15445_v14 = vunpack.i.l.bf16 %v15444_v11  ;;  %v15456_v39 = vunpack.i.h.bf16 %v15454_v49  ;;  %v15455_v9 = vunpack.i.l.bf16 %v15454_v49 }
 0x721   : > { %v13914_v1 = vsel %vm13909_vm7, %v13905_v48, %v15445_v14  ;;  %v13915_v33 = vsel %vm13909_vm7, %v13906_v34, %v15446_v15  ;;  %v13907_v29 = vsel %vm13900_vm6, %v13898_v38, %v15455_v9  ;;  %v13908_v42 = vsel %vm13900_vm6, %v13899_v52, %v15456_v39 }
 0x722   : > { %v15459_v45 = vpop.permute.xlu1 %15458  ;;  %v15464_v16 = vpop.permute.xlu0 %15463 }
 0x723   : > { %v15466_v63 = vunpack.i.h.bf16 %v15464_v16  ;;  %v15465_v26 = vunpack.i.l.bf16 %v15464_v16  ;;  %v15461_v12 = vunpack.i.h.bf16 %v15459_v45  ;;  %v15460_v10 = vunpack.i.l.bf16 %v15459_v45 }
 0x725   : > { %v13923_v32 = vsel %vm13918_vm8, %v13914_v1, %v15465_v26  ;;  %v13924_v28 = vsel %vm13918_vm8, %v13915_v33, %v15466_v63  ;;  %v13916_v18 = vsel %vm13909_vm7, %v13907_v29, %v15460_v10  ;;  %v13917_v37 = vsel %vm13909_vm7, %v13908_v42, %v15461_v12 }
 0x726   : > { %v13929_v25 = vpack.c.bf16 %v13924_v28, %v13923_v32  ;;  %v15469_v59 = vpop.permute.xlu1 %15468 }
 0x727   : > { %v15471_v47 = vunpack.i.h.bf16 %v15469_v59  ;;  %v15470_v22 = vunpack.i.l.bf16 %v15469_v59 }
 0x728   : > { %15219 = vmatprep.mubr.msk.bf16.mxu0 %vm392_vm0, %v13929_v25 }
 0x729   : > { %v13925_v19 = vsel %vm13918_vm8, %v13916_v18, %v15470_v22  ;;  %v13926_v4 = vsel %vm13918_vm8, %v13917_v37, %v15471_v47 }
 0x72a   : > { %v13930_v57 = vpack.c.bf16 %v13926_v4, %v13925_v19 }
 0x72c   : > { %15220 = vmatmul.mubr.msk.bf16.gmra.mxu0 %vm392_vm0, %v13930_v57 }
 0x7dc   : > { %v15217_v21 = vpop.f32.mrf.mxu0 }
 0x7dd   : > { %v14025_v0 = vadd.f32 %v15217_v21, %v14580_v50 }
 0x7de   : > { %v14016_v53 = vpop.f32.mrf.mxu0 }
 0x7df   : > { %v14607_v5 = vpack.c.bf16 %v14025_v0, %v14025_v0  ;;  %v14017_v51 = vadd.f32 %v14580_v50, %v14016_v53 }
 0x7e0   : > { %v15218_v2 = vpop.f32.mrf.mxu0 }
 0x7e1   : > { %14082 = vst.msk [vmem:[%s328_s12 + $0x8] sm:$0xf] %vm14079_vm9, %v14607_v5  ;;  %v14605_v43 = vpack.c.bf16 %v14017_v51, %v14017_v51  ;;  %v14028_v13 = vadd.f32 %v15218_v2, %v14580_v50 }
 0x7e2   : > { %v14019_v62 = vpop.f32.mrf.mxu0 }
 0x7e3   : > { %14080 = vst.msk [vmem:[%s328_s12] sm:$0xf] %vm14079_vm9, %v14605_v43  ;;  %v14608_v17 = vpack.c.bf16 %v14028_v13, %v14028_v13  ;;  %v14020_v7 = vadd.f32 %v14580_v50, %v14019_v62 }
 0x7e5   : > { %14083 = vst.msk [vmem:[%s328_s12 + $0xc] sm:$0xf] %vm14079_vm9, %v14608_v17  ;;  %v14606_v56 = vpack.c.bf16 %v14020_v7, %v14020_v7 }
 0x7e7   : > { %14081 = vst.msk [vmem:[%s328_s12 + $0x4] sm:$0xf] %vm14079_vm9, %v14606_v56 }
 0x7ec   : > { %v15221_v49 = vpop.f32.mrf.mxu0 }
 0x7ed   : > { %v14041_v11 = vadd.f32 %v15221_v49, %v14580_v50 }
 0x7ee   : > { %v14032_v24 = vpop.f32.mrf.mxu0 }
 0x7ef   : > { %v14611_v27 = vpack.c.bf16 %v14041_v11, %v14041_v11  ;;  %v14033_v36 = vadd.f32 %v14580_v50, %v14032_v24 }
 0x7f0   : > { %v15222_v31 = vpop.f32.mrf.mxu0 }
 0x7f1   : > { %14086 = vst.msk [vmem:[%s328_s12 + $0x18] sm:$0xf] %vm14079_vm9, %v14611_v27  ;;  %v14609_v6 = vpack.c.bf16 %v14033_v36, %v14033_v36  ;;  %v14044_v55 = vadd.f32 %v15222_v31, %v14580_v50 }
 0x7f2   : > { %v14035_v61 = vpop.f32.mrf.mxu0 }
 0x7f3   : > { %14084 = vst.msk [vmem:[%s328_s12 + $0x10] sm:$0xf] %vm14079_vm9, %v14609_v6  ;;  %v14612_v60 = vpack.c.bf16 %v14044_v55, %v14044_v55  ;;  %v14036_v23 = vadd.f32 %v14580_v50, %v14035_v61 }
 0x7f5   : > { %14087 = vst.msk [vmem:[%s328_s12 + $0x1c] sm:$0xf] %vm14079_vm9, %v14612_v60  ;;  %v14610_v3 = vpack.c.bf16 %v14036_v23, %v14036_v23 }
 0x7f7   : > { %14085 = vst.msk [vmem:[%s328_s12 + $0x14] sm:$0xf] %vm14079_vm9, %v14610_v3 }
 0x7f8   : > { %15893 = shalt.err (!%p15890_p5)
}
 0x7f9   : > { %s15894_s13 = scalar_lea.hbm %s22138_s20, 512  ;;  %s15898_s10 = scalar_lea.hbm %s22191_s6, 1024 }
 0x7fa   : > { %p15895_p6 = scmp.ne.s32.totalorder %s22138_s20, %s15894_s13  ;;  %p15899_p9 = scmp.lt.s32.totalorder %s22138_s20, %s22191_s6 }
 0x7fb   : > { %p15900_p2 = scmp.lt.s32.totalorder %s15898_s10, %s15894_s13 }
 0x7fc   : > { %p15896_p4 = pnand %p15895_p6, %p23463_p12 }
 0x7fd   : > { %p15901_p3 = por %p15900_p2, %p15899_p9 }
 0x7fe   : > { %p15897_p8 = pneg %p15896_p4 }
 0x800   : > { %p15902_p10 = pnand %p15901_p3, %p15897_p8 }
 0x802   : > { %15905 = shalt.err (!%p15902_p10)
}
 0x803   : > { %s15980_s9 = smov 64   ;;  %s15981_s11 = smov 4  }
 0x804   : > { %15241 = dma.vmem_to_hbm [thread:$0]  (%p23463_p12), %s22140_s8, 512, %s22138_s20, %s14089_s25, %s15980_s9, %s15980_s9, %s15981_s11  }
 0x805 PF: > { %s14118_s30 = sand.u32 1, %s15940_s21   ;;  %p23464_p7 = scmp.ne.s32.totalorder %s22611_s28, 0 }
 0x806   : > { %p23465_p1 = scmp.ge.s32.totalorder %s15952_s24, 2  ;;  %s14119_s17 = scalar_lea.sflag [#allocation4], %s14118_s30 }
 0x808   : > { %p15261_p13 = pnand %p23465_p1, %p23464_p7 }
 0x80a   : > { %p15262_p0 = pneg %p15261_p13 }
 0x80c   : > { %15935 = dma.done.wait (%p15262_p0), %s14119_s17, 512  }
 0x80d   : > { %15937 = vsyncadd (%p15262_p0), %s14119_s17, 4294966784  ;;  %p21_p11 = scmp.ge.s32.totalorder %s16117_s16, 4   ;;  %s23466_s21 = smov %s15944_s22 }
 0x80e   : > { %s23467_s22 = smov %s15948_s23  ;;  %s23468_s23 = smov %s16133_s19 }
 0x80f   : > { %s23469_s24 = smov %s16117_s16  ;;  %23 = sbr.rel (!%p21_p11) target bundleno = 7 (0x7), region = 105 }
 0x814   :  { %14124 = vsyncpa [#allocation3], 1 }
 0x815   :  { %14126 = vsyncpa [#allocation3 + $0x1], 1 }
 0x816   :  { %14127 = vsyncpa [#allocation6], 1 }
 0x817   :  { %14128 = vsyncpa [#allocation9], 1 }
 0x818   :  { %14129 = vsyncpa [#allocation4], 1 }
 0x819   :  { %14131 = vsyncpa [#allocation4 + $0x1], 1 }

</bundles_post_ra>
